<compile_context>
chip_gen: v7x
topology: tpu7x:2x2x1
jax: 0.10.0
libtpu: 0.0.40
codegen_flags: <defaults>
</compile_context>

<pallas_src>
import numpy as np
import jax
import jax.numpy as jnp
from jax.experimental import pallas as pl
from jax.experimental.pallas import tpu as pltpu


# ----------------------------------------------------------------------------
# Per-image stacked 0/1 gather matrix for a k=4, s=2, p=1 conv on (H*W, C) rows.
# Row (t*Ho*Wo + o), t = ky*4+kx, selects input row r = iy*W + ix of output
# position o = oy*Wo + ox with iy = 2*oy+ky-1, ix = 2*ox+kx-1.  Out-of-bounds
# taps are all-zero rows, which reproduces zero padding exactly.
# ----------------------------------------------------------------------------
def _gather_stack(h):
    ho = h // 2
    hw, howo = h * h, ho * ho
    g = np.zeros((16 * howo, hw), np.float32)
    for ky in range(4):
        for kx in range(4):
            t = ky * 4 + kx
            for oy in range(ho):
                iy = 2 * oy + ky - 1
                if iy < 0 or iy >= h:
                    continue
                for ox in range(ho):
                    ix = 2 * ox + kx - 1
                    if ix < 0 or ix >= h:
                        continue
                    g[t * howo + oy * ho + ox, iy * h + ix] = 1.0
    return g


# ----------------------------------------------------------------------------
# Fused kernel: [conv(k4,s2,p1)+ReLU] x4  ->  View(flatten)  ->  fc1+ReLU -> fc2
# All intermediate activations stay in VMEM / vregs.
# ----------------------------------------------------------------------------
def _make_fused_kernel(batch, conv_dims):
    """conv_dims: tuple of (hw, howo, cin, cout) per conv layer."""
    n_conv = len(conv_dims)

    def kernel(*refs):
        f32, bf16 = jnp.float32, jnp.bfloat16
        x_ref = refs[0]
        conv_refs = [refs[1 + 3 * l: 4 + 3 * l] for l in range(n_conv)]
        w1_ref, b1_ref, w2_ref, b2_ref = refs[1 + 3 * n_conv: 5 + 3 * n_conv]
        out_ref = refs[5 + 3 * n_conv]

        hw0 = conv_dims[0][0]
        for n in range(batch):                                # static unroll (batch=2)
            a = x_ref[n * hw0:(n + 1) * hw0, :]               # (H*W, nc) bf16
            for (hw, howo, cin, cout), (g_ref, w_ref, b_ref) in zip(conv_dims, conv_refs):
                # (1) all 16 taps gathered in ONE MXU pass
                p = jnp.dot(g_ref[...], a, preferred_element_type=f32)   # (16*howo, cin)
                # regroup (16*howo, cin) -> (howo, 16*cin): im2col patch rows
                pc = jnp.concatenate(
                    [p[t * howo:(t + 1) * howo, :] for t in range(16)], axis=1)
                # (2) single deep-K tap contraction + bias + ReLU
                z = jnp.dot(pc.astype(bf16), w_ref[...],
                            preferred_element_type=f32)                  # (howo, cout)
                a = jnp.maximum(z + b_ref[...], 0.0).astype(bf16)
            # a is (1, c_last): View([batch, -1]) is a row-wise no-op at 1x1 spatial
            h = jnp.dot(a, w1_ref[...], preferred_element_type=f32)
            h = jnp.maximum(h + b1_ref[...], 0.0).astype(bf16)
            o = jnp.dot(h, w2_ref[...], preferred_element_type=f32)
            out_ref[n:n + 1, :] = (o + b2_ref[...]).astype(out_ref.dtype)

    return kernel


# ----------------------------------------------------------------------------
# Parameter init (deterministic, xavier_uniform like the PyTorch module)
# ----------------------------------------------------------------------------
def _xavier_uniform(key, shape, fan_in, fan_out):
    limit = float(np.sqrt(6.0 / (fan_in + fan_out)))
    return jax.random.uniform(key, shape, jnp.float32, -limit, limit)


def init_vae_encoder_params(key, resolution, nc, latents):
    resolution_log2 = int(np.log2(resolution))
    params = {"convs": []}
    out_ch = nc
    for i in range(resolution_log2):
        ch_idx = int(np.floor(i / 2.0 + 5))
        in_ch = nc if i == 0 else out_ch
        out_ch = 2 ** ch_idx
        key, kw, kb = jax.random.split(key, 3)
        fan_in, fan_out = in_ch * 16, out_ch * 16
        w = _xavier_uniform(kw, (out_ch, in_ch, 4, 4), fan_in, fan_out)
        bound = 1.0 / np.sqrt(fan_in)
        b = jax.random.uniform(kb, (out_ch,), jnp.float32, -bound, bound)
        params["convs"].append((w, b))

    key, kw, kb = jax.random.split(key, 3)
    w1 = _xavier_uniform(kw, (out_ch, 512), out_ch, 512)
    b1 = jax.random.uniform(kb, (512,), jnp.float32,
                            -1.0 / np.sqrt(out_ch), 1.0 / np.sqrt(out_ch))
    params["fc1"] = (w1, b1)

    key, kw, kb = jax.random.split(key, 3)
    w2 = _xavier_uniform(kw, (512, latents * 2), 512, latents * 2)
    b2 = jax.random.uniform(kb, (latents * 2,), jnp.float32,
                            -1.0 / np.sqrt(512), 1.0 / np.sqrt(512))
    params["fc2"] = (w2, b2)
    return params


# ----------------------------------------------------------------------------
# Build the fused forward (one-time weight prep, then a single pallas_call).
# ----------------------------------------------------------------------------
def make_vae_encoder_forward(params, batch, resolution, nc, latents):
    n_conv = int(np.log2(resolution))
    convs = params["convs"]
    assert len(convs) == n_conv

    conv_dims = []
    fused_args = []
    h, cin = resolution, nc
    for l in range(n_conv):
        w, b = convs[l]                                    # (Co, Ci, 4, 4), (Co,)
        co, ci = int(w.shape[0]), int(w.shape[1])
        assert ci == cin
        ho = h // 2
        conv_dims.append((h * h, ho * ho, ci, co))
        g = _gather_stack(h)                               # (16*Ho*Wo, H*W), per-image
        # deep-K tap weight: rows ordered (t, ci), t = ky*4 + kx
        wdeep = jnp.transpose(w, (2, 3, 1, 0)).reshape(16 * ci, co)
        fused_args += [jnp.asarray(g, jnp.bfloat16),
                       wdeep.astype(jnp.bfloat16),
                       b.reshape(1, co).astype(jnp.float32)]
        h, cin = ho, co
    assert h == 1, "expected 1x1 spatial after the conv stack"

    w1, b1 = params["fc1"]
    w2, b2 = params["fc2"]
    c_last = int(w1.shape[0])
    fc_hidden = int(w1.shape[1])
    n_out = int(w2.shape[1])
    fused_args += [w1.astype(jnp.bfloat16),
                   b1.reshape(1, -1).astype(jnp.float32),
                   w2.astype(jnp.bfloat16),               # unpadded (512, 2*latents)
                   b2.reshape(1, -1).astype(jnp.float32)]
    fused_args = tuple(fused_args)

    kernel = _make_fused_kernel(batch, tuple(conv_dims))
    n_inputs = 1 + len(fused_args)

    # Advisory cost estimate for XLA's scheduler.
    flops = 0
    for (hw, howo, ci, co) in conv_dims:
        flops += batch * (2 * (16 * howo) * hw * ci + 2 * howo * (16 * ci) * co)
    flops += batch * (2 * c_last * fc_hidden + 2 * fc_hidden * n_out)
    bytes_accessed = sum(int(np.prod(a.shape)) * a.dtype.itemsize for a in fused_args)
    bytes_accessed += batch * resolution * resolution * nc * 2 + batch * n_out * 4

    def forward(x_nchw):
        # Single fused host op: NCHW -> (N*H*W, C) rows, bf16.  All remaining
        # im2col / padding / channel mixing happens inside the Pallas kernel.
        x = jnp.transpose(x_nchw, (0, 2, 3, 1))
        x = x.reshape(batch * resolution * resolution, nc).astype(jnp.bfloat16)
        return pl.pallas_call(
            kernel,
            out_shape=jax.ShapeDtypeStruct((batch, n_out), jnp.float32),
            in_specs=[pl.BlockSpec(memory_space=pltpu.MemorySpace.VMEM)] * n_inputs,
            out_specs=pl.BlockSpec(memory_space=pltpu.MemorySpace.VMEM),
            cost_estimate=pl.CostEstimate(flops=int(flops), transcendentals=0,
                                          bytes_accessed=int(bytes_accessed)),
        )(x, *fused_args)

    return jax.jit(forward)


# ----------------------------------------------------------------------------
# Pure-XLA f32 reference (kernel runs weights/activations in bf16)
# ----------------------------------------------------------------------------
def vae_encoder_reference(params, x_nchw):
    x = x_nchw.astype(jnp.float32)
    for w, b in params["convs"]:
        x = jax.lax.conv_general_dilated(
            x, w, window_strides=(2, 2), padding=((1, 1), (1, 1)),
            dimension_numbers=("NCHW", "OIHW", "NCHW"))
        x = jax.nn.relu(x + b.reshape(1, -1, 1, 1))
    x = x.reshape(x.shape[0], -1)                    # View([batch, -1]) semantics
    w1, b1 = params["fc1"]
    x = jax.nn.relu(x @ w1 + b1)
    w2, b2 = params["fc2"]
    return x @ w2 + b2


if __name__ == "__main__":
    resolution, nc, latents, batch = 16, 4, 8, 2

    key = jax.random.PRNGKey(0)
    key, kx, kp = jax.random.split(key, 3)
    x = jax.random.normal(kx, (batch, nc, resolution, resolution), jnp.float32)
    params = init_vae_encoder_params(kp, resolution, nc, latents)

    forward = make_vae_encoder_forward(params, batch, resolution, nc, latents)
    out = jax.block_until_ready(forward(x))

    assert out.shape == (batch, latents * 2), out.shape
    assert bool(jnp.all(jnp.isfinite(out)))

    # loose tolerance: kernel uses bf16 weights/activations, reference is f32
    ref = jax.block_until_ready(vae_encoder_reference(params, x))
    rel = float(jnp.linalg.norm(out - ref) / jnp.maximum(jnp.linalg.norm(ref), 1e-30))
    assert rel < 0.1, f"relative L2 error too large: {rel}"

    print("KERNEL_OK")
</pallas_src>

<mosaic_0001>
module attributes {stable_mosaic.version = 11 : i64} {
  func.func @kernel(%arg0: memref<512x4xbf16, #tpu.memory_space<vmem>>, %arg1: memref<1024x256xbf16, #tpu.memory_space<vmem>>, %arg2: memref<64x32xbf16, #tpu.memory_space<vmem>>, %arg3: memref<1x32xf32, #tpu.memory_space<vmem>>, %arg4: memref<256x64xbf16, #tpu.memory_space<vmem>>, %arg5: memref<512x32xbf16, #tpu.memory_space<vmem>>, %arg6: memref<1x32xf32, #tpu.memory_space<vmem>>, %arg7: memref<64x16xbf16, #tpu.memory_space<vmem>>, %arg8: memref<512x64xbf16, #tpu.memory_space<vmem>>, %arg9: memref<1x64xf32, #tpu.memory_space<vmem>>, %arg10: memref<16x4xbf16, #tpu.memory_space<vmem>>, %arg11: memref<1024x64xbf16, #tpu.memory_space<vmem>>, %arg12: memref<1x64xf32, #tpu.memory_space<vmem>>, %arg13: memref<64x512xbf16, #tpu.memory_space<vmem>>, %arg14: memref<1x512xf32, #tpu.memory_space<vmem>>, %arg15: memref<512x16xbf16, #tpu.memory_space<vmem>>, %arg16: memref<1x16xf32, #tpu.memory_space<vmem>>, %arg17: memref<2x16xf32, #tpu.memory_space<vmem>>) attributes {dimension_semantics = [], scalar_prefetch = 0 : i64, scratch_operands = 0 : i64, tpu.core_type = #tpu.core_type<tc>} {
    %c0 = arith.constant 0 : index
    %c0_0 = arith.constant 0 : index
    %0 = vector.load %arg0[%c0, %c0_0] : memref<512x4xbf16, #tpu.memory_space<vmem>>, vector<256x4xbf16>
    %c0_1 = arith.constant 0 : index
    %c0_2 = arith.constant 0 : index
    %1 = vector.load %arg1[%c0_1, %c0_2] : memref<1024x256xbf16, #tpu.memory_space<vmem>>, vector<1024x256xbf16>
    %cst = arith.constant dense<0.000000e+00> : vector<1024x4xf32>
    %2 = tpu.matmul %1, %0, %cst {dimension_numbers = #tpu.dot_dimension_numbers<[1], [0], [0], [1], [0, 0, 1, 1], [], []>} : vector<1024x256xbf16>, vector<256x4xbf16>, vector<1024x4xf32> -> vector<1024x4xf32>
    %3 = vector.extract_strided_slice %2 {offsets = [0, 0], sizes = [64, 4], strides = [1, 1]} : vector<1024x4xf32> to vector<64x4xf32>
    %4 = vector.extract_strided_slice %2 {offsets = [64, 0], sizes = [64, 4], strides = [1, 1]} : vector<1024x4xf32> to vector<64x4xf32>
    %5 = vector.extract_strided_slice %2 {offsets = [128, 0], sizes = [64, 4], strides = [1, 1]} : vector<1024x4xf32> to vector<64x4xf32>
    %6 = vector.extract_strided_slice %2 {offsets = [192, 0], sizes = [64, 4], strides = [1, 1]} : vector<1024x4xf32> to vector<64x4xf32>
    %7 = vector.extract_strided_slice %2 {offsets = [256, 0], sizes = [64, 4], strides = [1, 1]} : vector<1024x4xf32> to vector<64x4xf32>
    %8 = vector.extract_strided_slice %2 {offsets = [320, 0], sizes = [64, 4], strides = [1, 1]} : vector<1024x4xf32> to vector<64x4xf32>
    %9 = vector.extract_strided_slice %2 {offsets = [384, 0], sizes = [64, 4], strides = [1, 1]} : vector<1024x4xf32> to vector<64x4xf32>
    %10 = vector.extract_strided_slice %2 {offsets = [448, 0], sizes = [64, 4], strides = [1, 1]} : vector<1024x4xf32> to vector<64x4xf32>
    %11 = vector.extract_strided_slice %2 {offsets = [512, 0], sizes = [64, 4], strides = [1, 1]} : vector<1024x4xf32> to vector<64x4xf32>
    %12 = vector.extract_strided_slice %2 {offsets = [576, 0], sizes = [64, 4], strides = [1, 1]} : vector<1024x4xf32> to vector<64x4xf32>
    %13 = vector.extract_strided_slice %2 {offsets = [640, 0], sizes = [64, 4], strides = [1, 1]} : vector<1024x4xf32> to vector<64x4xf32>
    %14 = vector.extract_strided_slice %2 {offsets = [704, 0], sizes = [64, 4], strides = [1, 1]} : vector<1024x4xf32> to vector<64x4xf32>
    %15 = vector.extract_strided_slice %2 {offsets = [768, 0], sizes = [64, 4], strides = [1, 1]} : vector<1024x4xf32> to vector<64x4xf32>
    %16 = vector.extract_strided_slice %2 {offsets = [832, 0], sizes = [64, 4], strides = [1, 1]} : vector<1024x4xf32> to vector<64x4xf32>
    %17 = vector.extract_strided_slice %2 {offsets = [896, 0], sizes = [64, 4], strides = [1, 1]} : vector<1024x4xf32> to vector<64x4xf32>
    %18 = vector.extract_strided_slice %2 {offsets = [960, 0], sizes = [64, 4], strides = [1, 1]} : vector<1024x4xf32> to vector<64x4xf32>
    %19 = tpu.concatenate %3, %4, %5, %6, %7, %8, %9, %10, %11, %12, %13, %14, %15, %16, %17, %18 in 1 : vector<64x4xf32>, vector<64x4xf32>, vector<64x4xf32>, vector<64x4xf32>, vector<64x4xf32>, vector<64x4xf32>, vector<64x4xf32>, vector<64x4xf32>, vector<64x4xf32>, vector<64x4xf32>, vector<64x4xf32>, vector<64x4xf32>, vector<64x4xf32>, vector<64x4xf32>, vector<64x4xf32>, vector<64x4xf32> -> vector<64x64xf32>
    %20 = arith.truncf %19 : vector<64x64xf32> to vector<64x64xbf16>
    %c0_3 = arith.constant 0 : index
    %c0_4 = arith.constant 0 : index
    %21 = vector.load %arg2[%c0_3, %c0_4] : memref<64x32xbf16, #tpu.memory_space<vmem>>, vector<64x32xbf16>
    %cst_5 = arith.constant dense<0.000000e+00> : vector<64x32xf32>
    %22 = tpu.matmul %20, %21, %cst_5 {dimension_numbers = #tpu.dot_dimension_numbers<[1], [0], [0], [1], [0, 0, 1, 1], [], []>} : vector<64x64xbf16>, vector<64x32xbf16>, vector<64x32xf32> -> vector<64x32xf32>
    %c0_6 = arith.constant 0 : index
    %c0_7 = arith.constant 0 : index
    %23 = vector.load %arg3[%c0_6, %c0_7] : memref<1x32xf32, #tpu.memory_space<vmem>>, vector<1x32xf32>
    %24 = vector.broadcast %23 : vector<1x32xf32> to vector<64x32xf32>
    %25 = arith.addf %22, %24 : vector<64x32xf32>
    %cst_8 = arith.constant 0.000000e+00 : f32
    %26 = vector.broadcast %cst_8 : f32 to vector<64x32xf32>
    %27 = arith.maximumf %25, %26 : vector<64x32xf32>
    %28 = arith.truncf %27 : vector<64x32xf32> to vector<64x32xbf16>
    %c0_9 = arith.constant 0 : index
    %c0_10 = arith.constant 0 : index
    %29 = vector.load %arg4[%c0_9, %c0_10] : memref<256x64xbf16, #tpu.memory_space<vmem>>, vector<256x64xbf16>
    %cst_11 = arith.constant dense<0.000000e+00> : vector<256x32xf32>
    %30 = tpu.matmul %29, %28, %cst_11 {dimension_numbers = #tpu.dot_dimension_numbers<[1], [0], [0], [1], [0, 0, 1, 1], [], []>} : vector<256x64xbf16>, vector<64x32xbf16>, vector<256x32xf32> -> vector<256x32xf32>
    %31 = vector.extract_strided_slice %30 {offsets = [0, 0], sizes = [16, 32], strides = [1, 1]} : vector<256x32xf32> to vector<16x32xf32>
    %32 = vector.extract_strided_slice %30 {offsets = [16, 0], sizes = [16, 32], strides = [1, 1]} : vector<256x32xf32> to vector<16x32xf32>
    %33 = vector.extract_strided_slice %30 {offsets = [32, 0], sizes = [16, 32], strides = [1, 1]} : vector<256x32xf32> to vector<16x32xf32>
    %34 = vector.extract_strided_slice %30 {offsets = [48, 0], sizes = [16, 32], strides = [1, 1]} : vector<256x32xf32> to vector<16x32xf32>
    %35 = vector.extract_strided_slice %30 {offsets = [64, 0], sizes = [16, 32], strides = [1, 1]} : vector<256x32xf32> to vector<16x32xf32>
    %36 = vector.extract_strided_slice %30 {offsets = [80, 0], sizes = [16, 32], strides = [1, 1]} : vector<256x32xf32> to vector<16x32xf32>
    %37 = vector.extract_strided_slice %30 {offsets = [96, 0], sizes = [16, 32], strides = [1, 1]} : vector<256x32xf32> to vector<16x32xf32>
    %38 = vector.extract_strided_slice %30 {offsets = [112, 0], sizes = [16, 32], strides = [1, 1]} : vector<256x32xf32> to vector<16x32xf32>
    %39 = vector.extract_strided_slice %30 {offsets = [128, 0], sizes = [16, 32], strides = [1, 1]} : vector<256x32xf32> to vector<16x32xf32>
    %40 = vector.extract_strided_slice %30 {offsets = [144, 0], sizes = [16, 32], strides = [1, 1]} : vector<256x32xf32> to vector<16x32xf32>
    %41 = vector.extract_strided_slice %30 {offsets = [160, 0], sizes = [16, 32], strides = [1, 1]} : vector<256x32xf32> to vector<16x32xf32>
    %42 = vector.extract_strided_slice %30 {offsets = [176, 0], sizes = [16, 32], strides = [1, 1]} : vector<256x32xf32> to vector<16x32xf32>
    %43 = vector.extract_strided_slice %30 {offsets = [192, 0], sizes = [16, 32], strides = [1, 1]} : vector<256x32xf32> to vector<16x32xf32>
    %44 = vector.extract_strided_slice %30 {offsets = [208, 0], sizes = [16, 32], strides = [1, 1]} : vector<256x32xf32> to vector<16x32xf32>
    %45 = vector.extract_strided_slice %30 {offsets = [224, 0], sizes = [16, 32], strides = [1, 1]} : vector<256x32xf32> to vector<16x32xf32>
    %46 = vector.extract_strided_slice %30 {offsets = [240, 0], sizes = [16, 32], strides = [1, 1]} : vector<256x32xf32> to vector<16x32xf32>
    %47 = tpu.concatenate %31, %32, %33, %34, %35, %36, %37, %38, %39, %40, %41, %42, %43, %44, %45, %46 in 1 : vector<16x32xf32>, vector<16x32xf32>, vector<16x32xf32>, vector<16x32xf32>, vector<16x32xf32>, vector<16x32xf32>, vector<16x32xf32>, vector<16x32xf32>, vector<16x32xf32>, vector<16x32xf32>, vector<16x32xf32>, vector<16x32xf32>, vector<16x32xf32>, vector<16x32xf32>, vector<16x32xf32>, vector<16x32xf32> -> vector<16x512xf32>
    %48 = arith.truncf %47 : vector<16x512xf32> to vector<16x512xbf16>
    %c0_12 = arith.constant 0 : index
    %c0_13 = arith.constant 0 : index
    %49 = vector.load %arg5[%c0_12, %c0_13] : memref<512x32xbf16, #tpu.memory_space<vmem>>, vector<512x32xbf16>
    %cst_14 = arith.constant dense<0.000000e+00> : vector<16x32xf32>
    %50 = tpu.matmul %48, %49, %cst_14 {dimension_numbers = #tpu.dot_dimension_numbers<[1], [0], [0], [1], [0, 0, 1, 1], [], []>} : vector<16x512xbf16>, vector<512x32xbf16>, vector<16x32xf32> -> vector<16x32xf32>
    %c0_15 = arith.constant 0 : index
    %c0_16 = arith.constant 0 : index
    %51 = vector.load %arg6[%c0_15, %c0_16] : memref<1x32xf32, #tpu.memory_space<vmem>>, vector<1x32xf32>
    %52 = vector.broadcast %51 : vector<1x32xf32> to vector<16x32xf32>
    %53 = arith.addf %50, %52 : vector<16x32xf32>
    %cst_17 = arith.constant 0.000000e+00 : f32
    %54 = vector.broadcast %cst_17 : f32 to vector<16x32xf32>
    %55 = arith.maximumf %53, %54 : vector<16x32xf32>
    %56 = arith.truncf %55 : vector<16x32xf32> to vector<16x32xbf16>
    %c0_18 = arith.constant 0 : index
    %c0_19 = arith.constant 0 : index
    %57 = vector.load %arg7[%c0_18, %c0_19] : memref<64x16xbf16, #tpu.memory_space<vmem>>, vector<64x16xbf16>
    %cst_20 = arith.constant dense<0.000000e+00> : vector<64x32xf32>
    %58 = tpu.matmul %57, %56, %cst_20 {dimension_numbers = #tpu.dot_dimension_numbers<[1], [0], [0], [1], [0, 0, 1, 1], [], []>} : vector<64x16xbf16>, vector<16x32xbf16>, vector<64x32xf32> -> vector<64x32xf32>
    %59 = vector.extract_strided_slice %58 {offsets = [0, 0], sizes = [4, 32], strides = [1, 1]} : vector<64x32xf32> to vector<4x32xf32>
    %60 = vector.extract_strided_slice %58 {offsets = [4, 0], sizes = [4, 32], strides = [1, 1]} : vector<64x32xf32> to vector<4x32xf32>
    %61 = vector.extract_strided_slice %58 {offsets = [8, 0], sizes = [4, 32], strides = [1, 1]} : vector<64x32xf32> to vector<4x32xf32>
    %62 = vector.extract_strided_slice %58 {offsets = [12, 0], sizes = [4, 32], strides = [1, 1]} : vector<64x32xf32> to vector<4x32xf32>
    %63 = vector.extract_strided_slice %58 {offsets = [16, 0], sizes = [4, 32], strides = [1, 1]} : vector<64x32xf32> to vector<4x32xf32>
    %64 = vector.extract_strided_slice %58 {offsets = [20, 0], sizes = [4, 32], strides = [1, 1]} : vector<64x32xf32> to vector<4x32xf32>
    %65 = vector.extract_strided_slice %58 {offsets = [24, 0], sizes = [4, 32], strides = [1, 1]} : vector<64x32xf32> to vector<4x32xf32>
    %66 = vector.extract_strided_slice %58 {offsets = [28, 0], sizes = [4, 32], strides = [1, 1]} : vector<64x32xf32> to vector<4x32xf32>
    %67 = vector.extract_strided_slice %58 {offsets = [32, 0], sizes = [4, 32], strides = [1, 1]} : vector<64x32xf32> to vector<4x32xf32>
    %68 = vector.extract_strided_slice %58 {offsets = [36, 0], sizes = [4, 32], strides = [1, 1]} : vector<64x32xf32> to vector<4x32xf32>
    %69 = vector.extract_strided_slice %58 {offsets = [40, 0], sizes = [4, 32], strides = [1, 1]} : vector<64x32xf32> to vector<4x32xf32>
    %70 = vector.extract_strided_slice %58 {offsets = [44, 0], sizes = [4, 32], strides = [1, 1]} : vector<64x32xf32> to vector<4x32xf32>
    %71 = vector.extract_strided_slice %58 {offsets = [48, 0], sizes = [4, 32], strides = [1, 1]} : vector<64x32xf32> to vector<4x32xf32>
    %72 = vector.extract_strided_slice %58 {offsets = [52, 0], sizes = [4, 32], strides = [1, 1]} : vector<64x32xf32> to vector<4x32xf32>
    %73 = vector.extract_strided_slice %58 {offsets = [56, 0], sizes = [4, 32], strides = [1, 1]} : vector<64x32xf32> to vector<4x32xf32>
    %74 = vector.extract_strided_slice %58 {offsets = [60, 0], sizes = [4, 32], strides = [1, 1]} : vector<64x32xf32> to vector<4x32xf32>
    %75 = tpu.concatenate %59, %60, %61, %62, %63, %64, %65, %66, %67, %68, %69, %70, %71, %72, %73, %74 in 1 : vector<4x32xf32>, vector<4x32xf32>, vector<4x32xf32>, vector<4x32xf32>, vector<4x32xf32>, vector<4x32xf32>, vector<4x32xf32>, vector<4x32xf32>, vector<4x32xf32>, vector<4x32xf32>, vector<4x32xf32>, vector<4x32xf32>, vector<4x32xf32>, vector<4x32xf32>, vector<4x32xf32>, vector<4x32xf32> -> vector<4x512xf32>
    %76 = arith.truncf %75 : vector<4x512xf32> to vector<4x512xbf16>
    %c0_21 = arith.constant 0 : index
    %c0_22 = arith.constant 0 : index
    %77 = vector.load %arg8[%c0_21, %c0_22] : memref<512x64xbf16, #tpu.memory_space<vmem>>, vector<512x64xbf16>
    %cst_23 = arith.constant dense<0.000000e+00> : vector<4x64xf32>
    %78 = tpu.matmul %76, %77, %cst_23 {dimension_numbers = #tpu.dot_dimension_numbers<[1], [0], [0], [1], [0, 0, 1, 1], [], []>} : vector<4x512xbf16>, vector<512x64xbf16>, vector<4x64xf32> -> vector<4x64xf32>
    %c0_24 = arith.constant 0 : index
    %c0_25 = arith.constant 0 : index
    %79 = vector.load %arg9[%c0_24, %c0_25] : memref<1x64xf32, #tpu.memory_space<vmem>>, vector<1x64xf32>
    %80 = vector.broadcast %79 : vector<1x64xf32> to vector<4x64xf32>
    %81 = arith.addf %78, %80 : vector<4x64xf32>
    %cst_26 = arith.constant 0.000000e+00 : f32
    %82 = vector.broadcast %cst_26 : f32 to vector<4x64xf32>
    %83 = arith.maximumf %81, %82 : vector<4x64xf32>
    %84 = arith.truncf %83 : vector<4x64xf32> to vector<4x64xbf16>
    %c0_27 = arith.constant 0 : index
    %c0_28 = arith.constant 0 : index
    %85 = vector.load %arg10[%c0_27, %c0_28] : memref<16x4xbf16, #tpu.memory_space<vmem>>, vector<16x4xbf16>
    %cst_29 = arith.constant dense<0.000000e+00> : vector<16x64xf32>
    %86 = tpu.matmul %85, %84, %cst_29 {dimension_numbers = #tpu.dot_dimension_numbers<[1], [0], [0], [1], [0, 0, 1, 1], [], []>} : vector<16x4xbf16>, vector<4x64xbf16>, vector<16x64xf32> -> vector<16x64xf32>
    %87 = vector.extract_strided_slice %86 {offsets = [0, 0], sizes = [1, 64], strides = [1, 1]} : vector<16x64xf32> to vector<1x64xf32>
    %88 = vector.extract_strided_slice %86 {offsets = [1, 0], sizes = [1, 64], strides = [1, 1]} : vector<16x64xf32> to vector<1x64xf32>
    %89 = vector.extract_strided_slice %86 {offsets = [2, 0], sizes = [1, 64], strides = [1, 1]} : vector<16x64xf32> to vector<1x64xf32>
    %90 = vector.extract_strided_slice %86 {offsets = [3, 0], sizes = [1, 64], strides = [1, 1]} : vector<16x64xf32> to vector<1x64xf32>
    %91 = vector.extract_strided_slice %86 {offsets = [4, 0], sizes = [1, 64], strides = [1, 1]} : vector<16x64xf32> to vector<1x64xf32>
    %92 = vector.extract_strided_slice %86 {offsets = [5, 0], sizes = [1, 64], strides = [1, 1]} : vector<16x64xf32> to vector<1x64xf32>
    %93 = vector.extract_strided_slice %86 {offsets = [6, 0], sizes = [1, 64], strides = [1, 1]} : vector<16x64xf32> to vector<1x64xf32>
    %94 = vector.extract_strided_slice %86 {offsets = [7, 0], sizes = [1, 64], strides = [1, 1]} : vector<16x64xf32> to vector<1x64xf32>
    %95 = vector.extract_strided_slice %86 {offsets = [8, 0], sizes = [1, 64], strides = [1, 1]} : vector<16x64xf32> to vector<1x64xf32>
    %96 = vector.extract_strided_slice %86 {offsets = [9, 0], sizes = [1, 64], strides = [1, 1]} : vector<16x64xf32> to vector<1x64xf32>
    %97 = vector.extract_strided_slice %86 {offsets = [10, 0], sizes = [1, 64], strides = [1, 1]} : vector<16x64xf32> to vector<1x64xf32>
    %98 = vector.extract_strided_slice %86 {offsets = [11, 0], sizes = [1, 64], strides = [1, 1]} : vector<16x64xf32> to vector<1x64xf32>
    %99 = vector.extract_strided_slice %86 {offsets = [12, 0], sizes = [1, 64], strides = [1, 1]} : vector<16x64xf32> to vector<1x64xf32>
    %100 = vector.extract_strided_slice %86 {offsets = [13, 0], sizes = [1, 64], strides = [1, 1]} : vector<16x64xf32> to vector<1x64xf32>
    %101 = vector.extract_strided_slice %86 {offsets = [14, 0], sizes = [1, 64], strides = [1, 1]} : vector<16x64xf32> to vector<1x64xf32>
    %102 = vector.extract_strided_slice %86 {offsets = [15, 0], sizes = [1, 64], strides = [1, 1]} : vector<16x64xf32> to vector<1x64xf32>
    %103 = tpu.concatenate %87, %88, %89, %90, %91, %92, %93, %94, %95, %96, %97, %98, %99, %100, %101, %102 in 1 : vector<1x64xf32>, vector<1x64xf32>, vector<1x64xf32>, vector<1x64xf32>, vector<1x64xf32>, vector<1x64xf32>, vector<1x64xf32>, vector<1x64xf32>, vector<1x64xf32>, vector<1x64xf32>, vector<1x64xf32>, vector<1x64xf32>, vector<1x64xf32>, vector<1x64xf32>, vector<1x64xf32>, vector<1x64xf32> -> vector<1x1024xf32>
    %104 = arith.truncf %103 : vector<1x1024xf32> to vector<1x1024xbf16>
    %c0_30 = arith.constant 0 : index
    %c0_31 = arith.constant 0 : index
    %105 = vector.load %arg11[%c0_30, %c0_31] : memref<1024x64xbf16, #tpu.memory_space<vmem>>, vector<1024x64xbf16>
    %cst_32 = arith.constant dense<0.000000e+00> : vector<1x64xf32>
    %106 = tpu.matmul %104, %105, %cst_32 {dimension_numbers = #tpu.dot_dimension_numbers<[1], [0], [0], [1], [0, 0, 1, 1], [], []>} : vector<1x1024xbf16>, vector<1024x64xbf16>, vector<1x64xf32> -> vector<1x64xf32>
    %c0_33 = arith.constant 0 : index
    %c0_34 = arith.constant 0 : index
    %107 = vector.load %arg12[%c0_33, %c0_34] : memref<1x64xf32, #tpu.memory_space<vmem>>, vector<1x64xf32>
    %108 = arith.addf %106, %107 : vector<1x64xf32>
    %cst_35 = arith.constant 0.000000e+00 : f32
    %109 = vector.broadcast %cst_35 : f32 to vector<1x64xf32>
    %110 = arith.maximumf %108, %109 : vector<1x64xf32>
    %111 = arith.truncf %110 : vector<1x64xf32> to vector<1x64xbf16>
    %c0_36 = arith.constant 0 : index
    %c0_37 = arith.constant 0 : index
    %112 = vector.load %arg13[%c0_36, %c0_37] : memref<64x512xbf16, #tpu.memory_space<vmem>>, vector<64x512xbf16>
    %cst_38 = arith.constant dense<0.000000e+00> : vector<1x512xf32>
    %113 = tpu.matmul %111, %112, %cst_38 {dimension_numbers = #tpu.dot_dimension_numbers<[1], [0], [0], [1], [0, 0, 1, 1], [], []>} : vector<1x64xbf16>, vector<64x512xbf16>, vector<1x512xf32> -> vector<1x512xf32>
    %c0_39 = arith.constant 0 : index
    %c0_40 = arith.constant 0 : index
    %114 = vector.load %arg14[%c0_39, %c0_40] : memref<1x512xf32, #tpu.memory_space<vmem>>, vector<1x512xf32>
    %115 = arith.addf %113, %114 : vector<1x512xf32>
    %cst_41 = arith.constant 0.000000e+00 : f32
    %116 = vector.broadcast %cst_41 : f32 to vector<1x512xf32>
    %117 = arith.maximumf %115, %116 : vector<1x512xf32>
    %118 = arith.truncf %117 : vector<1x512xf32> to vector<1x512xbf16>
    %c0_42 = arith.constant 0 : index
    %c0_43 = arith.constant 0 : index
    %119 = vector.load %arg15[%c0_42, %c0_43] : memref<512x16xbf16, #tpu.memory_space<vmem>>, vector<512x16xbf16>
    %cst_44 = arith.constant dense<0.000000e+00> : vector<1x16xf32>
    %120 = tpu.matmul %118, %119, %cst_44 {dimension_numbers = #tpu.dot_dimension_numbers<[1], [0], [0], [1], [0, 0, 1, 1], [], []>} : vector<1x512xbf16>, vector<512x16xbf16>, vector<1x16xf32> -> vector<1x16xf32>
    %c0_45 = arith.constant 0 : index
    %c0_46 = arith.constant 0 : index
    %121 = vector.load %arg16[%c0_45, %c0_46] : memref<1x16xf32, #tpu.memory_space<vmem>>, vector<1x16xf32>
    %122 = arith.addf %120, %121 : vector<1x16xf32>
    %c0_47 = arith.constant 0 : index
    %c0_48 = arith.constant 0 : index
    %123 = vector.load %arg17[%c0_47, %c0_48] : memref<2x16xf32, #tpu.memory_space<vmem>>, vector<1x16xf32>
    tpu.vector_store %arg17[%c0_47, %c0_48], %122 {strides = array<i32>} : memref<2x16xf32, #tpu.memory_space<vmem>>, vector<1x16xf32>,
    %c256 = arith.constant 256 : index
    %c0_49 = arith.constant 0 : index
    %124 = vector.load %arg0[%c256, %c0_49] : memref<512x4xbf16, #tpu.memory_space<vmem>>, vector<256x4xbf16>
    %c0_50 = arith.constant 0 : index
    %c0_51 = arith.constant 0 : index
    %125 = vector.load %arg1[%c0_50, %c0_51] : memref<1024x256xbf16, #tpu.memory_space<vmem>>, vector<1024x256xbf16>
    %cst_52 = arith.constant dense<0.000000e+00> : vector<1024x4xf32>
    %126 = tpu.matmul %125, %124, %cst_52 {dimension_numbers = #tpu.dot_dimension_numbers<[1], [0], [0], [1], [0, 0, 1, 1], [], []>} : vector<1024x256xbf16>, vector<256x4xbf16>, vector<1024x4xf32> -> vector<1024x4xf32>
    %127 = vector.extract_strided_slice %126 {offsets = [0, 0], sizes = [64, 4], strides = [1, 1]} : vector<1024x4xf32> to vector<64x4xf32>
    %128 = vector.extract_strided_slice %126 {offsets = [64, 0], sizes = [64, 4], strides = [1, 1]} : vector<1024x4xf32> to vector<64x4xf32>
    %129 = vector.extract_strided_slice %126 {offsets = [128, 0], sizes = [64, 4], strides = [1, 1]} : vector<1024x4xf32> to vector<64x4xf32>
    %130 = vector.extract_strided_slice %126 {offsets = [192, 0], sizes = [64, 4], strides = [1, 1]} : vector<1024x4xf32> to vector<64x4xf32>
    %131 = vector.extract_strided_slice %126 {offsets = [256, 0], sizes = [64, 4], strides = [1, 1]} : vector<1024x4xf32> to vector<64x4xf32>
    %132 = vector.extract_strided_slice %126 {offsets = [320, 0], sizes = [64, 4], strides = [1, 1]} : vector<1024x4xf32> to vector<64x4xf32>
    %133 = vector.extract_strided_slice %126 {offsets = [384, 0], sizes = [64, 4], strides = [1, 1]} : vector<1024x4xf32> to vector<64x4xf32>
    %134 = vector.extract_strided_slice %126 {offsets = [448, 0], sizes = [64, 4], strides = [1, 1]} : vector<1024x4xf32> to vector<64x4xf32>
    %135 = vector.extract_strided_slice %126 {offsets = [512, 0], sizes = [64, 4], strides = [1, 1]} : vector<1024x4xf32> to vector<64x4xf32>
    %136 = vector.extract_strided_slice %126 {offsets = [576, 0], sizes = [64, 4], strides = [1, 1]} : vector<1024x4xf32> to vector<64x4xf32>
    %137 = vector.extract_strided_slice %126 {offsets = [640, 0], sizes = [64, 4], strides = [1, 1]} : vector<1024x4xf32> to vector<64x4xf32>
    %138 = vector.extract_strided_slice %126 {offsets = [704, 0], sizes = [64, 4], strides = [1, 1]} : vector<1024x4xf32> to vector<64x4xf32>
    %139 = vector.extract_strided_slice %126 {offsets = [768, 0], sizes = [64, 4], strides = [1, 1]} : vector<1024x4xf32> to vector<64x4xf32>
    %140 = vector.extract_strided_slice %126 {offsets = [832, 0], sizes = [64, 4], strides = [1, 1]} : vector<1024x4xf32> to vector<64x4xf32>
    %141 = vector.extract_strided_slice %126 {offsets = [896, 0], sizes = [64, 4], strides = [1, 1]} : vector<1024x4xf32> to vector<64x4xf32>
    %142 = vector.extract_strided_slice %126 {offsets = [960, 0], sizes = [64, 4], strides = [1, 1]} : vector<1024x4xf32> to vector<64x4xf32>
    %143 = tpu.concatenate %127, %128, %129, %130, %131, %132, %133, %134, %135, %136, %137, %138, %139, %140, %141, %142 in 1 : vector<64x4xf32>, vector<64x4xf32>, vector<64x4xf32>, vector<64x4xf32>, vector<64x4xf32>, vector<64x4xf32>, vector<64x4xf32>, vector<64x4xf32>, vector<64x4xf32>, vector<64x4xf32>, vector<64x4xf32>, vector<64x4xf32>, vector<64x4xf32>, vector<64x4xf32>, vector<64x4xf32>, vector<64x4xf32> -> vector<64x64xf32>
    %144 = arith.truncf %143 : vector<64x64xf32> to vector<64x64xbf16>
    %c0_53 = arith.constant 0 : index
    %c0_54 = arith.constant 0 : index
    %145 = vector.load %arg2[%c0_53, %c0_54] : memref<64x32xbf16, #tpu.memory_space<vmem>>, vector<64x32xbf16>
    %cst_55 = arith.constant dense<0.000000e+00> : vector<64x32xf32>
    %146 = tpu.matmul %144, %145, %cst_55 {dimension_numbers = #tpu.dot_dimension_numbers<[1], [0], [0], [1], [0, 0, 1, 1], [], []>} : vector<64x64xbf16>, vector<64x32xbf16>, vector<64x32xf32> -> vector<64x32xf32>
    %c0_56 = arith.constant 0 : index
    %c0_57 = arith.constant 0 : index
    %147 = vector.load %arg3[%c0_56, %c0_57] : memref<1x32xf32, #tpu.memory_space<vmem>>, vector<1x32xf32>
    %148 = vector.broadcast %147 : vector<1x32xf32> to vector<64x32xf32>
    %149 = arith.addf %146, %148 : vector<64x32xf32>
    %cst_58 = arith.constant 0.000000e+00 : f32
    %150 = vector.broadcast %cst_58 : f32 to vector<64x32xf32>
    %151 = arith.maximumf %149, %150 : vector<64x32xf32>
    %152 = arith.truncf %151 : vector<64x32xf32> to vector<64x32xbf16>
    %c0_59 = arith.constant 0 : index
    %c0_60 = arith.constant 0 : index
    %153 = vector.load %arg4[%c0_59, %c0_60] : memref<256x64xbf16, #tpu.memory_space<vmem>>, vector<256x64xbf16>
    %cst_61 = arith.constant dense<0.000000e+00> : vector<256x32xf32>
    %154 = tpu.matmul %153, %152, %cst_61 {dimension_numbers = #tpu.dot_dimension_numbers<[1], [0], [0], [1], [0, 0, 1, 1], [], []>} : vector<256x64xbf16>, vector<64x32xbf16>, vector<256x32xf32> -> vector<256x32xf32>
    %155 = vector.extract_strided_slice %154 {offsets = [0, 0], sizes = [16, 32], strides = [1, 1]} : vector<256x32xf32> to vector<16x32xf32>
    %156 = vector.extract_strided_slice %154 {offsets = [16, 0], sizes = [16, 32], strides = [1, 1]} : vector<256x32xf32> to vector<16x32xf32>
    %157 = vector.extract_strided_slice %154 {offsets = [32, 0], sizes = [16, 32], strides = [1, 1]} : vector<256x32xf32> to vector<16x32xf32>
    %158 = vector.extract_strided_slice %154 {offsets = [48, 0], sizes = [16, 32], strides = [1, 1]} : vector<256x32xf32> to vector<16x32xf32>
    %159 = vector.extract_strided_slice %154 {offsets = [64, 0], sizes = [16, 32], strides = [1, 1]} : vector<256x32xf32> to vector<16x32xf32>
    %160 = vector.extract_strided_slice %154 {offsets = [80, 0], sizes = [16, 32], strides = [1, 1]} : vector<256x32xf32> to vector<16x32xf32>
    %161 = vector.extract_strided_slice %154 {offsets = [96, 0], sizes = [16, 32], strides = [1, 1]} : vector<256x32xf32> to vector<16x32xf32>
    %162 = vector.extract_strided_slice %154 {offsets = [112, 0], sizes = [16, 32], strides = [1, 1]} : vector<256x32xf32> to vector<16x32xf32>
    %163 = vector.extract_strided_slice %154 {offsets = [128, 0], sizes = [16, 32], strides = [1, 1]} : vector<256x32xf32> to vector<16x32xf32>
    %164 = vector.extract_strided_slice %154 {offsets = [144, 0], sizes = [16, 32], strides = [1, 1]} : vector<256x32xf32> to vector<16x32xf32>
    %165 = vector.extract_strided_slice %154 {offsets = [160, 0], sizes = [16, 32], strides = [1, 1]} : vector<256x32xf32> to vector<16x32xf32>
    %166 = vector.extract_strided_slice %154 {offsets = [176, 0], sizes = [16, 32], strides = [1, 1]} : vector<256x32xf32> to vector<16x32xf32>
    %167 = vector.extract_strided_slice %154 {offsets = [192, 0], sizes = [16, 32], strides = [1, 1]} : vector<256x32xf32> to vector<16x32xf32>
    %168 = vector.extract_strided_slice %154 {offsets = [208, 0], sizes = [16, 32], strides = [1, 1]} : vector<256x32xf32> to vector<16x32xf32>
    %169 = vector.extract_strided_slice %154 {offsets = [224, 0], sizes = [16, 32], strides = [1, 1]} : vector<256x32xf32> to vector<16x32xf32>
    %170 = vector.extract_strided_slice %154 {offsets = [240, 0], sizes = [16, 32], strides = [1, 1]} : vector<256x32xf32> to vector<16x32xf32>
    %171 = tpu.concatenate %155, %156, %157, %158, %159, %160, %161, %162, %163, %164, %165, %166, %167, %168, %169, %170 in 1 : vector<16x32xf32>, vector<16x32xf32>, vector<16x32xf32>, vector<16x32xf32>, vector<16x32xf32>, vector<16x32xf32>, vector<16x32xf32>, vector<16x32xf32>, vector<16x32xf32>, vector<16x32xf32>, vector<16x32xf32>, vector<16x32xf32>, vector<16x32xf32>, vector<16x32xf32>, vector<16x32xf32>, vector<16x32xf32> -> vector<16x512xf32>
    %172 = arith.truncf %171 : vector<16x512xf32> to vector<16x512xbf16>
    %c0_62 = arith.constant 0 : index
    %c0_63 = arith.constant 0 : index
    %173 = vector.load %arg5[%c0_62, %c0_63] : memref<512x32xbf16, #tpu.memory_space<vmem>>, vector<512x32xbf16>
    %cst_64 = arith.constant dense<0.000000e+00> : vector<16x32xf32>
    %174 = tpu.matmul %172, %173, %cst_64 {dimension_numbers = #tpu.dot_dimension_numbers<[1], [0], [0], [1], [0, 0, 1, 1], [], []>} : vector<16x512xbf16>, vector<512x32xbf16>, vector<16x32xf32> -> vector<16x32xf32>
    %c0_65 = arith.constant 0 : index
    %c0_66 = arith.constant 0 : index
    %175 = vector.load %arg6[%c0_65, %c0_66] : memref<1x32xf32, #tpu.memory_space<vmem>>, vector<1x32xf32>
    %176 = vector.broadcast %175 : vector<1x32xf32> to vector<16x32xf32>
    %177 = arith.addf %174, %176 : vector<16x32xf32>
    %cst_67 = arith.constant 0.000000e+00 : f32
    %178 = vector.broadcast %cst_67 : f32 to vector<16x32xf32>
    %179 = arith.maximumf %177, %178 : vector<16x32xf32>
    %180 = arith.truncf %179 : vector<16x32xf32> to vector<16x32xbf16>
    %c0_68 = arith.constant 0 : index
    %c0_69 = arith.constant 0 : index
    %181 = vector.load %arg7[%c0_68, %c0_69] : memref<64x16xbf16, #tpu.memory_space<vmem>>, vector<64x16xbf16>
    %cst_70 = arith.constant dense<0.000000e+00> : vector<64x32xf32>
    %182 = tpu.matmul %181, %180, %cst_70 {dimension_numbers = #tpu.dot_dimension_numbers<[1], [0], [0], [1], [0, 0, 1, 1], [], []>} : vector<64x16xbf16>, vector<16x32xbf16>, vector<64x32xf32> -> vector<64x32xf32>
    %183 = vector.extract_strided_slice %182 {offsets = [0, 0], sizes = [4, 32], strides = [1, 1]} : vector<64x32xf32> to vector<4x32xf32>
    %184 = vector.extract_strided_slice %182 {offsets = [4, 0], sizes = [4, 32], strides = [1, 1]} : vector<64x32xf32> to vector<4x32xf32>
    %185 = vector.extract_strided_slice %182 {offsets = [8, 0], sizes = [4, 32], strides = [1, 1]} : vector<64x32xf32> to vector<4x32xf32>
    %186 = vector.extract_strided_slice %182 {offsets = [12, 0], sizes = [4, 32], strides = [1, 1]} : vector<64x32xf32> to vector<4x32xf32>
    %187 = vector.extract_strided_slice %182 {offsets = [16, 0], sizes = [4, 32], strides = [1, 1]} : vector<64x32xf32> to vector<4x32xf32>
    %188 = vector.extract_strided_slice %182 {offsets = [20, 0], sizes = [4, 32], strides = [1, 1]} : vector<64x32xf32> to vector<4x32xf32>
    %189 = vector.extract_strided_slice %182 {offsets = [24, 0], sizes = [4, 32], strides = [1, 1]} : vector<64x32xf32> to vector<4x32xf32>
    %190 = vector.extract_strided_slice %182 {offsets = [28, 0], sizes = [4, 32], strides = [1, 1]} : vector<64x32xf32> to vector<4x32xf32>
    %191 = vector.extract_strided_slice %182 {offsets = [32, 0], sizes = [4, 32], strides = [1, 1]} : vector<64x32xf32> to vector<4x32xf32>
    %192 = vector.extract_strided_slice %182 {offsets = [36, 0], sizes = [4, 32], strides = [1, 1]} : vector<64x32xf32> to vector<4x32xf32>
    %193 = vector.extract_strided_slice %182 {offsets = [40, 0], sizes = [4, 32], strides = [1, 1]} : vector<64x32xf32> to vector<4x32xf32>
    %194 = vector.extract_strided_slice %182 {offsets = [44, 0], sizes = [4, 32], strides = [1, 1]} : vector<64x32xf32> to vector<4x32xf32>
    %195 = vector.extract_strided_slice %182 {offsets = [48, 0], sizes = [4, 32], strides = [1, 1]} : vector<64x32xf32> to vector<4x32xf32>
    %196 = vector.extract_strided_slice %182 {offsets = [52, 0], sizes = [4, 32], strides = [1, 1]} : vector<64x32xf32> to vector<4x32xf32>
    %197 = vector.extract_strided_slice %182 {offsets = [56, 0], sizes = [4, 32], strides = [1, 1]} : vector<64x32xf32> to vector<4x32xf32>
    %198 = vector.extract_strided_slice %182 {offsets = [60, 0], sizes = [4, 32], strides = [1, 1]} : vector<64x32xf32> to vector<4x32xf32>
    %199 = tpu.concatenate %183, %184, %185, %186, %187, %188, %189, %190, %191, %192, %193, %194, %195, %196, %197, %198 in 1 : vector<4x32xf32>, vector<4x32xf32>, vector<4x32xf32>, vector<4x32xf32>, vector<4x32xf32>, vector<4x32xf32>, vector<4x32xf32>, vector<4x32xf32>, vector<4x32xf32>, vector<4x32xf32>, vector<4x32xf32>, vector<4x32xf32>, vector<4x32xf32>, vector<4x32xf32>, vector<4x32xf32>, vector<4x32xf32> -> vector<4x512xf32>
    %200 = arith.truncf %199 : vector<4x512xf32> to vector<4x512xbf16>
    %c0_71 = arith.constant 0 : index
    %c0_72 = arith.constant 0 : index
    %201 = vector.load %arg8[%c0_71, %c0_72] : memref<512x64xbf16, #tpu.memory_space<vmem>>, vector<512x64xbf16>
    %cst_73 = arith.constant dense<0.000000e+00> : vector<4x64xf32>
    %202 = tpu.matmul %200, %201, %cst_73 {dimension_numbers = #tpu.dot_dimension_numbers<[1], [0], [0], [1], [0, 0, 1, 1], [], []>} : vector<4x512xbf16>, vector<512x64xbf16>, vector<4x64xf32> -> vector<4x64xf32>
    %c0_74 = arith.constant 0 : index
    %c0_75 = arith.constant 0 : index
    %203 = vector.load %arg9[%c0_74, %c0_75] : memref<1x64xf32, #tpu.memory_space<vmem>>, vector<1x64xf32>
    %204 = vector.broadcast %203 : vector<1x64xf32> to vector<4x64xf32>
    %205 = arith.addf %202, %204 : vector<4x64xf32>
    %cst_76 = arith.constant 0.000000e+00 : f32
    %206 = vector.broadcast %cst_76 : f32 to vector<4x64xf32>
    %207 = arith.maximumf %205, %206 : vector<4x64xf32>
    %208 = arith.truncf %207 : vector<4x64xf32> to vector<4x64xbf16>
    %c0_77 = arith.constant 0 : index
    %c0_78 = arith.constant 0 : index
    %209 = vector.load %arg10[%c0_77, %c0_78] : memref<16x4xbf16, #tpu.memory_space<vmem>>, vector<16x4xbf16>
    %cst_79 = arith.constant dense<0.000000e+00> : vector<16x64xf32>
    %210 = tpu.matmul %209, %208, %cst_79 {dimension_numbers = #tpu.dot_dimension_numbers<[1], [0], [0], [1], [0, 0, 1, 1], [], []>} : vector<16x4xbf16>, vector<4x64xbf16>, vector<16x64xf32> -> vector<16x64xf32>
    %211 = vector.extract_strided_slice %210 {offsets = [0, 0], sizes = [1, 64], strides = [1, 1]} : vector<16x64xf32> to vector<1x64xf32>
    %212 = vector.extract_strided_slice %210 {offsets = [1, 0], sizes = [1, 64], strides = [1, 1]} : vector<16x64xf32> to vector<1x64xf32>
    %213 = vector.extract_strided_slice %210 {offsets = [2, 0], sizes = [1, 64], strides = [1, 1]} : vector<16x64xf32> to vector<1x64xf32>
    %214 = vector.extract_strided_slice %210 {offsets = [3, 0], sizes = [1, 64], strides = [1, 1]} : vector<16x64xf32> to vector<1x64xf32>
    %215 = vector.extract_strided_slice %210 {offsets = [4, 0], sizes = [1, 64], strides = [1, 1]} : vector<16x64xf32> to vector<1x64xf32>
    %216 = vector.extract_strided_slice %210 {offsets = [5, 0], sizes = [1, 64], strides = [1, 1]} : vector<16x64xf32> to vector<1x64xf32>
    %217 = vector.extract_strided_slice %210 {offsets = [6, 0], sizes = [1, 64], strides = [1, 1]} : vector<16x64xf32> to vector<1x64xf32>
    %218 = vector.extract_strided_slice %210 {offsets = [7, 0], sizes = [1, 64], strides = [1, 1]} : vector<16x64xf32> to vector<1x64xf32>
    %219 = vector.extract_strided_slice %210 {offsets = [8, 0], sizes = [1, 64], strides = [1, 1]} : vector<16x64xf32> to vector<1x64xf32>
    %220 = vector.extract_strided_slice %210 {offsets = [9, 0], sizes = [1, 64], strides = [1, 1]} : vector<16x64xf32> to vector<1x64xf32>
    %221 = vector.extract_strided_slice %210 {offsets = [10, 0], sizes = [1, 64], strides = [1, 1]} : vector<16x64xf32> to vector<1x64xf32>
    %222 = vector.extract_strided_slice %210 {offsets = [11, 0], sizes = [1, 64], strides = [1, 1]} : vector<16x64xf32> to vector<1x64xf32>
    %223 = vector.extract_strided_slice %210 {offsets = [12, 0], sizes = [1, 64], strides = [1, 1]} : vector<16x64xf32> to vector<1x64xf32>
    %224 = vector.extract_strided_slice %210 {offsets = [13, 0], sizes = [1, 64], strides = [1, 1]} : vector<16x64xf32> to vector<1x64xf32>
    %225 = vector.extract_strided_slice %210 {offsets = [14, 0], sizes = [1, 64], strides = [1, 1]} : vector<16x64xf32> to vector<1x64xf32>
    %226 = vector.extract_strided_slice %210 {offsets = [15, 0], sizes = [1, 64], strides = [1, 1]} : vector<16x64xf32> to vector<1x64xf32>
    %227 = tpu.concatenate %211, %212, %213, %214, %215, %216, %217, %218, %219, %220, %221, %222, %223, %224, %225, %226 in 1 : vector<1x64xf32>, vector<1x64xf32>, vector<1x64xf32>, vector<1x64xf32>, vector<1x64xf32>, vector<1x64xf32>, vector<1x64xf32>, vector<1x64xf32>, vector<1x64xf32>, vector<1x64xf32>, vector<1x64xf32>, vector<1x64xf32>, vector<1x64xf32>, vector<1x64xf32>, vector<1x64xf32>, vector<1x64xf32> -> vector<1x1024xf32>
    %228 = arith.truncf %227 : vector<1x1024xf32> to vector<1x1024xbf16>
    %c0_80 = arith.constant 0 : index
    %c0_81 = arith.constant 0 : index
    %229 = vector.load %arg11[%c0_80, %c0_81] : memref<1024x64xbf16, #tpu.memory_space<vmem>>, vector<1024x64xbf16>
    %cst_82 = arith.constant dense<0.000000e+00> : vector<1x64xf32>
    %230 = tpu.matmul %228, %229, %cst_82 {dimension_numbers = #tpu.dot_dimension_numbers<[1], [0], [0], [1], [0, 0, 1, 1], [], []>} : vector<1x1024xbf16>, vector<1024x64xbf16>, vector<1x64xf32> -> vector<1x64xf32>
    %c0_83 = arith.constant 0 : index
    %c0_84 = arith.constant 0 : index
    %231 = vector.load %arg12[%c0_83, %c0_84] : memref<1x64xf32, #tpu.memory_space<vmem>>, vector<1x64xf32>
    %232 = arith.addf %230, %231 : vector<1x64xf32>
    %cst_85 = arith.constant 0.000000e+00 : f32
    %233 = vector.broadcast %cst_85 : f32 to vector<1x64xf32>
    %234 = arith.maximumf %232, %233 : vector<1x64xf32>
    %235 = arith.truncf %234 : vector<1x64xf32> to vector<1x64xbf16>
    %c0_86 = arith.constant 0 : index
    %c0_87 = arith.constant 0 : index
    %236 = vector.load %arg13[%c0_86, %c0_87] : memref<64x512xbf16, #tpu.memory_space<vmem>>, vector<64x512xbf16>
    %cst_88 = arith.constant dense<0.000000e+00> : vector<1x512xf32>
    %237 = tpu.matmul %235, %236, %cst_88 {dimension_numbers = #tpu.dot_dimension_numbers<[1], [0], [0], [1], [0, 0, 1, 1], [], []>} : vector<1x64xbf16>, vector<64x512xbf16>, vector<1x512xf32> -> vector<1x512xf32>
    %c0_89 = arith.constant 0 : index
    %c0_90 = arith.constant 0 : index
    %238 = vector.load %arg14[%c0_89, %c0_90] : memref<1x512xf32, #tpu.memory_space<vmem>>, vector<1x512xf32>
    %239 = arith.addf %237, %238 : vector<1x512xf32>
    %cst_91 = arith.constant 0.000000e+00 : f32
    %240 = vector.broadcast %cst_91 : f32 to vector<1x512xf32>
    %241 = arith.maximumf %239, %240 : vector<1x512xf32>
    %242 = arith.truncf %241 : vector<1x512xf32> to vector<1x512xbf16>
    %c0_92 = arith.constant 0 : index
    %c0_93 = arith.constant 0 : index
    %243 = vector.load %arg15[%c0_92, %c0_93] : memref<512x16xbf16, #tpu.memory_space<vmem>>, vector<512x16xbf16>
    %cst_94 = arith.constant dense<0.000000e+00> : vector<1x16xf32>
    %244 = tpu.matmul %242, %243, %cst_94 {dimension_numbers = #tpu.dot_dimension_numbers<[1], [0], [0], [1], [0, 0, 1, 1], [], []>} : vector<1x512xbf16>, vector<512x16xbf16>, vector<1x16xf32> -> vector<1x16xf32>
    %c0_95 = arith.constant 0 : index
    %c0_96 = arith.constant 0 : index
    %245 = vector.load %arg16[%c0_95, %c0_96] : memref<1x16xf32, #tpu.memory_space<vmem>>, vector<1x16xf32>
    %246 = arith.addf %244, %245 : vector<1x16xf32>
    %c1 = arith.constant 1 : index
    %c0_97 = arith.constant 0 : index
    %247 = vector.load %arg17[%c1, %c0_97] : memref<2x16xf32, #tpu.memory_space<vmem>>, vector<1x16xf32>
    tpu.vector_store %arg17[%c1, %c0_97], %246 {strides = array<i32>} : memref<2x16xf32, #tpu.memory_space<vmem>>, vector<1x16xf32>,
    return
  }
}

</mosaic_0001>

<bundles_post_ra>
// kernel: forward.1
= control target key start
LH: loop header
LB: loop body
LE: loop exit
PB: predicated region body
PF: predicated region fallthrough
CT: control target
= control target key end

     0   :  { %s16172_s0 = inlined_call_operand.vmem [shape: bf16[512,4], index: 0, kind: input, shape index: {}]   ;;  %s16173_s1 = inlined_call_operand.vmem [shape: bf16[1024,256], index: 1, kind: input, shape index: {}]   ;;  %s16174_s2 = inlined_call_operand.vmem [shape: bf16[64,32], index: 2, kind: input, shape index: {}]   ;;  %s16175_s3 = inlined_call_operand.vmem [shape: f32[1,32], index: 3, kind: input, shape index: {}]   ;;  %s16176_s4 = inlined_call_operand.vmem [shape: bf16[256,64], index: 4, kind: input, shape index: {}]   ;;  %s16177_s5 = inlined_call_operand.vmem [shape: bf16[512,32], index: 5, kind: input, shape index: {}]   ;;  %s16178_s6 = inlined_call_operand.vmem [shape: f32[1,32], index: 6, kind: input, shape index: {}]   ;;  %s16179_s7 = inlined_call_operand.vmem [shape: bf16[64,16], index: 7, kind: input, shape index: {}]   ;;  %s16180_s8 = inlined_call_operand.vmem [shape: bf16[512,64], index: 8, kind: input, shape index: {}]   ;;  %s16181_s9 = inlined_call_operand.vmem [shape: f32[1,64], index: 9, kind: input, shape index: {}]   ;;  %s16182_s10 = inlined_call_operand.vmem [shape: bf16[16,4], index: 10, kind: input, shape index: {}]   ;;  %s16183_s11 = inlined_call_operand.vmem [shape: bf16[1024,64], index: 11, kind: input, shape index: {}]   ;;  %s16184_s12 = inlined_call_operand.vmem [shape: f32[1,64], index: 12, kind: input, shape index: {}]   ;;  %s16185_s13 = inlined_call_operand.vmem [shape: bf16[64,512], index: 13, kind: input, shape index: {}]   ;;  %s16186_s14 = inlined_call_operand.vmem [shape: f32[1,512], index: 14, kind: input, shape index: {}]   ;;  %s16187_s15 = inlined_call_operand.vmem [shape: bf16[512,16], index: 15, kind: input, shape index: {}]   ;;  %s16188_s16 = inlined_call_operand.vmem [shape: f32[1,16], index: 16, kind: input, shape index: {}]   ;;  %s16189_s17 = inlined_call_operand.hbm [shape: f32[2,16], index: 17, kind: output, shape index: {}]  }
   0x1   :  { %16224 = sst [smem:[#allocation5_spill]] %s16172_s0 }
   0x2   :  { %16225 = sst [smem:[#allocation6_spill]] %s16173_s1 }
   0x3   :  { %s16226_s26 = sld [smem:[#allocation5_spill]]  ;;  %v12842_v1 = vmov 0   ;;  %s16227_s22 = sld [smem:[#allocation6_spill]] }
   0x4   :  { %954 = vmatprep.subr.bf16.mxu0 %v12842_v1  ;;  %s16219_s30 = smov 4   ;;  %s16217_s21 = smov 8  }
   0x5   :  { %s16214_s29 = smov 12   ;;  %s16212_s24 = smov 16  }
   0x9   :  { %v11984_v0 = vld [vmem:[%s16226_s26] sm:$0xff]   ;;  %v11985_v2 = vld [vmem:[%s16226_s26 + $0x8] sm:$0xff]   ;;  %v11986_v3 = vld [vmem:[%s16226_s26 + $0x10] sm:$0xff]  }
   0xa   :  { %955 = vmatpush1.bf16.msra.mxu0 %v11984_v0  ;;  %v11987_v4 = vld [vmem:[%s16226_s26 + $0x18] sm:$0xff]   ;;  %v11988_v5 = vld [vmem:[%s16226_s26 + $0x20] sm:$0xff]   ;;  %v11989_v7 = vld [vmem:[%s16226_s26 + $0x28] sm:$0xff]  }
   0xb   :  { %956 = vmatprep.subr.bf16.mxu0 %v12842_v1  ;;  %v12002_v6 = vld [vmem:[%s16227_s22 + $0x4] ss:$8 sps:$4 sm:$0xff]   ;;  %v11990_v8 = vld [vmem:[%s16226_s26 + $0x30] sm:$0xff]   ;;  %v11991_v9 = vld [vmem:[%s16226_s26 + $0x38] sm:$0xff]  }
   0xc   :  { %986 = vmatprep.mubr.bf16.mxu0 %v12002_v6  ;;  %v11992_v10 = vld [vmem:[%s16226_s26 + $0x40] sm:$0xff]   ;;  %v11993_v11 = vld [vmem:[%s16226_s26 + $0x48] sm:$0xff]   ;;  %v11994_v12 = vld [vmem:[%s16226_s26 + $0x50] sm:$0xff]  }
   0xd   :  { %v11995_v13 = vld [vmem:[%s16226_s26 + $0x58] sm:$0xff]   ;;  %v11996_v14 = vld [vmem:[%s16226_s26 + $0x60] sm:$0xff]   ;;  %v11997_v15 = vld [vmem:[%s16226_s26 + $0x68] sm:$0xff]  }
   0xe   :  { %957 = vmatpush1.bf16.msra.mxu0 %v11985_v2  ;;  %v11998_v16 = vld [vmem:[%s16226_s26 + $0x70] sm:$0xff]   ;;  %v11999_v17 = vld [vmem:[%s16226_s26 + $0x78] sm:$0xff]   ;;  %v12000_v18 = vld [vmem:[%s16227_s22] ss:$8 sps:$4 sm:$0xff]  }
   0xf   :  { %958 = vmatprep.subr.bf16.mxu0 %v12842_v1  ;;  %v12003_v19 = vld [vmem:[%s16227_s22 + $0x14] ss:$8 sps:$4 sm:$0xff]   ;;  %v12005_v20 = vld [vmem:[%s16227_s22 + $0x10] ss:$8 sps:$4 sm:$0xff]   ;;  %v12006_v21 = vld [vmem:[%s16227_s22 + $0x24] ss:$8 sps:$4 sm:$0xff]  }
  0x10   :  { %v12008_v22 = vld [vmem:[%s16227_s22 + $0x20] ss:$8 sps:$4 sm:$0xff]   ;;  %v12009_v23 = vld [vmem:[%s16227_s22 + $0x34] ss:$8 sps:$4 sm:$0xff]   ;;  %v12011_v24 = vld [vmem:[%s16227_s22 + $0x30] ss:$8 sps:$4 sm:$0xff]  }
  0x11   :  { %v12012_v25 = vld [vmem:[%s16227_s22 + $0x44] ss:$8 sps:$4 sm:$0xff]   ;;  %v12014_v26 = vld [vmem:[%s16227_s22 + $0x40] ss:$8 sps:$4 sm:$0xff]   ;;  %v12015_v27 = vld [vmem:[%s16227_s22 + $0x54] ss:$8 sps:$4 sm:$0xff]  }
  0x12   :  { %959 = vmatpush1.bf16.msra.mxu0 %v11986_v3  ;;  %v12017_v28 = vld [vmem:[%s16227_s22 + $0x50] ss:$8 sps:$4 sm:$0xff]   ;;  %v12018_v29 = vld [vmem:[%s16227_s22 + $0x64] ss:$8 sps:$4 sm:$0xff]   ;;  %v12020_v30 = vld [vmem:[%s16227_s22 + $0x60] ss:$8 sps:$4 sm:$0xff]  }
  0x13   :  { %960 = vmatprep.subr.bf16.mxu0 %v12842_v1  ;;  %v12021_v31 = vld [vmem:[%s16227_s22 + $0x74] ss:$8 sps:$4 sm:$0xff]   ;;  %v12023_v32 = vld [vmem:[%s16227_s22 + $0x70] ss:$8 sps:$4 sm:$0xff]   ;;  %v12024_v33 = vld [vmem:[%s16227_s22 + $0x84] ss:$8 sps:$4 sm:$0xff]  }
  0x14   :  { %v12026_v34 = vld [vmem:[%s16227_s22 + $0x80] ss:$8 sps:$4 sm:$0xff]   ;;  %v12027_v35 = vld [vmem:[%s16227_s22 + $0x94] ss:$8 sps:$4 sm:$0xff]   ;;  %v12029_v36 = vld [vmem:[%s16227_s22 + $0x90] ss:$8 sps:$4 sm:$0xff]  }
  0x15   :  { %v12030_v37 = vld [vmem:[%s16227_s22 + $0xa4] ss:$8 sps:$4 sm:$0xff]   ;;  %v12032_v38 = vld [vmem:[%s16227_s22 + $0xa0] ss:$8 sps:$4 sm:$0xff]   ;;  %v12033_v39 = vld [vmem:[%s16227_s22 + $0xb4] ss:$8 sps:$4 sm:$0xff]  }
  0x16   :  { %961 = vmatpush1.bf16.msra.mxu0 %v11987_v4  ;;  %v12035_v40 = vld [vmem:[%s16227_s22 + $0xb0] ss:$8 sps:$4 sm:$0xff]   ;;  %v12036_v41 = vld [vmem:[%s16227_s22 + $0xc4] ss:$8 sps:$4 sm:$0xff]   ;;  %v12038_v42 = vld [vmem:[%s16227_s22 + $0xc0] ss:$8 sps:$4 sm:$0xff]  }
  0x17   :  { %962 = vmatprep.subr.bf16.mxu0 %v12842_v1  ;;  %v12039_v43 = vld [vmem:[%s16227_s22 + $0xd4] ss:$8 sps:$4 sm:$0xff]   ;;  %v12041_v44 = vld [vmem:[%s16227_s22 + $0xd0] ss:$8 sps:$4 sm:$0xff]   ;;  %v12042_v45 = vld [vmem:[%s16227_s22 + $0xe4] ss:$8 sps:$4 sm:$0xff]  }
  0x18   :  { %v12044_v46 = vld [vmem:[%s16227_s22 + $0xe0] ss:$8 sps:$4 sm:$0xff]   ;;  %v12045_v47 = vld [vmem:[%s16227_s22 + $0xf4] ss:$8 sps:$4 sm:$0xff]   ;;  %v12047_v48 = vld [vmem:[%s16227_s22 + $0xf0] ss:$8 sps:$4 sm:$0xff]  }
  0x19   :  { %v12048_v49 = vld [vmem:[%s16227_s22 + $0x104] ss:$8 sps:$4 sm:$0xff]   ;;  %v12050_v50 = vld [vmem:[%s16227_s22 + $0x100] ss:$8 sps:$4 sm:$0xff]   ;;  %v12051_v51 = vld [vmem:[%s16227_s22 + $0x114] ss:$8 sps:$4 sm:$0xff]  }
  0x1a   :  { %963 = vmatpush1.bf16.msra.mxu0 %v11988_v5  ;;  %v12053_v52 = vld [vmem:[%s16227_s22 + $0x110] ss:$8 sps:$4 sm:$0xff]   ;;  %v12054_v53 = vld [vmem:[%s16227_s22 + $0x124] ss:$8 sps:$4 sm:$0xff]   ;;  %v12056_v54 = vld [vmem:[%s16227_s22 + $0x120] ss:$8 sps:$4 sm:$0xff]  }
  0x1b   :  { %964 = vmatprep.subr.bf16.mxu0 %v12842_v1  ;;  %v12057_v55 = vld [vmem:[%s16227_s22 + $0x134] ss:$8 sps:$4 sm:$0xff]   ;;  %v12059_v56 = vld [vmem:[%s16227_s22 + $0x130] ss:$8 sps:$4 sm:$0xff]   ;;  %v12060_v57 = vld [vmem:[%s16227_s22 + $0x144] ss:$8 sps:$4 sm:$0xff]  }
  0x1c   :  { %v12062_v58 = vld [vmem:[%s16227_s22 + $0x140] ss:$8 sps:$4 sm:$0xff]   ;;  %v12063_v59 = vld [vmem:[%s16227_s22 + $0x154] ss:$8 sps:$4 sm:$0xff]   ;;  %v12065_v60 = vld [vmem:[%s16227_s22 + $0x150] ss:$8 sps:$4 sm:$0xff]  }
  0x1d   :  { %v12066_v61 = vld [vmem:[%s16227_s22 + $0x164] ss:$8 sps:$4 sm:$0xff]   ;;  %v12068_v62 = vld [vmem:[%s16227_s22 + $0x160] ss:$8 sps:$4 sm:$0xff]   ;;  %v12069_v63 = vld [vmem:[%s16227_s22 + $0x174] ss:$8 sps:$4 sm:$0xff]  }
  0x1e   :  { %965 = vmatpush1.bf16.msra.mxu0 %v11989_v7  ;;  %v12071_v0 = vld [vmem:[%s16227_s22 + $0x170] ss:$8 sps:$4 sm:$0xff]   ;;  %v12072_v2 = vld [vmem:[%s16227_s22 + $0x184] ss:$8 sps:$4 sm:$0xff]   ;;  %v12074_v3 = vld [vmem:[%s16227_s22 + $0x180] ss:$8 sps:$4 sm:$0xff]  }
  0x1f   :  { %966 = vmatprep.subr.bf16.mxu0 %v12842_v1  ;;  %v12075_v4 = vld [vmem:[%s16227_s22 + $0x194] ss:$8 sps:$4 sm:$0xff]   ;;  %v12077_v5 = vld [vmem:[%s16227_s22 + $0x190] ss:$8 sps:$4 sm:$0xff]   ;;  %v12078_v6 = vld [vmem:[%s16227_s22 + $0x1a4] ss:$8 sps:$4 sm:$0xff]  }
  0x20   :  { %v12080_v7 = vld [vmem:[%s16227_s22 + $0x1a0] ss:$8 sps:$4 sm:$0xff]  }
  0x22   :  { %967 = vmatpush1.bf16.msra.mxu0 %v11990_v8  ;;  %v12081_v8 = vld [vmem:[%s16227_s22 + $0x1b4] ss:$8 sps:$4 sm:$0xff]  }
  0x23   :  { %968 = vmatprep.subr.bf16.mxu0 %v12842_v1 }
  0x26   :  { %969 = vmatpush1.bf16.msra.mxu0 %v11991_v9  ;;  %v12083_v9 = vld [vmem:[%s16227_s22 + $0x1b0] ss:$8 sps:$4 sm:$0xff]  }
  0x27   :  { %970 = vmatprep.subr.bf16.mxu0 %v12842_v1 }
  0x2a   :  { %971 = vmatpush1.bf16.msra.mxu0 %v11992_v10 }
  0x2b   :  { %972 = vmatprep.subr.bf16.mxu0 %v12842_v1 }
  0x2e   :  { %973 = vmatpush1.bf16.msra.mxu0 %v11993_v11 }
  0x2f   :  { %974 = vmatprep.subr.bf16.mxu0 %v12842_v1 }
  0x32   :  { %975 = vmatpush1.bf16.msra.mxu0 %v11994_v12 }
  0x33   :  { %976 = vmatprep.subr.bf16.mxu0 %v12842_v1 }
  0x36   :  { %977 = vmatpush1.bf16.msra.mxu0 %v11995_v13  ;;  %v12084_v13 = vld [vmem:[%s16227_s22 + $0x1c4] ss:$8 sps:$4 sm:$0xff]  }
  0x37   :  { %978 = vmatprep.subr.bf16.mxu0 %v12842_v1 }
  0x3a   :  { %979 = vmatpush1.bf16.msra.mxu0 %v11996_v14 }
  0x3b   :  { %980 = vmatprep.subr.bf16.mxu0 %v12842_v1 }
  0x3e   :  { %981 = vmatpush1.bf16.msra.mxu0 %v11997_v15  ;;  %v12086_v15 = vld [vmem:[%s16227_s22 + $0x1c0] ss:$8 sps:$4 sm:$0xff]  }
  0x3f   :  { %982 = vmatprep.subr.bf16.mxu0 %v12842_v1 }
  0x42   :  { %983 = vmatpush1.bf16.msra.mxu0 %v11998_v16 }
  0x43   :  { %984 = vmatprep.subr.bf16.mxu0 %v12842_v1 }
  0x46   :  { %985 = vmatpush1.bf16.msra.mxu0 %v11999_v17 }
  0x49   :  { %987 = vmatmul.mubr.bf16.vlgmr.msra.gmra.mrb[0].mxu0 %v12000_v18 }
  0x4a   :  { %994 = vmatprep.mubr.bf16.mxu0 %v12003_v19  ;;  %v12087_v19 = vld [vmem:[%s16227_s22 + $0x1d4] ss:$8 sps:$4 sm:$0xff]  }
  0x51   :  { %995 = vmatmul.mubr.bf16.gmra.mrb[4].mxu0 %v12005_v20 }
  0x52   :  { %1002 = vmatprep.mubr.bf16.mxu0 %v12006_v21  ;;  %v12089_v21 = vld [vmem:[%s16227_s22 + $0x1d0] ss:$8 sps:$4 sm:$0xff]  }
  0x59   :  { %1003 = vmatmul.mubr.bf16.gmra.mrb[8].mxu0 %v12008_v22 }
  0x5a   :  { %1010 = vmatprep.mubr.bf16.mxu0 %v12009_v23 }
  0x61   :  { %1011 = vmatmul.mubr.bf16.gmra.mrb[12].mxu0 %v12011_v24 }
  0x62   :  { %1018 = vmatprep.mubr.bf16.mxu0 %v12012_v25  ;;  %v12090_v25 = vld [vmem:[%s16227_s22 + $0x1e4] ss:$8 sps:$4 sm:$0xff]  }
  0x69   :  { %1019 = vmatmul.mubr.bf16.gmra.mrb[16].mxu0 %v12014_v26 }
  0x6a   :  { %1026 = vmatprep.mubr.bf16.mxu0 %v12015_v27  ;;  %v12092_v27 = vld [vmem:[%s16227_s22 + $0x1e0] ss:$8 sps:$4 sm:$0xff]  }
  0x71   :  { %1027 = vmatmul.mubr.bf16.gmra.mrb[20].mxu0 %v12017_v28 }
  0x72   :  { %1034 = vmatprep.mubr.bf16.mxu0 %v12018_v29 }
  0x79   :  { %1035 = vmatmul.mubr.bf16.gmra.mrb[24].mxu0 %v12020_v30 }
  0x7a   :  { %1042 = vmatprep.mubr.bf16.mxu0 %v12021_v31  ;;  %v12093_v31 = vld [vmem:[%s16227_s22 + $0x1f4] ss:$8 sps:$4 sm:$0xff]  }
  0x81   :  { %1043 = vmatmul.mubr.bf16.gmra.mrb[28].mxu0 %v12023_v32 }
  0x82   :  { %1050 = vmatprep.mubr.bf16.mxu0 %v12024_v33  ;;  %v12095_v33 = vld [vmem:[%s16227_s22 + $0x1f0] ss:$8 sps:$4 sm:$0xff]  }
  0x89   :  { %1051 = vmatmul.mubr.bf16.gmra.mrb[32].mxu0 %v12026_v34 }
  0x8a   :  { %1058 = vmatprep.mubr.bf16.mxu0 %v12027_v35 }
  0x91   :  { %1059 = vmatmul.mubr.bf16.gmra.mrb[36].mxu0 %v12029_v36 }
  0x92   :  { %1066 = vmatprep.mubr.bf16.mxu0 %v12030_v37  ;;  %v12096_v37 = vld [vmem:[%s16227_s22 + $0x204] ss:$8 sps:$4 sm:$0xff]  }
  0x99   :  { %1067 = vmatmul.mubr.bf16.gmra.mrb[40].mxu0 %v12032_v38 }
  0x9a   :  { %1074 = vmatprep.mubr.bf16.mxu0 %v12033_v39 }
  0xa1   :  { %1075 = vmatmul.mubr.bf16.gmra.mrb[44].mxu0 %v12035_v40  ;;  %v12098_v40 = vld [vmem:[%s16227_s22 + $0x200] ss:$8 sps:$4 sm:$0xff]  }
  0xa2   :  { %1082 = vmatprep.mubr.bf16.mxu0 %v12036_v41 }
  0xa9   :  { %1083 = vmatmul.mubr.bf16.gmra.mrb[48].mxu0 %v12038_v42 }
  0xaa   :  { %1090 = vmatprep.mubr.bf16.mxu0 %v12039_v43 }
  0xb1   :  { %1091 = vmatmul.mubr.bf16.gmra.mrb[52].mxu0 %v12041_v44  ;;  %v12099_v44 = vld [vmem:[%s16227_s22 + $0x214] ss:$8 sps:$4 sm:$0xff]  }
  0xb2   :  { %1098 = vmatprep.mubr.bf16.mxu0 %v12042_v45 }
  0xb9   :  { %1099 = vmatmul.mubr.bf16.gmra.mrb[56].mxu0 %v12044_v46 }
  0xba   :  { %1106 = vmatprep.mubr.bf16.mxu0 %v12045_v47  ;;  %v12101_v47 = vld [vmem:[%s16227_s22 + $0x210] ss:$8 sps:$4 sm:$0xff]  }
  0xc1   :  { %1107 = vmatmul.mubr.bf16.gmra.mrb[60].mxu0 %v12047_v48 }
  0xc2   :  { %1114 = vmatprep.mubr.bf16.mxu0 %v12048_v49 }
  0xc9   :  { %1115 = vmatmul.mubr.bf16.gmra.mrb[64].mxu0 %v12050_v50 }
  0xca   :  { %1122 = vmatprep.mubr.bf16.mxu0 %v12051_v51  ;;  %v12102_v51 = vld [vmem:[%s16227_s22 + $0x224] ss:$8 sps:$4 sm:$0xff]  }
  0xd1   :  { %1123 = vmatmul.mubr.bf16.gmra.mrb[68].mxu0 %v12053_v52 }
  0xd2   :  { %1130 = vmatprep.mubr.bf16.mxu0 %v12054_v53 }
  0xd9   :  { %1131 = vmatmul.mubr.bf16.gmra.mrb[72].mxu0 %v12056_v54  ;;  %v12104_v54 = vld [vmem:[%s16227_s22 + $0x220] ss:$8 sps:$4 sm:$0xff]  }
  0xda   :  { %1138 = vmatprep.mubr.bf16.mxu0 %v12057_v55 }
  0xe1   :  { %1139 = vmatmul.mubr.bf16.gmra.mrb[76].mxu0 %v12059_v56 }
  0xe2   :  { %1146 = vmatprep.mubr.bf16.mxu0 %v12060_v57 }
  0xe9   :  { %1147 = vmatmul.mubr.bf16.gmra.mrb[80].mxu0 %v12062_v58  ;;  %v12105_v58 = vld [vmem:[%s16227_s22 + $0x234] ss:$8 sps:$4 sm:$0xff]  }
  0xea   :  { %1154 = vmatprep.mubr.bf16.mxu0 %v12063_v59 }
  0xf1   :  { %1155 = vmatmul.mubr.bf16.gmra.mrb[84].mxu0 %v12065_v60 }
  0xf2   :  { %1162 = vmatprep.mubr.bf16.mxu0 %v12066_v61  ;;  %v12107_v61 = vld [vmem:[%s16227_s22 + $0x230] ss:$8 sps:$4 sm:$0xff]  }
  0xf9   :  { %1163 = vmatmul.mubr.bf16.gmra.mrb[88].mxu0 %v12068_v62 }
  0xfa   :  { %1170 = vmatprep.mubr.bf16.mxu0 %v12069_v63 }
 0x101   :  { %1171 = vmatmul.mubr.bf16.gmra.mrb[92].mxu0 %v12071_v0 }
 0x102   :  { %1178 = vmatprep.mubr.bf16.mxu0 %v12072_v2  ;;  %v12108_v2 = vld [vmem:[%s16227_s22 + $0x244] ss:$8 sps:$4 sm:$0xff]  }
 0x109   :  { %1179 = vmatmul.mubr.bf16.gmra.mrb[96].mxu0 %v12074_v3 }
 0x10a   :  { %1186 = vmatprep.mubr.bf16.mxu0 %v12075_v4 }
 0x111   :  { %1187 = vmatmul.mubr.bf16.gmra.mrb[100].mxu0 %v12077_v5  ;;  %v12110_v5 = vld [vmem:[%s16227_s22 + $0x240] ss:$8 sps:$4 sm:$0xff]  }
 0x112   :  { %1194 = vmatprep.mubr.bf16.mxu0 %v12078_v6 }
 0x119   :  { %1195 = vmatmul.mubr.bf16.gmra.mrb[104].mxu0 %v12080_v7 }
 0x11a   :  { %1202 = vmatprep.mubr.bf16.mxu0 %v12081_v8 }
 0x11c   :  { %v13185_v10 = vpop.f32.mrb[0].mxu0 }
 0x11d   :  { %v990_v11 = vpop.f32.mrb[1].mxu0 }
 0x11e   :  { %v13187_v12 = vpop.f32.mrb[2].mxu0 }
 0x11f   :  { %v993_v14 = vpop.f32.mrb[3].mxu0 }
 0x120   :  { %v12113_v14 = vld [vmem:[%s16227_s22 + $0x250] ss:$8 sps:$4 sm:$0xff]  }
 0x121   :  { %1203 = vmatmul.mubr.bf16.gmra.mrb[108].mxu0 %v12083_v9  ;;  %v12111_v9 = vld [vmem:[%s16227_s22 + $0x254] ss:$8 sps:$4 sm:$0xff]  }
 0x122   :  { %1210 = vmatprep.mubr.bf16.mxu0 %v12084_v13 }
 0x124   :  { %v13195_v16 = vpop.f32.mrb[4].mxu0 }
 0x125   :  { %v998_v17 = vpop.f32.mrb[5].mxu0 }
 0x126   :  { %v13197_v18 = vpop.f32.mrb[6].mxu0 }
 0x127   :  { %v1001_v20 = vpop.f32.mrb[7].mxu0 }
 0x128   :  { %v12114_v20 = vld [vmem:[%s16227_s22 + $0x264] ss:$8 sps:$4 sm:$0xff]  }
 0x129   :  { %1211 = vmatmul.mubr.bf16.gmra.mrb[112].mxu0 %v12086_v15 }
 0x12a   :  { %1218 = vmatprep.mubr.bf16.mxu0 %v12087_v19 }
 0x12c   :  { %v13205_v22 = vpop.f32.mrb[8].mxu0 }
 0x12d   :  { %v1006_v23 = vpop.f32.mrb[9].mxu0 }
 0x12e   :  { %v13207_v24 = vpop.f32.mrb[10].mxu0 }
 0x12f   :  { %v1009_v26 = vpop.f32.mrb[11].mxu0 }
 0x131   :  { %1219 = vmatmul.mubr.bf16.gmra.mrb[116].mxu0 %v12089_v21 }
 0x132   :  { %1226 = vmatprep.mubr.bf16.mxu0 %v12090_v25  ;;  %v12116_v25 = vld [vmem:[%s16227_s22 + $0x260] ss:$8 sps:$4 sm:$0xff]  }
 0x134   :  { %v13215_v28 = vpop.f32.mrb[12].mxu0 }
 0x135   :  { %v1014_v29 = vpop.f32.mrb[13].mxu0 }
 0x136   :  { %v13217_v30 = vpop.f32.mrb[14].mxu0 }
 0x137   :  { %v1017_v32 = vpop.f32.mrb[15].mxu0 }
 0x139   :  { %1227 = vmatmul.mubr.bf16.gmra.mrb[120].mxu0 %v12092_v27 }
 0x13a   :  { %1234 = vmatprep.mubr.bf16.mxu0 %v12093_v31  ;;  %v12117_v31 = vld [vmem:[%s16227_s22 + $0x274] ss:$8 sps:$4 sm:$0xff]  }
 0x13c   :  { %v1020_v34 = vpop.f32.mrb[16].mxu0 }
 0x13d   :  { %v1022_v35 = vpop.f32.mrb[17].mxu0 }
 0x13e   :  { %v1023_v36 = vpop.f32.mrb[18].mxu0 }
 0x13f   :  { %v1025_v38 = vpop.f32.mrb[19].mxu0  ;;  %v11164_v39 = vpack.i.bf16 %v1023_v36, %v1020_v34  ;;  %v12119_v34 = vld [vmem:[%s16227_s22 + $0x270] ss:$8 sps:$4 sm:$0xff]  }
 0x140   :  { %v12120_v38 = vld [vmem:[%s16227_s22 + $0x284] ss:$8 sps:$4 sm:$0xff]  }
 0x141   :  { %1235 = vmatmul.mubr.bf16.gmra.mrb[124].mxu0 %v12095_v33  ;;  %11165 = vrot.lane.b32.xlu0 %v11164_v39, %s16219_s30 }
 0x142   :  { %1242 = vmatprep.mubr.bf16.mxu0 %v12096_v37 }
 0x144   :  { %v1028_v41 = vpop.f32.mrb[20].mxu0 }
 0x145   :  { %v1030_v42 = vpop.f32.mrb[21].mxu0 }
 0x146   :  { %v1031_v43 = vpop.f32.mrb[22].mxu0 }
 0x147   :  { %v11169_v45 = vpack.i.bf16 %v1031_v43, %v1028_v41  ;;  %v1033_v46 = vpop.f32.mrb[23].mxu0  ;;  %v12122_v41 = vld [vmem:[%s16227_s22 + $0x280] ss:$8 sps:$4 sm:$0xff]  }
 0x149   :  { %1243 = vmatmul.mubr.bf16.gmra.mrb[128].mxu0 %v12098_v40  ;;  %11170 = vrot.lane.b32.xlu0 %v11169_v45, %s16219_s30  ;;  %v12123_v45 = vld [vmem:[%s16227_s22 + $0x294] ss:$8 sps:$4 sm:$0xff]  }
 0x14a   :  { %1250 = vmatprep.mubr.bf16.mxu0 %v12099_v44 }
 0x14c   :  { %v1036_v48 = vpop.f32.mrb[24].mxu0 }
 0x14d   :  { %v1038_v49 = vpop.f32.mrb[25].mxu0 }
 0x14e   :  { %v1039_v50 = vpop.f32.mrb[26].mxu0 }
 0x14f   :  { %v1041_v52 = vpop.f32.mrb[27].mxu0  ;;  %v11174_v53 = vpack.i.bf16 %v1039_v50, %v1036_v48  ;;  %v12125_v48 = vld [vmem:[%s16227_s22 + $0x290] ss:$8 sps:$4 sm:$0xff]  }
 0x150   :  { %v12126_v52 = vld [vmem:[%s16227_s22 + $0x2a4] ss:$8 sps:$4 sm:$0xff]  }
 0x151   :  { %1251 = vmatmul.mubr.bf16.gmra.mrb[132].mxu0 %v12101_v47  ;;  %11175 = vrot.lane.b32.xlu1 %v11174_v53, %s16219_s30 }
 0x152   :  { %1258 = vmatprep.mubr.bf16.mxu0 %v12102_v51 }
 0x154   :  { %v1044_v55 = vpop.f32.mrb[28].mxu0 }
 0x155   :  { %v1046_v56 = vpop.f32.mrb[29].mxu0 }
 0x156   :  { %v1047_v57 = vpop.f32.mrb[30].mxu0 }
 0x157   :  { %v11179_v59 = vpack.i.bf16 %v1047_v57, %v1044_v55  ;;  %v1049_v60 = vpop.f32.mrb[31].mxu0  ;;  %v12128_v55 = vld [vmem:[%s16227_s22 + $0x2a0] ss:$8 sps:$4 sm:$0xff]  }
 0x159   :  { %1259 = vmatmul.mubr.bf16.gmra.mrb[136].mxu0 %v12104_v54  ;;  %11180 = vrot.lane.b32.xlu0 %v11179_v59, %s16219_s30  ;;  %v12129_v59 = vld [vmem:[%s16227_s22 + $0x2b4] ss:$8 sps:$4 sm:$0xff]  }
 0x15a   :  { %1266 = vmatprep.mubr.bf16.mxu0 %v12105_v58 }
 0x15c   :  { %v1052_v62 = vpop.f32.mrb[32].mxu0 }
 0x15d   :  { %v1054_v63 = vpop.f32.mrb[33].mxu0 }
 0x15e   :  { %v1055_v0 = vpop.f32.mrb[34].mxu0 }
 0x15f   :  { %v11184_v3 = vpack.i.bf16 %v1055_v0, %v1052_v62  ;;  %v1057_v4 = vpop.f32.mrb[35].mxu0  ;;  %v12131_v62 = vld [vmem:[%s16227_s22 + $0x2b0] ss:$8 sps:$4 sm:$0xff]  }
 0x161   :  { %1267 = vmatmul.mubr.bf16.gmra.mrb[140].mxu0 %v12107_v61  ;;  %11185 = vrot.lane.b32.xlu1 %v11184_v3, %s16217_s21  ;;  %v12132_v3 = vld [vmem:[%s16227_s22 + $0x2c4] ss:$8 sps:$4 sm:$0xff]  }
 0x162   :  { %1274 = vmatprep.mubr.bf16.mxu0 %v12108_v2 }
 0x164   :  { %v1060_v6 = vpop.f32.mrb[36].mxu0 }
 0x165   :  { %v1062_v7 = vpop.f32.mrb[37].mxu0 }
 0x166   :  { %v1063_v8 = vpop.f32.mrb[38].mxu0 }
 0x167   :  { %v11189_v11 = vpack.i.bf16 %v1063_v8, %v1060_v6  ;;  %v1065_v13 = vpop.f32.mrb[39].mxu0  ;;  %v12134_v6 = vld [vmem:[%s16227_s22 + $0x2c0] ss:$8 sps:$4 sm:$0xff]  }
 0x169   :  { %1275 = vmatmul.mubr.bf16.gmra.mrb[144].mxu0 %v12110_v5  ;;  %11190 = vrot.lane.b32.xlu1 %v11189_v11, %s16217_s21  ;;  %v12135_v11 = vld [vmem:[%s16227_s22 + $0x2d4] ss:$8 sps:$4 sm:$0xff]  }
 0x16a   :  { %1282 = vmatprep.mubr.bf16.mxu0 %v12111_v9 }
 0x16c   :  { %v1068_v15 = vpop.f32.mrb[40].mxu0 }
 0x16d   :  { %v1070_v17 = vpop.f32.mrb[41].mxu0 }
 0x16e   :  { %v1071_v19 = vpop.f32.mrb[42].mxu0 }
 0x16f   :  { %v11194_v21 = vpack.i.bf16 %v1071_v19, %v1068_v15  ;;  %v1073_v23 = vpop.f32.mrb[43].mxu0  ;;  %v12137_v15 = vld [vmem:[%s16227_s22 + $0x2d0] ss:$8 sps:$4 sm:$0xff]  }
 0x171   :  { %1283 = vmatmul.mubr.bf16.gmra.mrb[148].mxu0 %v12113_v14  ;;  %11195 = vrot.lane.b32.xlu1 %v11194_v21, %s16217_s21  ;;  %v12138_v21 = vld [vmem:[%s16227_s22 + $0x2e4] ss:$8 sps:$4 sm:$0xff]  }
 0x172   :  { %1290 = vmatprep.mubr.bf16.mxu0 %v12114_v20 }
 0x174   :  { %v1076_v26 = vpop.f32.mrb[44].mxu0 }
 0x175   :  { %v1078_v27 = vpop.f32.mrb[45].mxu0 }
 0x176   :  { %v1079_v29 = vpop.f32.mrb[46].mxu0 }
 0x177   :  { %v11199_v32 = vpack.i.bf16 %v1079_v29, %v1076_v26  ;;  %v1081_v33 = vpop.f32.mrb[47].mxu0  ;;  %v12140_v26 = vld [vmem:[%s16227_s22 + $0x2e0] ss:$8 sps:$4 sm:$0xff]  }
 0x179   :  { %1291 = vmatmul.mubr.bf16.gmra.mrb[152].mxu0 %v12116_v25  ;;  %11200 = vrot.lane.b32.xlu0 %v11199_v32, %s16217_s21  ;;  %v12141_v32 = vld [vmem:[%s16227_s22 + $0x2f4] ss:$8 sps:$4 sm:$0xff]  }
 0x17a   :  { %1298 = vmatprep.mubr.bf16.mxu0 %v12117_v31 }
 0x17c   :  { %v1084_v35 = vpop.f32.mrb[48].mxu0 }
 0x17d   :  { %v1086_v36 = vpop.f32.mrb[49].mxu0 }
 0x17e   :  { %v1087_v37 = vpop.f32.mrb[50].mxu0 }
 0x17f   :  { %v11204_v39 = vpack.i.bf16 %v1087_v37, %v1084_v35  ;;  %v1089_v40 = vpop.f32.mrb[51].mxu0 }
 0x181   :  { %1299 = vmatmul.mubr.bf16.gmra.mrb[156].mxu0 %v12119_v34  ;;  %11205 = vrot.lane.b32.xlu0 %v11204_v39, %s16214_s29 }
 0x182   :  { %1306 = vmatprep.mubr.bf16.mxu0 %v12120_v38 }
 0x184   :  { %v1092_v42 = vpop.f32.mrb[52].mxu0 }
 0x185   :  { %v1094_v43 = vpop.f32.mrb[53].mxu0 }
 0x186   :  { %v1095_v44 = vpop.f32.mrb[54].mxu0 }
 0x187   :  { %v11209_v46 = vpack.i.bf16 %v1095_v44, %v1092_v42  ;;  %v1097_v47 = vpop.f32.mrb[55].mxu0 }
 0x189   :  { %1307 = vmatmul.mubr.bf16.gmra.mrb[160].mxu0 %v12122_v41  ;;  %11210 = vrot.lane.b32.xlu1 %v11209_v46, %s16214_s29 }
 0x18a   :  { %1314 = vmatprep.mubr.bf16.mxu0 %v12123_v45 }
 0x18c   :  { %v1100_v49 = vpop.f32.mrb[56].mxu0 }
 0x18d   :  { %v1102_v50 = vpop.f32.mrb[57].mxu0 }
 0x18e   :  { %v1103_v51 = vpop.f32.mrb[58].mxu0 }
 0x18f   :  { %v11214_v53 = vpack.i.bf16 %v1103_v51, %v1100_v49  ;;  %v1105_v54 = vpop.f32.mrb[59].mxu0 }
 0x191   :  { %1315 = vmatmul.mubr.bf16.gmra.mrb[164].mxu0 %v12125_v48  ;;  %11215 = vrot.lane.b32.xlu1 %v11214_v53, %s16214_s29 }
 0x192   :  { %1322 = vmatprep.mubr.bf16.mxu0 %v12126_v52 }
 0x194   :  { %v1108_v56 = vpop.f32.mrb[60].mxu0 }
 0x195   :  { %v1110_v57 = vpop.f32.mrb[61].mxu0 }
 0x196   :  { %v1111_v58 = vpop.f32.mrb[62].mxu0 }
 0x197   :  { %v11219_v60 = vpack.i.bf16 %v1111_v58, %v1108_v56  ;;  %v1113_v61 = vpop.f32.mrb[63].mxu0 }
 0x199   :  { %1323 = vmatmul.mubr.bf16.gmra.mrb[168].mxu0 %v12128_v55  ;;  %11220 = vrot.lane.b32.xlu0 %v11219_v60, %s16214_s29 }
 0x19a   :  { %1330 = vmatprep.mubr.bf16.mxu0 %v12129_v59 }
 0x19c   :  { %v1116_v63 = vpop.f32.mrb[64].mxu0 }
 0x19d   :  { %v1118_v0 = vpop.f32.mrb[65].mxu0 }
 0x19e   :  { %v1119_v2 = vpop.f32.mrb[66].mxu0 }
 0x19f   :  { %v11224_v4 = vpack.i.bf16 %v1119_v2, %v1116_v63  ;;  %v1121_v5 = vpop.f32.mrb[67].mxu0 }
 0x1a1   :  { %1331 = vmatmul.mubr.bf16.gmra.mrb[172].mxu0 %v12131_v62  ;;  %11225 = vrot.lane.b32.xlu0 %v11224_v4, %s16212_s24 }
 0x1a2   :  { %1338 = vmatprep.mubr.bf16.mxu0 %v12132_v3 }
 0x1a4   :  { %v1124_v7 = vpop.f32.mrb[68].mxu0 }
 0x1a5   :  { %v1126_v8 = vpop.f32.mrb[69].mxu0 }
 0x1a6   :  { %v1127_v9 = vpop.f32.mrb[70].mxu0 }
 0x1a7   :  { %v11229_v13 = vpack.i.bf16 %v1127_v9, %v1124_v7  ;;  %v1129_v14 = vpop.f32.mrb[71].mxu0 }
 0x1a9   :  { %1339 = vmatmul.mubr.bf16.gmra.mrb[176].mxu0 %v12134_v6  ;;  %11230 = vrot.lane.b32.xlu1 %v11229_v13, %s16212_s24 }
 0x1aa   :  { %1346 = vmatprep.mubr.bf16.mxu0 %v12135_v11 }
 0x1ac   :  { %v1132_v17 = vpop.f32.mrb[72].mxu0 }
 0x1ad   :  { %v1134_v19 = vpop.f32.mrb[73].mxu0 }
 0x1ae   :  { %v1135_v20 = vpop.f32.mrb[74].mxu0 }
 0x1af   :  { %v11234_v23 = vpack.i.bf16 %v1135_v20, %v1132_v17  ;;  %v1137_v25 = vpop.f32.mrb[75].mxu0 }
 0x1b1   :  { %1347 = vmatmul.mubr.bf16.gmra.mrb[180].mxu0 %v12137_v15  ;;  %11235 = vrot.lane.b32.xlu1 %v11234_v23, %s16212_s24 }
 0x1b2   :  { %1354 = vmatprep.mubr.bf16.mxu0 %v12138_v21 }
 0x1b4   :  { %v1140_v27 = vpop.f32.mrb[76].mxu0 }
 0x1b5   :  { %v1142_v29 = vpop.f32.mrb[77].mxu0 }
 0x1b6   :  { %v1143_v31 = vpop.f32.mrb[78].mxu0 }
 0x1b7   :  { %v11239_v33 = vpack.i.bf16 %v1143_v31, %v1140_v27  ;;  %v1145_v34 = vpop.f32.mrb[79].mxu0 }
 0x1b9   :  { %1355 = vmatmul.mubr.bf16.gmra.mrb[184].mxu0 %v12140_v26  ;;  %11240 = vrot.lane.b32.xlu0 %v11239_v33, %s16212_s24 }
 0x1ba   :  { %1362 = vmatprep.mubr.bf16.mxu0 %v12141_v32 }
 0x1bc   :  { %v1148_v35 = vpop.f32.mrb[80].mxu0 }
 0x1bd   :  { %22 = vsyncpa [#allocation3], 0  ;;  %v1150_v36 = vpop.f32.mrb[81].mxu0  ;;  %v12143_v37 = vld [vmem:[%s16227_s22 + $0x2f0] ss:$8 sps:$4 sm:$0xff]   ;;  %s16204_s20 = smov 20  }
 0x1be   :  { %v1151_v38 = vpop.f32.mrb[82].mxu0  ;;  %v12144_v39 = vld [vmem:[%s16227_s22 + $0x304] ss:$8 sps:$4 sm:$0xff]   ;;  %v12146_v44 = vld [vmem:[%s16227_s22 + $0x300] ss:$8 sps:$4 sm:$0xff]   ;;  %s16202_s23 = smov 24  }
 0x1bf   :  { %v11244_v40 = vpack.i.bf16 %v1151_v38, %v1148_v35  ;;  %v1153_v41 = vpop.f32.mrb[83].mxu0  ;;  %v12147_v46 = vld [vmem:[%s16227_s22 + $0x314] ss:$8 sps:$4 sm:$0xff]   ;;  %v12149_v51 = vld [vmem:[%s16227_s22 + $0x310] ss:$8 sps:$4 sm:$0xff]   ;;  %s16192_s28 = smov 28  }
 0x1c0   :  { %v12150_v53 = vld [vmem:[%s16227_s22 + $0x324] ss:$8 sps:$4 sm:$0xff]   ;;  %v12152_v58 = vld [vmem:[%s16227_s22 + $0x320] ss:$8 sps:$4 sm:$0xff]   ;;  %v12153_v60 = vld [vmem:[%s16227_s22 + $0x334] ss:$8 sps:$4 sm:$0xff]  }
 0x1c1   :  { %1363 = vmatmul.mubr.bf16.gmra.mrb[188].mxu0 %v12143_v37  ;;  %11245 = vrot.lane.b32.xlu0 %v11244_v40, %s16204_s20  ;;  %v12155_v2 = vld [vmem:[%s16227_s22 + $0x330] ss:$8 sps:$4 sm:$0xff]   ;;  %v12156_v4 = vld [vmem:[%s16227_s22 + $0x344] ss:$8 sps:$4 sm:$0xff]   ;;  %v12158_v9 = vld [vmem:[%s16227_s22 + $0x340] ss:$8 sps:$4 sm:$0xff]  }
 0x1c2   :  { %1370 = vmatprep.mubr.bf16.mxu0 %v12144_v39  ;;  %v12159_v13 = vld [vmem:[%s16227_s22 + $0x354] ss:$8 sps:$4 sm:$0xff]   ;;  %v12161_v20 = vld [vmem:[%s16227_s22 + $0x350] ss:$8 sps:$4 sm:$0xff]   ;;  %v12162_v23 = vld [vmem:[%s16227_s22 + $0x364] ss:$8 sps:$4 sm:$0xff]  }
 0x1c3   :  { %v12164_v31 = vld [vmem:[%s16227_s22 + $0x360] ss:$8 sps:$4 sm:$0xff]   ;;  %v12165_v33 = vld [vmem:[%s16227_s22 + $0x374] ss:$8 sps:$4 sm:$0xff]   ;;  %v12167_v38 = vld [vmem:[%s16227_s22 + $0x370] ss:$8 sps:$4 sm:$0xff]  }
 0x1c4   :  { %v1156_v42 = vpop.f32.mrb[84].mxu0  ;;  %v12168_v40 = vld [vmem:[%s16227_s22 + $0x384] ss:$8 sps:$4 sm:$0xff]   ;;  %s12850_s25 = smov 32   ;;  %s16200_s0 = smov 36   ;;  %vm1979_vm0 = vcmask 31744  }
 0x1c5   :  { %v1158_v43 = vpop.f32.mrb[85].mxu0  ;;  %s16198_s18 = smov 40   ;;  %s16196_s19 = smov 44   ;;  %vm1988_vm1 = vcmask 64512   ;;  %vm1997_vm2 = vcmask 97280   ;;  %vm2006_vm3 = vcmask 130048  }
 0x1c6   :  { %v1159_v45 = vpop.f32.mrb[86].mxu0  ;;  %s16194_s1 = smov 48   ;;  %vm2015_vm4 = vcmask 162816   ;;  %vm2024_vm5 = vcmask 195584   ;;  %vm2033_vm6 = vcmask 228352   ;;  %vm2042_vm7 = vcmask 261120  }
 0x1c7   :  { %v11249_v47 = vpack.i.bf16 %v1159_v45, %v1156_v42  ;;  %v1161_v48 = vpop.f32.mrb[87].mxu0  ;;  %v12170_v45 = vld [vmem:[%s16227_s22 + $0x380] ss:$8 sps:$4 sm:$0xff]   ;;  %vm2051_vm8 = vcmask 293888   ;;  %vm2060_vm9 = vcmask 326656   ;;  %vm2069_vm10 = vcmask 359424  }
 0x1c8   :  { %vm2078_vm11 = vcmask 392192   ;;  %vm2087_vm12 = vcmask 424960   ;;  %vm16221_vm13 = vcmask 457728   ;;  %vm16216_vm14 = vcmask 490496   ;;  %s12858_s29 = smov 64   ;;  %s16228_s24 = smov 4  }
 0x1c9   :  { %1371 = vmatmul.mubr.bf16.gmra.mrb[192].mxu0 %v12146_v44  ;;  %11250 = vrot.lane.b32.xlu1 %v11249_v47, %s16204_s20  ;;  %v12171_v47 = vld [vmem:[%s16227_s22 + $0x394] ss:$8 sps:$4 sm:$0xff]   ;;  %vm2157_vm15 = vcmask 523264   ;;  %s16229_s21 = smov 8   ;;  %s16240_s27 = smov 56  }
 0x1ca   :  { %1378 = vmatprep.mubr.bf16.mxu0 %v12147_v46 }
 0x1cc   :  { %v1164_v49 = vpop.f32.mrb[88].mxu0 }
 0x1cd   :  { %v1166_v50 = vpop.f32.mrb[89].mxu0 }
 0x1ce   :  { %v1167_v52 = vpop.f32.mrb[90].mxu0 }
 0x1cf   :  { %v11254_v54 = vpack.i.bf16 %v1167_v52, %v1164_v49  ;;  %v1169_v55 = vpop.f32.mrb[91].mxu0  ;;  %v12173_v52 = vld [vmem:[%s16227_s22 + $0x390] ss:$8 sps:$4 sm:$0xff]  }
 0x1d1   :  { %1379 = vmatmul.mubr.bf16.gmra.mrb[196].mxu0 %v12149_v51  ;;  %11255 = vrot.lane.b32.xlu1 %v11254_v54, %s16204_s20  ;;  %v12174_v54 = vld [vmem:[%s16227_s22 + $0x3a4] ss:$8 sps:$4 sm:$0xff]  }
 0x1d2   :  { %1386 = vmatprep.mubr.bf16.mxu0 %v12150_v53 }
 0x1d4   :  { %v1172_v56 = vpop.f32.mrb[92].mxu0 }
 0x1d5   :  { %v1174_v57 = vpop.f32.mrb[93].mxu0 }
 0x1d6   :  { %v1175_v59 = vpop.f32.mrb[94].mxu0 }
 0x1d7   :  { %v11259_v61 = vpack.i.bf16 %v1175_v59, %v1172_v56  ;;  %v1177_v62 = vpop.f32.mrb[95].mxu0  ;;  %v12176_v59 = vld [vmem:[%s16227_s22 + $0x3a0] ss:$8 sps:$4 sm:$0xff]  }
 0x1d9   :  { %1387 = vmatmul.mubr.bf16.gmra.mrb[200].mxu0 %v12152_v58  ;;  %11260 = vrot.lane.b32.xlu0 %v11259_v61, %s16204_s20  ;;  %v12177_v61 = vld [vmem:[%s16227_s22 + $0x3b4] ss:$8 sps:$4 sm:$0xff]   ;;  %s16241_s20 = smov 60  }
 0x1da   :  { %1394 = vmatprep.mubr.bf16.mxu0 %v12153_v60 }
 0x1dc   :  { %v1180_v63 = vpop.f32.mrb[96].mxu0 }
 0x1dd   :  { %v1182_v0 = vpop.f32.mrb[97].mxu0 }
 0x1de   :  { %v1183_v3 = vpop.f32.mrb[98].mxu0 }
 0x1df   :  { %v11264_v5 = vpack.i.bf16 %v1183_v3, %v1180_v63  ;;  %v1185_v6 = vpop.f32.mrb[99].mxu0  ;;  %v12179_v3 = vld [vmem:[%s16227_s22 + $0x3b0] ss:$8 sps:$4 sm:$0xff]  }
 0x1e1   :  { %1395 = vmatmul.mubr.bf16.gmra.mrb[204].mxu0 %v12155_v2  ;;  %11265 = vrot.lane.b32.xlu0 %v11264_v5, %s16202_s23  ;;  %v12180_v5 = vld [vmem:[%s16227_s22 + $0x3c4] ss:$8 sps:$4 sm:$0xff]  }
 0x1e2   :  { %1402 = vmatprep.mubr.bf16.mxu0 %v12156_v4 }
 0x1e4   :  { %v1188_v7 = vpop.f32.mrb[100].mxu0 }
 0x1e5   :  { %v1190_v8 = vpop.f32.mrb[101].mxu0 }
 0x1e6   :  { %v1191_v11 = vpop.f32.mrb[102].mxu0 }
 0x1e7   :  { %v11269_v14 = vpack.i.bf16 %v1191_v11, %v1188_v7  ;;  %v1193_v15 = vpop.f32.mrb[103].mxu0  ;;  %v12182_v11 = vld [vmem:[%s16227_s22 + $0x3c0] ss:$8 sps:$4 sm:$0xff]  }
 0x1e9   :  { %1403 = vmatmul.mubr.bf16.gmra.mrb[208].mxu0 %v12158_v9  ;;  %11270 = vrot.lane.b32.xlu1 %v11269_v14, %s16202_s23  ;;  %v12183_v14 = vld [vmem:[%s16227_s22 + $0x3d4] ss:$8 sps:$4 sm:$0xff]  }
 0x1ea   :  { %1410 = vmatprep.mubr.bf16.mxu0 %v12159_v13 }
 0x1ec   :  { %v1196_v17 = vpop.f32.mrb[104].mxu0 }
 0x1ed   :  { %v1198_v19 = vpop.f32.mrb[105].mxu0 }
 0x1ee   :  { %v1199_v21 = vpop.f32.mrb[106].mxu0 }
 0x1ef   :  { %v11274_v25 = vpack.i.bf16 %v1199_v21, %v1196_v17  ;;  %v1201_v26 = vpop.f32.mrb[107].mxu0  ;;  %v12185_v21 = vld [vmem:[%s16227_s22 + $0x3d0] ss:$8 sps:$4 sm:$0xff]  }
 0x1f1   :  { %1411 = vmatmul.mubr.bf16.gmra.mrb[212].mxu0 %v12161_v20  ;;  %11275 = vrot.lane.b32.xlu1 %v11274_v25, %s16202_s23  ;;  %v12186_v25 = vld [vmem:[%s16227_s22 + $0x3e4] ss:$8 sps:$4 sm:$0xff]  }
 0x1f2   :  { %1418 = vmatprep.mubr.bf16.mxu0 %v12162_v23 }
 0x1f4   :  { %v1204_v27 = vpop.f32.mrb[108].mxu0 }
 0x1f5   :  { %v1206_v29 = vpop.f32.mrb[109].mxu0 }
 0x1f6   :  { %v1207_v32 = vpop.f32.mrb[110].mxu0 }
 0x1f7   :  { %v11279_v34 = vpack.i.bf16 %v1207_v32, %v1204_v27  ;;  %v1209_v35 = vpop.f32.mrb[111].mxu0  ;;  %v12188_v32 = vld [vmem:[%s16227_s22 + $0x3e0] ss:$8 sps:$4 sm:$0xff]  }
 0x1f9   :  { %1419 = vmatmul.mubr.bf16.gmra.mrb[216].mxu0 %v12164_v31  ;;  %11280 = vrot.lane.b32.xlu0 %v11279_v34, %s16202_s23  ;;  %v12189_v34 = vld [vmem:[%s16227_s22 + $0x3f4] ss:$8 sps:$4 sm:$0xff]   ;;  %s16235_s23 = smov 36  }
 0x1fa   :  { %1426 = vmatprep.mubr.bf16.mxu0 %v12165_v33 }
 0x1fc   :  { %v1212_v36 = vpop.f32.mrb[112].mxu0 }
 0x1fd   :  { %v1214_v37 = vpop.f32.mrb[113].mxu0 }
 0x1fe   :  { %v1215_v39 = vpop.f32.mrb[114].mxu0 }
 0x1ff   :  { %v11284_v41 = vpack.i.bf16 %v1215_v39, %v1212_v36  ;;  %v1217_v42 = vpop.f32.mrb[115].mxu0  ;;  %v12191_v39 = vld [vmem:[%s16227_s22 + $0x3f0] ss:$8 sps:$4 sm:$0xff]  }
 0x201   :  { %1427 = vmatmul.mubr.bf16.gmra.mrb[220].mxu0 %v12167_v38  ;;  %11285 = vrot.lane.b32.xlu0 %v11284_v41, %s16192_s28 }
 0x202   :  { %1434 = vmatprep.mubr.bf16.mxu0 %v12168_v40 }
 0x204   :  { %v1220_v43 = vpop.f32.mrb[116].mxu0 }
 0x205   :  { %v1222_v44 = vpop.f32.mrb[117].mxu0 }
 0x206   :  { %v1223_v46 = vpop.f32.mrb[118].mxu0 }
 0x207   :  { %v11289_v48 = vpack.i.bf16 %v1223_v46, %v1220_v43  ;;  %v1225_v49 = vpop.f32.mrb[119].mxu0 }
 0x209   :  { %1435 = vmatmul.mubr.bf16.gmra.mrb[224].mxu0 %v12170_v45  ;;  %11290 = vrot.lane.b32.xlu1 %v11289_v48, %s16192_s28 }
 0x20a   :  { %1442 = vmatprep.mubr.bf16.mxu0 %v12171_v47 }
 0x20c   :  { %v1228_v50 = vpop.f32.mrb[120].mxu0 }
 0x20d   :  { %v1230_v51 = vpop.f32.mrb[121].mxu0 }
 0x20e   :  { %v1231_v53 = vpop.f32.mrb[122].mxu0 }
 0x20f   :  { %v11294_v55 = vpack.i.bf16 %v1231_v53, %v1228_v50  ;;  %v1233_v56 = vpop.f32.mrb[123].mxu0 }
 0x211   :  { %1443 = vmatmul.mubr.bf16.gmra.mrb[228].mxu0 %v12173_v52  ;;  %11295 = vrot.lane.b32.xlu1 %v11294_v55, %s16192_s28 }
 0x212   :  { %1450 = vmatprep.mubr.bf16.mxu0 %v12174_v54 }
 0x214   :  { %v1236_v57 = vpop.f32.mrb[124].mxu0 }
 0x215   :  { %v1238_v58 = vpop.f32.mrb[125].mxu0 }
 0x216   :  { %v1239_v60 = vpop.f32.mrb[126].mxu0 }
 0x217   :  { %v11299_v62 = vpack.i.bf16 %v1239_v60, %v1236_v57  ;;  %v1241_v63 = vpop.f32.mrb[127].mxu0 }
 0x219   :  { %1451 = vmatmul.mubr.bf16.gmra.mrb[232].mxu0 %v12176_v59  ;;  %11300 = vrot.lane.b32.xlu0 %v11299_v62, %s16192_s28  ;;  %s16210_s28 = smov 52  }
 0x21a   :  { %1458 = vmatprep.mubr.bf16.mxu0 %v12177_v61 }
 0x21c   :  { %v1244_v0 = vpop.f32.mrb[128].mxu0 }
 0x21d   :  { %v1246_v2 = vpop.f32.mrb[129].mxu0 }
 0x21e   :  { %v1247_v4 = vpop.f32.mrb[130].mxu0 }
 0x21f   :  { %v11304_v6 = vpack.i.bf16 %v1247_v4, %v1244_v0  ;;  %v1249_v7 = vpop.f32.mrb[131].mxu0 }
 0x221   :  { %1459 = vmatmul.mubr.bf16.gmra.mrb[236].mxu0 %v12179_v3  ;;  %11305 = vrot.lane.b32.xlu0 %v11304_v6, %s12850_s25 }
 0x222   :  { %1466 = vmatprep.mubr.bf16.mxu0 %v12180_v5 }
 0x224   :  { %v1252_v8 = vpop.f32.mrb[132].mxu0 }
 0x225   :  { %v1254_v9 = vpop.f32.mrb[133].mxu0 }
 0x226   :  { %v1255_v13 = vpop.f32.mrb[134].mxu0 }
 0x227   :  { %v11309_v15 = vpack.i.bf16 %v1255_v13, %v1252_v8  ;;  %v1257_v17 = vpop.f32.mrb[135].mxu0 }
 0x229   :  { %1467 = vmatmul.mubr.bf16.gmra.mrb[240].mxu0 %v12182_v11  ;;  %11310 = vrot.lane.b32.xlu0 %v11309_v15, %s12850_s25 }
 0x22a   :  { %1474 = vmatprep.mubr.bf16.mxu0 %v12183_v14 }
 0x22c   :  { %v1260_v19 = vpop.f32.mrb[136].mxu0 }
 0x22d   :  { %v1262_v20 = vpop.f32.mrb[137].mxu0 }
 0x22e   :  { %v1263_v23 = vpop.f32.mrb[138].mxu0 }
 0x22f   :  { %v11314_v26 = vpack.i.bf16 %v1263_v23, %v1260_v19  ;;  %v1265_v27 = vpop.f32.mrb[139].mxu0 }
 0x231   :  { %1475 = vmatmul.mubr.bf16.gmra.mrb[244].mxu0 %v12185_v21  ;;  %11315 = vrot.lane.b32.xlu1 %v11314_v26, %s12850_s25 }
 0x232   :  { %1482 = vmatprep.mubr.bf16.mxu0 %v12186_v25 }
 0x234   :  { %v1268_v29 = vpop.f32.mrb[140].mxu0 }
 0x235   :  { %v1270_v31 = vpop.f32.mrb[141].mxu0 }
 0x236   :  { %v1271_v33 = vpop.f32.mrb[142].mxu0 }
 0x237   :  { %v11319_v35 = vpack.i.bf16 %v1271_v33, %v1268_v29  ;;  %v1273_v36 = vpop.f32.mrb[143].mxu0 }
 0x239   :  { %1483 = vmatmul.mubr.bf16.gmra.mrb[248].mxu0 %v12188_v32  ;;  %11320 = vrot.lane.b32.xlu1 %v11319_v35, %s12850_s25 }
 0x23a   :  { %1490 = vmatprep.mubr.bf16.mxu0 %v12189_v34 }
 0x23c   :  { %v1276_v37 = vpop.f32.mrb[144].mxu0 }
 0x23d   :  { %v1278_v38 = vpop.f32.mrb[145].mxu0 }
 0x23e   :  { %v1279_v40 = vpop.f32.mrb[146].mxu0 }
 0x23f   :  { %v11324_v41 = vpack.i.bf16 %v1279_v40, %v1276_v37  ;;  %v1281_v42 = vpop.f32.mrb[147].mxu0 }
 0x241   :  { %1491 = vmatmul.mubr.bf16.gmra.mrb[252].mxu0 %v12191_v39  ;;  %11325 = vrot.lane.b32.xlu1 %v11324_v41, %s16200_s0 }
 0x244   :  { %v1284_v43 = vpop.f32.mrb[148].mxu0 }
 0x245   :  { %v1286_v44 = vpop.f32.mrb[149].mxu0 }
 0x246   :  { %v1287_v45 = vpop.f32.mrb[150].mxu0 }
 0x247   :  { %v11329_v46 = vpack.i.bf16 %v1287_v45, %v1284_v43  ;;  %v1289_v47 = vpop.f32.mrb[151].mxu0 }
 0x249   :  { %11330 = vrot.lane.b32.xlu0 %v11329_v46, %s16200_s0 }
 0x24c   :  { %v1292_v48 = vpop.f32.mrb[152].mxu0 }
 0x24d   :  { %v1294_v49 = vpop.f32.mrb[153].mxu0 }
 0x24e   :  { %v1295_v50 = vpop.f32.mrb[154].mxu0 }
 0x24f   :  { %v11334_v51 = vpack.i.bf16 %v1295_v50, %v1292_v48  ;;  %v1297_v52 = vpop.f32.mrb[155].mxu0 }
 0x251   :  { %11335 = vrot.lane.b32.xlu0 %v11334_v51, %s16200_s0 }
 0x254   :  { %v1300_v53 = vpop.f32.mrb[156].mxu0 }
 0x255   :  { %v1302_v54 = vpop.f32.mrb[157].mxu0 }
 0x256   :  { %v1303_v55 = vpop.f32.mrb[158].mxu0 }
 0x257   :  { %v11339_v56 = vpack.i.bf16 %v1303_v55, %v1300_v53  ;;  %v1305_v57 = vpop.f32.mrb[159].mxu0 }
 0x259   :  { %11340 = vrot.lane.b32.xlu1 %v11339_v56, %s16200_s0  ;;  %s16237_s0 = smov 44  }
 0x25c   :  { %v1308_v58 = vpop.f32.mrb[160].mxu0 }
 0x25d   :  { %v1310_v59 = vpop.f32.mrb[161].mxu0 }
 0x25e   :  { %v1311_v60 = vpop.f32.mrb[162].mxu0 }
 0x25f   :  { %v11344_v61 = vpack.i.bf16 %v1311_v60, %v1308_v58  ;;  %v1313_v62 = vpop.f32.mrb[163].mxu0 }
 0x261   :  { %11345 = vrot.lane.b32.xlu1 %v11344_v61, %s16198_s18 }
 0x264   :  { %v1316_v63 = vpop.f32.mrb[164].mxu0 }
 0x265   :  { %v1318_v0 = vpop.f32.mrb[165].mxu0 }
 0x266   :  { %v1319_v2 = vpop.f32.mrb[166].mxu0 }
 0x267   :  { %v11349_v3 = vpack.i.bf16 %v1319_v2, %v1316_v63  ;;  %v1321_v4 = vpop.f32.mrb[167].mxu0 }
 0x269   :  { %11350 = vrot.lane.b32.xlu0 %v11349_v3, %s16198_s18 }
 0x26c   :  { %v1324_v5 = vpop.f32.mrb[168].mxu0 }
 0x26d   :  { %v1326_v6 = vpop.f32.mrb[169].mxu0 }
 0x26e   :  { %v1327_v7 = vpop.f32.mrb[170].mxu0 }
 0x26f   :  { %v11354_v8 = vpack.i.bf16 %v1327_v7, %v1324_v5  ;;  %v1329_v9 = vpop.f32.mrb[171].mxu0 }
 0x271   :  { %11355 = vrot.lane.b32.xlu0 %v11354_v8, %s16198_s18 }
 0x274   :  { %v1332_v11 = vpop.f32.mrb[172].mxu0 }
 0x275   :  { %v1334_v13 = vpop.f32.mrb[173].mxu0 }
 0x276   :  { %v1335_v14 = vpop.f32.mrb[174].mxu0 }
 0x277   :  { %v11359_v15 = vpack.i.bf16 %v1335_v14, %v1332_v11  ;;  %v1337_v17 = vpop.f32.mrb[175].mxu0 }
 0x279   :  { %11360 = vrot.lane.b32.xlu1 %v11359_v15, %s16198_s18  ;;  %s12859_s18 = smov 96  }
 0x27c   :  { %v1340_v19 = vpop.f32.mrb[176].mxu0 }
 0x27d   :  { %v1342_v20 = vpop.f32.mrb[177].mxu0 }
 0x27e   :  { %v1343_v21 = vpop.f32.mrb[178].mxu0 }
 0x27f   :  { %v11364_v23 = vpack.i.bf16 %v1343_v21, %v1340_v19  ;;  %v1345_v25 = vpop.f32.mrb[179].mxu0 }
 0x281   :  { %11365 = vrot.lane.b32.xlu1 %v11364_v23, %s16196_s19 }
 0x284   :  { %v1348_v26 = vpop.f32.mrb[180].mxu0 }
 0x285   :  { %v1350_v27 = vpop.f32.mrb[181].mxu0 }
 0x286   :  { %v1351_v29 = vpop.f32.mrb[182].mxu0 }
 0x287   :  { %v11369_v31 = vpack.i.bf16 %v1351_v29, %v1348_v26  ;;  %v1353_v32 = vpop.f32.mrb[183].mxu0 }
 0x289   :  { %11370 = vrot.lane.b32.xlu0 %v11369_v31, %s16196_s19  ;;  %v12192_v31 = vld [vmem:[%s16174_s2] sm:$0xff]  }
 0x28a   :  { %10999 = vmatprep.subr.bf16.mxu1 %v12192_v31 }
 0x28b   :  { %11000 = vmatpush3.bf16.msra.mxu1 %v12192_v31 }
 0x28c   :  { %v1356_v33 = vpop.f32.mrb[184].mxu0 }
 0x28d   :  { %v1358_v34 = vpop.f32.mrb[185].mxu0 }
 0x28e   :  { %v1359_v35 = vpop.f32.mrb[186].mxu0 }
 0x28f   :  { %v11374_v36 = vpack.i.bf16 %v1359_v35, %v1356_v33  ;;  %v1361_v37 = vpop.f32.mrb[187].mxu0 }
 0x291   :  { %11375 = vrot.lane.b32.xlu0 %v11374_v36, %s16196_s19 }
 0x294   :  { %v1364_v38 = vpop.f32.mrb[188].mxu0 }
 0x295   :  { %v1366_v39 = vpop.f32.mrb[189].mxu0 }
 0x296   :  { %v1367_v40 = vpop.f32.mrb[190].mxu0 }
 0x297   :  { %v11379_v41 = vpack.i.bf16 %v1367_v40, %v1364_v38  ;;  %v1369_v42 = vpop.f32.mrb[191].mxu0 }
 0x299   :  { %11380 = vrot.lane.b32.xlu1 %v11379_v41, %s16196_s19  ;;  %s16208_s19 = smov 56  }
 0x29c   :  { %v1372_v43 = vpop.f32.mrb[192].mxu0 }
 0x29d   :  { %v1374_v44 = vpop.f32.mrb[193].mxu0 }
 0x29e   :  { %v1375_v45 = vpop.f32.mrb[194].mxu0  ;;  %v12193_v44 = vld [vmem:[%s16174_s2 + $0x8] sm:$0xff]  }
 0x29f   :  { %v11384_v46 = vpack.i.bf16 %v1375_v45, %v1372_v43  ;;  %v1377_v47 = vpop.f32.mrb[195].mxu0  ;;  %11001 = vmatprep.subr.bf16.mxu1 %v12193_v44 }
 0x2a0   :  { %11002 = vmatpush3.bf16.msra.mxu1 %v12193_v44 }
 0x2a1   :  { %11385 = vrot.lane.b32.xlu1 %v11384_v46, %s16194_s1 }
 0x2a4   :  { %v1380_v48 = vpop.f32.mrb[196].mxu0 }
 0x2a5   :  { %v1382_v49 = vpop.f32.mrb[197].mxu0 }
 0x2a6   :  { %v1383_v50 = vpop.f32.mrb[198].mxu0 }
 0x2a7   :  { %v11389_v51 = vpack.i.bf16 %v1383_v50, %v1380_v48  ;;  %v1385_v52 = vpop.f32.mrb[199].mxu0  ;;  %v12194_v50 = vld [vmem:[%s16174_s2 + $0x10] sm:$0xff]  }
 0x2a8   :  { %11003 = vmatprep.subr.bf16.mxu1 %v12194_v50 }
 0x2a9   :  { %11390 = vrot.lane.b32.xlu0 %v11389_v51, %s16194_s1  ;;  %11004 = vmatpush3.bf16.msra.mxu1 %v12194_v50  ;;  %v12195_v51 = vld [vmem:[%s16174_s2 + $0x18] sm:$0xff]  }
 0x2aa   :  { %11005 = vmatprep.subr.bf16.mxu1 %v12195_v51 }
 0x2ac   :  { %v1388_v53 = vpop.f32.mrb[200].mxu0 }
 0x2ad   :  { %v1390_v54 = vpop.f32.mrb[201].mxu0  ;;  %11006 = vmatpush3.bf16.msra.mxu1 %v12195_v51 }
 0x2ae   :  { %v1391_v55 = vpop.f32.mrb[202].mxu0 }
 0x2af   :  { %v11394_v56 = vpack.i.bf16 %v1391_v55, %v1388_v53  ;;  %v1393_v57 = vpop.f32.mrb[203].mxu0 }
 0x2b1   :  { %11395 = vrot.lane.b32.xlu0 %v11394_v56, %s16194_s1 }
 0x2b4   :  { %v1396_v58 = vpop.f32.mrb[204].mxu0 }
 0x2b5   :  { %v1398_v59 = vpop.f32.mrb[205].mxu0 }
 0x2b6   :  { %v1399_v60 = vpop.f32.mrb[206].mxu0 }
 0x2b7   :  { %v11399_v61 = vpack.i.bf16 %v1399_v60, %v1396_v58  ;;  %v1401_v62 = vpop.f32.mrb[207].mxu0 }
 0x2b8   :  { %v13486_v62 = vpop.permute.xlu1 %11175 }
 0x2b9   :  { %11400 = vrot.lane.b32.xlu1 %v11399_v61, %s16194_s1  ;;  %s16206_s1 = smov 60  }
 0x2bc   :  { %v1404_v63 = vpop.f32.mrb[208].mxu0 }
 0x2bd   :  { %v1406_v0 = vpop.f32.mrb[209].mxu0 }
 0x2be   :  { %v1407_v2 = vpop.f32.mrb[210].mxu0  ;;  %v13488_v0 = vpop.permute.xlu0 %11165 }
 0x2bf   :  { %v11404_v3 = vpack.i.bf16 %v1407_v2, %v1404_v63  ;;  %v1409_v4 = vpop.f32.mrb[211].mxu0  ;;  %v11168_v50 = vunpack.i.h.bf16 %v13488_v0  ;;  %v11167_v51 = vunpack.i.l.bf16 %v13488_v0 }
 0x2c1   :  { %11405 = vrot.lane.b32.xlu1 %v11404_v3, %s16210_s28  ;;  %v13491_v3 = vpop.permute.xlu1 %11185 }
 0x2c4   :  { %v1412_v5 = vpop.f32.mrb[212].mxu0 }
 0x2c5   :  { %v1414_v6 = vpop.f32.mrb[213].mxu0 }
 0x2c6   :  { %v1415_v7 = vpop.f32.mrb[214].mxu0 }
 0x2c7   :  { %v11409_v8 = vpack.i.bf16 %v1415_v7, %v1412_v5  ;;  %v1417_v9 = vpop.f32.mrb[215].mxu0  ;;  %v11171_v7 = vpop.permute.xlu0 %11170 }
 0x2c9   :  { %11410 = vrot.lane.b32.xlu0 %v11409_v8, %s16210_s28  ;;  %v13494_v8 = vpop.permute.xlu1 %11190 }
 0x2ca   :  { %v11193_v0 = vunpack.i.h.bf16 %v13494_v8 }
 0x2cc   :  { %v1420_v11 = vpop.f32.mrb[216].mxu0 }
 0x2cd   :  { %v1422_v13 = vpop.f32.mrb[217].mxu0 }
 0x2ce   :  { %v1423_v14 = vpop.f32.mrb[218].mxu0 }
 0x2cf   :  { %v11414_v15 = vpack.i.bf16 %v1423_v14, %v1420_v11  ;;  %v1425_v17 = vpop.f32.mrb[219].mxu0  ;;  %v13496_v11 = vpop.permute.xlu0 %11180 }
 0x2d0   :  { %v13498_v14 = vpop.permute.xlu1 %11195 }
 0x2d1   :  { %11415 = vrot.lane.b32.xlu0 %v11414_v15, %s16210_s28 }
 0x2d4   :  { %v1428_v19 = vpop.f32.mrb[220].mxu0 }
 0x2d5   :  { %v1430_v20 = vpop.f32.mrb[221].mxu0 }
 0x2d6   :  { %v1431_v21 = vpop.f32.mrb[222].mxu0  ;;  %v13501_v20 = vpop.permute.xlu0 %11200 }
 0x2d7   :  { %v11434_v23 = vpack.i.bf16 %v1431_v21, %v1428_v19  ;;  %v1433_v25 = vpop.f32.mrb[223].mxu0  ;;  %v13503_v21 = vpop.permute.xlu1 %11210 }
 0x2db   :  { %v13507_v25 = vpop.permute.xlu1 %11215 }
 0x2dc   :  { %v1436_v26 = vpop.f32.mrb[224].mxu0 }
 0x2dd   :  { %v1438_v27 = vpop.f32.mrb[225].mxu0 }
 0x2de   :  { %v1439_v29 = vpop.f32.mrb[226].mxu0 }
 0x2df   :  { %v11419_v32 = vpack.i.bf16 %v1439_v29, %v1436_v26  ;;  %v1441_v33 = vpop.f32.mrb[227].mxu0  ;;  %v13511_v27 = vpop.permute.xlu1 %11230 }
 0x2e1   :  { %11420 = vrot.lane.b32.xlu1 %v11419_v32, %s16208_s19 }
 0x2e3   :  { %v13515_v31 = vpop.permute.xlu1 %11235 }
 0x2e4   :  { %v1444_v34 = vpop.f32.mrb[228].mxu0 }
 0x2e5   :  { %v1446_v35 = vpop.f32.mrb[229].mxu0 }
 0x2e6   :  { %v1447_v36 = vpop.f32.mrb[230].mxu0 }
 0x2e7   :  { %v11424_v37 = vpack.i.bf16 %v1447_v36, %v1444_v34  ;;  %v1449_v38 = vpop.f32.mrb[231].mxu0  ;;  %v13519_v33 = vpop.permute.xlu1 %11250 }
 0x2e9   :  { %11425 = vrot.lane.b32.xlu0 %v11424_v37, %s16208_s19 }
 0x2eb   :  { %v13523_v35 = vpop.permute.xlu1 %11255 }
 0x2ec   :  { %v1452_v39 = vpop.f32.mrb[232].mxu0 }
 0x2ed   :  { %v1454_v40 = vpop.f32.mrb[233].mxu0 }
 0x2ee   :  { %v1455_v41 = vpop.f32.mrb[234].mxu0 }
 0x2ef   :  { %v11444_v42 = vpack.i.bf16 %v1455_v41, %v1452_v39  ;;  %v1457_v43 = vpop.f32.mrb[235].mxu0  ;;  %v13527_v37 = vpop.permute.xlu1 %11270 }
 0x2f3   :  { %v13531_v39 = vpop.permute.xlu1 %11275 }
 0x2f4   :  { %v1460_v45 = vpop.f32.mrb[236].mxu0 }
 0x2f5   :  { %v1462_v46 = vpop.f32.mrb[237].mxu0 }
 0x2f6   :  { %v1463_v47 = vpop.f32.mrb[238].mxu0 }
 0x2f7   :  { %v11449_v48 = vpack.i.bf16 %v1463_v47, %v1460_v45  ;;  %v1465_v49 = vpop.f32.mrb[239].mxu0  ;;  %v13535_v41 = vpop.permute.xlu1 %11290 }
 0x2fb   :  { %v13539_v43 = vpop.permute.xlu1 %11295 }
 0x2fc   :  { %v1468_v52 = vpop.f32.mrb[240].mxu0 }
 0x2fd   :  { %v1470_v53 = vpop.f32.mrb[241].mxu0 }
 0x2fe   :  { %v1471_v54 = vpop.f32.mrb[242].mxu0  ;;  %v11172_v53 = vunpack.i.l.bf16 %v11171_v7 }
 0x2ff   :  { %v11429_v55 = vpack.i.bf16 %v1471_v54, %v1468_v52  ;;  %v1473_v56 = vpop.f32.mrb[243].mxu0  ;;  %v13543_v45 = vpop.permute.xlu1 %11315  ;;  %v11173_v52 = vunpack.i.h.bf16 %v11171_v7 }
 0x300   :  { %v11178_v56 = vunpack.i.h.bf16 %v13486_v62 }
 0x301   :  { %11430 = vrot.lane.b32.xlu1 %v11429_v55, %s16206_s1 }
 0x303   :  { %v13547_v47 = vpop.permute.xlu1 %11320 }
 0x304   :  { %v1476_v57 = vpop.f32.mrb[244].mxu0 }
 0x305   :  { %11435 = vrot.lane.b32.xlu1 %v11434_v23, %s16210_s28  ;;  %v1478_v58 = vpop.f32.mrb[245].mxu0  ;;  %v13505_v23 = vpop.permute.xlu0 %11205  ;;  %s16230_s28 = smov 12  }
 0x306   :  { %v1479_v59 = vpop.f32.mrb[246].mxu0  ;;  %v11183_v58 = vunpack.i.h.bf16 %v13496_v11 }
 0x307   :  { %v11439_v60 = vpack.i.bf16 %v1479_v59, %v1476_v57  ;;  %v1481_v61 = vpop.f32.mrb[247].mxu0  ;;  %v13551_v49 = vpop.permute.xlu1 %11325  ;;  %v11177_v57 = vunpack.i.l.bf16 %v13486_v62  ;;  %v11182_v59 = vunpack.i.l.bf16 %v13496_v11  ;;  %v1980_v62 = vsel %vm1979_vm0, %v13185_v10, %v11167_v51 }
 0x308   :  { %v1981_v61 = vsel %vm1979_vm0, %v13187_v12, %v11168_v50  ;;  %v1987_v10 = vsel %vm1979_vm0, %v13217_v30, %v11183_v58  ;;  %v11203_v11 = vunpack.i.h.bf16 %v13501_v20 }
 0x309   :  { %11450 = vrot.lane.b32.xlu1 %v11449_v48, %s16208_s19  ;;  %11440 = vrot.lane.b32.xlu0 %v11439_v60, %s16206_s1  ;;  %v13509_v26 = vpop.permute.xlu0 %11220  ;;  %v11188_v60 = vunpack.i.h.bf16 %v13491_v3 }
 0x30a   :  { %v11222_v58 = vunpack.i.l.bf16 %v13509_v26 }
 0x30b   :  { %v13557_v55 = vpop.permute.xlu1 %11340 }
 0x30c   :  { %v1484_v63 = vpop.f32.mrb[248].mxu0 }
 0x30d   :  { %11445 = vrot.lane.b32.xlu0 %v11444_v42, %s16208_s19  ;;  %v1486_v2 = vpop.f32.mrb[249].mxu0  ;;  %v13513_v29 = vpop.permute.xlu0 %11225 }
 0x30e   :  { %v1487_v4 = vpop.f32.mrb[250].mxu0  ;;  %v11192_v2 = vunpack.i.l.bf16 %v13494_v8  ;;  %v1984_v8 = vsel %vm1979_vm0, %v13205_v22, %v11177_v57  ;;  %v1996_v57 = vsel %vm1988_vm1, %v1987_v10, %v11203_v11 }
 0x30f   :  { %v11454_v5 = vpack.i.bf16 %v1487_v4, %v1484_v63  ;;  %v1489_v6 = vpop.f32.mrb[251].mxu0  ;;  %v11187_v63 = vunpack.i.l.bf16 %v13491_v3  ;;  %v1983_v4 = vsel %vm1979_vm0, %v13197_v18, %v11173_v52  ;;  %v13578_v12 = vpop.permute.xlu1 %11345  ;;  %v1985_v3 = vsel %vm1979_vm0, %v13207_v24, %v11178_v56 }
 0x310   :  { %v11198_v6 = vunpack.i.h.bf16 %v13498_v14  ;;  %v11197_v18 = vunpack.i.l.bf16 %v13498_v14  ;;  %v1992_v24 = vsel %vm1988_vm1, %v1983_v4, %v11193_v0  ;;  %v11207_v14 = vunpack.i.l.bf16 %v13505_v23 }
 0x311   :  { %11455 = vrot.lane.b32.xlu0 %v11454_v5, %s16206_s1  ;;  %v13517_v32 = vpop.permute.xlu0 %11240  ;;  %v1982_v5 = vsel %vm1979_vm0, %v13195_v16, %v11172_v53  ;;  %v1986_v16 = vsel %vm1979_vm0, %v13215_v28, %v11182_v59  ;;  %v11213_v28 = vunpack.i.h.bf16 %v13503_v21  ;;  %v11218_v52 = vunpack.i.h.bf16 %v13507_v25 }
 0x312   :  { %v1991_v22 = vsel %vm1988_vm1, %v1982_v5, %v11192_v2  ;;  %v1994_v30 = vsel %vm1988_vm1, %v1985_v3, %v11198_v6  ;;  %v1993_v51 = vsel %vm1988_vm1, %v1984_v8, %v11197_v18  ;;  %v11217_v53 = vunpack.i.l.bf16 %v13507_v25 }
 0x313   :  { %v11223_v56 = vunpack.i.h.bf16 %v13509_v26  ;;  %v2001_v0 = vsel %vm1997_vm2, %v1992_v24, %v11213_v28  ;;  %v2003_v5 = vsel %vm1997_vm2, %v1994_v30, %v11218_v52  ;;  %v11243_v10 = vunpack.i.h.bf16 %v13517_v32 }
 0x314   :  { %v1492_v9 = vpop.f32.mrb[252].mxu0  ;;  %v11242_v18 = vunpack.i.l.bf16 %v13517_v32  ;;  %v11253_v24 = vunpack.i.h.bf16 %v13519_v33  ;;  %v11257_v28 = vunpack.i.l.bf16 %v13523_v35 }
 0x315   :  { %v1494_v13 = vpop.f32.mrb[253].mxu0  ;;  %v13521_v34 = vpop.permute.xlu0 %11245  ;;  %v2005_v6 = vsel %vm1997_vm2, %v1996_v57, %v11223_v56  ;;  %v11273_v57 = vunpack.i.h.bf16 %v13527_v37 }
 0x316   :  { %v1495_v15 = vpop.f32.mrb[254].mxu0  ;;  %v11202_v13 = vunpack.i.l.bf16 %v13501_v20  ;;  %v13602_v20 = vpop.permute.xlu1 %11360 }
 0x317   :  { %v11459_v17 = vpack.i.bf16 %v1495_v15, %v1492_v9  ;;  %v1497_v19 = vpop.f32.mrb[255].mxu0  ;;  %v1990_v9 = vsel %vm1988_vm1, %v1981_v61, %v11188_v60  ;;  %v1989_v15 = vsel %vm1988_vm1, %v1980_v62, %v11187_v63  ;;  %v11227_v60 = vunpack.i.l.bf16 %v13513_v29 }
 0x318   :  { %v11212_v19 = vunpack.i.l.bf16 %v13503_v21  ;;  %v11228_v21 = vunpack.i.h.bf16 %v13513_v29  ;;  %v11233_v61 = vunpack.i.h.bf16 %v13511_v27  ;;  %v11232_v63 = vunpack.i.l.bf16 %v13511_v27 }
 0x319   :  { %11460 = vrot.lane.b32.xlu1 %v11459_v17, %s16206_s1  ;;  %v13525_v36 = vpop.permute.xlu0 %11260  ;;  %v11208_v17 = vunpack.i.h.bf16 %v13505_v23  ;;  %v1995_v23 = vsel %vm1988_vm1, %v1986_v16, %v11202_v13  ;;  %v1998_v25 = vsel %vm1997_vm2, %v1989_v15, %v11207_v14  ;;  %v11238_v62 = vunpack.i.h.bf16 %v13515_v31  ;;  %s16231_s1 = smov 16  }
 0x31a   :  { %v2000_v2 = vsel %vm1997_vm2, %v1991_v22, %v11212_v19  ;;  %v13622_v4 = vpop.permute.xlu1 %11365  ;;  %v2002_v29 = vsel %vm1997_vm2, %v1993_v51, %v11217_v53  ;;  %v11237_v27 = vunpack.i.l.bf16 %v13515_v31  ;;  %v2004_v3 = vsel %vm1997_vm2, %v1995_v23, %v11222_v58 }
 0x31b   :  { %v1999_v59 = vsel %vm1997_vm2, %v1990_v9, %v11208_v17  ;;  %v2007_v16 = vsel %vm2006_vm3, %v1998_v25, %v11227_v60  ;;  %v2010_v9 = vsel %vm2006_vm3, %v2001_v0, %v11233_v61  ;;  %v2009_v11 = vsel %vm2006_vm3, %v2000_v2, %v11232_v63 }
 0x31c   :  { %v2008_v8 = vsel %vm2006_vm3, %v1999_v59, %v11228_v21  ;;  %v11248_v13 = vunpack.i.h.bf16 %v13521_v34  ;;  %v2012_v15 = vsel %vm2006_vm3, %v2003_v5, %v11238_v62  ;;  %v11247_v31 = vunpack.i.l.bf16 %v13521_v34 }
 0x31d   :  { %v13529_v38 = vpop.permute.xlu0 %11265  ;;  %v11252_v22 = vunpack.i.l.bf16 %v13519_v33  ;;  %v2011_v30 = vsel %vm2006_vm3, %v2002_v29, %v11237_v27  ;;  %v11258_v14 = vunpack.i.h.bf16 %v13523_v35  ;;  %v11263_v19 = vunpack.i.h.bf16 %v13525_v36 }
 0x31e   :  { %v13642_v32 = vpop.permute.xlu1 %11380  ;;  %v2014_v51 = vsel %vm2006_vm3, %v2005_v6, %v11243_v10  ;;  %v2013_v34 = vsel %vm2006_vm3, %v2004_v3, %v11242_v18  ;;  %v11262_v52 = vunpack.i.l.bf16 %v13525_v36  ;;  %v11268_v33 = vunpack.i.h.bf16 %v13529_v38 }
 0x31f   :  { %v2017_v53 = vsel %vm2015_vm4, %v2008_v8, %v11248_v13  ;;  %v11267_v56 = vunpack.i.l.bf16 %v13529_v38  ;;  %v11272_v23 = vunpack.i.l.bf16 %v13527_v37  ;;  %v2016_v35 = vsel %vm2015_vm4, %v2007_v16, %v11247_v31 }
 0x320   :  { %v2019_v58 = vsel %vm2015_vm4, %v2010_v9, %v11253_v24  ;;  %v2018_v21 = vsel %vm2015_vm4, %v2009_v11, %v11252_v22  ;;  %v11278_v59 = vunpack.i.h.bf16 %v13531_v39  ;;  %v2021_v61 = vsel %vm2015_vm4, %v2012_v15, %v11258_v14 }
 0x321   :  { %v13533_v40 = vpop.permute.xlu0 %11280  ;;  %v2020_v38 = vsel %vm2015_vm4, %v2011_v30, %v11257_v28  ;;  %v2023_v63 = vsel %vm2015_vm4, %v2014_v51, %v11263_v19  ;;  %v11277_v37 = vunpack.i.l.bf16 %v13531_v39  ;;  %v2022_v25 = vsel %vm2015_vm4, %v2013_v34, %v11262_v52 }
 0x322   :  { %v13662_v60 = vpop.permute.xlu1 %11385  ;;  %v2026_v0 = vsel %vm2024_vm5, %v2017_v53, %v11268_v33  ;;  %v11283_v2 = vunpack.i.h.bf16 %v13533_v40  ;;  %v11282_v62 = vunpack.i.l.bf16 %v13533_v40  ;;  %v2025_v5 = vsel %vm2024_vm5, %v2016_v35, %v11267_v56 }
 0x323   :  { %v2028_v29 = vsel %vm2024_vm5, %v2019_v58, %v11273_v57  ;;  %v2027_v6 = vsel %vm2024_vm5, %v2018_v21, %v11272_v23  ;;  %v2030_v3 = vsel %vm2024_vm5, %v2021_v61, %v11278_v59  ;;  %v11293_v8 = vunpack.i.h.bf16 %v13535_v41 }
 0x324   :  { %v11292_v10 = vunpack.i.l.bf16 %v13535_v41  ;;  %v2029_v16 = vsel %vm2024_vm5, %v2020_v38, %v11277_v37  ;;  %v11298_v9 = vunpack.i.h.bf16 %v13539_v43  ;;  %v11297_v11 = vunpack.i.l.bf16 %v13539_v43 }
 0x325   :  { %v13537_v42 = vpop.permute.xlu0 %11285  ;;  %v2032_v15 = vsel %vm2024_vm5, %v2023_v63, %v11283_v2  ;;  %v2037_v43 = vsel %vm2033_vm6, %v2028_v29, %v11293_v8  ;;  %v11328_v33 = vunpack.i.h.bf16 %v13551_v49  ;;  %v11348_v35 = vunpack.i.h.bf16 %v13578_v12 }
 0x326   :  { %v11288_v27 = vunpack.i.h.bf16 %v13537_v42  ;;  %v11287_v39 = vunpack.i.l.bf16 %v13537_v42  ;;  %v2031_v42 = vsel %vm2024_vm5, %v2022_v25, %v11282_v62  ;;  %v2036_v28 = vsel %vm2033_vm6, %v2027_v6, %v11292_v10 }
 0x327   :  { %v13702_v34 = vsel %vm2033_vm6, %v2030_v3, %v11298_v9  ;;  %v13705_v52 = vsel %vm2033_vm6, %v2029_v16, %v11297_v11  ;;  %v11347_v58 = vunpack.i.l.bf16 %v13578_v12  ;;  %v11318_v59 = vunpack.i.h.bf16 %v13543_v45 }
 0x328   :  { %v2035_v24 = vsel %vm2033_vm6, %v2026_v0, %v11288_v27  ;;  %v2034_v14 = vsel %vm2033_vm6, %v2025_v5, %v11287_v39  ;;  %v11368_v61 = vunpack.i.h.bf16 %v13622_v4  ;;  %v11367_v38 = vunpack.i.l.bf16 %v13622_v4 }
 0x329   :  { %v13541_v44 = vpop.permute.xlu0 %11300  ;;  %v11388_v25 = vunpack.i.h.bf16 %v13662_v60  ;;  %v11387_v0 = vunpack.i.l.bf16 %v13662_v60 }
 0x32a   :  { %v11303_v13 = vunpack.i.h.bf16 %v13541_v44  ;;  %v11302_v31 = vunpack.i.l.bf16 %v13541_v44 }
 0x32b   :  { %v13682_v40 = vpop.permute.xlu1 %11400 }
 0x32c   :  { %v13712_v53 = vsel %vm2033_vm6, %v2031_v42, %v11302_v31 }
 0x32d   :  { %v13545_v46 = vpop.permute.xlu0 %11305 }
 0x32e   :  { %v11308_v41 = vunpack.i.h.bf16 %v13545_v46  ;;  %v11307_v22 = vunpack.i.l.bf16 %v13545_v46  ;;  %v13708_v46 = vsel %vm2033_vm6, %v2032_v15, %v11303_v13 }
 0x330   :  { %v2044_v56 = vsel %vm2042_vm7, %v2035_v24, %v11308_v41  ;;  %v2043_v57 = vsel %vm2042_vm7, %v2034_v14, %v11307_v22 }
 0x331   :  { %v13549_v48 = vpop.permute.xlu0 %11310 }
 0x332   :  { %v11313_v30 = vunpack.i.h.bf16 %v13549_v48  ;;  %v11312_v19 = vunpack.i.l.bf16 %v13549_v48  ;;  %v11327_v48 = vunpack.i.l.bf16 %v13551_v49  ;;  %v2053_v49 = vsel %vm2051_vm8, %v2044_v56, %v11328_v33 }
 0x333   :  { %v11406_v44 = vpop.permute.xlu1 %11405  ;;  %v2062_v29 = vsel %vm2060_vm9, %v2053_v49, %v11348_v35 }
 0x334   :  { %v2046_v23 = vsel %vm2042_vm7, %v2037_v43, %v11313_v30  ;;  %v2045_v21 = vsel %vm2042_vm7, %v2036_v28, %v11312_v19  ;;  %v2052_v2 = vsel %vm2051_vm8, %v2043_v57, %v11327_v48  ;;  %v11408_v62 = vunpack.i.h.bf16 %v11406_v44 }
 0x335   :  { %v13555_v54 = vpop.permute.xlu0 %11330  ;;  %v11407_v5 = vunpack.i.l.bf16 %v11406_v44  ;;  %v2061_v6 = vsel %vm2060_vm9, %v2052_v2, %v11347_v58  ;;  %v2071_v39 = vsel %vm2069_vm10, %v2062_v29, %v11368_v61  ;;  %v11317_v19 = vunpack.i.l.bf16 %v13543_v45 }
 0x336   :  { %v11333_v12 = vunpack.i.h.bf16 %v13555_v54  ;;  %v11332_v3 = vunpack.i.l.bf16 %v13555_v54  ;;  %v2070_v8 = vsel %vm2069_vm10, %v2061_v6, %v11367_v38  ;;  %v2080_v16 = vsel %vm2078_vm11, %v2071_v39, %v11388_v25 }
 0x337   :  { %v2079_v9 = vsel %vm2078_vm11, %v2070_v8, %v11387_v0  ;;  %v2089_v54 = vsel %vm2087_vm12, %v2080_v16, %v11408_v62  ;;  %v2048_v45 = vsel %vm2042_vm7, %v13702_v34, %v11318_v59  ;;  %v2047_v39 = vsel %vm2042_vm7, %v13705_v52, %v11317_v19 }
 0x338   :  { %v2088_v42 = vsel %vm2087_vm12, %v2079_v9, %v11407_v5  ;;  %v2055_v56 = vsel %vm2051_vm8, %v2046_v23, %v11333_v12  ;;  %v2054_v48 = vsel %vm2051_vm8, %v2045_v21, %v11332_v3 }
 0x339   :  { %v13576_v7 = vpop.permute.xlu0 %11335 }
 0x33a   :  { %v11338_v21 = vunpack.i.h.bf16 %v13576_v7 }
 0x33c   :  { %v2057_v9 = vsel %vm2051_vm8, %v2048_v45, %v11338_v21 }
 0x33d   :  { %v13600_v50 = vpop.permute.xlu0 %11350 }
 0x33e   :  { %v11353_v10 = vunpack.i.h.bf16 %v13600_v50  ;;  %v11352_v31 = vunpack.i.l.bf16 %v13600_v50 }
 0x340   :  { %v2063_v58 = vsel %vm2060_vm9, %v2054_v48, %v11352_v31 }
 0x341   :  { %v13620_v26 = vpop.permute.xlu0 %11355 }
 0x342   :  { %v11358_v62 = vunpack.i.h.bf16 %v13620_v26  ;;  %v11357_v5 = vunpack.i.l.bf16 %v13620_v26 }
 0x345   :  { %v13640_v17 = vpop.permute.xlu0 %11370 }
 0x346   :  { %v11373_v22 = vunpack.i.h.bf16 %v13640_v17  ;;  %v11372_v30 = vunpack.i.l.bf16 %v13640_v17  ;;  %v2064_v17 = vsel %vm2060_vm9, %v2055_v56, %v11353_v10 }
 0x348   :  { %v2072_v23 = vsel %vm2069_vm10, %v2063_v58, %v11372_v30  ;;  %v11342_v30 = vunpack.i.l.bf16 %v13557_v55 }
 0x349   :  { %v13660_v36 = vpop.permute.xlu0 %11375 }
 0x34d   :  { %v13680_v18 = vpop.permute.xlu0 %11390 }
 0x34e   :  { %v11393_v44 = vunpack.i.h.bf16 %v13680_v18  ;;  %v11392_v50 = vunpack.i.l.bf16 %v13680_v18  ;;  %v11323_v18 = vunpack.i.h.bf16 %v13547_v47 }
 0x350   :  { %v2081_v25 = vsel %vm2078_vm11, %v2072_v23, %v11392_v50 }
 0x351   :  { %v13699_v51 = vpop.permute.xlu0 %11395 }
 0x352   :  { %v11398_v8 = vunpack.i.h.bf16 %v13699_v51  ;;  %v11397_v10 = vunpack.i.l.bf16 %v13699_v51  ;;  %v2050_v51 = vsel %vm2042_vm7, %v13708_v46, %v11323_v18 }
 0x353   :  { %v11421_v37 = vpop.permute.xlu1 %11420 }
 0x354   :  { %v11423_v4 = vunpack.i.h.bf16 %v11421_v37  ;;  %v11422_v27 = vunpack.i.l.bf16 %v11421_v37  ;;  %v2073_v37 = vsel %vm2069_vm10, %v2064_v17, %v11373_v22 }
 0x355   :  { %v11411_v63 = vpop.permute.xlu0 %11410  ;;  %v2082_v49 = vsel %vm2078_vm11, %v2073_v37, %v11393_v44 }
 0x356   :  { %v2097_v41 = vsel %vm16221_vm13, %v2088_v42, %v11422_v27  ;;  %v2098_v24 = vsel %vm16221_vm13, %v2089_v54, %v11423_v4  ;;  %v11413_v57 = vunpack.i.h.bf16 %v11411_v63  ;;  %v11412_v35 = vunpack.i.l.bf16 %v11411_v63 }
 0x357   :  { %v11337_v63 = vunpack.i.l.bf16 %v13576_v7  ;;  %v11378_v7 = vunpack.i.h.bf16 %v13660_v36  ;;  %v11377_v4 = vunpack.i.l.bf16 %v13660_v36  ;;  %v2066_v42 = vsel %vm2060_vm9, %v2057_v9, %v11358_v62 }
 0x358   :  { %v2091_v2 = vsel %vm2087_vm12, %v2082_v49, %v11413_v57  ;;  %v2090_v12 = vsel %vm2087_vm12, %v2081_v25, %v11412_v35  ;;  %v11382_v57 = vunpack.i.l.bf16 %v13642_v32 }
 0x359   :  { %v13734_v60 = vpop.permute.xlu0 %11415 }
 0x35a   :  { %v11417_v36 = vunpack.i.l.bf16 %v13734_v60 }
 0x35d   :  { %v11426_v14 = vpop.permute.xlu0 %11425 }
 0x35e   :  { %v11428_v61 = vunpack.i.h.bf16 %v11426_v14  ;;  %v11427_v38 = vunpack.i.l.bf16 %v11426_v14 }
 0x360   :  { %v2100_v29 = vsel %vm16221_vm13, %v2091_v2, %v11428_v61  ;;  %v2099_v6 = vsel %vm16221_vm13, %v2090_v12, %v11427_v38  ;;  %v11403_v38 = vunpack.i.h.bf16 %v13682_v40 }
 0x373   :  { %v11431_v11 = vpop.permute.xlu1 %11430 }
 0x374   :  { %v11433_v13 = vunpack.i.h.bf16 %v11431_v11  ;;  %v11432_v15 = vunpack.i.l.bf16 %v11431_v11  ;;  %v2056_v11 = vsel %vm2051_vm8, %v2047_v39, %v11337_v63  ;;  %v9883_v39 = vld [vmem:[%s16175_s3] ss:$0 sm:$0xff] }
 0x375   :  { %v2065_v54 = vsel %vm2060_vm9, %v2056_v11, %v11357_v5 }
 0x376   :  { %v2106_v43 = vsel %vm16216_vm14, %v2097_v41, %v11432_v15  ;;  %v2107_v28 = vsel %vm16216_vm14, %v2098_v24, %v11433_v13  ;;  %v11418_v13 = vunpack.i.h.bf16 %v13734_v60  ;;  %v11322_v41 = vunpack.i.l.bf16 %v13547_v47 }
 0x377   :  { %v2114_v33 = vpack.c.bf16 %v2107_v28, %v2106_v43  ;;  %v11436_v15 = vpop.permute.xlu1 %11435  ;;  %v2075_v24 = vsel %vm2069_vm10, %v2066_v42, %v11378_v7  ;;  %v2074_v22 = vsel %vm2069_vm10, %v2065_v54, %v11377_v4  ;;  %v11343_v60 = vunpack.i.h.bf16 %v13557_v55 }
 0x378   :  { %v2084_v14 = vsel %vm2078_vm11, %v2075_v24, %v11398_v8  ;;  %v2083_v43 = vsel %vm2078_vm11, %v2074_v22, %v11397_v10  ;;  %v11363_v47 = vunpack.i.h.bf16 %v13602_v20  ;;  %v11383_v55 = vunpack.i.h.bf16 %v13642_v32 }
 0x379   :  { %11007 = vmatprep.mubr.msk.bf16.mxu1 %vm2157_vm15, %v2114_v33  ;;  %v2093_v19 = vsel %vm2087_vm12, %v2084_v14, %v11418_v13  ;;  %v2092_v44 = vsel %vm2087_vm12, %v2083_v43, %v11417_v36  ;;  %v11362_v33 = vunpack.i.l.bf16 %v13602_v20  ;;  %v2049_v61 = vsel %vm2042_vm7, %v13712_v53, %v11322_v41 }
 0x37a   :  { %v11402_v20 = vunpack.i.l.bf16 %v13682_v40  ;;  %v2059_v18 = vsel %vm2051_vm8, %v2050_v51, %v11343_v60  ;;  %v2058_v37 = vsel %vm2051_vm8, %v2049_v61, %v11342_v30  ;;  %v11438_v23 = vunpack.i.h.bf16 %v11436_v15  ;;  %v12204_v61 = vld [vmem:[%s16176_s4 + $0x40] sm:$0xff]  }
 0x37b   :  { %v11441_v0 = vpop.permute.xlu0 %11440  ;;  %v11451_v35 = vpop.permute.xlu1 %11450  ;;  %v11437_v21 = vunpack.i.l.bf16 %v11436_v15  ;;  %v2068_v32 = vsel %vm2060_vm9, %v2059_v18, %v11363_v47  ;;  %v2067_v63 = vsel %vm2060_vm9, %v2058_v37, %v11362_v33  ;;  %v12208_v18 = vld [vmem:[%s16176_s4 + $0x60] sm:$0xff]   ;;  %v12209_v37 = vld [vmem:[%s16176_s4 + $0x68] sm:$0xff]  }
 0x37c   :  { %v11443_v34 = vunpack.i.h.bf16 %v11441_v0  ;;  %v11442_v59 = vunpack.i.l.bf16 %v11441_v0  ;;  %v11453_v49 = vunpack.i.h.bf16 %v11451_v35  ;;  %v11452_v25 = vunpack.i.l.bf16 %v11451_v35  ;;  %v12201_v35 = vld [vmem:[%s16176_s4 + $0x28] sm:$0xff]  }
 0x37d   :  { %v2077_v53 = vsel %vm2069_vm10, %v2068_v32, %v11383_v55  ;;  %v2076_v0 = vsel %vm2069_vm10, %v2067_v63, %v11382_v57  ;;  %v12199_v55 = vld [vmem:[%s16176_s4 + $0x18] sm:$0xff]   ;;  %v12200_v57 = vld [vmem:[%s16176_s4 + $0x20] sm:$0xff]  }
 0x37e   :  { %v2109_v27 = vsel %vm16216_vm14, %v2100_v29, %v11443_v34  ;;  %v2108_v3 = vsel %vm16216_vm14, %v2099_v6, %v11442_v59  ;;  %v2086_v40 = vsel %vm2078_vm11, %v2077_v53, %v11403_v38  ;;  %v2085_v2 = vsel %vm2078_vm11, %v2076_v0, %v11402_v20  ;;  %v12205_v38 = vld [vmem:[%s16176_s4 + $0x48] sm:$0xff]   ;;  %v12206_v20 = vld [vmem:[%s16176_s4 + $0x50] sm:$0xff]   ;;  %v12212_v32 = vld [vmem:[%s16177_s5 + $0x40] sm:$0xff]  }
 0x37f   :  { %v11446_v26 = vpop.permute.xlu0 %11445  ;;  %v2115_v16 = vpack.c.bf16 %v2109_v27, %v2108_v3  ;;  %v2095_v34 = vsel %vm2087_vm12, %v2086_v40, %v11438_v23  ;;  %v2094_v59 = vsel %vm2087_vm12, %v2085_v2, %v11437_v21  ;;  %v12196_v3 = vld [vmem:[%s16176_s4] sm:$0xff]   ;;  %v12210_v23 = vld [vmem:[%s16176_s4 + $0x70] sm:$0xff]   ;;  %v12211_v21 = vld [vmem:[%s16176_s4 + $0x78] sm:$0xff]  }
 0x380   :  { %v11448_v52 = vunpack.i.h.bf16 %v11446_v26  ;;  %v11447_v31 = vunpack.i.l.bf16 %v11446_v26  ;;  %v2103_v29 = vsel %vm16221_vm13, %v2094_v59, %v11452_v25  ;;  %v2104_v6 = vsel %vm16221_vm13, %v2095_v34, %v11453_v49  ;;  %v12213_v63 = vld [vmem:[%s16177_s5] sm:$0xff]   ;;  %v12214_v49 = vld [vmem:[%s16177_s5 + $0x48] sm:$0xff]   ;;  %v12216_v53 = vld [vmem:[%s16177_s5 + $0x50] sm:$0xff]  }
 0x381   :  { %11008 = vmatmul.mubr.msk.bf16.vlgmr.msra.gmra.mrb[0].mxu1 %vm2157_vm15, %v2115_v16  ;;  %v12215_v25 = vld [vmem:[%s16177_s5 + $0x8] sm:$0xff]   ;;  %v12217_v0 = vld [vmem:[%s16177_s5 + $0x10] sm:$0xff]   ;;  %v12218_v40 = vld [vmem:[%s16177_s5 + $0x58] sm:$0xff]  }
 0x382   :  { %v2102_v56 = vsel %vm16221_vm13, %v2093_v19, %v11448_v52  ;;  %v2101_v48 = vsel %vm16221_vm13, %v2092_v44, %v11447_v31  ;;  %v12219_v2 = vld [vmem:[%s16177_s5 + $0x18] sm:$0xff]   ;;  %vm12861_vm13 = vmmov 0  }
 0x383   :  { %v11456_v28 = vpop.permute.xlu0 %11455 }
 0x384   :  { %v11458_v46 = vunpack.i.h.bf16 %v11456_v28  ;;  %v11457_v50 = vunpack.i.l.bf16 %v11456_v28 }
 0x386   :  { %v2111_v17 = vsel %vm16216_vm14, %v2102_v56, %v11458_v46  ;;  %v2110_v58 = vsel %vm16216_vm14, %v2101_v48, %v11457_v50  ;;  %v12197_v56 = vld [vmem:[%s16176_s4 + $0x8] sm:$0xff]   ;;  %v12198_v48 = vld [vmem:[%s16176_s4 + $0x10] sm:$0xff]  }
 0x387   :  { %v2116_v45 = vpack.c.bf16 %v2111_v17, %v2110_v58  ;;  %v12202_v17 = vld [vmem:[%s16176_s4 + $0x30] sm:$0xff]   ;;  %v12203_v58 = vld [vmem:[%s16176_s4 + $0x38] sm:$0xff]  }
 0x389   :  { %11011 = vmatprep.mubr.msk.bf16.mxu1 %vm2157_vm15, %v2116_v45  ;;  %v12207_v45 = vld [vmem:[%s16176_s4 + $0x58] sm:$0xff]  }
 0x38b   :  { %v11461_v12 = vpop.permute.xlu1 %11460 }
 0x38c   :  { %v11463_v62 = vunpack.i.h.bf16 %v11461_v12  ;;  %v11462_v5 = vunpack.i.l.bf16 %v11461_v12  ;;  %v12220_v12 = vld [vmem:[%s16177_s5 + $0x60] sm:$0xff]  }
 0x38e   :  { %v2113_v7 = vsel %vm16216_vm14, %v2104_v6, %v11463_v62  ;;  %v2112_v4 = vsel %vm16216_vm14, %v2103_v29, %v11462_v5  ;;  %v12221_v6 = vld [vmem:[%s16177_s5 + $0x20] sm:$0xff]   ;;  %vm16222_vm14 = vcmask 785408  }
 0x38f   :  { %v2117_v27 = vpack.c.bf16 %v2113_v7, %v2112_v4 }
 0x391   :  { %11012 = vmatmul.mubr.msk.bf16.gmra.mrb[4].mxu1 %vm2157_vm15, %v2117_v27 }
 0x392   :  { %11023 = vmatprep.mubr.msk.bf16.mxu1 %vm2157_vm15, %v12196_v3  ;;  %v12222_v3 = vld [vmem:[%s16177_s5 + $0x68] sm:$0xff]  }
 0x454   :  { %v11009_v8 = vpop.f32.mrb[0].mxu1 }
 0x455   :  { %v2213_v10 = vadd.f32 %v11009_v8, %v9883_v39  ;;  %v2204_v26 = vpop.f32.mrb[1].mxu1  ;;  %v12224_v8 = vld [vmem:[%s16177_s5 + $0x70] sm:$0xff]  }
 0x456   :  { %v2205_v16 = vadd.f32 %v9883_v39, %v2204_v26  ;;  %v11010_v9 = vpop.f32.mrb[2].mxu1 }
 0x457   :  { %v2216_v11 = vadd.f32 %v11010_v9, %v9883_v39  ;;  %v2207_v13 = vpop.f32.mrb[3].mxu1  ;;  %v2237_v15 = vmax.f32 %v2213_v10, 0.0 }
 0x458   :  { %v2208_v36 = vadd.f32 %v9883_v39, %v2207_v13  ;;  %v2235_v54 = vmax.f32 %v2205_v16, 0.0  ;;  %v12225_v13 = vld [vmem:[%s16177_s5 + $0x30] sm:$0xff]  }
 0x459   :  { %v2238_v42 = vmax.f32 %v2216_v11, 0.0 }
 0x45a   :  { %v2236_v52 = vmax.f32 %v2208_v36, 0.0 }
 0x45b   :  { %v2244_v31 = vpack.c.bf16 %v2238_v42, %v2237_v15 }
 0x45c   :  { %v2243_v51 = vpack.c.bf16 %v2236_v52, %v2235_v54  ;;  %v12226_v54 = vld [vmem:[%s16177_s5 + $0x78] sm:$0xff]  }
 0x45d   :  { %v12227_v52 = vld [vmem:[%s16177_s5 + $0x38] sm:$0xff]  }
 0x45e   :  { %11015 = vmatprep.subr.bf16.mxu1 %v2243_v51 }
 0x45f   :  { %11016 = vmatpush3.bf16.msra.mxu1 %v2243_v51 }
 0x460   :  { %11017 = vmatprep.subr.bf16.mxu1 %v2244_v31 }
 0x463   :  { %11018 = vmatpush3.bf16.msra.mxu1 %v2244_v31 }
 0x464   :  { %v11013_v41 = vpop.f32.mrb[4].mxu1 }
 0x465   :  { %v2229_v24 = vadd.f32 %v11013_v41, %v9883_v39  ;;  %v2220_v22 = vpop.f32.mrb[5].mxu1  ;;  %v12228_v41 = vld [vmem:[%s16177_s5 + $0xc0] sm:$0xff]  }
 0x466   :  { %v2221_v60 = vadd.f32 %v9883_v39, %v2220_v22  ;;  %v11014_v30 = vpop.f32.mrb[6].mxu1 }
 0x467   :  { %v2232_v14 = vadd.f32 %v11014_v30, %v9883_v39  ;;  %v2223_v43 = vpop.f32.mrb[7].mxu1  ;;  %v2241_v19 = vmax.f32 %v2229_v24, 0.0 }
 0x468   :  { %v2224_v28 = vadd.f32 %v9883_v39, %v2223_v43  ;;  %v2239_v46 = vmax.f32 %v2221_v60, 0.0  ;;  %v12223_v39 = vld [vmem:[%s16177_s5 + $0x28] sm:$0xff]  }
 0x469   :  { %v2242_v44 = vmax.f32 %v2232_v14, 0.0 }
 0x46a   :  { %v2240_v50 = vmax.f32 %v2224_v28, 0.0 }
 0x46b   :  { %v2246_v47 = vpack.c.bf16 %v2242_v44, %v2241_v19 }
 0x46c   :  { %v2245_v33 = vpack.c.bf16 %v2240_v50, %v2239_v46 }
 0x46e   :  { %11019 = vmatprep.subr.bf16.mxu1 %v2245_v33 }
 0x46f   :  { %11020 = vmatpush3.bf16.msra.mxu1 %v2245_v33 }
 0x470   :  { %11021 = vmatprep.subr.bf16.mxu1 %v2246_v47 }
 0x473   :  { %11022 = vmatpush3.bf16.msra.mxu1 %v2246_v47 }
 0x474   :  { %10517 = vmatprep.subr.bf16.mxu1 %v12212_v32 }
 0x476   :  { %11024 = vmatmul.mubr.msk.bf16.vlgmr.msra.gmra.mrb[8].mxu1 %vm2157_vm15, %v12197_v56 }
 0x477   :  { %11027 = vmatprep.mubr.msk.bf16.mxu1 %vm2157_vm15, %v12198_v48  ;;  %10518 = vmatpush3.bf16.msra.mxu1 %v12213_v63 }
 0x478   :  { %10519 = vmatprep.subr.bf16.mxu1 %v12214_v49 }
 0x47b   :  { %10520 = vmatpush3.bf16.msra.mxu1 %v12215_v25 }
 0x47c   :  { %10521 = vmatprep.subr.bf16.mxu1 %v12216_v53 }
 0x47e   :  { %11028 = vmatmul.mubr.msk.bf16.gmra.mrb[12].mxu1 %vm2157_vm15, %v12199_v55 }
 0x47f   :  { %11031 = vmatprep.mubr.msk.bf16.mxu1 %vm2157_vm15, %v12200_v57  ;;  %10522 = vmatpush3.bf16.msra.mxu1 %v12217_v0 }
 0x480   :  { %10523 = vmatprep.subr.bf16.mxu1 %v12218_v40 }
 0x483   :  { %10524 = vmatpush3.bf16.msra.mxu1 %v12219_v2 }
 0x484   :  { %10525 = vmatprep.subr.bf16.mxu1 %v12220_v12 }
 0x486   :  { %11032 = vmatmul.mubr.msk.bf16.gmra.mrb[16].mxu1 %vm2157_vm15, %v12201_v35 }
 0x487   :  { %11035 = vmatprep.mubr.msk.bf16.mxu1 %vm2157_vm15, %v12202_v17  ;;  %10526 = vmatpush3.bf16.msra.mxu1 %v12221_v6 }
 0x488   :  { %10527 = vmatprep.subr.bf16.mxu1 %v12222_v3 }
 0x48b   :  { %10528 = vmatpush3.bf16.msra.mxu1 %v12223_v39 }
 0x48c   :  { %10529 = vmatprep.subr.bf16.mxu1 %v12224_v8 }
 0x48e   :  { %11036 = vmatmul.mubr.msk.bf16.gmra.mrb[20].mxu1 %vm2157_vm15, %v12203_v58 }
 0x48f   :  { %11039 = vmatprep.mubr.msk.bf16.mxu1 %vm2157_vm15, %v12204_v61  ;;  %10530 = vmatpush3.bf16.msra.mxu1 %v12225_v13 }
 0x490   :  { %10531 = vmatprep.subr.bf16.mxu1 %v12226_v54 }
 0x493   :  { %10532 = vmatpush3.bf16.msra.mxu1 %v12227_v52 }
 0x494   :  { %10539 = vmatprep.subr.bf16.mxu1 %v12228_v41  ;;  %v12232_v41 = vld [vmem:[%s16177_s5 + $0xd0] sm:$0xff]  }
 0x496   :  { %11040 = vmatmul.mubr.msk.bf16.gmra.mrb[24].mxu1 %vm2157_vm15, %v12205_v38 }
 0x497   :  { %11043 = vmatprep.mubr.msk.bf16.mxu1 %vm2157_vm15, %v12206_v20 }
 0x49e   :  { %11044 = vmatmul.mubr.msk.bf16.gmra.mrb[28].mxu1 %vm2157_vm15, %v12207_v45 }
 0x49f   :  { %11047 = vmatprep.mubr.msk.bf16.mxu1 %vm2157_vm15, %v12208_v18 }
 0x4a6   :  { %11048 = vmatmul.mubr.msk.bf16.gmra.mrb[32].mxu1 %vm2157_vm15, %v12209_v37 }
 0x4a7   :  { %11051 = vmatprep.mubr.msk.bf16.mxu1 %vm2157_vm15, %v12210_v23 }
 0x4ae   :  { %11052 = vmatmul.mubr.msk.bf16.gmra.mrb[36].mxu1 %vm2157_vm15, %v12211_v21 }
 0x549   :  { %v11025_v34 = vpop.f32.mrb[8].mxu1 }
 0x54a   :  { %v13919_v59 = vpop.f32.mrb[9].mxu1 }
 0x54b   :  { %v11026_v62 = vpop.f32.mrb[10].mxu1 }
 0x54c   :  { %v11464_v5 = vpack.i.bf16 %v11026_v62, %v11025_v34  ;;  %v13921_v29 = vpop.f32.mrb[11].mxu1 }
 0x54e   :  { %11465 = vrot.lane.b32.xlu1 %v11464_v5, %s12850_s25 }
 0x551   :  { %v11029_v7 = vpop.f32.mrb[12].mxu1 }
 0x552   :  { %v2457_v4 = vpop.f32.mrb[13].mxu1 }
 0x553   :  { %v11030_v27 = vpop.f32.mrb[14].mxu1 }
 0x554   :  { %v11489_v10 = vpack.i.bf16 %v11030_v27, %v11029_v7  ;;  %v2460_v26 = vpop.f32.mrb[15].mxu1 }
 0x555   :  { %v11469_v16 = vpack.i.bf16 %v2460_v26, %v2457_v4 }
 0x557   :  { %11470 = vrot.lane.b32.xlu1 %v11469_v16, %s12858_s29 }
 0x559   :  { %v11033_v9 = vpop.f32.mrb[16].mxu1 }
 0x55a   :  { %v13937_v11 = vpop.f32.mrb[17].mxu1 }
 0x55b   :  { %11490 = vrot.lane.b32.xlu1 %v11489_v10, %s12859_s18  ;;  %v11034_v36 = vpop.f32.mrb[18].mxu1 }
 0x55c   :  { %v11474_v15 = vpack.i.bf16 %v11034_v36, %v11033_v9  ;;  %v13943_v42 = vpop.f32.mrb[19].mxu1 }
 0x55e   :  { %11475 = vrot.lane.b32.xlu0 %v11474_v15, %s12850_s25 }
 0x561   :  { %v11037_v31 = vpop.f32.mrb[20].mxu1 }
 0x562   :  { %v2489_v51 = vpop.f32.mrb[21].mxu1 }
 0x563   :  { %v11038_v24 = vpop.f32.mrb[22].mxu1 }
 0x564   :  { %v11484_v22 = vpack.i.bf16 %v11038_v24, %v11037_v31  ;;  %v2492_v60 = vpop.f32.mrb[23].mxu1  ;;  %v12229_v31 = vld [vmem:[%s16177_s5 + $0x80] sm:$0xff]  }
 0x565   :  { %v11479_v30 = vpack.i.bf16 %v2492_v60, %v2489_v51  ;;  %v12231_v51 = vld [vmem:[%s16177_s5 + $0x88] sm:$0xff]  }
 0x567   :  { %11480 = vrot.lane.b32.xlu0 %v11479_v30, %s12858_s29 }
 0x569   :  { %v11041_v14 = vpop.f32.mrb[24].mxu1 }
 0x56a   :  { %v13956_v43 = vpop.f32.mrb[25].mxu1 }
 0x56b   :  { %11485 = vrot.lane.b32.xlu0 %v11484_v22, %s12859_s18  ;;  %v11042_v28 = vpop.f32.mrb[26].mxu1  ;;  %v12233_v22 = vld [vmem:[%s16177_s5 + $0x90] sm:$0xff]  }
 0x56c   :  { %v11494_v19 = vpack.i.bf16 %v11042_v28, %v11041_v14  ;;  %v13959_v44 = vpop.f32.mrb[27].mxu1  ;;  %v12234_v14 = vld [vmem:[%s16177_s5 + $0xd8] sm:$0xff]  }
 0x56e   :  { %11495 = vrot.lane.b32.xlu1 %v11494_v19, %s12850_s25 }
 0x571   :  { %v11045_v46 = vpop.f32.mrb[28].mxu1 }
 0x572   :  { %v2521_v50 = vpop.f32.mrb[29].mxu1 }
 0x573   :  { %v11046_v47 = vpop.f32.mrb[30].mxu1 }
 0x574   :  { %v11519_v33 = vpack.i.bf16 %v11046_v47, %v11045_v46  ;;  %v2524_v56 = vpop.f32.mrb[31].mxu1 }
 0x575   :  { %v11499_v48 = vpack.i.bf16 %v2524_v56, %v2521_v50  ;;  %v12235_v50 = vld [vmem:[%s16177_s5 + $0x98] sm:$0xff]  }
 0x577   :  { %11500 = vrot.lane.b32.xlu1 %v11499_v48, %s12858_s29 }
 0x579   :  { %v11049_v55 = vpop.f32.mrb[32].mxu1 }
 0x57a   :  { %v13963_v57 = vpop.f32.mrb[33].mxu1 }
 0x57b   :  { %11520 = vrot.lane.b32.xlu1 %v11519_v33, %s12859_s18  ;;  %v11050_v35 = vpop.f32.mrb[34].mxu1 }
 0x57c   :  { %v11504_v17 = vpack.i.bf16 %v11050_v35, %v11049_v55  ;;  %v13966_v58 = vpop.f32.mrb[35].mxu1  ;;  %v12236_v55 = vld [vmem:[%s16177_s5 + $0xe0] sm:$0xff]  }
 0x57e   :  { %11505 = vrot.lane.b32.xlu0 %v11504_v17, %s12850_s25 }
 0x581   :  { %v11053_v61 = vpop.f32.mrb[36].mxu1 }
 0x582   :  { %v2553_v38 = vpop.f32.mrb[37].mxu1 }
 0x583   :  { %v11054_v20 = vpop.f32.mrb[38].mxu1 }
 0x584   :  { %v11514_v45 = vpack.i.bf16 %v11054_v20, %v11053_v61  ;;  %v2556_v18 = vpop.f32.mrb[39].mxu1 }
 0x585   :  { %v11509_v37 = vpack.i.bf16 %v2556_v18, %v2553_v38  ;;  %v12239_v18 = vld [vmem:[%s16177_s5 + $0xa8] sm:$0xff]  }
 0x587   :  { %11510 = vrot.lane.b32.xlu0 %v11509_v37, %s12858_s29  ;;  %v12240_v37 = vld [vmem:[%s16177_s5 + $0xf0] sm:$0xff]  }
 0x58b   :  { %11515 = vrot.lane.b32.xlu0 %v11514_v45, %s12859_s18 }
 0x5c0   :  { %v11466_v23 = vpop.permute.xlu1 %11465 }
 0x5c1   :  { %v11468_v32 = vunpack.i.h.bf16 %v11466_v23  ;;  %v11467_v63 = vunpack.i.l.bf16 %v11466_v23 }
 0x5c3   :  { %v2664_v0 = vsel %vm2042_vm7, %v13919_v59, %v11467_v63  ;;  %v2665_v40 = vsel %vm2042_vm7, %v13921_v29, %v11468_v32 }
 0x5c9   :  { %v11471_v21 = vpop.permute.xlu1 %11470 }
 0x5ca   :  { %v11473_v49 = vunpack.i.h.bf16 %v11471_v21  ;;  %v11472_v25 = vunpack.i.l.bf16 %v11471_v21  ;;  %v12241_v21 = vld [vmem:[%s16177_s5 + $0xb0] sm:$0xff]  }
 0x5cc   :  { %v2667_v34 = vsel %vm2157_vm15, %v2665_v40, %v11473_v49  ;;  %v2666_v62 = vsel %vm2157_vm15, %v2664_v0, %v11472_v25  ;;  %v12242_v49 = vld [vmem:[%s16177_s5 + $0xf8] sm:$0xff]  }
 0x5cd   :  { %v11491_v53 = vpop.permute.xlu1 %11490  ;;  %v12243_v40 = vld [vmem:[%s16177_s5 + $0xb8] sm:$0xff]  }
 0x5ce   :  { %v11493_v2 = vunpack.i.h.bf16 %v11491_v53  ;;  %v11492_v12 = vunpack.i.l.bf16 %v11491_v53 }
 0x5d0   :  { %v2669_v5 = vsel %vm16222_vm14, %v2666_v62, %v11492_v12  ;;  %v2670_v6 = vsel %vm16222_vm14, %v2667_v34, %v11493_v2  ;;  %v11476_v4 = vpop.permute.xlu0 %11475 }
 0x5d1   :  { %v2689_v7 = vpack.c.bf16 %v2670_v6, %v2669_v5  ;;  %v11478_v3 = vunpack.i.h.bf16 %v11476_v4  ;;  %v11477_v39 = vunpack.i.l.bf16 %v11476_v4 }
 0x5d3   :  { %v2671_v29 = vsel %vm2042_vm7, %v13937_v11, %v11477_v39  ;;  %v2672_v26 = vsel %vm2042_vm7, %v13943_v42, %v11478_v3  ;;  %v12230_v11 = vld [vmem:[%s16177_s5 + $0xc8] sm:$0xff]  }
 0x5d9   :  { %v11481_v27 = vpop.permute.xlu0 %11480 }
 0x5da   :  { %v11483_v8 = vunpack.i.h.bf16 %v11481_v27  ;;  %v11482_v59 = vunpack.i.l.bf16 %v11481_v27 }
 0x5dc   :  { %v2673_v13 = vsel %vm2157_vm15, %v2671_v29, %v11482_v59  ;;  %v2674_v36 = vsel %vm2157_vm15, %v2672_v26, %v11483_v8  ;;  %v9924_v29 = vld [vmem:[%s16178_s6] ss:$0 sm:$0xff] }
 0x5dd   :  { %v11486_v10 = vpop.permute.xlu0 %11485 }
 0x5de   :  { %v11488_v16 = vunpack.i.h.bf16 %v11486_v10  ;;  %v11487_v9 = vunpack.i.l.bf16 %v11486_v10 }
 0x5e0   :  { %v2675_v15 = vsel %vm16222_vm14, %v2673_v13, %v11487_v9  ;;  %v2676_v54 = vsel %vm16222_vm14, %v2674_v36, %v11488_v16  ;;  %v11496_v42 = vpop.permute.xlu1 %11495 }
 0x5e1   :  { %v2690_v52 = vpack.c.bf16 %v2676_v54, %v2675_v15  ;;  %v11498_v60 = vunpack.i.h.bf16 %v11496_v42  ;;  %v11497_v30 = vunpack.i.l.bf16 %v11496_v42 }
 0x5e3   :  { %2988 = vmatprep.mubr.bf16.mxu1 %v2690_v52  ;;  %v2677_v47 = vsel %vm2042_vm7, %v13956_v43, %v11497_v30  ;;  %v2678_v33 = vsel %vm2042_vm7, %v13959_v44, %v11498_v60  ;;  %v12237_v43 = vld [vmem:[%s16177_s5 + $0xa0] sm:$0xff]   ;;  %v12238_v44 = vld [vmem:[%s16177_s5 + $0xe8] sm:$0xff]   ;;  %v12247_v60 = vld [vmem:[%s16179_s7 + $0x18] sm:$0xff]  }
 0x5e4   :  { %2989 = vmatmul.mubr.bf16.vlgmr.msra.gmra.mrb[40].mxu1 %v2689_v7  ;;  %v12248_v30 = vld [vmem:[%s16180_s8 + $0x40] sm:$0xff]  }
 0x5e5   :  { %10540 = vmatpush3.bf16.msra.mxu1 %v12229_v31 }
 0x5e6   :  { %10541 = vmatprep.subr.bf16.mxu1 %v12230_v11 }
 0x5e9   :  { %10542 = vmatpush3.bf16.msra.mxu1 %v12231_v51  ;;  %v11501_v24 = vpop.permute.xlu1 %11500 }
 0x5ea   :  { %10543 = vmatprep.subr.bf16.mxu1 %v12232_v41  ;;  %v11503_v28 = vunpack.i.h.bf16 %v11501_v24  ;;  %v11502_v19 = vunpack.i.l.bf16 %v11501_v24  ;;  %v12245_v24 = vld [vmem:[%s16179_s7 + $0x8] sm:$0xff]  }
 0x5ec   :  { %v2680_v35 = vsel %vm2157_vm15, %v2678_v33, %v11503_v28  ;;  %v2679_v17 = vsel %vm2157_vm15, %v2677_v47, %v11502_v19  ;;  %v12250_v28 = vld [vmem:[%s16180_s8 + $0x48] sm:$0xff]   ;;  %v12254_v47 = vld [vmem:[%s16180_s8 + $0x58] sm:$0xff]  }
 0x5ed   :  { %10544 = vmatpush3.bf16.msra.mxu1 %v12233_v22  ;;  %v11521_v46 = vpop.permute.xlu1 %11520  ;;  %v12246_v22 = vld [vmem:[%s16179_s7 + $0x10] sm:$0xff]   ;;  %v12251_v19 = vld [vmem:[%s16180_s8 + $0x8] sm:$0xff]   ;;  %v12255_v33 = vld [vmem:[%s16180_s8 + $0x18] sm:$0xff]  }
 0x5ee   :  { %v11523_v56 = vunpack.i.h.bf16 %v11521_v46  ;;  %v11522_v48 = vunpack.i.l.bf16 %v11521_v46  ;;  %10545 = vmatprep.subr.bf16.mxu1 %v12234_v14  ;;  %v12249_v14 = vld [vmem:[%s16180_s8] sm:$0xff]   ;;  %v12252_v46 = vld [vmem:[%s16180_s8 + $0x50] sm:$0xff]  }
 0x5f0   :  { %v2681_v61 = vsel %vm16222_vm14, %v2679_v17, %v11522_v48  ;;  %v2682_v38 = vsel %vm16222_vm14, %v2680_v35, %v11523_v56  ;;  %v11506_v45 = vpop.permute.xlu0 %11505  ;;  %v12256_v56 = vld [vmem:[%s16180_s8 + $0x60] sm:$0xff]   ;;  %v12259_v35 = vld [vmem:[%s16180_s8 + $0x28] sm:$0xff]   ;;  %v12260_v17 = vld [vmem:[%s16180_s8 + $0x70] sm:$0xff]  }
 0x5f1   :  { %v2691_v20 = vpack.c.bf16 %v2682_v38, %v2681_v61  ;;  %10546 = vmatpush3.bf16.msra.mxu1 %v12235_v50  ;;  %v11508_v32 = vunpack.i.h.bf16 %v11506_v45  ;;  %v11507_v63 = vunpack.i.l.bf16 %v11506_v45  ;;  %v12253_v50 = vld [vmem:[%s16180_s8 + $0x10] sm:$0xff]   ;;  %v12257_v48 = vld [vmem:[%s16180_s8 + $0x20] sm:$0xff]   ;;  %v12262_v38 = vld [vmem:[%s16180_s8 + $0x78] sm:$0xff]  }
 0x5f2   :  { %10547 = vmatprep.subr.bf16.mxu1 %v12236_v55  ;;  %v12258_v55 = vld [vmem:[%s16180_s8 + $0x68] sm:$0xff]   ;;  %v12261_v61 = vld [vmem:[%s16180_s8 + $0x30] sm:$0xff]  }
 0x5f3   :  { %v2683_v2 = vsel %vm2042_vm7, %v13963_v57, %v11507_v63  ;;  %v2684_v12 = vsel %vm2042_vm7, %v13966_v58, %v11508_v32  ;;  %v12244_v57 = vld [vmem:[%s16179_s7] sm:$0xff]  }
 0x5f5   :  { %10548 = vmatpush3.bf16.msra.mxu1 %v12237_v43 }
 0x5f6   :  { %10549 = vmatprep.subr.bf16.mxu1 %v12238_v44  ;;  %v12264_v44 = vld [vmem:[%s16180_s8 + $0xc0] sm:$0xff]  }
 0x5f9   :  { %10550 = vmatpush3.bf16.msra.mxu1 %v12239_v18  ;;  %v11511_v23 = vpop.permute.xlu0 %11510 }
 0x5fa   :  { %10551 = vmatprep.subr.bf16.mxu1 %v12240_v37  ;;  %v11513_v25 = vunpack.i.h.bf16 %v11511_v23  ;;  %v11512_v53 = vunpack.i.l.bf16 %v11511_v23 }
 0x5fc   :  { %v2686_v5 = vsel %vm2157_vm15, %v2684_v12, %v11513_v25  ;;  %v2685_v6 = vsel %vm2157_vm15, %v2683_v2, %v11512_v53 }
 0x5fd   :  { %10552 = vmatpush3.bf16.msra.mxu1 %v12241_v21  ;;  %v11516_v0 = vpop.permute.xlu0 %11515 }
 0x5fe   :  { %v11518_v34 = vunpack.i.h.bf16 %v11516_v0  ;;  %v11517_v62 = vunpack.i.l.bf16 %v11516_v0  ;;  %10553 = vmatprep.subr.bf16.mxu1 %v12242_v49 }
 0x600   :  { %v2687_v7 = vsel %vm16222_vm14, %v2685_v6, %v11517_v62  ;;  %v2688_v4 = vsel %vm16222_vm14, %v2686_v5, %v11518_v34 }
 0x601   :  { %10554 = vmatpush3.bf16.msra.mxu1 %v12243_v40  ;;  %v2692_v27 = vpack.c.bf16 %v2688_v4, %v2687_v7 }
 0x603   :  { %3029 = vmatprep.mubr.bf16.mxu1 %v2692_v27 }
 0x604   :  { %3030 = vmatmul.mubr.bf16.vlgmr.msra.gmra.mrb[44].mxu1 %v2691_v20  ;;  %v12263_v20 = vld [vmem:[%s16180_s8 + $0x38] sm:$0xff]  }
 0x605   :  { %11057 = vmatprep.mubr.msk.bf16.mxu1 %vm2006_vm3, %v12244_v57 }
 0x6b7   :  { %v10533_v58 = vpop.f32.mrb[40].mxu1 }
 0x6b8   :  { %v10534_v3 = vpop.f32.mrb[41].mxu1 }
 0x6b9   :  { %v10535_v39 = vadd.f32 %v10534_v3, %v10533_v58  ;;  %v10536_v8 = vpop.f32.mrb[42].mxu1 }
 0x6ba   :  { %v10537_v59 = vpop.f32.mrb[43].mxu1 }
 0x6bb   :  { %v10538_v10 = vadd.f32 %v10537_v59, %v10536_v8  ;;  %v2991_v9 = vadd.f32 %v10535_v39, %v9924_v29 }
 0x6bd   :  { %v2994_v54 = vadd.f32 %v10538_v10, %v9924_v29 }
 0x6d7   :  { %v10555_v26 = vpop.f32.mrb[44].mxu1 }
 0x6d8   :  { %v10556_v16 = vpop.f32.mrb[45].mxu1 }
 0x6d9   :  { %v10557_v13 = vadd.f32 %v10556_v16, %v10555_v26  ;;  %v10558_v36 = vpop.f32.mrb[46].mxu1 }
 0x6da   :  { %v10559_v15 = vpop.f32.mrb[47].mxu1 }
 0x6db   :  { %v3032_v52 = vadd.f32 %v10557_v13, %v2991_v9  ;;  %v10560_v31 = vadd.f32 %v10559_v15, %v10558_v36 }
 0x6dd   :  { %v3035_v11 = vadd.f32 %v10560_v31, %v2994_v54  ;;  %v3038_v42 = vmax.f32 %v3032_v52, 0.0 }
 0x6df   :  { %v3039_v51 = vmax.f32 %v3035_v11, 0.0 }
 0x6e1   :  { %v3040_v41 = vpack.c.bf16 %v3039_v51, %v3038_v42  ;;  %v12265_v51 = vld [vmem:[%s16180_s8 + $0x80] sm:$0xff]  }
 0x6e3   :  { %11055 = vmatprep.subr.bf16.mxu1 %v3040_v41 }
 0x6e4   :  { %11056 = vmatpush3.bf16.msra.mxu1 %v3040_v41 }
 0x6e5   :  { %10566 = vmatprep.subr.bf16.mxu1 %v12248_v30 }
 0x6e7   :  { %11058 = vmatmul.mubr.msk.bf16.vlgmr.msra.gmra.mrb[48].mxu1 %vm2006_vm3, %v12245_v24  ;;  %v12266_v24 = vld [vmem:[%s16180_s8 + $0xc8] sm:$0xff]  }
 0x6e8   :  { %11061 = vmatprep.mubr.msk.bf16.mxu1 %vm2006_vm3, %v12246_v22  ;;  %10567 = vmatpush3.bf16.msra.mxu1 %v12249_v14  ;;  %v12267_v14 = vld [vmem:[%s16180_s8 + $0x88] sm:$0xff]  }
 0x6e9   :  { %10568 = vmatprep.subr.bf16.mxu1 %v12250_v28 }
 0x6ec   :  { %10569 = vmatpush3.bf16.msra.mxu1 %v12251_v19  ;;  %v12268_v19 = vld [vmem:[%s16180_s8 + $0xd0] sm:$0xff]  }
 0x6ed   :  { %10570 = vmatprep.subr.bf16.mxu1 %v12252_v46 }
 0x6ef   :  { %11062 = vmatmul.mubr.msk.bf16.gmra.mrb[52].mxu1 %vm2006_vm3, %v12247_v60 }
 0x6f0   :  { %10571 = vmatpush3.bf16.msra.mxu1 %v12253_v50 }
 0x6f1   :  { %10572 = vmatprep.subr.bf16.mxu1 %v12254_v47 }
 0x6f4   :  { %10573 = vmatpush3.bf16.msra.mxu1 %v12255_v33  ;;  %v12269_v33 = vld [vmem:[%s16180_s8 + $0x90] sm:$0xff]  }
 0x6f5   :  { %10574 = vmatprep.subr.bf16.mxu1 %v12256_v56  ;;  %v12270_v56 = vld [vmem:[%s16180_s8 + $0xd8] sm:$0xff]  }
 0x6f8   :  { %10575 = vmatpush3.bf16.msra.mxu1 %v12257_v48  ;;  %v12271_v48 = vld [vmem:[%s16180_s8 + $0x98] sm:$0xff]  }
 0x6f9   :  { %10576 = vmatprep.subr.bf16.mxu1 %v12258_v55  ;;  %v12272_v55 = vld [vmem:[%s16180_s8 + $0xe0] sm:$0xff]  }
 0x6fc   :  { %10577 = vmatpush3.bf16.msra.mxu1 %v12259_v35  ;;  %v12273_v35 = vld [vmem:[%s16180_s8 + $0xa0] sm:$0xff]  }
 0x6fd   :  { %10578 = vmatprep.subr.bf16.mxu1 %v12260_v17  ;;  %v12274_v17 = vld [vmem:[%s16180_s8 + $0xe8] sm:$0xff]  }
 0x700   :  { %10579 = vmatpush3.bf16.msra.mxu1 %v12261_v61  ;;  %v12275_v61 = vld [vmem:[%s16180_s8 + $0xa8] sm:$0xff]  }
 0x701   :  { %10580 = vmatprep.subr.bf16.mxu1 %v12262_v38  ;;  %v12276_v38 = vld [vmem:[%s16180_s8 + $0xf0] sm:$0xff]  }
 0x704   :  { %10581 = vmatpush3.bf16.msra.mxu1 %v12263_v20 }
 0x705   :  { %10588 = vmatprep.subr.bf16.mxu1 %v12264_v44 }
 0x7ba   :  { %v11059_v43 = vpop.f32.mrb[48].mxu1 }
 0x7bb   :  { %v3160_v45 = vrot.slane %v11059_v43, 4  ;;  %v3115_v18 = vpop.f32.mrb[49].mxu1 }
 0x7bc   :  { %v3147_v37 = vrot.slane %v3115_v18, 4  ;;  %v11060_v23 = vpop.f32.mrb[50].mxu1 }
 0x7bd   :  { %v3168_v21 = vrot.slane %v11060_v23, 4  ;;  %v3118_v32 = vpop.f32.mrb[51].mxu1 }
 0x7be   :  { %v3155_v63 = vrot.slane %v3118_v32, 4  ;;  %v11524_v49 = vpack.i.bf16 %v3147_v37, %v3160_v45  ;;  %v11529_v25 = vpack.i.bf16 %v3118_v32, %v11060_v23  ;;  %v12278_v45 = vld [vmem:[%s16180_s8 + $0xf8] sm:$0xff]  }
 0x7bf   :  { %v12279_v23 = vld [vmem:[%s16180_s8 + $0xb8] sm:$0xff]  }
 0x7c0   :  { %11525 = vrot.lane.b32.xlu0 %v11524_v49, %s12850_s25  ;;  %11530 = vrot.lane.b32.xlu1 %v11529_v25, %s12858_s29  ;;  %v11534_v53 = vpack.i.bf16 %v3155_v63, %v3168_v21  ;;  %v12860_v49 = vmov 0.0  }
 0x7c2   :  { %v11063_v0 = vpop.f32.mrb[52].mxu1 }
 0x7c3   :  { %v3186_v40 = vrot.slane %v11063_v0, 4  ;;  %v14120_v2 = vpop.f32.mrb[53].mxu1 }
 0x7c4   :  { %v3173_v12 = vrot.slane %v14120_v2, 4  ;;  %11535 = vrot.lane.b32.xlu0 %v11534_v53, %s12859_s18  ;;  %v11064_v34 = vpop.f32.mrb[54].mxu1 }
 0x7c5   :  { %v3194_v62 = vrot.slane %v11064_v34, 4  ;;  %v3134_v5 = vpop.f32.mrb[55].mxu1 }
 0x7c6   :  { %v3181_v6 = vrot.slane %v3134_v5, 4  ;;  %v11539_v7 = vpack.i.bf16 %v3173_v12, %v3186_v40  ;;  %v11544_v4 = vpack.i.bf16 %v3134_v5, %v11064_v34  ;;  %v9965_v12 = vld [vmem:[%s16181_s9] ss:$0 sm:$0xff] }
 0x7c8   :  { %11540 = vrot.lane.b32.xlu1 %v11539_v7, %s12850_s25  ;;  %11545 = vrot.lane.b32.xlu0 %v11544_v4, %s12858_s29  ;;  %v11549_v27 = vpack.i.bf16 %v3181_v6, %v3194_v62 }
 0x7cc   :  { %11550 = vrot.lane.b32.xlu1 %v11549_v27, %s12859_s18 }
 0x832   :  { %v11526_v57 = vpop.permute.xlu0 %11525  ;;  %v11531_v58 = vpop.permute.xlu1 %11530 }
 0x833   :  { %v11528_v3 = vunpack.i.h.bf16 %v11526_v57  ;;  %v11527_v39 = vunpack.i.l.bf16 %v11526_v57  ;;  %v11533_v8 = vunpack.i.h.bf16 %v11531_v58  ;;  %v11532_v59 = vunpack.i.l.bf16 %v11531_v58 }
 0x835   :  { %v3198_v10 = vsel %vm2042_vm7, %v3115_v18, %v11528_v3  ;;  %v3201_v29 = vsel %vm2042_vm7, %v11059_v43, %v11527_v39  ;;  %v12277_v43 = vld [vmem:[%s16180_s8 + $0xb0] sm:$0xff]   ;;  %v12280_v39 = vld [vmem:[%s16182_s10] sm:$0xff]  }
 0x836   :  { %v11536_v26 = vpop.permute.xlu0 %11535  ;;  %v3199_v13 = vsel %vm2157_vm15, %v3198_v10, %v11533_v8  ;;  %v3202_v36 = vsel %vm2157_vm15, %v3201_v29, %v11532_v59  ;;  %v12281_v8 = vld [vmem:[%s16183_s11 + $0x40] sm:$0xff]   ;;  %v12283_v10 = vld [vmem:[%s16183_s11 + $0x48] sm:$0xff]  }
 0x837   :  { %v11538_v16 = vunpack.i.h.bf16 %v11536_v26  ;;  %v11537_v9 = vunpack.i.l.bf16 %v11536_v26  ;;  %v12282_v59 = vld [vmem:[%s16183_s11] sm:$0xff]   ;;  %v12284_v29 = vld [vmem:[%s16183_s11 + $0x8] sm:$0xff]   ;;  %v12285_v26 = vld [vmem:[%s16183_s11 + $0x50] sm:$0xff]  }
 0x839   :  { %v3200_v15 = vsel %vm16222_vm14, %v3199_v13, %v11538_v16  ;;  %v3203_v54 = vsel %vm16222_vm14, %v3202_v36, %v11537_v9  ;;  %v12286_v16 = vld [vmem:[%s16183_s11 + $0x10] sm:$0xff]   ;;  %v12287_v9 = vld [vmem:[%s16183_s11 + $0x58] sm:$0xff]   ;;  %v12289_v36 = vld [vmem:[%s16183_s11 + $0x60] sm:$0xff]  }
 0x83a   :  { %v3210_v52 = vpack.c.bf16 %v3200_v15, %v3200_v15  ;;  %v11541_v31 = vpop.permute.xlu1 %11540  ;;  %v11546_v11 = vpop.permute.xlu0 %11545  ;;  %v3211_v42 = vpack.c.bf16 %v3203_v54, %v3203_v54  ;;  %v12288_v13 = vld [vmem:[%s16183_s11 + $0x18] sm:$0xff]   ;;  %v12290_v15 = vld [vmem:[%s16183_s11 + $0x20] sm:$0xff]   ;;  %v12291_v54 = vld [vmem:[%s16183_s11 + $0x68] sm:$0xff]  }
 0x83b   :  { %v11542_v41 = vunpack.i.l.bf16 %v11541_v31  ;;  %v11547_v22 = vunpack.i.l.bf16 %v11546_v11  ;;  %v11543_v20 = vunpack.i.h.bf16 %v11541_v31  ;;  %v11548_v44 = vunpack.i.h.bf16 %v11546_v11  ;;  %v12293_v31 = vld [vmem:[%s16183_s11 + $0x70] sm:$0xff]  }
 0x83c   :  { %3509 = vmatprep.mubr.bf16.mxu1 %v3211_v42  ;;  %v12294_v11 = vld [vmem:[%s16183_s11 + $0x30] sm:$0xff]   ;;  %v12295_v42 = vld [vmem:[%s16183_s11 + $0x78] sm:$0xff]  }
 0x83d   :  { %v3207_v60 = vsel %vm2042_vm7, %v11063_v0, %v11542_v41  ;;  %3510 = vmatmul.mubr.bf16.vlgmr.msra.gmra.mrb[56].mxu1 %v3210_v52  ;;  %v3204_v18 = vsel %vm2042_vm7, %v14120_v2, %v11543_v20  ;;  %v12292_v52 = vld [vmem:[%s16183_s11 + $0x28] sm:$0xff]   ;;  %v12297_v41 = vld [vmem:[%s16183_s11 + $0xc0] sm:$0xff]  }
 0x83e   :  { %10589 = vmatpush3.bf16.msra.mxu1 %v12265_v51  ;;  %v11551_v30 = vpop.permute.xlu1 %11550  ;;  %v3208_v46 = vsel %vm2157_vm15, %v3207_v60, %v11547_v22  ;;  %v3205_v21 = vsel %vm2157_vm15, %v3204_v18, %v11548_v44  ;;  %v12296_v51 = vld [vmem:[%s16183_s11 + $0x38] sm:$0xff]  }
 0x83f   :  { %v11552_v28 = vunpack.i.l.bf16 %v11551_v30  ;;  %10590 = vmatprep.subr.bf16.mxu1 %v12266_v24  ;;  %v11553_v37 = vunpack.i.h.bf16 %v11551_v30 }
 0x841   :  { %v3209_v50 = vsel %vm16222_vm14, %v3208_v46, %v11552_v28  ;;  %v3206_v32 = vsel %vm16222_vm14, %v3205_v21, %v11553_v37  ;;  %vm16223_vm14 = vcmask 1041408  }
 0x842   :  { %10591 = vmatpush3.bf16.msra.mxu1 %v12267_v14  ;;  %v3213_v47 = vpack.c.bf16 %v3209_v50, %v3209_v50  ;;  %v3212_v63 = vpack.c.bf16 %v3206_v32, %v3206_v32 }
 0x843   :  { %10592 = vmatprep.subr.bf16.mxu1 %v12268_v19 }
 0x844   :  { %3549 = vmatprep.mubr.bf16.mxu1 %v3213_v47 }
 0x846   :  { %10593 = vmatpush3.bf16.msra.mxu1 %v12269_v33 }
 0x847   :  { %10594 = vmatprep.subr.bf16.mxu1 %v12270_v56 }
 0x84a   :  { %10595 = vmatpush3.bf16.msra.mxu1 %v12271_v48 }
 0x84b   :  { %10596 = vmatprep.subr.bf16.mxu1 %v12272_v55 }
 0x84e   :  { %10597 = vmatpush3.bf16.msra.mxu1 %v12273_v35 }
 0x84f   :  { %10598 = vmatprep.subr.bf16.mxu1 %v12274_v17 }
 0x852   :  { %10599 = vmatpush3.bf16.msra.mxu1 %v12275_v61 }
 0x853   :  { %10600 = vmatprep.subr.bf16.mxu1 %v12276_v38 }
 0x856   :  { %10601 = vmatpush3.bf16.msra.mxu1 %v12277_v43 }
 0x857   :  { %10602 = vmatprep.subr.bf16.mxu1 %v12278_v45 }
 0x85a   :  { %10603 = vmatpush3.bf16.msra.mxu1 %v12279_v23 }
 0x85b   :  { %11065 = vmatprep.subr.bf16.mxu1 %v12860_v49 }
 0x85d   :  { %3550 = vmatmul.mubr.bf16.vlgmr.msra.gmra.mrb[60].mxu1 %v3212_v63 }
 0x85e   :  { %11067 = vmatprep.mubr.msk.bf16.mxu1 %vm12861_vm13, %v12860_v49 }
 0x910   :  { %v10582_v25 = vpop.f32.mrb[56].mxu1 }
 0x911   :  { %v10583_v53 = vpop.f32.mrb[57].mxu1 }
 0x912   :  { %v10584_v0 = vadd.f32 %v10583_v53, %v10582_v25  ;;  %v10585_v40 = vpop.f32.mrb[58].mxu1  ;;  %v12298_v25 = vld [vmem:[%s16183_s11 + $0x80] sm:$0xff]   ;;  %v12299_v53 = vld [vmem:[%s16183_s11 + $0xc8] sm:$0xff]  }
 0x913   :  { %v10586_v2 = vpop.f32.mrb[59].mxu1  ;;  %v12300_v40 = vld [vmem:[%s16183_s11 + $0x88] sm:$0xff]  }
 0x914   :  { %v3512_v5 = vadd.f32 %v10584_v0, %v9965_v12  ;;  %v12301_v2 = vld [vmem:[%s16183_s11 + $0xd0] sm:$0xff]  }
 0x915   :  { %v12302_v12 = vld [vmem:[%s16183_s11 + $0x90] sm:$0xff]  }
 0x930   :  { %v10604_v34 = vpop.f32.mrb[60].mxu1 }
 0x931   :  { %v10605_v62 = vpop.f32.mrb[61].mxu1 }
 0x932   :  { %v10606_v6 = vadd.f32 %v10605_v62, %v10604_v34  ;;  %v10607_v7 = vpop.f32.mrb[62].mxu1  ;;  %v12303_v34 = vld [vmem:[%s16183_s11 + $0xd8] sm:$0xff]  }
 0x933   :  { %v10608_v4 = vpop.f32.mrb[63].mxu1  ;;  %v12304_v62 = vld [vmem:[%s16183_s11 + $0x98] sm:$0xff]   ;;  %v12307_v7 = vld [vmem:[%s16183_s11 + $0xe8] sm:$0xff]  }
 0x934   :  { %v3552_v27 = vadd.f32 %v10606_v6, %v3512_v5  ;;  %v12305_v5 = vld [vmem:[%s16183_s11 + $0xe0] sm:$0xff]   ;;  %v12308_v4 = vld [vmem:[%s16183_s11 + $0xa8] sm:$0xff]  }
 0x935   :  { %v12306_v6 = vld [vmem:[%s16183_s11 + $0xa0] sm:$0xff]  }
 0x936   :  { %v3557_v57 = vmax.f32 %v3552_v27, 0.0  ;;  %v12309_v27 = vld [vmem:[%s16183_s11 + $0xf0] sm:$0xff]  }
 0x938   :  { %v3558_v58 = vpack.c.bf16 %v3557_v57, %v3557_v57 }
 0x93a   :  { %v3571_v3 = vsel %vm16223_vm14, %v3558_v58, 0  ;;  %v12310_v58 = vld [vmem:[%s16183_s11 + $0xb0] sm:$0xff]   ;;  %vm4899_vm14 = vcmask 122880  }
 0x93b   :  { %11066 = vmatpush3.bf16.msra.mxu1 %v3571_v3  ;;  %v12311_v3 = vld [vmem:[%s16183_s11 + $0xf8] sm:$0xff]  }
 0x93c   :  { %10612 = vmatprep.subr.bf16.mxu1 %v12281_v8 }
 0x93e   :  { %11068 = vmatmul.mubr.msk.bf16.vlgmr.msra.gmra.mrb[64].mxu1 %vm1979_vm0, %v12280_v39 }
 0x93f   :  { %10613 = vmatpush3.bf16.msra.mxu1 %v12282_v59 }
 0x940   :  { %10614 = vmatprep.subr.bf16.mxu1 %v12283_v10  ;;  %v12312_v10 = vld [vmem:[%s16183_s11 + $0xb8] sm:$0xff]  }
 0x943   :  { %10615 = vmatpush3.bf16.msra.mxu1 %v12284_v29  ;;  %v12313_v29 = vld [vmem:[%s16183_s11 + $0x140] sm:$0xff]  }
 0x944   :  { %10616 = vmatprep.subr.bf16.mxu1 %v12285_v26 }
 0x947   :  { %10617 = vmatpush3.bf16.msra.mxu1 %v12286_v16 }
 0x948   :  { %10618 = vmatprep.subr.bf16.mxu1 %v12287_v9 }
 0x94b   :  { %10619 = vmatpush3.bf16.msra.mxu1 %v12288_v13  ;;  %v12314_v13 = vld [vmem:[%s16183_s11 + $0x100] sm:$0xff]  }
 0x94c   :  { %10620 = vmatprep.subr.bf16.mxu1 %v12289_v36 }
 0x94f   :  { %10621 = vmatpush3.bf16.msra.mxu1 %v12290_v15  ;;  %v12315_v15 = vld [vmem:[%s16183_s11 + $0x148] sm:$0xff]  }
 0x950   :  { %10622 = vmatprep.subr.bf16.mxu1 %v12291_v54 }
 0x953   :  { %10623 = vmatpush3.bf16.msra.mxu1 %v12292_v52  ;;  %v12316_v52 = vld [vmem:[%s16183_s11 + $0x108] sm:$0xff]  }
 0x954   :  { %10624 = vmatprep.subr.bf16.mxu1 %v12293_v31  ;;  %v12317_v31 = vld [vmem:[%s16183_s11 + $0x150] sm:$0xff]  }
 0x957   :  { %10625 = vmatpush3.bf16.msra.mxu1 %v12294_v11  ;;  %v12318_v11 = vld [vmem:[%s16183_s11 + $0x110] sm:$0xff]  }
 0x958   :  { %10626 = vmatprep.subr.bf16.mxu1 %v12295_v42  ;;  %v12319_v42 = vld [vmem:[%s16183_s11 + $0x158] sm:$0xff]  }
 0x95b   :  { %10627 = vmatpush3.bf16.msra.mxu1 %v12296_v51  ;;  %v12320_v51 = vld [vmem:[%s16183_s11 + $0x118] sm:$0xff]  }
 0x95c   :  { %10634 = vmatprep.subr.bf16.mxu1 %v12297_v41  ;;  %v12321_v41 = vld [vmem:[%s16183_s11 + $0x160] sm:$0xff]  }
 0xa11   :  { %v14247_v24 = vpop.f32.mrb[64].mxu1 }
 0xa12   :  { %v11069_v22 = vpop.f32.mrb[65].mxu1  ;;  %v3627_v60 = vrot.slane %v14247_v24, 5  ;;  %v3633_v30 = vrot.slane %v14247_v24, 7  ;;  %v3615_v14 = vrot.slane %v14247_v24, 1  ;;  %v3621_v28 = vrot.slane %v14247_v24, 3 }
 0xa13   :  { %v14253_v19 = vpop.f32.mrb[66].mxu1  ;;  %v3619_v20 = vrot.slane %v14247_v24, 2  ;;  %v3631_v18 = vrot.slane %v14247_v24, 6  ;;  %v3625_v59 = vrot.slane %v14247_v24, 4  ;;  %v12323_v22 = vld [vmem:[%s16183_s11 + $0x168] sm:$0xff]  }
 0xa14   :  { %v11070_v46 = vpop.f32.mrb[67].mxu1  ;;  %v11559_v50 = vpack.i.bf16 %v3627_v60, %v3633_v30  ;;  %v11554_v47 = vpack.i.bf16 %v3615_v14, %v3621_v28  ;;  %v3650_v33 = vrot.slane %v14253_v19, 5  ;;  %v3656_v56 = vrot.slane %v14253_v19, 7  ;;  %v12324_v60 = vld [vmem:[%s16183_s11 + $0x128] sm:$0xff]   ;;  %v12325_v30 = vld [vmem:[%s16183_s11 + $0x170] sm:$0xff]  }
 0xa15   :  { %v3638_v48 = vrot.slane %v14253_v19, 1  ;;  %v3644_v55 = vrot.slane %v14253_v19, 3  ;;  %v3642_v26 = vrot.slane %v14253_v19, 2  ;;  %v12326_v28 = vld [vmem:[%s16183_s11 + $0x130] sm:$0xff]   ;;  %v12327_v46 = vld [vmem:[%s16183_s11 + $0x178] sm:$0xff]  }
 0xa16   :  { %11560 = vrot.lane.b32.xlu1 %v11559_v50, %s12858_s29  ;;  %11555 = vrot.lane.b32.xlu0 %v11554_v47, %s12858_s29  ;;  %v11569_v35 = vpack.i.bf16 %v3650_v33, %v3656_v56  ;;  %v12328_v33 = vld [vmem:[%s16183_s11 + $0x138] sm:$0xff]   ;;  %v12329_v56 = vld [vmem:[%s16183_s11 + $0x1c0] sm:$0xff]  }
 0xa17   :  { %v11564_v17 = vpack.i.bf16 %v3638_v48, %v3644_v55  ;;  %v3654_v48 = vrot.slane %v14253_v19, 6 }
 0xa1a   :  { %11570 = vrot.lane.b32.xlu1 %v11569_v35, %s12858_s29  ;;  %11565 = vrot.lane.b32.xlu0 %v11564_v17, %s12858_s29  ;;  %v12330_v17 = vld [vmem:[%s16183_s11 + $0x180] sm:$0xff]  }
 0xa88   :  { %v11561_v61 = vpop.permute.xlu1 %11560  ;;  %v11556_v38 = vpop.permute.xlu0 %11555 }
 0xa89   :  { %v11562_v43 = vunpack.i.l.bf16 %v11561_v61  ;;  %v11558_v44 = vunpack.i.h.bf16 %v11556_v38  ;;  %v11557_v45 = vunpack.i.l.bf16 %v11556_v38  ;;  %v11563_v39 = vunpack.i.h.bf16 %v11561_v61  ;;  %v12331_v38 = vld [vmem:[%s16183_s11 + $0x1c8] sm:$0xff]  }
 0xa8b   :  { %v3660_v37 = vsel %vm2157_vm15, %v14247_v24, %v11558_v44  ;;  %v3661_v23 = vsel %vm2157_vm15, %v3619_v20, %v11557_v45  ;;  %v3663_v21 = vsel %vm2157_vm15, %v3631_v18, %v11562_v43  ;;  %v3662_v16 = vsel %vm2157_vm15, %v3625_v59, %v11563_v39  ;;  %v12322_v24 = vld [vmem:[%s16183_s11 + $0x120] sm:$0xff]   ;;  %v12332_v43 = vld [vmem:[%s16183_s11 + $0x188] sm:$0xff]   ;;  %v12333_v44 = vld [vmem:[%s16183_s11 + $0x1d0] sm:$0xff]  }
 0xa8c   :  { %v3668_v32 = vpack.c.bf16 %v3660_v37, %v3660_v37  ;;  %v3669_v63 = vpack.c.bf16 %v3661_v23, %v3661_v23  ;;  %v3671_v0 = vpack.c.bf16 %v3663_v21, %v3663_v21  ;;  %v11566_v57 = vpop.permute.xlu0 %11565  ;;  %v3670_v36 = vpack.c.bf16 %v3662_v16, %v3662_v16  ;;  %v11571_v14 = vpop.permute.xlu1 %11570  ;;  %v12334_v45 = vld [vmem:[%s16183_s11 + $0x190] sm:$0xff]   ;;  %v12335_v18 = vld [vmem:[%s16183_s11 + $0x1d8] sm:$0xff]   ;;  %v12337_v23 = vld [vmem:[%s16183_s11 + $0x1e0] sm:$0xff]  }
 0xa8d   :  { %v11567_v8 = vunpack.i.l.bf16 %v11566_v57  ;;  %v11568_v50 = vunpack.i.h.bf16 %v11566_v57  ;;  %v11572_v47 = vunpack.i.l.bf16 %v11571_v14  ;;  %v12336_v37 = vld [vmem:[%s16183_s11 + $0x198] sm:$0xff]   ;;  %v12338_v21 = vld [vmem:[%s16183_s11 + $0x1a0] sm:$0xff]  }
 0xa8e   :  { %4221 = vmatprep.mubr.bf16.mxu1 %v3669_v63  ;;  %v12340_v63 = vld [vmem:[%s16183_s11 + $0x1a8] sm:$0xff]   ;;  %v12356_v57 = vld [vmem:[%s16185_s13 + $0x64] ss:$16 sps:$4 sm:$0xff]  }
 0xa8f   :  { %4222 = vmatmul.mubr.bf16.vlgmr.msra.gmra.mrb[68].mxu1 %v3668_v32  ;;  %v3665_v9 = vsel %vm2157_vm15, %v3642_v26, %v11567_v8  ;;  %v3664_v55 = vsel %vm2157_vm15, %v14253_v19, %v11568_v50  ;;  %v3667_v35 = vsel %vm2157_vm15, %v3654_v48, %v11572_v47  ;;  %v12339_v32 = vld [vmem:[%s16183_s11 + $0x1e8] sm:$0xff]   ;;  %v3804_v26 = vld [vmem:[%s16184_s12] sm:$0x1] }
 0xa90   :  { %10635 = vmatpush3.bf16.msra.mxu1 %v12298_v25  ;;  %4261 = vmatprep.mubr.bf16.mxu1 %v3671_v0  ;;  %v3673_v54 = vpack.c.bf16 %v3665_v9, %v3665_v9  ;;  %v3672_v61 = vpack.c.bf16 %v3664_v55, %v3664_v55  ;;  %v3675_v20 = vpack.c.bf16 %v3667_v35, %v3667_v35  ;;  %v12341_v25 = vld [vmem:[%s16183_s11 + $0x1f0] sm:$0xff]   ;;  %v12343_v0 = vld [vmem:[%s16183_s11 + $0x1f8] sm:$0xff]  }
 0xa91   :  { %10636 = vmatprep.subr.bf16.mxu1 %v12299_v53  ;;  %v12342_v53 = vld [vmem:[%s16183_s11 + $0x1b0] sm:$0xff]   ;;  %v12357_v47 = vld [vmem:[%s16185_s13 + $0x8] ss:$16 sps:$4 sm:$0xff]   ;;  %v12365_v55 = vld [vmem:[%s16185_s13 + $0x4c] ss:$16 sps:$4 sm:$0xff]  }
 0xa92   :  { %v12360_v48 = vld [vmem:[%s16185_s13 + $0x28] ss:$16 sps:$4 sm:$0xff]  }
 0xa93   :  { %v12363_v35 = vld [vmem:[%s16185_s13 + $0x48] ss:$16 sps:$4 sm:$0xff]  }
 0xa94   :  { %10637 = vmatpush3.bf16.msra.mxu1 %v12300_v40  ;;  %v11573_v40 = vunpack.i.h.bf16 %v11571_v14 }
 0xa95   :  { %10638 = vmatprep.subr.bf16.mxu1 %v12301_v2  ;;  %v3648_v2 = vrot.slane %v14253_v19, 4  ;;  %v12347_v19 = vld [vmem:[%s16185_s13 + $0x4] ss:$16 sps:$4 sm:$0xff]  }
 0xa98   :  { %10639 = vmatpush3.bf16.msra.mxu1 %v12302_v12  ;;  %v12344_v12 = vld [vmem:[%s16183_s11 + $0x1b8] sm:$0xff]  }
 0xa99   :  { %10640 = vmatprep.subr.bf16.mxu1 %v12303_v34  ;;  %v3666_v34 = vsel %vm2157_vm15, %v3648_v2, %v11573_v40  ;;  %v12383_v40 = vld [vmem:[%s16187_s15 + $0x78] sm:$0xff]  }
 0xa9a   :  { %v12384_v2 = vld [vmem:[%s16187_s15 + $0x38] sm:$0xff]  }
 0xa9c   :  { %10641 = vmatpush3.bf16.msra.mxu1 %v12304_v62  ;;  %v3674_v62 = vpack.c.bf16 %v3666_v34, %v3666_v34  ;;  %v4449_v34 = vlaneseq }
 0xa9d   :  { %10642 = vmatprep.subr.bf16.mxu1 %v12305_v5  ;;  %v12345_v5 = vld [vmem:[%s16185_s13] ss:$16 sps:$4 sm:$0xff]  }
 0xaa0   :  { %10643 = vmatpush3.bf16.msra.mxu1 %v12306_v6  ;;  %v12350_v6 = vld [vmem:[%s16185_s13 + $0x24] ss:$16 sps:$4 sm:$0xff]  }
 0xaa1   :  { %10644 = vmatprep.subr.bf16.mxu1 %v12307_v7  ;;  %v12348_v7 = vld [vmem:[%s16185_s13 + $0x20] ss:$16 sps:$4 sm:$0xff]  }
 0xaa4   :  { %10645 = vmatpush3.bf16.msra.mxu1 %v12308_v4  ;;  %v12353_v4 = vld [vmem:[%s16185_s13 + $0x44] ss:$16 sps:$4 sm:$0xff]  }
 0xaa5   :  { %10646 = vmatprep.subr.bf16.mxu1 %v12309_v27  ;;  %v12351_v27 = vld [vmem:[%s16185_s13 + $0x40] ss:$16 sps:$4 sm:$0xff]  }
 0xaa8   :  { %10647 = vmatpush3.bf16.msra.mxu1 %v12310_v58  ;;  %v12354_v58 = vld [vmem:[%s16185_s13 + $0x60] ss:$16 sps:$4 sm:$0xff]  }
 0xaa9   :  { %10648 = vmatprep.subr.bf16.mxu1 %v12311_v3  ;;  %v12359_v3 = vld [vmem:[%s16185_s13 + $0xc] ss:$16 sps:$4 sm:$0xff]  }
 0xaac   :  { %10649 = vmatpush3.bf16.msra.mxu1 %v12312_v10 }
 0xaad   :  { %10656 = vmatprep.subr.bf16.mxu1 %v12313_v29 }
 0xaaf   :  { %4262 = vmatmul.mubr.bf16.vlgmr.msra.gmra.mrb[72].mxu1 %v3670_v36 }
 0xab0   :  { %10657 = vmatpush3.bf16.msra.mxu1 %v12314_v13  ;;  %4301 = vmatprep.mubr.bf16.mxu1 %v3673_v54 }
 0xab1   :  { %10658 = vmatprep.subr.bf16.mxu1 %v12315_v15 }
 0xab4   :  { %10659 = vmatpush3.bf16.msra.mxu1 %v12316_v52 }
 0xab5   :  { %10660 = vmatprep.subr.bf16.mxu1 %v12317_v31 }
 0xab8   :  { %10661 = vmatpush3.bf16.msra.mxu1 %v12318_v11 }
 0xab9   :  { %10662 = vmatprep.subr.bf16.mxu1 %v12319_v42 }
 0xabc   :  { %10663 = vmatpush3.bf16.msra.mxu1 %v12320_v51 }
 0xabd   :  { %10664 = vmatprep.subr.bf16.mxu1 %v12321_v41 }
 0xac0   :  { %10665 = vmatpush3.bf16.msra.mxu1 %v12322_v24 }
 0xac1   :  { %10666 = vmatprep.subr.bf16.mxu1 %v12323_v22 }
 0xac4   :  { %10667 = vmatpush3.bf16.msra.mxu1 %v12324_v60 }
 0xac5   :  { %10668 = vmatprep.subr.bf16.mxu1 %v12325_v30 }
 0xac8   :  { %10669 = vmatpush3.bf16.msra.mxu1 %v12326_v28 }
 0xac9   :  { %10670 = vmatprep.subr.bf16.mxu1 %v12327_v46 }
 0xacc   :  { %10671 = vmatpush3.bf16.msra.mxu1 %v12328_v33 }
 0xacd   :  { %10678 = vmatprep.subr.bf16.mxu1 %v12329_v56  ;;  %v12362_v56 = vld [vmem:[%s16185_s13 + $0x2c] ss:$16 sps:$4 sm:$0xff]  }
 0xacf   :  { %4302 = vmatmul.mubr.bf16.vlgmr.msra.gmra.mrb[76].mxu1 %v3672_v61  ;;  %v12366_v61 = vld [vmem:[%s16185_s13 + $0x68] ss:$16 sps:$4 sm:$0xff]  }
 0xad0   :  { %10679 = vmatpush3.bf16.msra.mxu1 %v12330_v17  ;;  %4341 = vmatprep.mubr.bf16.mxu1 %v3675_v20  ;;  %v12368_v17 = vld [vmem:[%s16185_s13 + $0x6c] ss:$16 sps:$4 sm:$0xff]   ;;  %v12370_v20 = vld [vmem:[%s16187_s15] sm:$0xff]  }
 0xad1   :  { %10680 = vmatprep.subr.bf16.mxu1 %v12331_v38  ;;  %v12369_v38 = vld [vmem:[%s16187_s15 + $0x40] sm:$0xff]  }
 0xad4   :  { %10681 = vmatpush3.bf16.msra.mxu1 %v12332_v43  ;;  %v12371_v43 = vld [vmem:[%s16187_s15 + $0x48] sm:$0xff]  }
 0xad5   :  { %10682 = vmatprep.subr.bf16.mxu1 %v12333_v44  ;;  %v12372_v44 = vld [vmem:[%s16187_s15 + $0x8] sm:$0xff]  }
 0xad8   :  { %10683 = vmatpush3.bf16.msra.mxu1 %v12334_v45  ;;  %v12373_v45 = vld [vmem:[%s16187_s15 + $0x50] sm:$0xff]  }
 0xad9   :  { %10684 = vmatprep.subr.bf16.mxu1 %v12335_v18  ;;  %v12374_v18 = vld [vmem:[%s16187_s15 + $0x10] sm:$0xff]  }
 0xadc   :  { %10685 = vmatpush3.bf16.msra.mxu1 %v12336_v37  ;;  %v12375_v37 = vld [vmem:[%s16187_s15 + $0x58] sm:$0xff]  }
 0xadd   :  { %10686 = vmatprep.subr.bf16.mxu1 %v12337_v23  ;;  %v12376_v23 = vld [vmem:[%s16187_s15 + $0x18] sm:$0xff]  }
 0xae0   :  { %10687 = vmatpush3.bf16.msra.mxu1 %v12338_v21  ;;  %v12377_v21 = vld [vmem:[%s16187_s15 + $0x60] sm:$0xff]  }
 0xae1   :  { %10688 = vmatprep.subr.bf16.mxu1 %v12339_v32  ;;  %v12378_v32 = vld [vmem:[%s16187_s15 + $0x20] sm:$0xff]  }
 0xae4   :  { %10689 = vmatpush3.bf16.msra.mxu1 %v12340_v63  ;;  %v12379_v63 = vld [vmem:[%s16187_s15 + $0x68] sm:$0xff]  }
 0xae5   :  { %10690 = vmatprep.subr.bf16.mxu1 %v12341_v25  ;;  %v12380_v25 = vld [vmem:[%s16187_s15 + $0x28] sm:$0xff]  }
 0xae8   :  { %10691 = vmatpush3.bf16.msra.mxu1 %v12342_v53  ;;  %v12381_v53 = vld [vmem:[%s16187_s15 + $0x70] sm:$0xff]  }
 0xae9   :  { %10692 = vmatprep.subr.bf16.mxu1 %v12343_v0  ;;  %v12382_v0 = vld [vmem:[%s16187_s15 + $0x30] sm:$0xff]  }
 0xaec   :  { %10693 = vmatpush3.bf16.msra.mxu1 %v12344_v12  ;;  %v12385_v12 = vld [vmem:[%s16187_s15 + $0xc0] sm:$0xff]  }
 0xaed   :  { %4472 = vmatprep.subr.bf16.mxu1 %v12347_v19  ;;  %v4367_v19 = vld [vmem:[%s16186_s14] sm:$0xf] }
 0xaef   :  { %4342 = vmatmul.mubr.bf16.vlgmr.msra.gmra.mrb[80].mxu1 %v3674_v62  ;;  %v14526_v62 = vshrl.u32 %v4449_v34, 7  ;;  %v12416_v34 = vld [vmem:[%s16226_s26 + $0xf8] sm:$0xff]  }
 0xaf0   :  { %4504 = vmatprep.mubr.bf16.mxu1 %v12842_v1  ;;  %4473 = vmatpush1.bf16.msra.mxu1 %v12345_v5 }
 0xaf1   :  { %4474 = vmatprep.subr.bf16.mxu1 %v12350_v6  ;;  %v4451_v5 = vsub.s32 0, %v14526_v62  ;;  %v4455_v6 = vsub.s32 1, %v14526_v62 }
 0xaf4   :  { %4475 = vmatpush1.bf16.msra.mxu1 %v12348_v7  ;;  %v4452_v7 = vrot.slane %v4367_v19, %v4451_v5 }
 0xaf5   :  { %4476 = vmatprep.subr.bf16.mxu1 %v12353_v4  ;;  %v4456_v4 = vrot.slane %v4367_v19, %v4455_v6 }
 0xaf8   :  { %4477 = vmatpush1.bf16.msra.mxu1 %v12351_v27 }
 0xaf9   :  { %4478 = vmatprep.subr.bf16.mxu1 %v12356_v57 }
 0xafc   :  { %4479 = vmatpush1.bf16.msra.mxu1 %v12354_v58 }
 0xafd   :  { %4513 = vmatprep.subr.bf16.mxu1 %v12359_v3 }
 0xb62   :  { %v10628_v39 = vpop.f32.mrb[68].mxu1 }
 0xb63   :  { %v10629_v8 = vpop.f32.mrb[69].mxu1 }
 0xb64   :  { %v10630_v59 = vadd.f32 %v10629_v8, %v10628_v39  ;;  %v10631_v10 = vpop.f32.mrb[70].mxu1 }
 0xb65   :  { %v10632_v29 = vpop.f32.mrb[71].mxu1 }
 0xb66   :  { %v4224_v13 = vadd.f32 %v10630_v59, %v3804_v26  ;;  %v12386_v26 = vld [vmem:[%s16187_s15 + $0x80] sm:$0xff]  }
 0xb82   :  { %v10650_v16 = vpop.f32.mrb[72].mxu1 }
 0xb83   :  { %v10651_v9 = vpop.f32.mrb[73].mxu1 }
 0xb84   :  { %v10652_v36 = vadd.f32 %v10651_v9, %v10650_v16  ;;  %v10653_v15 = vpop.f32.mrb[74].mxu1  ;;  %v12387_v9 = vld [vmem:[%s16187_s15 + $0xc8] sm:$0xff]  }
 0xb85   :  { %v10654_v54 = vpop.f32.mrb[75].mxu1  ;;  %v12389_v15 = vld [vmem:[%s16187_s15 + $0xd0] sm:$0xff]  }
 0xb86   :  { %v4264_v52 = vadd.f32 %v10652_v36, %v4224_v13  ;;  %v12388_v13 = vld [vmem:[%s16187_s15 + $0x88] sm:$0xff]   ;;  %v4463_v36 = vsub.s32 3, %v14526_v62 }
 0xb88   :  { %v4464_v54 = vrot.slane %v4367_v19, %v4463_v36 }
 0xba2   :  { %v10672_v31 = vpop.f32.mrb[76].mxu1 }
 0xba3   :  { %v10673_v11 = vpop.f32.mrb[77].mxu1 }
 0xba4   :  { %v10674_v42 = vadd.f32 %v10673_v11, %v10672_v31  ;;  %v10675_v51 = vpop.f32.mrb[78].mxu1  ;;  %v12391_v31 = vld [vmem:[%s16187_s15 + $0xd8] sm:$0xff]  }
 0xba5   :  { %v10676_v41 = vpop.f32.mrb[79].mxu1 }
 0xba6   :  { %v4304_v24 = vadd.f32 %v10674_v42, %v4264_v52  ;;  %v12390_v52 = vld [vmem:[%s16187_s15 + $0x90] sm:$0xff]  }
 0xbc2   :  { %v10694_v22 = vpop.f32.mrb[80].mxu1 }
 0xbc3   :  { %v10695_v60 = vpop.f32.mrb[81].mxu1 }
 0xbc4   :  { %v10696_v30 = vadd.f32 %v10695_v60, %v10694_v22  ;;  %v10697_v14 = vpop.f32.mrb[82].mxu1  ;;  %v12393_v60 = vld [vmem:[%s16187_s15 + $0xe0] sm:$0xff]  }
 0xbc5   :  { %v10698_v28 = vpop.f32.mrb[83].mxu1 }
 0xbc6   :  { %v4344_v46 = vadd.f32 %v10696_v30, %v4304_v24  ;;  %v12392_v24 = vld [vmem:[%s16187_s15 + $0x98] sm:$0xff]   ;;  %v12394_v28 = vld [vmem:[%s16187_s15 + $0xa0] sm:$0xff]  }
 0xbc8   :  { %v4349_v50 = vmax.f32 %v4344_v46, 0.0  ;;  %v4459_v46 = vsub.s32 2, %v14526_v62  ;;  %v12817_v62 = vld [vmem:[%s16187_s15 + $0xb8] sm:$0xff]  }
 0xbca   :  { %v4350_v33 = vpack.c.bf16 %v4349_v50, %v4349_v50  ;;  %v12395_v50 = vld [vmem:[%s16187_s15 + $0xe8] sm:$0xff]  }
 0xbcc   :  { %10080 = vmatmul.mubr.msk.bf16.vlgmr.msra.gmra.mrb[84].mxu1 %vm2157_vm15, %v4350_v33 }
 0xbcd   :  { %4514 = vmatpush1.bf16.msra.mxu1 %v12357_v47  ;;  %4545 = vmatprep.mubr.bf16.mxu1 %v12842_v1  ;;  %v12396_v47 = vld [vmem:[%s16187_s15 + $0xa8] sm:$0xff]  }
 0xbce   :  { %4515 = vmatprep.subr.bf16.mxu1 %v12362_v56  ;;  %v12397_v56 = vld [vmem:[%s16187_s15 + $0xf0] sm:$0xff]  }
 0xbd1   :  { %4516 = vmatpush1.bf16.msra.mxu1 %v12360_v48  ;;  %v12398_v48 = vld [vmem:[%s16187_s15 + $0xb0] sm:$0xff]  }
 0xbd2   :  { %4517 = vmatprep.subr.bf16.mxu1 %v12365_v55 }
 0xbd5   :  { %4518 = vmatpush1.bf16.msra.mxu1 %v12363_v35  ;;  %v12399_v35 = vld [vmem:[%s16187_s15 + $0xf8] sm:$0xff]  }
 0xbd6   :  { %4519 = vmatprep.subr.bf16.mxu1 %v12368_v17  ;;  %v12400_v17 = vld [vmem:[%s16187_s15 + $0xb8] sm:$0xff]  }
 0xbd9   :  { %4520 = vmatpush1.bf16.msra.mxu1 %v12366_v61 }
 0xbda   :  { %10700 = vmatprep.subr.bf16.mxu1 %v12369_v38  ;;  %v12401_v38 = vld [vmem:[%s16226_s26 + $0x80] sm:$0xff]  }
 0xbdc   :  { %10081 = vmatmul.mubr.msk.bf16.vlgmr.msra.gmra.mrb[88].mxu1 %vm2157_vm15, %v4350_v33  ;;  %v4460_v33 = vrot.slane %v4367_v19, %v4459_v46  ;;  %v12417_v19 = vld [vmem:[%s16227_s22] ss:$8 sps:$4 sm:$0xff]  }
 0xbdd   :  { %10701 = vmatpush3.bf16.msra.mxu1 %v12370_v20  ;;  %v12419_v20 = vld [vmem:[%s16227_s22 + $0x4] ss:$8 sps:$4 sm:$0xff]  }
 0xbde   :  { %10702 = vmatprep.subr.bf16.mxu1 %v12371_v43 }
 0xbe1   :  { %10703 = vmatpush3.bf16.msra.mxu1 %v12372_v44  ;;  %v12402_v44 = vld [vmem:[%s16226_s26 + $0x88] sm:$0xff]  }
 0xbe2   :  { %10704 = vmatprep.subr.bf16.mxu1 %v12373_v45  ;;  %v12403_v45 = vld [vmem:[%s16226_s26 + $0x90] sm:$0xff]  }
 0xbe5   :  { %10705 = vmatpush3.bf16.msra.mxu1 %v12374_v18  ;;  %v12404_v18 = vld [vmem:[%s16226_s26 + $0x98] sm:$0xff]  }
 0xbe6   :  { %10706 = vmatprep.subr.bf16.mxu1 %v12375_v37  ;;  %v12405_v37 = vld [vmem:[%s16226_s26 + $0xa0] sm:$0xff]  }
 0xbe9   :  { %10707 = vmatpush3.bf16.msra.mxu1 %v12376_v23  ;;  %v12406_v23 = vld [vmem:[%s16226_s26 + $0xa8] sm:$0xff]  }
 0xbea   :  { %10708 = vmatprep.subr.bf16.mxu1 %v12377_v21  ;;  %v12407_v21 = vld [vmem:[%s16226_s26 + $0xb0] sm:$0xff]  }
 0xbed   :  { %10709 = vmatpush3.bf16.msra.mxu1 %v12378_v32  ;;  %v12408_v32 = vld [vmem:[%s16226_s26 + $0xb8] sm:$0xff]  }
 0xbee   :  { %10710 = vmatprep.subr.bf16.mxu1 %v12379_v63  ;;  %v12409_v63 = vld [vmem:[%s16226_s26 + $0xc0] sm:$0xff]  }
 0xbf1   :  { %10711 = vmatpush3.bf16.msra.mxu1 %v12380_v25  ;;  %v12410_v25 = vld [vmem:[%s16226_s26 + $0xc8] sm:$0xff]  }
 0xbf2   :  { %10712 = vmatprep.subr.bf16.mxu1 %v12381_v53  ;;  %v12411_v53 = vld [vmem:[%s16226_s26 + $0xd0] sm:$0xff]  }
 0xbf5   :  { %10713 = vmatpush3.bf16.msra.mxu1 %v12382_v0  ;;  %v12412_v0 = vld [vmem:[%s16226_s26 + $0xd8] sm:$0xff]  }
 0xbf6   :  { %10714 = vmatprep.subr.bf16.mxu1 %v12383_v40  ;;  %v12413_v40 = vld [vmem:[%s16226_s26 + $0xe0] sm:$0xff]  }
 0xbf9   :  { %10715 = vmatpush3.bf16.msra.mxu1 %v12384_v2  ;;  %v12414_v2 = vld [vmem:[%s16226_s26 + $0xe8] sm:$0xff]  }
 0xbfa   :  { %10722 = vmatprep.subr.bf16.mxu1 %v12385_v12  ;;  %v12415_v12 = vld [vmem:[%s16226_s26 + $0xf0] sm:$0xff]  }
 0xc9f   :  { %v4506_v27 = vpop.f32.mrb[84].mxu1 }
 0xca0   :  { %v4507_v57 = vadd.f32 %v4506_v27, %v4452_v7  ;;  %v4508_v58 = vpop.f32.mrb[85].mxu1  ;;  %v12420_v7 = vld [vmem:[%s16227_s22 + $0x14] ss:$8 sps:$4 sm:$0xff]   ;;  %v12423_v27 = vld [vmem:[%s16227_s22 + $0x24] ss:$8 sps:$4 sm:$0xff]  }
 0xca1   :  { %v4509_v3 = vadd.f32 %v4508_v58, %v4456_v4  ;;  %v4510_v39 = vpop.f32.mrb[86].mxu1  ;;  %v12422_v4 = vld [vmem:[%s16227_s22 + $0x10] ss:$8 sps:$4 sm:$0xff]   ;;  %v12426_v58 = vld [vmem:[%s16227_s22 + $0x34] ss:$8 sps:$4 sm:$0xff]  }
 0xca2   :  { %v4554_v8 = vmax.f32 %v4507_v57, 0.0  ;;  %v4511_v59 = vpop.f32.mrb[87].mxu1  ;;  %v12425_v57 = vld [vmem:[%s16227_s22 + $0x20] ss:$8 sps:$4 sm:$0xff]   ;;  %v12429_v39 = vld [vmem:[%s16227_s22 + $0x44] ss:$8 sps:$4 sm:$0xff]  }
 0xca3   :  { %v4555_v10 = vmax.f32 %v4509_v3, 0.0  ;;  %v12428_v3 = vld [vmem:[%s16227_s22 + $0x30] ss:$8 sps:$4 sm:$0xff]   ;;  %v12432_v59 = vld [vmem:[%s16227_s22 + $0x54] ss:$8 sps:$4 sm:$0xff]  }
 0xca4   :  { %v4558_v16 = vpack.c.bf16 %v4554_v8, %v4554_v8  ;;  %v12431_v8 = vld [vmem:[%s16227_s22 + $0x40] ss:$8 sps:$4 sm:$0xff]  }
 0xca5   :  { %v4559_v29 = vpack.c.bf16 %v4555_v10, %v4555_v10  ;;  %v12434_v10 = vld [vmem:[%s16227_s22 + $0x50] ss:$8 sps:$4 sm:$0xff]  }
 0xca7   :  { %4851 = vmatprep.mubr.bf16.mxu1 %v4559_v29  ;;  %v12435_v29 = vld [vmem:[%s16227_s22 + $0x64] ss:$8 sps:$4 sm:$0xff]  }
 0xca8   :  { %4852 = vmatmul.mubr.bf16.vlgmr.msra.gmra.mrb[92].mxu1 %v4558_v16  ;;  %v12438_v16 = vld [vmem:[%s16227_s22 + $0x74] ss:$8 sps:$4 sm:$0xff]  }
 0xca9   :  { %10723 = vmatpush3.bf16.msra.mxu1 %v12386_v26  ;;  %v12437_v26 = vld [vmem:[%s16227_s22 + $0x60] ss:$8 sps:$4 sm:$0xff]  }
 0xcaa   :  { %10724 = vmatprep.subr.bf16.mxu1 %v12387_v9  ;;  %v12440_v9 = vld [vmem:[%s16227_s22 + $0x70] ss:$8 sps:$4 sm:$0xff]  }
 0xcad   :  { %10725 = vmatpush3.bf16.msra.mxu1 %v12388_v13  ;;  %v12441_v13 = vld [vmem:[%s16227_s22 + $0x84] ss:$8 sps:$4 sm:$0xff]  }
 0xcae   :  { %10726 = vmatprep.subr.bf16.mxu1 %v12389_v15  ;;  %v12443_v15 = vld [vmem:[%s16227_s22 + $0x80] ss:$8 sps:$4 sm:$0xff]  }
 0xcaf   :  { %v4547_v11 = vpop.f32.mrb[88].mxu1 }
 0xcb0   :  { %v4549_v42 = vpop.f32.mrb[89].mxu1  ;;  %v4548_v55 = vadd.f32 %v4547_v11, %v4460_v33  ;;  %v12449_v11 = vld [vmem:[%s16227_s22 + $0xa0] ss:$8 sps:$4 sm:$0xff]   ;;  %v12464_v33 = vld [vmem:[%s16227_s22 + $0xf0] ss:$8 sps:$4 sm:$0xff]  }
 0xcb1   :  { %v4550_v51 = vadd.f32 %v4549_v42, %v4464_v54  ;;  %v4551_v41 = vpop.f32.mrb[90].mxu1  ;;  %10727 = vmatpush3.bf16.msra.mxu1 %v12390_v52  ;;  %v12444_v54 = vld [vmem:[%s16227_s22 + $0x94] ss:$8 sps:$4 sm:$0xff]   ;;  %v12446_v52 = vld [vmem:[%s16227_s22 + $0x90] ss:$8 sps:$4 sm:$0xff]  }
 0xcb2   :  { %v4552_v22 = vpop.f32.mrb[91].mxu1  ;;  %10728 = vmatprep.subr.bf16.mxu1 %v12391_v31  ;;  %v4556_v61 = vmax.f32 %v4548_v55, 0.0  ;;  %v12447_v31 = vld [vmem:[%s16227_s22 + $0xa4] ss:$8 sps:$4 sm:$0xff]   ;;  %v12450_v42 = vld [vmem:[%s16227_s22 + $0xb4] ss:$8 sps:$4 sm:$0xff]  }
 0xcb3   :  { %v4557_v30 = vmax.f32 %v4550_v51, 0.0  ;;  %v12452_v51 = vld [vmem:[%s16227_s22 + $0xb0] ss:$8 sps:$4 sm:$0xff]   ;;  %v12453_v41 = vld [vmem:[%s16227_s22 + $0xc4] ss:$8 sps:$4 sm:$0xff]  }
 0xcb4   :  { %v4560_v43 = vpack.c.bf16 %v4556_v61, %v4556_v61  ;;  %v12456_v22 = vld [vmem:[%s16227_s22 + $0xd4] ss:$8 sps:$4 sm:$0xff]   ;;  %v12465_v55 = vld [vmem:[%s16227_s22 + $0x104] ss:$8 sps:$4 sm:$0xff]  }
 0xcb5   :  { %10729 = vmatpush3.bf16.msra.mxu1 %v12392_v24  ;;  %v4561_v14 = vpack.c.bf16 %v4557_v30, %v4557_v30  ;;  %v12455_v24 = vld [vmem:[%s16227_s22 + $0xc0] ss:$8 sps:$4 sm:$0xff]   ;;  %v12459_v30 = vld [vmem:[%s16227_s22 + $0xe4] ss:$8 sps:$4 sm:$0xff]   ;;  %v12468_v61 = vld [vmem:[%s16227_s22 + $0x114] ss:$8 sps:$4 sm:$0xff]  }
 0xcb6   :  { %10730 = vmatprep.subr.bf16.mxu1 %v12393_v60  ;;  %v12458_v60 = vld [vmem:[%s16227_s22 + $0xd0] ss:$8 sps:$4 sm:$0xff]  }
 0xcb7   :  { %4891 = vmatprep.mubr.bf16.mxu1 %v4561_v14  ;;  %v12461_v14 = vld [vmem:[%s16227_s22 + $0xe0] ss:$8 sps:$4 sm:$0xff]  }
 0xcb9   :  { %10731 = vmatpush3.bf16.msra.mxu1 %v12394_v28  ;;  %v12462_v28 = vld [vmem:[%s16227_s22 + $0xf4] ss:$8 sps:$4 sm:$0xff]  }
 0xcba   :  { %10732 = vmatprep.subr.bf16.mxu1 %v12395_v50 }
 0xcbd   :  { %10733 = vmatpush3.bf16.msra.mxu1 %v12396_v47 }
 0xcbe   :  { %10734 = vmatprep.subr.bf16.mxu1 %v12397_v56 }
 0xcc1   :  { %10735 = vmatpush3.bf16.msra.mxu1 %v12398_v48 }
 0xcc2   :  { %10736 = vmatprep.subr.bf16.mxu1 %v12399_v35 }
 0xcc5   :  { %10737 = vmatpush3.bf16.msra.mxu1 %v12400_v17  ;;  %v12467_v17 = vld [vmem:[%s16227_s22 + $0x100] ss:$8 sps:$4 sm:$0xff]  }
 0xcc6   :  { %5797 = vmatprep.subr.bf16.mxu1 %v12842_v1 }
 0xcc8   :  { %4892 = vmatmul.mubr.bf16.vlgmr.msra.gmra.mrb[96].mxu1 %v4560_v43  ;;  %v12473_v43 = vld [vmem:[%s16227_s22 + $0x120] ss:$8 sps:$4 sm:$0xff]  }
 0xcc9   :  { %5798 = vmatpush1.bf16.msra.mxu1 %v12401_v38  ;;  %5829 = vmatprep.mubr.bf16.mxu1 %v12419_v20  ;;  %v12470_v38 = vld [vmem:[%s16227_s22 + $0x110] ss:$8 sps:$4 sm:$0xff]   ;;  %v12471_v20 = vld [vmem:[%s16227_s22 + $0x124] ss:$8 sps:$4 sm:$0xff]  }
 0xcca   :  { %5799 = vmatprep.subr.bf16.mxu1 %v12842_v1 }
 0xccd   :  { %5800 = vmatpush1.bf16.msra.mxu1 %v12402_v44  ;;  %v12474_v44 = vld [vmem:[%s16227_s22 + $0x134] ss:$8 sps:$4 sm:$0xff]  }
 0xcce   :  { %5801 = vmatprep.subr.bf16.mxu1 %v12842_v1 }
 0xcd1   :  { %5802 = vmatpush1.bf16.msra.mxu1 %v12403_v45  ;;  %v4626_v45 = vld [vmem:[%s16188_s16] sm:$0x1] }
 0xcd2   :  { %5803 = vmatprep.subr.bf16.mxu1 %v12842_v1 }
 0xcd5   :  { %5804 = vmatpush1.bf16.msra.mxu1 %v12404_v18 }
 0xcd6   :  { %5805 = vmatprep.subr.bf16.mxu1 %v12842_v1 }
 0xcd9   :  { %5806 = vmatpush1.bf16.msra.mxu1 %v12405_v37 }
 0xcda   :  { %5807 = vmatprep.subr.bf16.mxu1 %v12842_v1 }
 0xcdd   :  { %5808 = vmatpush1.bf16.msra.mxu1 %v12406_v23  ;;  %v12476_v23 = vld [vmem:[%s16227_s22 + $0x130] ss:$8 sps:$4 sm:$0xff]  }
 0xcde   :  { %5809 = vmatprep.subr.bf16.mxu1 %v12842_v1 }
 0xce1   :  { %5810 = vmatpush1.bf16.msra.mxu1 %v12407_v21 }
 0xce2   :  { %5811 = vmatprep.subr.bf16.mxu1 %v12842_v1 }
 0xce5   :  { %5812 = vmatpush1.bf16.msra.mxu1 %v12408_v32 }
 0xce6   :  { %5813 = vmatprep.subr.bf16.mxu1 %v12842_v1 }
 0xce9   :  { %5814 = vmatpush1.bf16.msra.mxu1 %v12409_v63 }
 0xcea   :  { %5815 = vmatprep.subr.bf16.mxu1 %v12842_v1 }
 0xced   :  { %5816 = vmatpush1.bf16.msra.mxu1 %v12410_v25  ;;  %v12477_v25 = vld [vmem:[%s16227_s22 + $0x144] ss:$8 sps:$4 sm:$0xff]  }
 0xcee   :  { %5817 = vmatprep.subr.bf16.mxu1 %v12842_v1 }
 0xcf1   :  { %5818 = vmatpush1.bf16.msra.mxu1 %v12411_v53 }
 0xcf2   :  { %5819 = vmatprep.subr.bf16.mxu1 %v12842_v1 }
 0xcf5   :  { %5820 = vmatpush1.bf16.msra.mxu1 %v12412_v0 }
 0xcf6   :  { %5821 = vmatprep.subr.bf16.mxu1 %v12842_v1 }
 0xcf9   :  { %5822 = vmatpush1.bf16.msra.mxu1 %v12413_v40  ;;  %v12479_v40 = vld [vmem:[%s16227_s22 + $0x140] ss:$8 sps:$4 sm:$0xff]  }
 0xcfa   :  { %5823 = vmatprep.subr.bf16.mxu1 %v12842_v1 }
 0xcfd   :  { %5824 = vmatpush1.bf16.msra.mxu1 %v12414_v2  ;;  %v12480_v2 = vld [vmem:[%s16227_s22 + $0x154] ss:$8 sps:$4 sm:$0xff]  }
 0xcfe   :  { %5825 = vmatprep.subr.bf16.mxu1 %v12842_v1 }
 0xd01   :  { %5826 = vmatpush1.bf16.msra.mxu1 %v12415_v12  ;;  %v12482_v12 = vld [vmem:[%s16227_s22 + $0x150] ss:$8 sps:$4 sm:$0xff]  }
 0xd02   :  { %5827 = vmatprep.subr.bf16.mxu1 %v12842_v1 }
 0xd05   :  { %5828 = vmatpush1.bf16.msra.mxu1 %v12416_v34  ;;  %v12483_v34 = vld [vmem:[%s16227_s22 + $0x164] ss:$8 sps:$4 sm:$0xff]  }
 0xd08   :  { %5830 = vmatmul.mubr.bf16.vlgmr.msra.gmra.mrb[100].mxu1 %v12417_v19  ;;  %v12485_v19 = vld [vmem:[%s16227_s22 + $0x160] ss:$8 sps:$4 sm:$0xff]  }
 0xd09   :  { %5837 = vmatprep.mubr.bf16.mxu1 %v12420_v7  ;;  %v12486_v7 = vld [vmem:[%s16227_s22 + $0x174] ss:$8 sps:$4 sm:$0xff]  }
 0xd10   :  { %5838 = vmatmul.mubr.bf16.gmra.mrb[104].mxu1 %v12422_v4  ;;  %v12488_v4 = vld [vmem:[%s16227_s22 + $0x170] ss:$8 sps:$4 sm:$0xff]  }
 0xd11   :  { %5845 = vmatprep.mubr.bf16.mxu1 %v12423_v27  ;;  %v12489_v27 = vld [vmem:[%s16227_s22 + $0x184] ss:$8 sps:$4 sm:$0xff]  }
 0xd18   :  { %5846 = vmatmul.mubr.bf16.gmra.mrb[108].mxu1 %v12425_v57  ;;  %v12491_v57 = vld [vmem:[%s16227_s22 + $0x180] ss:$8 sps:$4 sm:$0xff]  }
 0xd19   :  { %5853 = vmatprep.mubr.bf16.mxu1 %v12426_v58  ;;  %v12492_v58 = vld [vmem:[%s16227_s22 + $0x194] ss:$8 sps:$4 sm:$0xff]  }
 0xd20   :  { %5854 = vmatmul.mubr.bf16.gmra.mrb[112].mxu1 %v12428_v3  ;;  %v12494_v3 = vld [vmem:[%s16227_s22 + $0x190] ss:$8 sps:$4 sm:$0xff]  }
 0xd21   :  { %5861 = vmatprep.mubr.bf16.mxu1 %v12429_v39  ;;  %v12540_v39 = vld [vmem:[%s16174_s2] sm:$0xff]  }
 0xd22   :  { %11071 = vmatprep.subr.bf16.mxu0 %v12540_v39 }
 0xd23   :  { %11072 = vmatpush3.bf16.msra.mxu0 %v12540_v39 }
 0xd28   :  { %5862 = vmatmul.mubr.bf16.gmra.mrb[116].mxu1 %v12431_v8  ;;  %v12495_v8 = vld [vmem:[%s16227_s22 + $0x1a4] ss:$8 sps:$4 sm:$0xff]  }
 0xd29   :  { %5869 = vmatprep.mubr.bf16.mxu1 %v12432_v59  ;;  %v12497_v59 = vld [vmem:[%s16227_s22 + $0x1a0] ss:$8 sps:$4 sm:$0xff]  }
 0xd30   :  { %5870 = vmatmul.mubr.bf16.gmra.mrb[120].mxu1 %v12434_v10  ;;  %v12498_v10 = vld [vmem:[%s16227_s22 + $0x1b4] ss:$8 sps:$4 sm:$0xff]  }
 0xd31   :  { %5877 = vmatprep.mubr.bf16.mxu1 %v12435_v29 }
 0xd38   :  { %5878 = vmatmul.mubr.bf16.gmra.mrb[124].mxu1 %v12437_v26 }
 0xd39   :  { %5885 = vmatprep.mubr.bf16.mxu1 %v12438_v16  ;;  %v12500_v16 = vld [vmem:[%s16227_s22 + $0x1b0] ss:$8 sps:$4 sm:$0xff]  }
 0xd40   :  { %5886 = vmatmul.mubr.bf16.gmra.mrb[128].mxu1 %v12440_v9 }
 0xd41   :  { %5893 = vmatprep.mubr.bf16.mxu1 %v12441_v13  ;;  %v12501_v13 = vld [vmem:[%s16227_s22 + $0x1c4] ss:$8 sps:$4 sm:$0xff]  }
 0xd48   :  { %5894 = vmatmul.mubr.bf16.gmra.mrb[132].mxu1 %v12443_v15 }
 0xd49   :  { %5901 = vmatprep.mubr.bf16.mxu1 %v12444_v54 }
 0xd50   :  { %5902 = vmatmul.mubr.bf16.gmra.mrb[136].mxu1 %v12446_v52 }
 0xd51   :  { %5909 = vmatprep.mubr.bf16.mxu1 %v12447_v31  ;;  %v12503_v31 = vld [vmem:[%s16227_s22 + $0x1c0] ss:$8 sps:$4 sm:$0xff]  }
 0xd58   :  { %5910 = vmatmul.mubr.bf16.gmra.mrb[140].mxu1 %v12449_v11 }
 0xd59   :  { %5917 = vmatprep.mubr.bf16.mxu1 %v12450_v42  ;;  %v12504_v42 = vld [vmem:[%s16227_s22 + $0x1d4] ss:$8 sps:$4 sm:$0xff]  }
 0xd60   :  { %5918 = vmatmul.mubr.bf16.gmra.mrb[144].mxu1 %v12452_v51 }
 0xd61   :  { %5925 = vmatprep.mubr.bf16.mxu1 %v12453_v41 }
 0xd68   :  { %5926 = vmatmul.mubr.bf16.gmra.mrb[148].mxu1 %v12455_v24 }
 0xd69   :  { %5933 = vmatprep.mubr.bf16.mxu1 %v12456_v22  ;;  %v12506_v22 = vld [vmem:[%s16227_s22 + $0x1d0] ss:$8 sps:$4 sm:$0xff]  }
 0xd70   :  { %5934 = vmatmul.mubr.bf16.gmra.mrb[152].mxu1 %v12458_v60 }
 0xd71   :  { %5941 = vmatprep.mubr.bf16.mxu1 %v12459_v30  ;;  %v12507_v30 = vld [vmem:[%s16227_s22 + $0x1e4] ss:$8 sps:$4 sm:$0xff]  }
 0xd78   :  { %5942 = vmatmul.mubr.bf16.gmra.mrb[156].mxu1 %v12461_v14 }
 0xd79   :  { %5949 = vmatprep.mubr.bf16.mxu1 %v12462_v28 }
 0xd7b   :  { %v10716_v50 = vpop.f32.mrb[92].mxu1 }
 0xd7c   :  { %v10717_v47 = vpop.f32.mrb[93].mxu1 }
 0xd7d   :  { %v10718_v56 = vadd.f32 %v10717_v47, %v10716_v50  ;;  %v10719_v48 = vpop.f32.mrb[94].mxu1  ;;  %v12509_v47 = vld [vmem:[%s16227_s22 + $0x1e0] ss:$8 sps:$4 sm:$0xff]  }
 0xd7e   :  { %v10720_v35 = vpop.f32.mrb[95].mxu1 }
 0xd7f   :  { %v4854_v21 = vadd.f32 %v10718_v56, %v4626_v45  ;;  %v12510_v56 = vld [vmem:[%s16227_s22 + $0x1f4] ss:$8 sps:$4 sm:$0xff]  }
 0xd80   :  { %5950 = vmatmul.mubr.bf16.gmra.mrb[160].mxu1 %v12464_v33 }
 0xd81   :  { %5957 = vmatprep.mubr.bf16.mxu1 %v12465_v55 }
 0xd88   :  { %5958 = vmatmul.mubr.bf16.gmra.mrb[164].mxu1 %v12467_v17  ;;  %v12512_v17 = vld [vmem:[%s16227_s22 + $0x1f0] ss:$8 sps:$4 sm:$0xff]  }
 0xd89   :  { %5965 = vmatprep.mubr.bf16.mxu1 %v12468_v61 }
 0xd90   :  { %5966 = vmatmul.mubr.bf16.gmra.mrb[168].mxu1 %v12470_v38  ;;  %v12513_v38 = vld [vmem:[%s16227_s22 + $0x204] ss:$8 sps:$4 sm:$0xff]  }
 0xd91   :  { %5973 = vmatprep.mubr.bf16.mxu1 %v12471_v20 }
 0xd98   :  { %5974 = vmatmul.mubr.bf16.gmra.mrb[172].mxu1 %v12473_v43 }
 0xd99   :  { %5981 = vmatprep.mubr.bf16.mxu1 %v12474_v44 }
 0xd9b   :  { %v10738_v18 = vpop.f32.mrb[96].mxu1 }
 0xd9c   :  { %v10739_v37 = vpop.f32.mrb[97].mxu1 }
 0xd9d   :  { %v10740_v32 = vadd.f32 %v10739_v37, %v10738_v18  ;;  %v10741_v63 = vpop.f32.mrb[98].mxu1  ;;  %v12515_v18 = vld [vmem:[%s16227_s22 + $0x200] ss:$8 sps:$4 sm:$0xff]  }
 0xd9e   :  { %v10742_v53 = vpop.f32.mrb[99].mxu1 }
 0xd9f   :  { %v4894_v0 = vadd.f32 %v10740_v32, %v4854_v21  ;;  %v12518_v53 = vld [vmem:[%s16227_s22 + $0x210] ss:$8 sps:$4 sm:$0xff]  }
 0xda0   :  { %5982 = vmatmul.mubr.bf16.gmra.mrb[176].mxu1 %v12476_v23  ;;  %v12516_v23 = vld [vmem:[%s16227_s22 + $0x214] ss:$8 sps:$4 sm:$0xff]  }
 0xda1   :  { %5989 = vmatprep.mubr.bf16.mxu1 %v12477_v25  ;;  %4900 = vst.msk [vmem:[#allocation2] sm:$0x1] %vm4899_vm14, %v4894_v0 }
 0xda8   :  { %5990 = vmatmul.mubr.bf16.gmra.mrb[180].mxu1 %v12479_v40  ;;  %v12519_v40 = vld [vmem:[%s16227_s22 + $0x224] ss:$8 sps:$4 sm:$0xff]  }
 0xda9   :  { %5997 = vmatprep.mubr.bf16.mxu1 %v12480_v2 }
 0xdb0   :  { %5998 = vmatmul.mubr.bf16.gmra.mrb[184].mxu1 %v12482_v12 }
 0xdb1   :  { %6005 = vmatprep.mubr.bf16.mxu1 %v12483_v34 }
 0xdb8   :  { %6006 = vmatmul.mubr.bf16.gmra.mrb[188].mxu1 %v12485_v19 }
 0xdb9   :  { %6013 = vmatprep.mubr.bf16.mxu1 %v12486_v7  ;;  %v12521_v7 = vld [vmem:[%s16227_s22 + $0x220] ss:$8 sps:$4 sm:$0xff]  }
 0xdc0   :  { %6014 = vmatmul.mubr.bf16.gmra.mrb[192].mxu1 %v12488_v4 }
 0xdc1   :  { %6021 = vmatprep.mubr.bf16.mxu1 %v12489_v27  ;;  %v12522_v27 = vld [vmem:[%s16227_s22 + $0x234] ss:$8 sps:$4 sm:$0xff]  }
 0xdc8   :  { %6022 = vmatmul.mubr.bf16.gmra.mrb[196].mxu1 %v12491_v57 }
 0xdc9   :  { %6029 = vmatprep.mubr.bf16.mxu1 %v12492_v58 }
 0xdd0   :  { %6030 = vmatmul.mubr.bf16.gmra.mrb[200].mxu1 %v12494_v3 }
 0xdd1   :  { %6037 = vmatprep.mubr.bf16.mxu1 %v12495_v8  ;;  %v12524_v8 = vld [vmem:[%s16227_s22 + $0x230] ss:$8 sps:$4 sm:$0xff]  }
 0xdd8   :  { %6038 = vmatmul.mubr.bf16.gmra.mrb[204].mxu1 %v12497_v59 }
 0xdd9   :  { %6045 = vmatprep.mubr.bf16.mxu1 %v12498_v10  ;;  %v12525_v10 = vld [vmem:[%s16227_s22 + $0x244] ss:$8 sps:$4 sm:$0xff]  }
 0xddb   :  { %v14824_v29 = vpop.f32.mrb[100].mxu1 }
 0xddc   :  { %v5833_v26 = vpop.f32.mrb[101].mxu1 }
 0xddd   :  { %v14829_v9 = vpop.f32.mrb[102].mxu1 }
 0xdde   :  { %v5836_v15 = vpop.f32.mrb[103].mxu1 }
 0xde0   :  { %6046 = vmatmul.mubr.bf16.gmra.mrb[208].mxu1 %v12500_v16 }
 0xde1   :  { %6053 = vmatprep.mubr.bf16.mxu1 %v12501_v13 }
 0xde3   :  { %v14834_v54 = vpop.f32.mrb[104].mxu1 }
 0xde4   :  { %v5841_v52 = vpop.f32.mrb[105].mxu1 }
 0xde5   :  { %v14839_v11 = vpop.f32.mrb[106].mxu1  ;;  %v12527_v52 = vld [vmem:[%s16227_s22 + $0x240] ss:$8 sps:$4 sm:$0xff]  }
 0xde6   :  { %v5844_v51 = vpop.f32.mrb[107].mxu1 }
 0xde8   :  { %6054 = vmatmul.mubr.bf16.gmra.mrb[212].mxu1 %v12503_v31 }
 0xde9   :  { %6061 = vmatprep.mubr.bf16.mxu1 %v12504_v42  ;;  %v12528_v42 = vld [vmem:[%s16227_s22 + $0x254] ss:$8 sps:$4 sm:$0xff]  }
 0xdeb   :  { %v14844_v41 = vpop.f32.mrb[108].mxu1 }
 0xdec   :  { %v5849_v24 = vpop.f32.mrb[109].mxu1 }
 0xded   :  { %v14849_v60 = vpop.f32.mrb[110].mxu1 }
 0xdee   :  { %v5852_v14 = vpop.f32.mrb[111].mxu1 }
 0xdef   :  { %v12530_v14 = vld [vmem:[%s16227_s22 + $0x250] ss:$8 sps:$4 sm:$0xff]  }
 0xdf0   :  { %6062 = vmatmul.mubr.bf16.gmra.mrb[216].mxu1 %v12506_v22 }
 0xdf1   :  { %6069 = vmatprep.mubr.bf16.mxu1 %v12507_v30 }
 0xdf3   :  { %v14854_v28 = vpop.f32.mrb[112].mxu1 }
 0xdf4   :  { %v5857_v50 = vpop.f32.mrb[113].mxu1 }
 0xdf5   :  { %v14859_v33 = vpop.f32.mrb[114].mxu1 }
 0xdf6   :  { %v5860_v48 = vpop.f32.mrb[115].mxu1 }
 0xdf8   :  { %6070 = vmatmul.mubr.bf16.gmra.mrb[220].mxu1 %v12509_v47  ;;  %v12531_v47 = vld [vmem:[%s16227_s22 + $0x264] ss:$8 sps:$4 sm:$0xff]  }
 0xdf9   :  { %6077 = vmatprep.mubr.bf16.mxu1 %v12510_v56 }
 0xdfb   :  { %v5863_v55 = vpop.f32.mrb[116].mxu1 }
 0xdfc   :  { %v5865_v35 = vpop.f32.mrb[117].mxu1 }
 0xdfd   :  { %v5866_v61 = vpop.f32.mrb[118].mxu1 }
 0xdfe   :  { %v11574_v20 = vpack.i.bf16 %v5866_v61, %v5863_v55  ;;  %v5868_v43 = vpop.f32.mrb[119].mxu1 }
 0xe00   :  { %6078 = vmatmul.mubr.bf16.gmra.mrb[224].mxu1 %v12512_v17  ;;  %11575 = vrot.lane.b32.xlu0 %v11574_v20, %s16228_s24  ;;  %v12533_v17 = vld [vmem:[%s16227_s22 + $0x260] ss:$8 sps:$4 sm:$0xff]  }
 0xe01   :  { %6085 = vmatprep.mubr.bf16.mxu1 %v12513_v38  ;;  %v12536_v38 = vld [vmem:[%s16227_s22 + $0x274] ss:$8 sps:$4 sm:$0xff]  }
 0xe03   :  { %v5871_v44 = vpop.f32.mrb[120].mxu1 }
 0xe04   :  { %v5873_v45 = vpop.f32.mrb[121].mxu1 }
 0xe05   :  { %v5874_v37 = vpop.f32.mrb[122].mxu1 }
 0xe06   :  { %v11579_v21 = vpack.i.bf16 %v5874_v37, %v5871_v44  ;;  %v5876_v32 = vpop.f32.mrb[123].mxu1 }
 0xe08   :  { %6086 = vmatmul.mubr.bf16.gmra.mrb[228].mxu1 %v12515_v18  ;;  %11580 = vrot.lane.b32.xlu1 %v11579_v21, %s16228_s24  ;;  %v12534_v18 = vld [vmem:[%s16227_s22 + $0x270] ss:$8 sps:$4 sm:$0xff]  }
 0xe09   :  { %6093 = vmatprep.mubr.bf16.mxu1 %v12516_v23  ;;  %v12539_v23 = vld [vmem:[%s16227_s22 + $0x284] ss:$8 sps:$4 sm:$0xff]  }
 0xe0b   :  { %v5879_v63 = vpop.f32.mrb[124].mxu1 }
 0xe0c   :  { %v5881_v25 = vpop.f32.mrb[125].mxu1 }
 0xe0d   :  { %v5882_v0 = vpop.f32.mrb[126].mxu1 }
 0xe0e   :  { %v11584_v2 = vpack.i.bf16 %v5882_v0, %v5879_v63  ;;  %v5884_v12 = vpop.f32.mrb[127].mxu1 }
 0xe10   :  { %6094 = vmatmul.mubr.bf16.gmra.mrb[232].mxu1 %v12518_v53  ;;  %11585 = vrot.lane.b32.xlu1 %v11584_v2, %s16228_s24  ;;  %v12537_v53 = vld [vmem:[%s16227_s22 + $0x280] ss:$8 sps:$4 sm:$0xff]  }
 0xe11   :  { %6101 = vmatprep.mubr.bf16.mxu1 %v12519_v40  ;;  %v12543_v40 = vld [vmem:[%s16227_s22 + $0x294] ss:$8 sps:$4 sm:$0xff]  }
 0xe13   :  { %v5887_v34 = vpop.f32.mrb[128].mxu1 }
 0xe14   :  { %v5889_v19 = vpop.f32.mrb[129].mxu1 }
 0xe15   :  { %v5890_v4 = vpop.f32.mrb[130].mxu1 }
 0xe16   :  { %v11589_v57 = vpack.i.bf16 %v5890_v4, %v5887_v34  ;;  %v5892_v58 = vpop.f32.mrb[131].mxu1 }
 0xe18   :  { %6102 = vmatmul.mubr.bf16.gmra.mrb[236].mxu1 %v12521_v7  ;;  %11590 = vrot.lane.b32.xlu0 %v11589_v57, %s16228_s24  ;;  %v12541_v7 = vld [vmem:[%s16227_s22 + $0x290] ss:$8 sps:$4 sm:$0xff]   ;;  %v12589_v57 = vld [vmem:[%s16174_s2 + $0x8] sm:$0xff]  }
 0xe19   :  { %6109 = vmatprep.mubr.bf16.mxu1 %v12522_v27  ;;  %v12546_v27 = vld [vmem:[%s16227_s22 + $0x2a4] ss:$8 sps:$4 sm:$0xff]   ;;  %11073 = vmatprep.subr.bf16.mxu0 %v12589_v57 }
 0xe1a   :  { %11074 = vmatpush3.bf16.msra.mxu0 %v12589_v57 }
 0xe1b   :  { %v5895_v3 = vpop.f32.mrb[132].mxu1 }
 0xe1c   :  { %v5897_v39 = vpop.f32.mrb[133].mxu1 }
 0xe1d   :  { %v5898_v59 = vpop.f32.mrb[134].mxu1 }
 0xe1e   :  { %v11594_v26 = vpack.i.bf16 %v5898_v59, %v5895_v3  ;;  %v5900_v16 = vpop.f32.mrb[135].mxu1  ;;  %v12544_v59 = vld [vmem:[%s16227_s22 + $0x2a0] ss:$8 sps:$4 sm:$0xff]  }
 0xe20   :  { %6110 = vmatmul.mubr.bf16.gmra.mrb[240].mxu1 %v12524_v8  ;;  %11595 = vrot.lane.b32.xlu0 %v11594_v26, %s16229_s21  ;;  %v12549_v26 = vld [vmem:[%s16227_s22 + $0x2b4] ss:$8 sps:$4 sm:$0xff]  }
 0xe21   :  { %6117 = vmatprep.mubr.bf16.mxu1 %v12525_v10 }
 0xe23   :  { %v5903_v13 = vpop.f32.mrb[136].mxu1 }
 0xe24   :  { %v5905_v15 = vpop.f32.mrb[137].mxu1 }
 0xe25   :  { %v5906_v31 = vpop.f32.mrb[138].mxu1 }
 0xe26   :  { %v11599_v51 = vpack.i.bf16 %v5906_v31, %v5903_v13  ;;  %v5908_v24 = vpop.f32.mrb[139].mxu1  ;;  %v12547_v31 = vld [vmem:[%s16227_s22 + $0x2b0] ss:$8 sps:$4 sm:$0xff]  }
 0xe28   :  { %6118 = vmatmul.mubr.bf16.gmra.mrb[244].mxu1 %v12527_v52  ;;  %11600 = vrot.lane.b32.xlu1 %v11599_v51, %s16229_s21  ;;  %v12552_v51 = vld [vmem:[%s16227_s22 + $0x2c4] ss:$8 sps:$4 sm:$0xff]  }
 0xe29   :  { %6125 = vmatprep.mubr.bf16.mxu1 %v12528_v42 }
 0xe2b   :  { %v5911_v22 = vpop.f32.mrb[140].mxu1 }
 0xe2c   :  { %v5913_v30 = vpop.f32.mrb[141].mxu1 }
 0xe2d   :  { %v5914_v50 = vpop.f32.mrb[142].mxu1 }
 0xe2e   :  { %v11604_v56 = vpack.i.bf16 %v5914_v50, %v5911_v22  ;;  %v5916_v48 = vpop.f32.mrb[143].mxu1  ;;  %v12550_v50 = vld [vmem:[%s16227_s22 + $0x2c0] ss:$8 sps:$4 sm:$0xff]  }
 0xe30   :  { %6126 = vmatmul.mubr.bf16.gmra.mrb[248].mxu1 %v12530_v14  ;;  %11605 = vrot.lane.b32.xlu1 %v11604_v56, %s16229_s21  ;;  %v12555_v56 = vld [vmem:[%s16227_s22 + $0x2d4] ss:$8 sps:$4 sm:$0xff]  }
 0xe31   :  { %6133 = vmatprep.mubr.bf16.mxu1 %v12531_v47 }
 0xe33   :  { %v5919_v55 = vpop.f32.mrb[144].mxu1 }
 0xe34   :  { %v5921_v35 = vpop.f32.mrb[145].mxu1 }
 0xe35   :  { %v5922_v61 = vpop.f32.mrb[146].mxu1 }
 0xe36   :  { %v11609_v20 = vpack.i.bf16 %v5922_v61, %v5919_v55  ;;  %v5924_v43 = vpop.f32.mrb[147].mxu1  ;;  %v12553_v61 = vld [vmem:[%s16227_s22 + $0x2d0] ss:$8 sps:$4 sm:$0xff]  }
 0xe38   :  { %6134 = vmatmul.mubr.bf16.gmra.mrb[252].mxu1 %v12533_v17  ;;  %11610 = vrot.lane.b32.xlu0 %v11609_v20, %s16229_s21  ;;  %v12558_v20 = vld [vmem:[%s16227_s22 + $0x2e4] ss:$8 sps:$4 sm:$0xff]   ;;  %s16238_s21 = smov 48  }
 0xe39   :  { %6141 = vmatprep.mubr.bf16.mxu1 %v12536_v38 }
 0xe3b   :  { %v5927_v44 = vpop.f32.mrb[148].mxu1 }
 0xe3c   :  { %v5929_v45 = vpop.f32.mrb[149].mxu1 }
 0xe3d   :  { %v5930_v37 = vpop.f32.mrb[150].mxu1 }
 0xe3e   :  { %v11614_v21 = vpack.i.bf16 %v5930_v37, %v5927_v44  ;;  %v5932_v32 = vpop.f32.mrb[151].mxu1 }
 0xe3f   :  { %v12556_v32 = vld [vmem:[%s16227_s22 + $0x2e0] ss:$8 sps:$4 sm:$0xff]  }
 0xe40   :  { %6142 = vmatmul.mubr.bf16.gmra.mrb[0].mxu1 %v12534_v18  ;;  %11615 = vrot.lane.b32.xlu0 %v11614_v21, %s16230_s28 }
 0xe41   :  { %6149 = vmatprep.mubr.bf16.mxu1 %v12539_v23 }
 0xe43   :  { %v5935_v63 = vpop.f32.mrb[152].mxu1 }
 0xe44   :  { %v5937_v25 = vpop.f32.mrb[153].mxu1 }
 0xe45   :  { %v5938_v0 = vpop.f32.mrb[154].mxu1 }
 0xe46   :  { %v11619_v2 = vpack.i.bf16 %v5938_v0, %v5935_v63  ;;  %v5940_v12 = vpop.f32.mrb[155].mxu1  ;;  %v12561_v0 = vld [vmem:[%s16227_s22 + $0x2f4] ss:$8 sps:$4 sm:$0xff]  }
 0xe48   :  { %6150 = vmatmul.mubr.bf16.gmra.mrb[4].mxu1 %v12537_v53  ;;  %11620 = vrot.lane.b32.xlu1 %v11619_v2, %s16230_s28 }
 0xe49   :  { %6157 = vmatprep.mubr.bf16.mxu1 %v12543_v40 }
 0xe4b   :  { %v5943_v34 = vpop.f32.mrb[156].mxu1 }
 0xe4c   :  { %v5945_v19 = vpop.f32.mrb[157].mxu1 }
 0xe4d   :  { %v5946_v4 = vpop.f32.mrb[158].mxu1 }
 0xe4e   :  { %v11624_v58 = vpack.i.bf16 %v5946_v4, %v5943_v34  ;;  %v5948_v3 = vpop.f32.mrb[159].mxu1 }
 0xe50   :  { %6158 = vmatmul.mubr.bf16.gmra.mrb[8].mxu1 %v12541_v7  ;;  %11625 = vrot.lane.b32.xlu1 %v11624_v58, %s16230_s28  ;;  %v12564_v58 = vld [vmem:[%s16227_s22 + $0x304] ss:$8 sps:$4 sm:$0xff]  }
 0xe51   :  { %6165 = vmatprep.mubr.bf16.mxu1 %v12546_v27 }
 0xe53   :  { %v5951_v39 = vpop.f32.mrb[160].mxu1 }
 0xe54   :  { %v5953_v8 = vpop.f32.mrb[161].mxu1 }
 0xe55   :  { %v5954_v10 = vpop.f32.mrb[162].mxu1 }
 0xe56   :  { %v11629_v16 = vpack.i.bf16 %v5954_v10, %v5951_v39  ;;  %v5956_v13 = vpop.f32.mrb[163].mxu1 }
 0xe58   :  { %6166 = vmatmul.mubr.bf16.gmra.mrb[12].mxu1 %v12544_v59  ;;  %11630 = vrot.lane.b32.xlu0 %v11629_v16, %s16230_s28 }
 0xe59   :  { %6173 = vmatprep.mubr.bf16.mxu1 %v12549_v26 }
 0xe5b   :  { %v5959_v15 = vpop.f32.mrb[164].mxu1 }
 0xe5c   :  { %v5961_v52 = vpop.f32.mrb[165].mxu1 }
 0xe5d   :  { %v5962_v42 = vpop.f32.mrb[166].mxu1  ;;  %v12567_v52 = vld [vmem:[%s16227_s22 + $0x314] ss:$8 sps:$4 sm:$0xff]  }
 0xe5e   :  { %v11634_v24 = vpack.i.bf16 %v5962_v42, %v5959_v15  ;;  %v5964_v22 = vpop.f32.mrb[167].mxu1 }
 0xe60   :  { %6174 = vmatmul.mubr.bf16.gmra.mrb[16].mxu1 %v12547_v31  ;;  %11635 = vrot.lane.b32.xlu0 %v11634_v24, %s16231_s1 }
 0xe61   :  { %6181 = vmatprep.mubr.bf16.mxu1 %v12552_v51 }
 0xe63   :  { %v5967_v30 = vpop.f32.mrb[168].mxu1 }
 0xe64   :  { %v5969_v14 = vpop.f32.mrb[169].mxu1 }
 0xe65   :  { %v5970_v47 = vpop.f32.mrb[170].mxu1 }
 0xe66   :  { %v11639_v48 = vpack.i.bf16 %v5970_v47, %v5967_v30  ;;  %v5972_v55 = vpop.f32.mrb[171].mxu1 }
 0xe68   :  { %6182 = vmatmul.mubr.bf16.gmra.mrb[20].mxu1 %v12550_v50  ;;  %11640 = vrot.lane.b32.xlu1 %v11639_v48, %s16231_s1 }
 0xe69   :  { %6189 = vmatprep.mubr.bf16.mxu1 %v12555_v56  ;;  %v12570_v56 = vld [vmem:[%s16227_s22 + $0x324] ss:$8 sps:$4 sm:$0xff]  }
 0xe6b   :  { %v5975_v35 = vpop.f32.mrb[172].mxu1 }
 0xe6c   :  { %v5977_v17 = vpop.f32.mrb[173].mxu1 }
 0xe6d   :  { %v5978_v38 = vpop.f32.mrb[174].mxu1 }
 0xe6e   :  { %v11644_v43 = vpack.i.bf16 %v5978_v38, %v5975_v35  ;;  %v5980_v44 = vpop.f32.mrb[175].mxu1 }
 0xe70   :  { %6190 = vmatmul.mubr.bf16.gmra.mrb[24].mxu1 %v12553_v61  ;;  %11645 = vrot.lane.b32.xlu1 %v11644_v43, %s16231_s1 }
 0xe71   :  { %6197 = vmatprep.mubr.bf16.mxu1 %v12558_v20 }
 0xe72   :  { %v11576_v45 = vpop.permute.xlu0 %11575 }
 0xe73   :  { %v11578_v18 = vunpack.i.h.bf16 %v11576_v45  ;;  %v11577_v37 = vunpack.i.l.bf16 %v11576_v45  ;;  %v5983_v23 = vpop.f32.mrb[176].mxu1  ;;  %v12573_v45 = vld [vmem:[%s16227_s22 + $0x334] ss:$8 sps:$4 sm:$0xff]  }
 0xe74   :  { %v5985_v21 = vpop.f32.mrb[177].mxu1 }
 0xe75   :  { %v6823_v63 = vsel %vm1979_vm0, %v14829_v9, %v11578_v18  ;;  %v6822_v25 = vsel %vm1979_vm0, %v14824_v29, %v11577_v37  ;;  %v5986_v53 = vpop.f32.mrb[178].mxu1  ;;  %v12559_v29 = vld [vmem:[%s16227_s22 + $0x2f0] ss:$8 sps:$4 sm:$0xff]  }
 0xe76   :  { %v11649_v40 = vpack.i.bf16 %v5986_v53, %v5983_v23  ;;  %v5988_v2 = vpop.f32.mrb[179].mxu1 }
 0xe78   :  { %6198 = vmatmul.mubr.bf16.gmra.mrb[28].mxu1 %v12556_v32  ;;  %11650 = vrot.lane.b32.xlu0 %v11649_v40, %s16231_s1  ;;  %s16232_s1 = smov 20  }
 0xe79   :  { %6205 = vmatprep.mubr.bf16.mxu1 %v12561_v0 }
 0xe7a   :  { %v11581_v12 = vpop.permute.xlu1 %11580 }
 0xe7b   :  { %v11583_v34 = vunpack.i.h.bf16 %v11581_v12  ;;  %v11582_v19 = vunpack.i.l.bf16 %v11581_v12  ;;  %v5991_v7 = vpop.f32.mrb[180].mxu1  ;;  %v12576_v12 = vld [vmem:[%s16227_s22 + $0x344] ss:$8 sps:$4 sm:$0xff]  }
 0xe7c   :  { %v5993_v4 = vpop.f32.mrb[181].mxu1 }
 0xe7d   :  { %v6825_v9 = vsel %vm1979_vm0, %v14839_v11, %v11583_v34  ;;  %v6824_v27 = vsel %vm1979_vm0, %v14834_v54, %v11582_v19  ;;  %v5994_v57 = vpop.f32.mrb[182].mxu1  ;;  %v12562_v54 = vld [vmem:[%s16227_s22 + $0x300] ss:$8 sps:$4 sm:$0xff]  }
 0xe7e   :  { %v11654_v3 = vpack.i.bf16 %v5994_v57, %v5991_v7  ;;  %v5996_v39 = vpop.f32.mrb[183].mxu1 }
 0xe80   :  { %6206 = vmatmul.mubr.bf16.gmra.mrb[32].mxu1 %v12559_v29  ;;  %11655 = vrot.lane.b32.xlu0 %v11654_v3, %s16232_s1 }
 0xe81   :  { %6213 = vmatprep.mubr.bf16.mxu1 %v12564_v58 }
 0xe82   :  { %v11586_v8 = vpop.permute.xlu1 %11585 }
 0xe83   :  { %v11588_v59 = vunpack.i.h.bf16 %v11586_v8  ;;  %v11587_v10 = vunpack.i.l.bf16 %v11586_v8  ;;  %v5999_v26 = vpop.f32.mrb[184].mxu1  ;;  %v12579_v8 = vld [vmem:[%s16227_s22 + $0x354] ss:$8 sps:$4 sm:$0xff]  }
 0xe84   :  { %v6001_v16 = vpop.f32.mrb[185].mxu1 }
 0xe85   :  { %v6827_v11 = vsel %vm1979_vm0, %v14849_v60, %v11588_v59  ;;  %v6826_v13 = vsel %vm1979_vm0, %v14844_v41, %v11587_v10  ;;  %v6002_v15 = vpop.f32.mrb[186].mxu1  ;;  %v12565_v41 = vld [vmem:[%s16227_s22 + $0x310] ss:$8 sps:$4 sm:$0xff]  }
 0xe86   :  { %v11659_v31 = vpack.i.bf16 %v6002_v15, %v5999_v26  ;;  %v6004_v42 = vpop.f32.mrb[187].mxu1 }
 0xe88   :  { %6214 = vmatmul.mubr.bf16.gmra.mrb[36].mxu1 %v12562_v54  ;;  %11660 = vrot.lane.b32.xlu1 %v11659_v31, %s16232_s1 }
 0xe89   :  { %6221 = vmatprep.mubr.bf16.mxu1 %v12567_v52 }
 0xe8a   :  { %v11591_v51 = vpop.permute.xlu0 %11590 }
 0xe8b   :  { %v11593_v24 = vunpack.i.h.bf16 %v11591_v51  ;;  %v11592_v22 = vunpack.i.l.bf16 %v11591_v51  ;;  %v6007_v30 = vpop.f32.mrb[188].mxu1  ;;  %v12582_v51 = vld [vmem:[%s16227_s22 + $0x364] ss:$8 sps:$4 sm:$0xff]  }
 0xe8c   :  { %v6009_v14 = vpop.f32.mrb[189].mxu1 }
 0xe8d   :  { %v6829_v60 = vsel %vm1979_vm0, %v14859_v33, %v11593_v24  ;;  %v6828_v50 = vsel %vm1979_vm0, %v14854_v28, %v11592_v22  ;;  %v6010_v47 = vpop.f32.mrb[190].mxu1  ;;  %v12568_v28 = vld [vmem:[%s16227_s22 + $0x320] ss:$8 sps:$4 sm:$0xff]  }
 0xe8e   :  { %v11664_v48 = vpack.i.bf16 %v6010_v47, %v6007_v30  ;;  %v6012_v55 = vpop.f32.mrb[191].mxu1 }
 0xe90   :  { %6222 = vmatmul.mubr.bf16.gmra.mrb[40].mxu1 %v12565_v41  ;;  %11665 = vrot.lane.b32.xlu1 %v11664_v48, %s16232_s1 }
 0xe91   :  { %6229 = vmatprep.mubr.bf16.mxu1 %v12570_v56 }
 0xe92   :  { %v11596_v35 = vpop.permute.xlu0 %11595 }
 0xe93   :  { %v11598_v17 = vunpack.i.h.bf16 %v11596_v35  ;;  %v11597_v61 = vunpack.i.l.bf16 %v11596_v35  ;;  %v6015_v38 = vpop.f32.mrb[192].mxu1  ;;  %v12585_v35 = vld [vmem:[%s16227_s22 + $0x374] ss:$8 sps:$4 sm:$0xff]  }
 0xe94   :  { %v6017_v20 = vpop.f32.mrb[193].mxu1 }
 0xe95   :  { %v6831_v33 = vsel %vm1988_vm1, %v6823_v63, %v11598_v17  ;;  %v6830_v43 = vsel %vm1988_vm1, %v6822_v25, %v11597_v61  ;;  %v6018_v44 = vpop.f32.mrb[194].mxu1  ;;  %v12571_v63 = vld [vmem:[%s16227_s22 + $0x330] ss:$8 sps:$4 sm:$0xff]  }
 0xe96   :  { %v11669_v18 = vpack.i.bf16 %v6018_v44, %v6015_v38  ;;  %v6020_v37 = vpop.f32.mrb[195].mxu1 }
 0xe98   :  { %6230 = vmatmul.mubr.bf16.gmra.mrb[44].mxu1 %v12568_v28  ;;  %11670 = vrot.lane.b32.xlu0 %v11669_v18, %s16232_s1  ;;  %s16233_s1 = smov 24  }
 0xe99   :  { %6237 = vmatprep.mubr.bf16.mxu1 %v12573_v45 }
 0xe9a   :  { %v11601_v23 = vpop.permute.xlu1 %11600 }
 0xe9b   :  { %v11603_v21 = vunpack.i.h.bf16 %v11601_v23  ;;  %v11602_v32 = vunpack.i.l.bf16 %v11601_v23  ;;  %v6023_v53 = vpop.f32.mrb[196].mxu1  ;;  %v12588_v23 = vld [vmem:[%s16227_s22 + $0x384] ss:$8 sps:$4 sm:$0xff]  }
 0xe9c   :  { %v6025_v0 = vpop.f32.mrb[197].mxu1 }
 0xe9d   :  { %v6833_v25 = vsel %vm1988_vm1, %v6825_v9, %v11603_v21  ;;  %v6832_v40 = vsel %vm1988_vm1, %v6824_v27, %v11602_v32  ;;  %v6026_v2 = vpop.f32.mrb[198].mxu1  ;;  %v12574_v9 = vld [vmem:[%s16227_s22 + $0x340] ss:$8 sps:$4 sm:$0xff]  }
 0xe9e   :  { %v11674_v34 = vpack.i.bf16 %v6026_v2, %v6023_v53  ;;  %v6028_v19 = vpop.f32.mrb[199].mxu1 }
 0xea0   :  { %6238 = vmatmul.mubr.bf16.gmra.mrb[48].mxu1 %v12571_v63  ;;  %11675 = vrot.lane.b32.xlu0 %v11674_v34, %s16233_s1 }
 0xea1   :  { %6245 = vmatprep.mubr.bf16.mxu1 %v12576_v12 }
 0xea2   :  { %v11606_v7 = vpop.permute.xlu1 %11605 }
 0xea3   :  { %v11608_v4 = vunpack.i.h.bf16 %v11606_v7  ;;  %v11607_v29 = vunpack.i.l.bf16 %v11606_v7  ;;  %v6031_v57 = vpop.f32.mrb[200].mxu1  ;;  %v12592_v7 = vld [vmem:[%s16227_s22 + $0x394] ss:$8 sps:$4 sm:$0xff]  }
 0xea4   :  { %v6033_v58 = vpop.f32.mrb[201].mxu1 }
 0xea5   :  { %v6835_v27 = vsel %vm1988_vm1, %v6827_v11, %v11608_v4  ;;  %v6834_v3 = vsel %vm1988_vm1, %v6826_v13, %v11607_v29  ;;  %v6034_v39 = vpop.f32.mrb[202].mxu1  ;;  %v12577_v11 = vld [vmem:[%s16227_s22 + $0x350] ss:$8 sps:$4 sm:$0xff]  }
 0xea6   :  { %v11679_v59 = vpack.i.bf16 %v6034_v39, %v6031_v57  ;;  %v6036_v10 = vpop.f32.mrb[203].mxu1 }
 0xea8   :  { %6246 = vmatmul.mubr.bf16.gmra.mrb[52].mxu1 %v12574_v9  ;;  %11680 = vrot.lane.b32.xlu1 %v11679_v59, %s16233_s1 }
 0xea9   :  { %6253 = vmatprep.mubr.bf16.mxu1 %v12579_v8 }
 0xeaa   :  { %v11611_v26 = vpop.permute.xlu0 %11610 }
 0xeab   :  { %v11613_v16 = vunpack.i.h.bf16 %v11611_v26  ;;  %v11612_v54 = vunpack.i.l.bf16 %v11611_v26  ;;  %v6039_v15 = vpop.f32.mrb[204].mxu1  ;;  %v12595_v26 = vld [vmem:[%s16227_s22 + $0x3a4] ss:$8 sps:$4 sm:$0xff]  }
 0xeac   :  { %v6041_v52 = vpop.f32.mrb[205].mxu1 }
 0xead   :  { %v6837_v13 = vsel %vm1988_vm1, %v6829_v60, %v11613_v16  ;;  %v6836_v31 = vsel %vm1988_vm1, %v6828_v50, %v11612_v54  ;;  %v6042_v42 = vpop.f32.mrb[206].mxu1  ;;  %v12580_v60 = vld [vmem:[%s16227_s22 + $0x360] ss:$8 sps:$4 sm:$0xff]   ;;  %v12611_v16 = vld [vmem:[%s16174_s2 + $0x10] sm:$0xff]   ;;  %vm16242_vm1 = vcmask 457728  }
 0xeae   :  { %v11684_v24 = vpack.i.bf16 %v6042_v42, %v6039_v15  ;;  %v6044_v22 = vpop.f32.mrb[207].mxu1  ;;  %11075 = vmatprep.subr.bf16.mxu0 %v12611_v16 }
 0xeaf   :  { %11076 = vmatpush3.bf16.msra.mxu0 %v12611_v16 }
 0xeb0   :  { %6254 = vmatmul.mubr.bf16.gmra.mrb[56].mxu1 %v12577_v11  ;;  %11685 = vrot.lane.b32.xlu1 %v11684_v24, %s16233_s1 }
 0xeb1   :  { %6261 = vmatprep.mubr.bf16.mxu1 %v12582_v51  ;;  %v12593_v51 = vld [vmem:[%s16227_s22 + $0x3a0] ss:$8 sps:$4 sm:$0xff]  }
 0xeb2   :  { %v11616_v30 = vpop.permute.xlu0 %11615 }
 0xeb3   :  { %v11618_v14 = vunpack.i.h.bf16 %v11616_v30  ;;  %v11617_v41 = vunpack.i.l.bf16 %v11616_v30  ;;  %v6047_v47 = vpop.f32.mrb[208].mxu1 }
 0xeb4   :  { %v6049_v56 = vpop.f32.mrb[209].mxu1 }
 0xeb5   :  { %v15056_v50 = vsel %vm1997_vm2, %v6831_v33, %v11618_v14  ;;  %v15059_v48 = vsel %vm1997_vm2, %v6830_v43, %v11617_v41  ;;  %v6050_v55 = vpop.f32.mrb[210].mxu1  ;;  %v12583_v43 = vld [vmem:[%s16227_s22 + $0x370] ss:$8 sps:$4 sm:$0xff]   ;;  %v12598_v14 = vld [vmem:[%s16227_s22 + $0x3b4] ss:$8 sps:$4 sm:$0xff]  }
 0xeb6   :  { %v11689_v17 = vpack.i.bf16 %v6050_v55, %v6047_v47  ;;  %v6052_v61 = vpop.f32.mrb[211].mxu1 }
 0xeb8   :  { %6262 = vmatmul.mubr.bf16.gmra.mrb[60].mxu1 %v12580_v60  ;;  %11690 = vrot.lane.b32.xlu0 %v11689_v17, %s16233_s1  ;;  %s16234_s1 = smov 28  }
 0xeb9   :  { %6269 = vmatprep.mubr.bf16.mxu1 %v12585_v35 }
 0xeba   :  { %v11621_v38 = vpop.permute.xlu1 %11620 }
 0xebb   :  { %v11623_v20 = vunpack.i.h.bf16 %v11621_v38  ;;  %v11622_v28 = vunpack.i.l.bf16 %v11621_v38  ;;  %v6055_v44 = vpop.f32.mrb[212].mxu1 }
 0xebc   :  { %v6057_v33 = vpop.f32.mrb[213].mxu1 }
 0xebd   :  { %v15069_v45 = vsel %vm1997_vm2, %v6833_v25, %v11623_v20  ;;  %v15072_v18 = vsel %vm1997_vm2, %v6832_v40, %v11622_v28  ;;  %v6058_v37 = vpop.f32.mrb[214].mxu1  ;;  %v12586_v40 = vld [vmem:[%s16227_s22 + $0x380] ss:$8 sps:$4 sm:$0xff]   ;;  %v12601_v20 = vld [vmem:[%s16227_s22 + $0x3c4] ss:$8 sps:$4 sm:$0xff]  }
 0xebe   :  { %v11694_v21 = vpack.i.bf16 %v6058_v37, %v6055_v44  ;;  %v6060_v32 = vpop.f32.mrb[215].mxu1 }
 0xec0   :  { %6270 = vmatmul.mubr.bf16.gmra.mrb[64].mxu1 %v12583_v43  ;;  %11695 = vrot.lane.b32.xlu0 %v11694_v21, %s16234_s1 }
 0xec1   :  { %6277 = vmatprep.mubr.bf16.mxu1 %v12588_v23 }
 0xec2   :  { %v11626_v53 = vpop.permute.xlu1 %11625 }
 0xec3   :  { %v11628_v0 = vunpack.i.h.bf16 %v11626_v53  ;;  %v11627_v63 = vunpack.i.l.bf16 %v11626_v53  ;;  %v6063_v2 = vpop.f32.mrb[216].mxu1 }
 0xec4   :  { %v6065_v25 = vpop.f32.mrb[217].mxu1 }
 0xec5   :  { %v15082_v12 = vsel %vm1997_vm2, %v6835_v27, %v11628_v0  ;;  %v15085_v34 = vsel %vm1997_vm2, %v6834_v3, %v11627_v63  ;;  %v6066_v19 = vpop.f32.mrb[218].mxu1  ;;  %v12590_v3 = vld [vmem:[%s16227_s22 + $0x390] ss:$8 sps:$4 sm:$0xff]   ;;  %v12604_v0 = vld [vmem:[%s16227_s22 + $0x3d4] ss:$8 sps:$4 sm:$0xff]  }
 0xec6   :  { %v11699_v4 = vpack.i.bf16 %v6066_v19, %v6063_v2  ;;  %v6068_v29 = vpop.f32.mrb[219].mxu1 }
 0xec8   :  { %6278 = vmatmul.mubr.bf16.gmra.mrb[68].mxu1 %v12586_v40  ;;  %11700 = vrot.lane.b32.xlu1 %v11699_v4, %s16234_s1 }
 0xec9   :  { %6285 = vmatprep.mubr.bf16.mxu1 %v12592_v7 }
 0xeca   :  { %v11631_v57 = vpop.permute.xlu0 %11630 }
 0xecb   :  { %v11633_v58 = vunpack.i.h.bf16 %v11631_v57  ;;  %v11632_v9 = vunpack.i.l.bf16 %v11631_v57  ;;  %v6071_v39 = vpop.f32.mrb[220].mxu1 }
 0xecc   :  { %v6073_v27 = vpop.f32.mrb[221].mxu1 }
 0xecd   :  { %v15095_v8 = vsel %vm1997_vm2, %v6837_v13, %v11633_v58  ;;  %v15098_v59 = vsel %vm1997_vm2, %v6836_v31, %v11632_v9  ;;  %v6074_v10 = vpop.f32.mrb[222].mxu1  ;;  %v12607_v58 = vld [vmem:[%s16227_s22 + $0x3e4] ss:$8 sps:$4 sm:$0xff]   ;;  %vm16243_vm2 = vmmov %vm16242_vm1 }
 0xece   :  { %v11704_v54 = vpack.i.bf16 %v6074_v10, %v6071_v39  ;;  %v6076_v15 = vpop.f32.mrb[223].mxu1 }
 0xed0   :  { %6286 = vmatmul.mubr.bf16.gmra.mrb[72].mxu1 %v12590_v3  ;;  %11705 = vrot.lane.b32.xlu1 %v11704_v54, %s16234_s1 }
 0xed1   :  { %6293 = vmatprep.mubr.bf16.mxu1 %v12595_v26 }
 0xed2   :  { %v11636_v52 = vpop.permute.xlu0 %11635 }
 0xed3   :  { %v11638_v11 = vunpack.i.h.bf16 %v11636_v52  ;;  %v11637_v13 = vunpack.i.l.bf16 %v11636_v52  ;;  %v6079_v31 = vpop.f32.mrb[224].mxu1 }
 0xed4   :  { %v6081_v42 = vpop.f32.mrb[225].mxu1 }
 0xed5   :  { %v15112_v24 = vsel %vm2006_vm3, %v15056_v50, %v11638_v11  ;;  %v15116_v22 = vsel %vm2006_vm3, %v15059_v48, %v11637_v13  ;;  %v6082_v30 = vpop.f32.mrb[226].mxu1  ;;  %v12596_v48 = vld [vmem:[%s16227_s22 + $0x3b0] ss:$8 sps:$4 sm:$0xff]  }
 0xed6   :  { %v11709_v41 = vpack.i.bf16 %v6082_v30, %v6079_v31  ;;  %v6084_v47 = vpop.f32.mrb[227].mxu1  ;;  %v12608_v31 = vld [vmem:[%s16227_s22 + $0x3f0] ss:$8 sps:$4 sm:$0xff]  }
 0xed8   :  { %6294 = vmatmul.mubr.bf16.gmra.mrb[76].mxu1 %v12593_v51  ;;  %11710 = vrot.lane.b32.xlu0 %v11709_v41, %s16234_s1 }
 0xed9   :  { %6301 = vmatprep.mubr.bf16.mxu1 %v12598_v14 }
 0xeda   :  { %v11641_v56 = vpop.permute.xlu1 %11640 }
 0xedb   :  { %v11643_v60 = vunpack.i.h.bf16 %v11641_v56  ;;  %v11642_v55 = vunpack.i.l.bf16 %v11641_v56  ;;  %v6087_v50 = vpop.f32.mrb[228].mxu1 }
 0xedc   :  { %v6089_v35 = vpop.f32.mrb[229].mxu1 }
 0xedd   :  { %v6849_v17 = vsel %vm2006_vm3, %v15069_v45, %v11643_v60  ;;  %v6848_v61 = vsel %vm2006_vm3, %v15072_v18, %v11642_v55  ;;  %v6090_v38 = vpop.f32.mrb[230].mxu1  ;;  %v12599_v45 = vld [vmem:[%s16227_s22 + $0x3c0] ss:$8 sps:$4 sm:$0xff]  }
 0xede   :  { %v11714_v28 = vpack.i.bf16 %v6090_v38, %v6087_v50  ;;  %v6092_v44 = vpop.f32.mrb[231].mxu1 }
 0xee0   :  { %6302 = vmatmul.mubr.bf16.gmra.mrb[80].mxu1 %v12596_v48  ;;  %11715 = vrot.lane.b32.xlu0 %v11714_v28, %s12850_s25 }
 0xee1   :  { %6309 = vmatprep.mubr.bf16.mxu1 %v12601_v20 }
 0xee2   :  { %v11646_v33 = vpop.permute.xlu1 %11645 }
 0xee3   :  { %v11648_v43 = vunpack.i.h.bf16 %v11646_v33  ;;  %v11647_v37 = vunpack.i.l.bf16 %v11646_v33  ;;  %v6095_v23 = vpop.f32.mrb[232].mxu1 }
 0xee4   :  { %v6097_v21 = vpop.f32.mrb[233].mxu1 }
 0xee5   :  { %v6851_v18 = vsel %vm2006_vm3, %v15082_v12, %v11648_v43  ;;  %v6850_v32 = vsel %vm2006_vm3, %v15085_v34, %v11647_v37  ;;  %v6098_v53 = vpop.f32.mrb[234].mxu1  ;;  %v12602_v12 = vld [vmem:[%s16227_s22 + $0x3d0] ss:$8 sps:$4 sm:$0xff]  }
 0xee6   :  { %v11719_v63 = vpack.i.bf16 %v6098_v53, %v6095_v23  ;;  %v6100_v2 = vpop.f32.mrb[235].mxu1 }
 0xee8   :  { %6310 = vmatmul.mubr.bf16.gmra.mrb[84].mxu1 %v12599_v45  ;;  %11720 = vrot.lane.b32.xlu0 %v11719_v63, %s12850_s25 }
 0xee9   :  { %6317 = vmatprep.mubr.bf16.mxu1 %v12604_v0 }
 0xeea   :  { %v11651_v25 = vpop.permute.xlu0 %11650 }
 0xeeb   :  { %v11653_v40 = vunpack.i.h.bf16 %v11651_v25  ;;  %v11652_v19 = vunpack.i.l.bf16 %v11651_v25  ;;  %v6103_v7 = vpop.f32.mrb[236].mxu1 }
 0xeec   :  { %v6105_v4 = vpop.f32.mrb[237].mxu1 }
 0xeed   :  { %v6853_v34 = vsel %vm2006_vm3, %v15095_v8, %v11653_v40  ;;  %v6852_v29 = vsel %vm2006_vm3, %v15098_v59, %v11652_v19  ;;  %v6106_v57 = vpop.f32.mrb[238].mxu1  ;;  %v12605_v8 = vld [vmem:[%s16227_s22 + $0x3e0] ss:$8 sps:$4 sm:$0xff]   ;;  %v12610_v59 = vld [vmem:[%s16227_s22 + $0x3f4] ss:$8 sps:$4 sm:$0xff]   ;;  %s16236_s22 = smov 40  }
 0xeee   :  { %v11724_v9 = vpack.i.bf16 %v6106_v57, %v6103_v7  ;;  %v6108_v39 = vpop.f32.mrb[239].mxu1 }
 0xef0   :  { %6318 = vmatmul.mubr.bf16.gmra.mrb[88].mxu1 %v12602_v12  ;;  %11725 = vrot.lane.b32.xlu1 %v11724_v9, %s12850_s25 }
 0xef1   :  { %6325 = vmatprep.mubr.bf16.mxu1 %v12607_v58 }
 0xef2   :  { %v15174_v38 = vpop.permute.xlu0 %11655 }
 0xef3   :  { %v6111_v27 = vpop.f32.mrb[240].mxu1 }
 0xef4   :  { %v6113_v3 = vpop.f32.mrb[241].mxu1 }
 0xef5   :  { %v6114_v10 = vpop.f32.mrb[242].mxu1 }
 0xef6   :  { %v11729_v26 = vpack.i.bf16 %v6114_v10, %v6111_v27  ;;  %v6116_v16 = vpop.f32.mrb[243].mxu1 }
 0xef8   :  { %6326 = vmatmul.mubr.bf16.gmra.mrb[92].mxu1 %v12605_v8  ;;  %11730 = vrot.lane.b32.xlu1 %v11729_v26, %s12850_s25 }
 0xef9   :  { %6333 = vmatprep.mubr.bf16.mxu1 %v12610_v59 }
 0xefa   :  { %v11661_v54 = vpop.permute.xlu1 %11660 }
 0xefb   :  { %v11663_v15 = vunpack.i.h.bf16 %v11661_v54  ;;  %v11662_v52 = vunpack.i.l.bf16 %v11661_v54  ;;  %v6119_v11 = vpop.f32.mrb[244].mxu1 }
 0xefc   :  { %v6121_v13 = vpop.f32.mrb[245].mxu1 }
 0xefd   :  { %v15166_v42 = vsel %vm2015_vm4, %v6849_v17, %v11663_v15  ;;  %v15169_v51 = vsel %vm2015_vm4, %v6848_v61, %v11662_v52  ;;  %v6122_v30 = vpop.f32.mrb[246].mxu1 }
 0xefe   :  { %v11734_v14 = vpack.i.bf16 %v6122_v30, %v6119_v11  ;;  %v6124_v41 = vpop.f32.mrb[247].mxu1 }
 0xf00   :  { %6334 = vmatmul.mubr.bf16.gmra.mrb[96].mxu1 %v12608_v31  ;;  %11735 = vrot.lane.b32.xlu1 %v11734_v14, %s16235_s23 }
 0xf02   :  { %v11666_v47 = vpop.permute.xlu1 %11665 }
 0xf03   :  { %v11668_v56 = vunpack.i.h.bf16 %v11666_v47  ;;  %v11667_v60 = vunpack.i.l.bf16 %v11666_v47  ;;  %v6127_v55 = vpop.f32.mrb[248].mxu1 }
 0xf04   :  { %v6129_v50 = vpop.f32.mrb[249].mxu1 }
 0xf05   :  { %v6859_v35 = vsel %vm2015_vm4, %v6851_v18, %v11668_v56  ;;  %v6858_v48 = vsel %vm2015_vm4, %v6850_v32, %v11667_v60  ;;  %v6130_v17 = vpop.f32.mrb[250].mxu1 }
 0xf06   :  { %v11739_v61 = vpack.i.bf16 %v6130_v17, %v6127_v55  ;;  %v6132_v20 = vpop.f32.mrb[251].mxu1 }
 0xf08   :  { %11740 = vrot.lane.b32.xlu0 %v11739_v61, %s16235_s23 }
 0xf0a   :  { %v11671_v28 = vpop.permute.xlu0 %11670 }
 0xf0b   :  { %v11673_v44 = vunpack.i.h.bf16 %v11671_v28  ;;  %v11672_v33 = vunpack.i.l.bf16 %v11671_v28  ;;  %v6135_v43 = vpop.f32.mrb[252].mxu1 }
 0xf0c   :  { %v6137_v37 = vpop.f32.mrb[253].mxu1 }
 0xf0d   :  { %v6861_v23 = vsel %vm2015_vm4, %v6853_v34, %v11673_v44  ;;  %v6860_v21 = vsel %vm2015_vm4, %v6852_v29, %v11672_v33  ;;  %v6138_v45 = vpop.f32.mrb[254].mxu1 }
 0xf0e   :  { %v11744_v18 = vpack.i.bf16 %v6138_v45, %v6135_v43  ;;  %v6140_v53 = vpop.f32.mrb[255].mxu1 }
 0xf10   :  { %11745 = vrot.lane.b32.xlu0 %v11744_v18, %s16235_s23 }
 0xf12   :  { %v15190_v10 = vpop.permute.xlu0 %11675 }
 0xf13   :  { %v6143_v32 = vpop.f32.mrb[0].mxu1 }
 0xf14   :  { %v6145_v0 = vpop.f32.mrb[1].mxu1 }
 0xf15   :  { %v6146_v63 = vpop.f32.mrb[2].mxu1 }
 0xf16   :  { %v11749_v2 = vpack.i.bf16 %v6146_v63, %v6143_v32  ;;  %v6148_v25 = vpop.f32.mrb[3].mxu1 }
 0xf17   :  { %v12612_v25 = vld [vmem:[%s16174_s2 + $0x18] sm:$0xff]   ;;  %s16239_s2 = smov 52  }
 0xf18   :  { %11750 = vrot.lane.b32.xlu1 %v11749_v2, %s16235_s23  ;;  %11077 = vmatprep.subr.bf16.mxu0 %v12612_v25 }
 0xf19   :  { %11078 = vmatpush3.bf16.msra.mxu0 %v12612_v25 }
 0xf1a   :  { %v15181_v4 = vpop.permute.xlu1 %11680 }
 0xf1b   :  { %v6151_v40 = vpop.f32.mrb[4].mxu1 }
 0xf1c   :  { %v6153_v19 = vpop.f32.mrb[5].mxu1 }
 0xf1d   :  { %v6154_v7 = vpop.f32.mrb[6].mxu1 }
 0xf1e   :  { %v11754_v12 = vpack.i.bf16 %v6154_v7, %v6151_v40  ;;  %v6156_v34 = vpop.f32.mrb[7].mxu1 }
 0xf20   :  { %11755 = vrot.lane.b32.xlu1 %v11754_v12, %s16236_s22 }
 0xf22   :  { %v11686_v29 = vpop.permute.xlu1 %11685 }
 0xf23   :  { %v11688_v57 = vunpack.i.h.bf16 %v11686_v29  ;;  %v11687_v58 = vunpack.i.l.bf16 %v11686_v29  ;;  %v6159_v9 = vpop.f32.mrb[8].mxu1 }
 0xf24   :  { %v6161_v39 = vpop.f32.mrb[9].mxu1 }
 0xf25   :  { %v15185_v27 = vsel %vm2024_vm5, %v6859_v35, %v11688_v57  ;;  %v15188_v3 = vsel %vm2024_vm5, %v6858_v48, %v11687_v58  ;;  %v6162_v8 = vpop.f32.mrb[10].mxu1 }
 0xf26   :  { %v11759_v59 = vpack.i.bf16 %v6162_v8, %v6159_v9  ;;  %v6164_v26 = vpop.f32.mrb[11].mxu1 }
 0xf28   :  { %11760 = vrot.lane.b32.xlu0 %v11759_v59, %s16236_s22 }
 0xf2a   :  { %v11691_v16 = vpop.permute.xlu0 %11690 }
 0xf2b   :  { %v11693_v54 = vunpack.i.h.bf16 %v11691_v16  ;;  %v11692_v15 = vunpack.i.l.bf16 %v11691_v16  ;;  %v6167_v52 = vpop.f32.mrb[12].mxu1 }
 0xf2c   :  { %v6169_v11 = vpop.f32.mrb[13].mxu1 }
 0xf2d   :  { %v6869_v13 = vsel %vm2024_vm5, %v6861_v23, %v11693_v54  ;;  %v6868_v31 = vsel %vm2024_vm5, %v6860_v21, %v11692_v15  ;;  %v6170_v30 = vpop.f32.mrb[14].mxu1 }
 0xf2e   :  { %v11764_v14 = vpack.i.bf16 %v6170_v30, %v6167_v52  ;;  %v6172_v41 = vpop.f32.mrb[15].mxu1 }
 0xf30   :  { %11765 = vrot.lane.b32.xlu0 %v11764_v14, %s16236_s22 }
 0xf32   :  { %v15198_v43 = vpop.permute.xlu0 %11695 }
 0xf33   :  { %v6175_v47 = vpop.f32.mrb[16].mxu1 }
 0xf34   :  { %v6177_v56 = vpop.f32.mrb[17].mxu1 }
 0xf35   :  { %v6178_v60 = vpop.f32.mrb[18].mxu1 }
 0xf36   :  { %v11769_v55 = vpack.i.bf16 %v6178_v60, %v6175_v47  ;;  %v6180_v50 = vpop.f32.mrb[19].mxu1 }
 0xf38   :  { %11770 = vrot.lane.b32.xlu1 %v11769_v55, %s16236_s22 }
 0xf3b   :  { %v6183_v35 = vpop.f32.mrb[20].mxu1 }
 0xf3c   :  { %v6185_v48 = vpop.f32.mrb[21].mxu1 }
 0xf3d   :  { %v6186_v17 = vpop.f32.mrb[22].mxu1 }
 0xf3e   :  { %v11774_v61 = vpack.i.bf16 %v6186_v17, %v6183_v35  ;;  %v6188_v20 = vpop.f32.mrb[23].mxu1 }
 0xf40   :  { %11775 = vrot.lane.b32.xlu1 %v11774_v61, %s16237_s0 }
 0xf43   :  { %v6191_v28 = vpop.f32.mrb[24].mxu1 }
 0xf44   :  { %v6193_v44 = vpop.f32.mrb[25].mxu1 }
 0xf45   :  { %v6194_v33 = vpop.f32.mrb[26].mxu1 }
 0xf46   :  { %v11779_v37 = vpack.i.bf16 %v6194_v33, %v6191_v28  ;;  %v6196_v23 = vpop.f32.mrb[27].mxu1 }
 0xf48   :  { %11780 = vrot.lane.b32.xlu0 %v11779_v37, %s16237_s0 }
 0xf4a   :  { %v11711_v21 = vpop.permute.xlu0 %11710 }
 0xf4b   :  { %v11713_v45 = vunpack.i.h.bf16 %v11711_v21  ;;  %v11712_v18 = vunpack.i.l.bf16 %v11711_v21  ;;  %v6199_v53 = vpop.f32.mrb[28].mxu1 }
 0xf4c   :  { %v6201_v32 = vpop.f32.mrb[29].mxu1 }
 0xf4d   :  { %v15202_v0 = vsel %vm2033_vm6, %v6869_v13, %v11713_v45  ;;  %v15205_v63 = vsel %vm2033_vm6, %v6868_v31, %v11712_v18  ;;  %v6202_v2 = vpop.f32.mrb[30].mxu1 }
 0xf4e   :  { %v11784_v40 = vpack.i.bf16 %v6202_v2, %v6199_v53  ;;  %v6204_v19 = vpop.f32.mrb[31].mxu1 }
 0xf50   :  { %11785 = vrot.lane.b32.xlu0 %v11784_v40, %s16237_s0 }
 0xf53   :  { %v6207_v7 = vpop.f32.mrb[32].mxu1 }
 0xf54   :  { %v6209_v12 = vpop.f32.mrb[33].mxu1 }
 0xf55   :  { %v6210_v34 = vpop.f32.mrb[34].mxu1 }
 0xf56   :  { %v11789_v29 = vpack.i.bf16 %v6210_v34, %v6207_v7  ;;  %v6212_v57 = vpop.f32.mrb[35].mxu1 }
 0xf58   :  { %11790 = vrot.lane.b32.xlu1 %v11789_v29, %s16237_s0 }
 0xf5b   :  { %v6215_v58 = vpop.f32.mrb[36].mxu1 }
 0xf5c   :  { %v6217_v9 = vpop.f32.mrb[37].mxu1 }
 0xf5d   :  { %v6218_v39 = vpop.f32.mrb[38].mxu1 }
 0xf5e   :  { %v11794_v8 = vpack.i.bf16 %v6218_v39, %v6215_v58  ;;  %v6220_v59 = vpop.f32.mrb[39].mxu1 }
 0xf60   :  { %11795 = vrot.lane.b32.xlu1 %v11794_v8, %s16238_s21 }
 0xf63   :  { %v6223_v26 = vpop.f32.mrb[40].mxu1 }
 0xf64   :  { %v6225_v16 = vpop.f32.mrb[41].mxu1 }
 0xf65   :  { %v6226_v54 = vpop.f32.mrb[42].mxu1 }
 0xf66   :  { %v11799_v15 = vpack.i.bf16 %v6226_v54, %v6223_v26  ;;  %v6228_v52 = vpop.f32.mrb[43].mxu1 }
 0xf68   :  { %11800 = vrot.lane.b32.xlu0 %v11799_v15, %s16238_s21 }
 0xf6b   :  { %v6231_v11 = vpop.f32.mrb[44].mxu1 }
 0xf6c   :  { %v6233_v13 = vpop.f32.mrb[45].mxu1 }
 0xf6d   :  { %v6234_v31 = vpop.f32.mrb[46].mxu1 }
 0xf6e   :  { %v11804_v30 = vpack.i.bf16 %v6234_v31, %v6231_v11  ;;  %v6236_v14 = vpop.f32.mrb[47].mxu1 }
 0xf70   :  { %11805 = vrot.lane.b32.xlu0 %v11804_v30, %s16238_s21 }
 0xf73   :  { %v6239_v41 = vpop.f32.mrb[48].mxu1 }
 0xf74   :  { %v6241_v47 = vpop.f32.mrb[49].mxu1 }
 0xf75   :  { %v6242_v56 = vpop.f32.mrb[50].mxu1 }
 0xf76   :  { %v11809_v60 = vpack.i.bf16 %v6242_v56, %v6239_v41  ;;  %v6244_v55 = vpop.f32.mrb[51].mxu1 }
 0xf78   :  { %11810 = vrot.lane.b32.xlu1 %v11809_v60, %s16238_s21 }
 0xf7b   :  { %v6247_v50 = vpop.f32.mrb[52].mxu1 }
 0xf7c   :  { %v6249_v35 = vpop.f32.mrb[53].mxu1 }
 0xf7d   :  { %v6250_v48 = vpop.f32.mrb[54].mxu1 }
 0xf7e   :  { %v11814_v17 = vpack.i.bf16 %v6250_v48, %v6247_v50  ;;  %v6252_v61 = vpop.f32.mrb[55].mxu1 }
 0xf80   :  { %11815 = vrot.lane.b32.xlu1 %v11814_v17, %s16239_s2 }
 0xf83   :  { %v6255_v20 = vpop.f32.mrb[56].mxu1 }
 0xf84   :  { %v6257_v28 = vpop.f32.mrb[57].mxu1 }
 0xf85   :  { %v6258_v44 = vpop.f32.mrb[58].mxu1 }
 0xf86   :  { %v11819_v33 = vpack.i.bf16 %v6258_v44, %v6255_v20  ;;  %v6260_v37 = vpop.f32.mrb[59].mxu1 }
 0xf88   :  { %11820 = vrot.lane.b32.xlu0 %v11819_v33, %s16239_s2 }
 0xf8b   :  { %v6263_v23 = vpop.f32.mrb[60].mxu1 }
 0xf8c   :  { %v6265_v21 = vpop.f32.mrb[61].mxu1 }
 0xf8d   :  { %v6266_v45 = vpop.f32.mrb[62].mxu1 }
 0xf8e   :  { %v11824_v18 = vpack.i.bf16 %v6266_v45, %v6263_v23  ;;  %v6268_v53 = vpop.f32.mrb[63].mxu1 }
 0xf90   :  { %11825 = vrot.lane.b32.xlu0 %v11824_v18, %s16239_s2 }
 0xf93   :  { %v6271_v32 = vpop.f32.mrb[64].mxu1 }
 0xf94   :  { %v6273_v2 = vpop.f32.mrb[65].mxu1 }
 0xf95   :  { %v6274_v25 = vpop.f32.mrb[66].mxu1 }
 0xf96   :  { %v11844_v40 = vpack.i.bf16 %v6274_v25, %v6271_v32  ;;  %v6276_v19 = vpop.f32.mrb[67].mxu1  ;;  %v11701_v32 = vpop.permute.xlu1 %11700 }
 0xf9a   :  { %v11706_v2 = vpop.permute.xlu1 %11705 }
 0xf9b   :  { %v6279_v7 = vpop.f32.mrb[68].mxu1 }
 0xf9c   :  { %v6281_v12 = vpop.f32.mrb[69].mxu1 }
 0xf9d   :  { %v6282_v34 = vpop.f32.mrb[70].mxu1 }
 0xf9e   :  { %v11829_v29 = vpack.i.bf16 %v6282_v34, %v6279_v7  ;;  %v6284_v57 = vpop.f32.mrb[71].mxu1  ;;  %v15228_v25 = vpop.permute.xlu1 %11725 }
 0xfa0   :  { %11830 = vrot.lane.b32.xlu1 %v11829_v29, %s16240_s27 }
 0xfa2   :  { %v15230_v19 = vpop.permute.xlu1 %11730 }
 0xfa3   :  { %v6287_v58 = vpop.f32.mrb[72].mxu1 }
 0xfa4   :  { %v6289_v9 = vpop.f32.mrb[73].mxu1 }
 0xfa5   :  { %v6290_v39 = vpop.f32.mrb[74].mxu1 }
 0xfa6   :  { %v11834_v8 = vpack.i.bf16 %v6290_v39, %v6287_v58  ;;  %v6292_v59 = vpop.f32.mrb[75].mxu1  ;;  %v11736_v12 = vpop.permute.xlu1 %11735 }
 0xfa8   :  { %11835 = vrot.lane.b32.xlu0 %v11834_v8, %s16240_s27 }
 0xfaa   :  { %v15236_v29 = vpop.permute.xlu1 %11750 }
 0xfab   :  { %v6295_v26 = vpop.f32.mrb[76].mxu1 }
 0xfac   :  { %v6297_v16 = vpop.f32.mrb[77].mxu1 }
 0xfad   :  { %v6298_v54 = vpop.f32.mrb[78].mxu1 }
 0xfae   :  { %v11854_v15 = vpack.i.bf16 %v6298_v54, %v6295_v26  ;;  %v6300_v52 = vpop.f32.mrb[79].mxu1  ;;  %v11756_v58 = vpop.permute.xlu1 %11755 }
 0xfaf   :  { %v11658_v52 = vunpack.i.h.bf16 %v15174_v38 }
 0xfb2   :  { %v15242_v39 = vpop.permute.xlu1 %11770 }
 0xfb3   :  { %v6303_v11 = vpop.f32.mrb[80].mxu1 }
 0xfb4   :  { %v6305_v13 = vpop.f32.mrb[81].mxu1 }
 0xfb5   :  { %v6306_v31 = vpop.f32.mrb[82].mxu1  ;;  %v11678_v13 = vunpack.i.h.bf16 %v15190_v10 }
 0xfb6   :  { %v11859_v30 = vpack.i.bf16 %v6306_v31, %v6303_v11  ;;  %v6308_v14 = vpop.f32.mrb[83].mxu1  ;;  %v15246_v59 = vpop.permute.xlu1 %11775  ;;  %v11657_v11 = vunpack.i.l.bf16 %v15174_v38  ;;  %v11677_v31 = vunpack.i.l.bf16 %v15190_v10  ;;  %v11703_v38 = vunpack.i.h.bf16 %v11701_v32 }
 0xfb7   :  { %v11682_v14 = vunpack.i.l.bf16 %v15181_v4 }
 0xfb8   :  { %v6854_v10 = vsel %vm2015_vm4, %v15116_v22, %v11657_v11  ;;  %v11777_v11 = vunpack.i.l.bf16 %v15246_v59 }
 0xfbb   :  { %v6311_v41 = vpop.f32.mrb[84].mxu1 }
 0xfbc   :  { %v6313_v47 = vpop.f32.mrb[85].mxu1 }
 0xfbd   :  { %v6314_v56 = vpop.f32.mrb[86].mxu1 }
 0xfbe   :  { %v11839_v60 = vpack.i.bf16 %v6314_v56, %v6311_v41  ;;  %v6316_v55 = vpop.f32.mrb[87].mxu1  ;;  %v11698_v56 = vunpack.i.h.bf16 %v15198_v43 }
 0xfbf   :  { %v6855_v55 = vsel %vm2015_vm4, %v15112_v24, %v11658_v52  ;;  %v11778_v52 = vunpack.i.h.bf16 %v15246_v59  ;;  %vm16244_vm4 = vcmask 490496  }
 0xfc0   :  { %11840 = vrot.lane.b32.xlu1 %v11839_v60, %s16241_s20  ;;  %v11697_v60 = vunpack.i.l.bf16 %v15198_v43  ;;  %v6864_v43 = vsel %vm2024_vm5, %v15169_v51, %v11682_v14 }
 0xfc3   :  { %v6319_v50 = vpop.f32.mrb[88].mxu1 }
 0xfc4   :  { %11845 = vrot.lane.b32.xlu1 %v11844_v40, %s16239_s2  ;;  %v6321_v35 = vpop.f32.mrb[89].mxu1  ;;  %v11716_v40 = vpop.permute.xlu0 %11715 }
 0xfc5   :  { %v6322_v48 = vpop.f32.mrb[90].mxu1  ;;  %v6863_v35 = vsel %vm2024_vm5, %v6855_v55, %v11678_v13 }
 0xfc6   :  { %v11849_v17 = vpack.i.bf16 %v6322_v48, %v6319_v50  ;;  %v6324_v61 = vpop.f32.mrb[91].mxu1  ;;  %v11702_v50 = vunpack.i.l.bf16 %v11701_v32  ;;  %v11708_v48 = vunpack.i.h.bf16 %v11706_v2  ;;  %v11757_v32 = vunpack.i.l.bf16 %v11756_v58 }
 0xfc8   :  { %11860 = vrot.lane.b32.xlu1 %v11859_v30, %s16240_s27  ;;  %11850 = vrot.lane.b32.xlu0 %v11849_v17, %s16241_s20  ;;  %v15232_v7 = vpop.permute.xlu0 %11720  ;;  %v11683_v30 = vunpack.i.h.bf16 %v15181_v4  ;;  %v11707_v4 = vunpack.i.l.bf16 %v11706_v2  ;;  %v6862_v17 = vsel %vm2024_vm5, %v6854_v10, %v11677_v31  ;;  %v6875_v51 = vsel %vm2033_vm6, %v15185_v27, %v11708_v48 }
 0xfc9   :  { %v6870_v22 = vsel %vm2033_vm6, %v6862_v17, %v11697_v60  ;;  %v11728_v10 = vunpack.i.h.bf16 %v15228_v25 }
 0xfca   :  { %v15250_v16 = vpop.permute.xlu1 %11790  ;;  %v6865_v61 = vsel %vm2024_vm5, %v15166_v42, %v11683_v30  ;;  %v11737_v42 = vunpack.i.l.bf16 %v11736_v12  ;;  %vm16245_vm5 = vmmov %vm16244_vm4 }
 0xfcb   :  { %v6327_v20 = vpop.f32.mrb[92].mxu1 }
 0xfcc   :  { %11855 = vrot.lane.b32.xlu0 %v11854_v15, %s16240_s27  ;;  %v6329_v28 = vpop.f32.mrb[93].mxu1  ;;  %v15234_v34 = vpop.permute.xlu0 %11740  ;;  %s12862_s27 = smov [#allocation2]  }
 0xfcd   :  { %v6330_v44 = vpop.f32.mrb[94].mxu1  ;;  %v11742_v17 = vunpack.i.l.bf16 %v15234_v34 }
 0xfce   :  { %v11864_v33 = vpack.i.bf16 %v6330_v44, %v6327_v20  ;;  %v6332_v37 = vpop.f32.mrb[95].mxu1  ;;  %v11718_v20 = vunpack.i.h.bf16 %v11716_v40  ;;  %v6871_v44 = vsel %vm2033_vm6, %v6863_v35, %v11698_v56 }
 0xfcf   :  { %v11723_v37 = vunpack.i.h.bf16 %v15232_v7 }
 0xfd0   :  { %11865 = vrot.lane.b32.xlu0 %v11864_v33, %s16241_s20  ;;  %v15238_v57 = vpop.permute.xlu0 %11745  ;;  %v11717_v33 = vunpack.i.l.bf16 %v11716_v40  ;;  %v6879_v2 = vsel %vm2042_vm7, %v6871_v44, %v11718_v20  ;;  %v11722_v40 = vunpack.i.l.bf16 %v15232_v7 }
 0xfd2   :  { %v15254_v15 = vpop.permute.xlu1 %11795 }
 0xfd3   :  { %v6335_v23 = vpop.f32.mrb[96].mxu1  ;;  %v11798_v30 = vunpack.i.h.bf16 %v15254_v15 }
 0xfd4   :  { %v6337_v21 = vpop.f32.mrb[97].mxu1  ;;  %v15240_v9 = vpop.permute.xlu0 %11760 }
 0xfd5   :  { %v6338_v45 = vpop.f32.mrb[98].mxu1  ;;  %v6872_v21 = vsel %vm2033_vm6, %v6864_v43, %v11702_v50 }
 0xfd6   :  { %v11869_v18 = vpack.i.bf16 %v6338_v45, %v6335_v23  ;;  %v6340_v53 = vpop.f32.mrb[99].mxu1  ;;  %v6873_v23 = vsel %vm2033_vm6, %v6865_v61, %v11703_v38  ;;  %v11738_v45 = vunpack.i.h.bf16 %v11736_v12  ;;  %v6878_v12 = vsel %vm2042_vm7, %v6870_v22, %v11717_v33 }
 0xfd7   :  { %v11758_v53 = vunpack.i.h.bf16 %v11756_v58  ;;  %v6881_v27 = vsel %vm2042_vm7, %v6873_v23, %v11723_v37  ;;  %v6886_v14 = vsel %vm2051_vm8, %v6878_v12, %v11737_v42  ;;  %v6880_v50 = vsel %vm2042_vm7, %v6872_v21, %v11722_v40 }
 0xfd8   :  { %11870 = vrot.lane.b32.xlu1 %v11869_v18, %s16241_s20  ;;  %v15244_v8 = vpop.permute.xlu0 %11765  ;;  %v15289_v18 = vsel %vm2033_vm6, %v15188_v3, %v11707_v4  ;;  %v11797_v3 = vunpack.i.l.bf16 %v15254_v15  ;;  %v6887_v58 = vsel %vm2051_vm8, %v6879_v2, %v11738_v45  ;;  %v6894_v59 = vsel %vm2060_vm9, %v6886_v14, %v11757_v32  ;;  %vm16246_vm6 = vmmov %vm16242_vm1 }
 0xfd9   :  { %v6895_v60 = vsel %vm2060_vm9, %v6887_v58, %v11758_v53  ;;  %v6902_v15 = vsel %vm2069_vm10, %v6894_v59, %v11777_v11  ;;  %v11743_v4 = vunpack.i.h.bf16 %v15234_v34  ;;  %v11763_v37 = vunpack.i.h.bf16 %v15240_v9 }
 0xfda   :  { %v6903_v35 = vsel %vm2069_vm10, %v6895_v60, %v11778_v52  ;;  %v6910_v43 = vsel %vm2078_vm11, %v6902_v15, %v11797_v3  ;;  %v11762_v23 = vunpack.i.l.bf16 %v15240_v9  ;;  %v11727_v40 = vunpack.i.l.bf16 %v15228_v25 }
 0xfdb   :  { %v6911_v61 = vsel %vm2078_vm11, %v6903_v35, %v11798_v30  ;;  %v6888_v12 = vsel %vm2051_vm8, %v6880_v50, %v11742_v17  ;;  %v6883_v25 = vsel %vm2042_vm7, %v6875_v51, %v11728_v10  ;;  %v11748_v60 = vunpack.i.h.bf16 %v15238_v57 }
 0xfdc   :  { %v15248_v26 = vpop.permute.xlu0 %11780  ;;  %v6896_v58 = vsel %vm2060_vm9, %v6888_v12, %v11762_v23  ;;  %v11768_v15 = vunpack.i.h.bf16 %v15244_v8 }
 0xfdd   :  { %v11783_v34 = vunpack.i.h.bf16 %v15248_v26  ;;  %v11782_v42 = vunpack.i.l.bf16 %v15248_v26  ;;  %v6891_v23 = vsel %vm2051_vm8, %v6883_v25, %v11748_v60  ;;  %v11792_v25 = vunpack.i.l.bf16 %v15250_v16 }
 0xfe0   :  { %v15252_v54 = vpop.permute.xlu0 %11785 }
 0xfe4   :  { %v15262_v41 = vpop.permute.xlu0 %11800 }
 0xfe5   :  { %v11803_v52 = vunpack.i.h.bf16 %v15262_v41  ;;  %v11802_v11 = vunpack.i.l.bf16 %v15262_v41 }
 0xfe8   :  { %v15278_v28 = vpop.permute.xlu0 %11805 }
 0xfea   :  { %v15264_v47 = vpop.permute.xlu1 %11810 }
 0xff2   :  { %v11816_v24 = vpop.permute.xlu1 %11815 }
 0xff3   :  { %v11818_v56 = vunpack.i.h.bf16 %v11816_v24  ;;  %v11817_v7 = vunpack.i.l.bf16 %v11816_v24 }
 0xff5   :  { %v6919_v24 = vsel %vm2087_vm12, %v6911_v61, %v11818_v56  ;;  %v6918_v44 = vsel %vm2087_vm12, %v6910_v43, %v11817_v7  ;;  %v11733_v7 = vunpack.i.h.bf16 %v15230_v19  ;;  %v11787_v43 = vunpack.i.l.bf16 %v15252_v54 }
 0xffa   :  { %v11821_v13 = vpop.permute.xlu0 %11820 }
 0xffb   :  { %v11823_v30 = vunpack.i.h.bf16 %v11821_v13  ;;  %v11822_v3 = vunpack.i.l.bf16 %v11821_v13  ;;  %v11747_v13 = vunpack.i.l.bf16 %v15238_v57  ;;  %v11788_v57 = vunpack.i.h.bf16 %v15252_v54 }
0x1002   :  { %v15307_v48 = vpop.permute.xlu0 %11825 }
0x1003   :  { %v11827_v54 = vunpack.i.l.bf16 %v15307_v48 }
0x1012   :  { %v11831_v31 = vpop.permute.xlu1 %11830 }
0x1013   :  { %v11833_v55 = vunpack.i.h.bf16 %v11831_v31  ;;  %v11832_v38 = vunpack.i.l.bf16 %v11831_v31  ;;  %v6889_v31 = vsel %vm2051_vm8, %v6881_v27, %v11743_v4  ;;  %v6904_v27 = vsel %vm2069_vm10, %v6896_v58, %v11782_v42 }
0x1014   :  { %v6897_v26 = vsel %vm2060_vm9, %v6889_v31, %v11763_v37  ;;  %v11767_v4 = vunpack.i.l.bf16 %v15244_v8  ;;  %v6899_v42 = vsel %vm2060_vm9, %v6891_v23, %v11768_v15  ;;  %v11772_v58 = vunpack.i.l.bf16 %v15242_v39  ;;  %v12613_v23 = vld [vmem:[%s16176_s4] sm:$0xff]  }
0x1015   :  { %v6927_v21 = vsel %vm16242_vm1, %v6919_v24, %v11833_v55  ;;  %v6926_v45 = vsel %vm16243_vm2, %v6918_v44, %v11832_v38  ;;  %v6905_v41 = vsel %vm2069_vm10, %v6897_v26, %v11783_v34  ;;  %v6912_v55 = vsel %vm2078_vm11, %v6904_v27, %v11802_v11  ;;  %vm16247_vm2 = vmmov %vm16244_vm4 }
0x1016   :  { %v6913_v59 = vsel %vm2078_vm11, %v6905_v41, %v11803_v52  ;;  %v6920_v35 = vsel %vm2087_vm12, %v6912_v55, %v11822_v3  ;;  %v6882_v44 = vsel %vm2042_vm7, %v15289_v18, %v11727_v40  ;;  %v6907_v40 = vsel %vm2069_vm10, %v6899_v42, %v11788_v57 }
0x1017   :  { %v6921_v50 = vsel %vm2087_vm12, %v6913_v59, %v11823_v30  ;;  %v11752_v11 = vunpack.i.l.bf16 %v15236_v29 }
0x101a   :  { %v11836_v53 = vpop.permute.xlu0 %11835 }
0x101b   :  { %v11838_v14 = vunpack.i.h.bf16 %v11836_v53  ;;  %v11837_v56 = vunpack.i.l.bf16 %v11836_v53 }
0x101d   :  { %v6929_v17 = vsel %vm16246_vm6, %v6921_v50, %v11838_v14  ;;  %v6928_v61 = vsel %vm16242_vm1, %v6920_v35, %v11837_v56  ;;  %vm16250_vm6 = vmmov %vm16242_vm1 }
0x1032   :  { %v11841_v20 = vpop.permute.xlu1 %11840 }
0x1033   :  { %v11843_v22 = vunpack.i.h.bf16 %v11841_v20  ;;  %v11842_v33 = vunpack.i.l.bf16 %v11841_v20 }
0x1035   :  { %v6935_v32 = vsel %vm16244_vm4, %v6927_v21, %v11843_v22  ;;  %v6934_v2 = vsel %vm16245_vm5, %v6926_v45, %v11842_v33  ;;  %vm16248_vm4 = vmmov %vm16247_vm2  ;;  %v11808_v22 = vunpack.i.h.bf16 %v15278_v28  ;;  %v11807_v33 = vunpack.i.l.bf16 %v15278_v28 }
0x1036   :  { %v6942_v9 = vpack.c.bf16 %v6935_v32, %v6934_v2  ;;  %v6890_v21 = vsel %vm2051_vm8, %v6882_v44, %v11747_v13  ;;  %v11828_v45 = vunpack.i.h.bf16 %v15307_v48  ;;  %v11846_v34 = vpop.permute.xlu1 %11845  ;;  %v6885_v28 = vsel %vm2042_vm7, %v15202_v0, %v11733_v7  ;;  %vm16249_vm5 = vmmov %vm16242_vm1 }
0x1037   :  { %v6898_v53 = vsel %vm2060_vm9, %v6890_v21, %v11767_v4  ;;  %v11732_v2 = vunpack.i.l.bf16 %v15230_v19  ;;  %v11753_v48 = vunpack.i.h.bf16 %v15236_v29  ;;  %v11773_v19 = vunpack.i.h.bf16 %v15242_v39  ;;  %vm16251_vm1 = vmmov %vm16247_vm2  ;;  %v10258_v21 = vld [vmem:[%s16175_s3] ss:$0 sm:$0xff] }
0x1038   :  { %11079 = vmatprep.mubr.msk.bf16.mxu0 %vm2157_vm15, %v6942_v9  ;;  %v6906_v52 = vsel %vm2069_vm10, %v6898_v53, %v11787_v43  ;;  %v6915_v9 = vsel %vm2078_vm11, %v6907_v40, %v11808_v22  ;;  %v11793_v29 = vunpack.i.h.bf16 %v15250_v16  ;;  %v11813_v13 = vunpack.i.h.bf16 %v15264_v47 }
0x1039   :  { %v6914_v31 = vsel %vm2078_vm11, %v6906_v52, %v11807_v33  ;;  %v6923_v30 = vsel %vm2087_vm12, %v6915_v9, %v11828_v45  ;;  %v6884_v60 = vsel %vm2042_vm7, %v15205_v63, %v11732_v2  ;;  %v11812_v39 = vunpack.i.l.bf16 %v15264_v47 }
0x103a   :  { %v11851_v38 = vpop.permute.xlu0 %11850  ;;  %v6922_v3 = vsel %vm2087_vm12, %v6914_v31, %v11827_v54  ;;  %v11861_v7 = vpop.permute.xlu1 %11860  ;;  %v6893_v55 = vsel %vm2051_vm8, %v6885_v28, %v11753_v48  ;;  %v11848_v50 = vunpack.i.h.bf16 %v11846_v34  ;;  %v11847_v35 = vunpack.i.l.bf16 %v11846_v34 }
0x103b   :  { %v11853_v51 = vunpack.i.h.bf16 %v11851_v38  ;;  %v11852_v10 = vunpack.i.l.bf16 %v11851_v38  ;;  %v6892_v38 = vsel %vm2051_vm8, %v6884_v60, %v11752_v11  ;;  %v6901_v16 = vsel %vm2060_vm9, %v6893_v55, %v11773_v19  ;;  %vm16253_vm8 = vmmov %vm16249_vm5  ;;  %v12615_v60 = vld [vmem:[%s16176_s4 + $0x10] sm:$0xff]  }
0x103c   :  { %v11862_v15 = vunpack.i.l.bf16 %v11861_v7  ;;  %v6909_v63 = vsel %vm2069_vm10, %v6901_v16, %v11793_v29  ;;  %v12619_v55 = vld [vmem:[%s16176_s4 + $0x30] sm:$0xff]  }
0x103d   :  { %v6937_v20 = vsel %vm16247_vm2, %v6929_v17, %v11853_v51  ;;  %v6936_v24 = vsel %vm16248_vm4, %v6928_v61, %v11852_v10  ;;  %vm16252_vm2 = vmmov %vm16251_vm1  ;;  %v6900_v51 = vsel %vm2060_vm9, %v6892_v38, %v11772_v58  ;;  %v11863_v10 = vunpack.i.h.bf16 %v11861_v7  ;;  %v12620_v38 = vld [vmem:[%s16176_s4 + $0x38] sm:$0xff]   ;;  %v12623_v16 = vld [vmem:[%s16176_s4 + $0x50] sm:$0xff]  }
0x103e   :  { %v6943_v8 = vpack.c.bf16 %v6937_v20, %v6936_v24  ;;  %v11856_v37 = vpop.permute.xlu0 %11855  ;;  %v6908_v4 = vsel %vm2069_vm10, %v6900_v51, %v11792_v25  ;;  %v6917_v47 = vsel %vm2078_vm11, %v6909_v63, %v11813_v13  ;;  %vm16254_vm9 = vmmov %vm16249_vm5  ;;  %v12616_v13 = vld [vmem:[%s16176_s4 + $0x18] sm:$0xff]   ;;  %v12627_v63 = vld [vmem:[%s16176_s4 + $0x70] sm:$0xff]   ;;  %vm16257_vm10 = vcmask 785408  }
0x103f   :  { %v11858_v18 = vunpack.i.h.bf16 %v11856_v37  ;;  %v11857_v32 = vunpack.i.l.bf16 %v11856_v37  ;;  %v6916_v17 = vsel %vm2078_vm11, %v6908_v4, %v11812_v39  ;;  %v6925_v57 = vsel %vm2087_vm12, %v6917_v47, %v11848_v50  ;;  %vm16255_vm4 = vmmov %vm16251_vm1  ;;  %v12617_v39 = vld [vmem:[%s16176_s4 + $0x20] sm:$0xff]   ;;  %v12624_v51 = vld [vmem:[%s16176_s4 + $0x58] sm:$0xff]  }
0x1040   :  { %11080 = vmatmul.mubr.msk.bf16.vlgmr.msra.gmra.mrb[0].mxu0 %vm2157_vm15, %v6943_v8  ;;  %v6924_v43 = vsel %vm2087_vm12, %v6916_v17, %v11847_v35  ;;  %v6933_v22 = vsel %vm16254_vm9, %v6925_v57, %v11863_v10  ;;  %v12621_v50 = vld [vmem:[%s16176_s4 + $0x40] sm:$0xff]   ;;  %v12622_v35 = vld [vmem:[%s16176_s4 + $0x48] sm:$0xff]   ;;  %v12628_v4 = vld [vmem:[%s16176_s4 + $0x78] sm:$0xff]  }
0x1041   :  { %v6931_v14 = vsel %vm16249_vm5, %v6923_v30, %v11858_v18  ;;  %v6930_v56 = vsel %vm16250_vm6, %v6922_v3, %v11857_v32  ;;  %v6932_v44 = vsel %vm16253_vm8, %v6924_v43, %v11862_v15  ;;  %vm16256_vm5 = vmmov %vm16251_vm1  ;;  %v12625_v10 = vld [vmem:[%s16176_s4 + $0x60] sm:$0xff]   ;;  %v12626_v15 = vld [vmem:[%s16176_s4 + $0x68] sm:$0xff]  }
0x1042   :  { %v11866_v12 = vpop.permute.xlu0 %11865  ;;  %v12629_v47 = vld [vmem:[%s16177_s5 + $0x40] sm:$0xff]   ;;  %v12632_v57 = vld [vmem:[%s16177_s5 + $0x8] sm:$0xff]   ;;  %v12633_v43 = vld [vmem:[%s16177_s5 + $0x50] sm:$0xff]  }
0x1043   :  { %v11868_v0 = vunpack.i.h.bf16 %v11866_v12  ;;  %v11867_v26 = vunpack.i.l.bf16 %v11866_v12  ;;  %v12630_v17 = vld [vmem:[%s16177_s5] sm:$0xff]   ;;  %vm16258_vm11 = vmmov %vm16257_vm10 }
0x1044   :  { %vm16259_vm12 = vmmov %vm16257_vm10 }
0x1045   :  { %v6939_v41 = vsel %vm16251_vm1, %v6931_v14, %v11868_v0  ;;  %v6938_v27 = vsel %vm16252_vm2, %v6930_v56, %v11867_v26  ;;  %vm16260_vm6 = vmmov %vm16257_vm10 }
0x1046   :  { %v6944_v59 = vpack.c.bf16 %v6939_v41, %v6938_v27  ;;  %v12614_v27 = vld [vmem:[%s16176_s4 + $0x8] sm:$0xff]   ;;  %vm16261_vm1 = vmmov %vm16260_vm6 }
0x1047   :  { %vm16262_vm2 = vmmov %vm16261_vm1 }
0x1048   :  { %11083 = vmatprep.mubr.msk.bf16.mxu0 %vm2157_vm15, %v6944_v59  ;;  %v12618_v59 = vld [vmem:[%s16176_s4 + $0x28] sm:$0xff]   ;;  %vm16263_vm8 = vmmov %vm16261_vm1 }
0x1049   :  { %vm16264_vm9 = vmmov %vm16261_vm1 }
0x104a   :  { %v11871_v61 = vpop.permute.xlu1 %11870 }
0x104b   :  { %v11873_v20 = vunpack.i.h.bf16 %v11871_v61  ;;  %v11872_v24 = vunpack.i.l.bf16 %v11871_v61  ;;  %v12631_v61 = vld [vmem:[%s16177_s5 + $0x48] sm:$0xff]  }
0x104d   :  { %v6941_v33 = vsel %vm16255_vm4, %v6933_v22, %v11873_v20  ;;  %v6940_v8 = vsel %vm16256_vm5, %v6932_v44, %v11872_v24  ;;  %v12634_v20 = vld [vmem:[%s16177_s5 + $0x10] sm:$0xff]   ;;  %v12635_v24 = vld [vmem:[%s16177_s5 + $0x58] sm:$0xff]   ;;  %v12637_v22 = vld [vmem:[%s16177_s5 + $0x60] sm:$0xff]  }
0x104e   :  { %v6945_v37 = vpack.c.bf16 %v6941_v33, %v6940_v8  ;;  %v12636_v44 = vld [vmem:[%s16177_s5 + $0x18] sm:$0xff]   ;;  %vm16266_vm4 = vmmov %vm16261_vm1 }
0x104f   :  { %vm16267_vm5 = vmmov %vm16261_vm1 }
0x1050   :  { %11084 = vmatmul.mubr.msk.bf16.gmra.mrb[4].mxu0 %vm2157_vm15, %v6945_v37 }
0x1051   :  { %11095 = vmatprep.mubr.msk.bf16.mxu0 %vm2157_vm15, %v12613_v23 }
0x1113   :  { %v11081_v45 = vpop.f32.mrb[0].mxu0 }
0x1114   :  { %v7040_v54 = vadd.f32 %v11081_v45, %v10258_v21  ;;  %v7031_v34 = vpop.f32.mrb[1].mxu0  ;;  %v12638_v45 = vld [vmem:[%s16177_s5 + $0x20] sm:$0xff]  }
0x1115   :  { %v7032_v42 = vadd.f32 %v10258_v21, %v7031_v34  ;;  %v11082_v53 = vpop.f32.mrb[2].mxu0 }
0x1116   :  { %v7043_v18 = vadd.f32 %v11082_v53, %v10258_v21  ;;  %v7034_v32 = vpop.f32.mrb[3].mxu0  ;;  %v7064_v2 = vmax.f32 %v7040_v54, 0.0  ;;  %v12639_v53 = vld [vmem:[%s16177_s5 + $0x68] sm:$0xff]  }
0x1117   :  { %v7035_v28 = vadd.f32 %v10258_v21, %v7034_v32  ;;  %v7062_v52 = vmax.f32 %v7032_v42, 0.0  ;;  %v12641_v32 = vld [vmem:[%s16177_s5 + $0x70] sm:$0xff]  }
0x1118   :  { %v7065_v40 = vmax.f32 %v7043_v18, 0.0  ;;  %v12640_v18 = vld [vmem:[%s16177_s5 + $0x28] sm:$0xff]  }
0x1119   :  { %v7063_v48 = vmax.f32 %v7035_v28, 0.0 }
0x111a   :  { %v7071_v11 = vpack.c.bf16 %v7065_v40, %v7064_v2 }
0x111b   :  { %v7070_v9 = vpack.c.bf16 %v7063_v48, %v7062_v52 }
0x111d   :  { %11087 = vmatprep.subr.bf16.mxu0 %v7070_v9 }
0x111e   :  { %11088 = vmatpush3.bf16.msra.mxu0 %v7070_v9  ;;  %v12642_v9 = vld [vmem:[%s16177_s5 + $0x30] sm:$0xff]  }
0x111f   :  { %11089 = vmatprep.subr.bf16.mxu0 %v7071_v11 }
0x1122   :  { %11090 = vmatpush3.bf16.msra.mxu0 %v7071_v11 }
0x1123   :  { %v11085_v31 = vpop.f32.mrb[4].mxu0 }
0x1124   :  { %v7056_v12 = vadd.f32 %v11085_v31, %v10258_v21  ;;  %v7047_v30 = vpop.f32.mrb[5].mxu0 }
0x1125   :  { %v7048_v3 = vadd.f32 %v10258_v21, %v7047_v30  ;;  %v11086_v0 = vpop.f32.mrb[6].mxu0  ;;  %v12643_v30 = vld [vmem:[%s16177_s5 + $0x78] sm:$0xff]  }
0x1126   :  { %v7059_v26 = vadd.f32 %v11086_v0, %v10258_v21  ;;  %v7050_v19 = vpop.f32.mrb[7].mxu0  ;;  %v7068_v14 = vmax.f32 %v7056_v12, 0.0 }
0x1127   :  { %v7051_v58 = vadd.f32 %v10258_v21, %v7050_v19  ;;  %v7066_v29 = vmax.f32 %v7048_v3, 0.0  ;;  %v12644_v3 = vld [vmem:[%s16177_s5 + $0x38] sm:$0xff]   ;;  %v12645_v19 = vld [vmem:[%s16177_s5 + $0xc0] sm:$0xff]  }
0x1128   :  { %v7069_v56 = vmax.f32 %v7059_v26, 0.0 }
0x1129   :  { %v7067_v25 = vmax.f32 %v7051_v58, 0.0 }
0x112a   :  { %v7073_v7 = vpack.c.bf16 %v7069_v56, %v7068_v14 }
0x112b   :  { %v7072_v41 = vpack.c.bf16 %v7067_v25, %v7066_v29 }
0x112d   :  { %11091 = vmatprep.subr.bf16.mxu0 %v7072_v41 }
0x112e   :  { %11092 = vmatpush3.bf16.msra.mxu0 %v7072_v41 }
0x112f   :  { %11093 = vmatprep.subr.bf16.mxu0 %v7073_v7 }
0x1132   :  { %11094 = vmatpush3.bf16.msra.mxu0 %v7073_v7 }
0x1133   :  { %10772 = vmatprep.subr.bf16.mxu0 %v12629_v47 }
0x1135   :  { %11096 = vmatmul.mubr.msk.bf16.vlgmr.msra.gmra.mrb[8].mxu0 %vm2157_vm15, %v12614_v27 }
0x1136   :  { %11099 = vmatprep.mubr.msk.bf16.mxu0 %vm2157_vm15, %v12615_v60  ;;  %10773 = vmatpush3.bf16.msra.mxu0 %v12630_v17 }
0x1137   :  { %10774 = vmatprep.subr.bf16.mxu0 %v12631_v61 }
0x113a   :  { %10775 = vmatpush3.bf16.msra.mxu0 %v12632_v57 }
0x113b   :  { %10776 = vmatprep.subr.bf16.mxu0 %v12633_v43 }
0x113d   :  { %11100 = vmatmul.mubr.msk.bf16.gmra.mrb[12].mxu0 %vm2157_vm15, %v12616_v13 }
0x113e   :  { %11103 = vmatprep.mubr.msk.bf16.mxu0 %vm2157_vm15, %v12617_v39  ;;  %10777 = vmatpush3.bf16.msra.mxu0 %v12634_v20 }
0x113f   :  { %10778 = vmatprep.subr.bf16.mxu0 %v12635_v24 }
0x1142   :  { %10779 = vmatpush3.bf16.msra.mxu0 %v12636_v44 }
0x1143   :  { %10780 = vmatprep.subr.bf16.mxu0 %v12637_v22 }
0x1145   :  { %11104 = vmatmul.mubr.msk.bf16.gmra.mrb[16].mxu0 %vm2157_vm15, %v12618_v59 }
0x1146   :  { %11107 = vmatprep.mubr.msk.bf16.mxu0 %vm2157_vm15, %v12619_v55  ;;  %10781 = vmatpush3.bf16.msra.mxu0 %v12638_v45 }
0x1147   :  { %10782 = vmatprep.subr.bf16.mxu0 %v12639_v53 }
0x114a   :  { %10783 = vmatpush3.bf16.msra.mxu0 %v12640_v18 }
0x114b   :  { %10784 = vmatprep.subr.bf16.mxu0 %v12641_v32 }
0x114d   :  { %11108 = vmatmul.mubr.msk.bf16.gmra.mrb[20].mxu0 %vm2157_vm15, %v12620_v38 }
0x114e   :  { %11111 = vmatprep.mubr.msk.bf16.mxu0 %vm2157_vm15, %v12621_v50  ;;  %10785 = vmatpush3.bf16.msra.mxu0 %v12642_v9 }
0x114f   :  { %10786 = vmatprep.subr.bf16.mxu0 %v12643_v30 }
0x1152   :  { %10787 = vmatpush3.bf16.msra.mxu0 %v12644_v3 }
0x1153   :  { %10794 = vmatprep.subr.bf16.mxu0 %v12645_v19 }
0x1155   :  { %11112 = vmatmul.mubr.msk.bf16.gmra.mrb[24].mxu0 %vm2157_vm15, %v12622_v35 }
0x1156   :  { %11115 = vmatprep.mubr.msk.bf16.mxu0 %vm2157_vm15, %v12623_v16 }
0x115d   :  { %11116 = vmatmul.mubr.msk.bf16.gmra.mrb[28].mxu0 %vm2157_vm15, %v12624_v51 }
0x115e   :  { %11119 = vmatprep.mubr.msk.bf16.mxu0 %vm2157_vm15, %v12625_v10 }
0x1165   :  { %11120 = vmatmul.mubr.msk.bf16.gmra.mrb[32].mxu0 %vm2157_vm15, %v12626_v15 }
0x1166   :  { %11123 = vmatprep.mubr.msk.bf16.mxu0 %vm2157_vm15, %v12627_v63 }
0x116d   :  { %11124 = vmatmul.mubr.msk.bf16.gmra.mrb[36].mxu0 %vm2157_vm15, %v12628_v4 }
0x1208   :  { %v11097_v33 = vpop.f32.mrb[8].mxu0 }
0x1209   :  { %v15493_v8 = vpop.f32.mrb[9].mxu0 }
0x120a   :  { %v11098_v37 = vpop.f32.mrb[10].mxu0 }
0x120b   :  { %v11874_v23 = vpack.i.bf16 %v11098_v37, %v11097_v33  ;;  %v15495_v21 = vpop.f32.mrb[11].mxu0 }
0x120d   :  { %11875 = vrot.lane.b32.xlu1 %v11874_v23, %s12850_s25 }
0x1210   :  { %v11101_v54 = vpop.f32.mrb[12].mxu0 }
0x1211   :  { %v7284_v34 = vpop.f32.mrb[13].mxu0 }
0x1212   :  { %v11102_v42 = vpop.f32.mrb[14].mxu0 }
0x1213   :  { %v11899_v28 = vpack.i.bf16 %v11102_v42, %v11101_v54  ;;  %v7287_v2 = vpop.f32.mrb[15].mxu0 }
0x1214   :  { %v11879_v40 = vpack.i.bf16 %v7287_v2, %v7284_v34 }
0x1216   :  { %11880 = vrot.lane.b32.xlu1 %v11879_v40, %s12858_s29 }
0x1218   :  { %v11105_v52 = vpop.f32.mrb[16].mxu0 }
0x1219   :  { %v15511_v48 = vpop.f32.mrb[17].mxu0 }
0x121a   :  { %11900 = vrot.lane.b32.xlu1 %v11899_v28, %s12859_s18  ;;  %v11106_v11 = vpop.f32.mrb[18].mxu0 }
0x121b   :  { %v11884_v31 = vpack.i.bf16 %v11106_v11, %v11105_v52  ;;  %v15517_v12 = vpop.f32.mrb[19].mxu0 }
0x121d   :  { %11885 = vrot.lane.b32.xlu0 %v11884_v31, %s12850_s25 }
0x1220   :  { %v11109_v0 = vpop.f32.mrb[20].mxu0 }
0x1221   :  { %v7316_v26 = vpop.f32.mrb[21].mxu0 }
0x1222   :  { %v11110_v58 = vpop.f32.mrb[22].mxu0 }
0x1223   :  { %v11894_v14 = vpack.i.bf16 %v11110_v58, %v11109_v0  ;;  %v7319_v56 = vpop.f32.mrb[23].mxu0 }
0x1224   :  { %v11889_v29 = vpack.i.bf16 %v7319_v56, %v7316_v26 }
0x1226   :  { %11890 = vrot.lane.b32.xlu0 %v11889_v29, %s12858_s29  ;;  %v12646_v29 = vld [vmem:[%s16177_s5 + $0x80] sm:$0xff]  }
0x1228   :  { %v11113_v25 = vpop.f32.mrb[24].mxu0 }
0x1229   :  { %v15530_v7 = vpop.f32.mrb[25].mxu0 }
0x122a   :  { %11895 = vrot.lane.b32.xlu0 %v11894_v14, %s12859_s18  ;;  %v11114_v41 = vpop.f32.mrb[26].mxu0 }
0x122b   :  { %v11904_v27 = vpack.i.bf16 %v11114_v41, %v11113_v25  ;;  %v15533_v60 = vpop.f32.mrb[27].mxu0  ;;  %v12648_v25 = vld [vmem:[%s16177_s5 + $0x88] sm:$0xff]   ;;  %v12649_v41 = vld [vmem:[%s16177_s5 + $0xd0] sm:$0xff]  }
0x122d   :  { %11905 = vrot.lane.b32.xlu1 %v11904_v27, %s12850_s25 }
0x1230   :  { %v11117_v13 = vpop.f32.mrb[28].mxu0 }
0x1231   :  { %v7348_v39 = vpop.f32.mrb[29].mxu0 }
0x1232   :  { %v11118_v59 = vpop.f32.mrb[30].mxu0 }
0x1233   :  { %v11929_v55 = vpack.i.bf16 %v11118_v59, %v11117_v13  ;;  %v7351_v38 = vpop.f32.mrb[31].mxu0  ;;  %v12650_v13 = vld [vmem:[%s16177_s5 + $0x90] sm:$0xff]  }
0x1234   :  { %v11909_v50 = vpack.i.bf16 %v7351_v38, %v7348_v39 }
0x1236   :  { %11910 = vrot.lane.b32.xlu1 %v11909_v50, %s12858_s29 }
0x1238   :  { %v11121_v35 = vpop.f32.mrb[32].mxu0 }
0x1239   :  { %v15537_v16 = vpop.f32.mrb[33].mxu0 }
0x123a   :  { %11930 = vrot.lane.b32.xlu1 %v11929_v55, %s12859_s18  ;;  %v11122_v51 = vpop.f32.mrb[34].mxu0  ;;  %v12651_v55 = vld [vmem:[%s16177_s5 + $0xd8] sm:$0xff]  }
0x123b   :  { %v11914_v10 = vpack.i.bf16 %v11122_v51, %v11121_v35  ;;  %v15540_v15 = vpop.f32.mrb[35].mxu0  ;;  %v12652_v51 = vld [vmem:[%s16177_s5 + $0x98] sm:$0xff]  }
0x123d   :  { %11915 = vrot.lane.b32.xlu0 %v11914_v10, %s12850_s25 }
0x1240   :  { %v11125_v63 = vpop.f32.mrb[36].mxu0 }
0x1241   :  { %v7380_v4 = vpop.f32.mrb[37].mxu0 }
0x1242   :  { %v11126_v47 = vpop.f32.mrb[38].mxu0 }
0x1243   :  { %v11924_v17 = vpack.i.bf16 %v11126_v47, %v11125_v63  ;;  %v7383_v61 = vpop.f32.mrb[39].mxu0 }
0x1244   :  { %v11919_v57 = vpack.i.bf16 %v7383_v61, %v7380_v4 }
0x1246   :  { %11920 = vrot.lane.b32.xlu0 %v11919_v57, %s12858_s29 }
0x124a   :  { %11925 = vrot.lane.b32.xlu0 %v11924_v17, %s12859_s18  ;;  %v12653_v17 = vld [vmem:[%s16177_s5 + $0xe0] sm:$0xff]  }
0x127f   :  { %v11876_v43 = vpop.permute.xlu1 %11875 }
0x1280   :  { %v11878_v24 = vunpack.i.h.bf16 %v11876_v43  ;;  %v11877_v44 = vunpack.i.l.bf16 %v11876_v43 }
0x1282   :  { %v7491_v23 = vsel %vm2042_vm7, %v15493_v8, %v11877_v44  ;;  %v7492_v45 = vsel %vm2042_vm7, %v15495_v21, %v11878_v24 }
0x1288   :  { %v11881_v20 = vpop.permute.xlu1 %11880 }
0x1289   :  { %v11883_v22 = vunpack.i.h.bf16 %v11881_v20  ;;  %v11882_v33 = vunpack.i.l.bf16 %v11881_v20 }
0x128b   :  { %v7494_v42 = vsel %vm2157_vm15, %v7492_v45, %v11883_v22  ;;  %v7493_v53 = vsel %vm2157_vm15, %v7491_v23, %v11882_v33  ;;  %v12656_v22 = vld [vmem:[%s16177_s5 + $0xa8] sm:$0xff]   ;;  %v12657_v33 = vld [vmem:[%s16177_s5 + $0xf0] sm:$0xff]  }
0x128c   :  { %v11901_v37 = vpop.permute.xlu1 %11900  ;;  %v12658_v23 = vld [vmem:[%s16177_s5 + $0xb0] sm:$0xff]  }
0x128d   :  { %v11903_v54 = vunpack.i.h.bf16 %v11901_v37  ;;  %v11902_v34 = vunpack.i.l.bf16 %v11901_v37 }
0x128f   :  { %v7495_v18 = vsel %vm16257_vm10, %v7493_v53, %v11902_v34  ;;  %v7496_v32 = vsel %vm16258_vm11, %v7494_v42, %v11903_v54  ;;  %v11886_v2 = vpop.permute.xlu0 %11885  ;;  %v12659_v34 = vld [vmem:[%s16177_s5 + $0xf8] sm:$0xff]   ;;  %vm16268_vm10 = vmmov %vm16261_vm1 }
0x1290   :  { %v7515_v28 = vpack.c.bf16 %v7496_v32, %v7495_v18  ;;  %v11888_v52 = vunpack.i.h.bf16 %v11886_v2  ;;  %v11887_v11 = vunpack.i.l.bf16 %v11886_v2  ;;  %v12660_v32 = vld [vmem:[%s16177_s5 + $0xb8] sm:$0xff]  }
0x1292   :  { %v7497_v21 = vsel %vm2042_vm7, %v15511_v48, %v11887_v11  ;;  %v7498_v30 = vsel %vm2042_vm7, %v15517_v12, %v11888_v52  ;;  %v12647_v48 = vld [vmem:[%s16177_s5 + $0xc8] sm:$0xff]  }
0x1298   :  { %v11891_v40 = vpop.permute.xlu0 %11890 }
0x1299   :  { %v11893_v9 = vunpack.i.h.bf16 %v11891_v40  ;;  %v11892_v8 = vunpack.i.l.bf16 %v11891_v40 }
0x129b   :  { %v7500_v26 = vsel %vm2157_vm15, %v7498_v30, %v11893_v9  ;;  %v7499_v19 = vsel %vm2157_vm15, %v7497_v21, %v11892_v8 }
0x129c   :  { %v11896_v31 = vpop.permute.xlu0 %11895 }
0x129d   :  { %v11898_v3 = vunpack.i.h.bf16 %v11896_v31  ;;  %v11897_v0 = vunpack.i.l.bf16 %v11896_v31 }
0x129f   :  { %v7501_v58 = vsel %vm16259_vm12, %v7499_v19, %v11897_v0  ;;  %v7502_v14 = vsel %vm16260_vm6, %v7500_v26, %v11898_v3  ;;  %v11906_v12 = vpop.permute.xlu1 %11905 }
0x12a0   :  { %v7516_v56 = vpack.c.bf16 %v7502_v14, %v7501_v58  ;;  %v11908_v39 = vunpack.i.h.bf16 %v11906_v12  ;;  %v11907_v59 = vunpack.i.l.bf16 %v11906_v12  ;;  %v10299_v58 = vld [vmem:[%s16178_s6] ss:$0 sm:$0xff] }
0x12a2   :  { %7814 = vmatprep.mubr.bf16.mxu0 %v7516_v56  ;;  %v7503_v10 = vsel %vm2042_vm7, %v15530_v7, %v11907_v59  ;;  %v7504_v63 = vsel %vm2042_vm7, %v15533_v60, %v11908_v39  ;;  %v12654_v7 = vld [vmem:[%s16177_s5 + $0xa0] sm:$0xff]   ;;  %v12655_v60 = vld [vmem:[%s16177_s5 + $0xe8] sm:$0xff]  }
0x12a3   :  { %7815 = vmatmul.mubr.bf16.vlgmr.msra.gmra.mrb[40].mxu0 %v7515_v28 }
0x12a4   :  { %10795 = vmatpush3.bf16.msra.mxu0 %v12646_v29 }
0x12a5   :  { %10796 = vmatprep.subr.bf16.mxu0 %v12647_v48 }
0x12a8   :  { %10797 = vmatpush3.bf16.msra.mxu0 %v12648_v25  ;;  %v11911_v27 = vpop.permute.xlu1 %11910 }
0x12a9   :  { %10798 = vmatprep.subr.bf16.mxu0 %v12649_v41  ;;  %v11913_v38 = vunpack.i.h.bf16 %v11911_v27  ;;  %v11912_v50 = vunpack.i.l.bf16 %v11911_v27 }
0x12ab   :  { %v7506_v61 = vsel %vm2157_vm15, %v7504_v63, %v11913_v38  ;;  %v7505_v57 = vsel %vm2157_vm15, %v7503_v10, %v11912_v50  ;;  %v12662_v50 = vld [vmem:[%s16179_s7 + $0x8] sm:$0xff]   ;;  %v12665_v10 = vld [vmem:[%s16180_s8 + $0x40] sm:$0xff]  }
0x12ac   :  { %10799 = vmatpush3.bf16.msra.mxu0 %v12650_v13  ;;  %v11931_v35 = vpop.permute.xlu1 %11930  ;;  %v12666_v63 = vld [vmem:[%s16180_s8] sm:$0xff]  }
0x12ad   :  { %v11933_v4 = vunpack.i.h.bf16 %v11931_v35  ;;  %v11932_v47 = vunpack.i.l.bf16 %v11931_v35  ;;  %10800 = vmatprep.subr.bf16.mxu0 %v12651_v55  ;;  %v12663_v35 = vld [vmem:[%s16179_s7 + $0x10] sm:$0xff]  }
0x12af   :  { %v7507_v43 = vsel %vm16261_vm1, %v7505_v57, %v11932_v47  ;;  %v7508_v20 = vsel %vm16262_vm2, %v7506_v61, %v11933_v4  ;;  %v11916_v44 = vpop.permute.xlu0 %11915  ;;  %v12667_v4 = vld [vmem:[%s16180_s8 + $0x48] sm:$0xff]   ;;  %v12670_v61 = vld [vmem:[%s16180_s8 + $0x10] sm:$0xff]   ;;  %v12671_v57 = vld [vmem:[%s16180_s8 + $0x58] sm:$0xff]  }
0x12b0   :  { %v7517_v24 = vpack.c.bf16 %v7508_v20, %v7507_v43  ;;  %10801 = vmatpush3.bf16.msra.mxu0 %v12652_v51  ;;  %v11918_v45 = vunpack.i.h.bf16 %v11916_v44  ;;  %v11917_v54 = vunpack.i.l.bf16 %v11916_v44  ;;  %v12664_v51 = vld [vmem:[%s16179_s7 + $0x18] sm:$0xff]   ;;  %v12668_v47 = vld [vmem:[%s16180_s8 + $0x8] sm:$0xff]   ;;  %v12673_v20 = vld [vmem:[%s16180_s8 + $0x60] sm:$0xff]  }
0x12b1   :  { %10802 = vmatprep.subr.bf16.mxu0 %v12653_v17  ;;  %v12669_v17 = vld [vmem:[%s16180_s8 + $0x50] sm:$0xff]   ;;  %v12672_v43 = vld [vmem:[%s16180_s8 + $0x18] sm:$0xff]  }
0x12b2   :  { %v7509_v28 = vsel %vm2042_vm7, %v15537_v16, %v11917_v54  ;;  %v7510_v2 = vsel %vm2042_vm7, %v15540_v15, %v11918_v45  ;;  %v12661_v16 = vld [vmem:[%s16179_s7] sm:$0xff]   ;;  %v12677_v44 = vld [vmem:[%s16180_s8 + $0x70] sm:$0xff]  }
0x12b3   :  { %v12681_v45 = vld [vmem:[%s16180_s8 + $0xc0] sm:$0xff]  }
0x12b4   :  { %10803 = vmatpush3.bf16.msra.mxu0 %v12654_v7  ;;  %v12675_v7 = vld [vmem:[%s16180_s8 + $0x68] sm:$0xff]  }
0x12b5   :  { %10804 = vmatprep.subr.bf16.mxu0 %v12655_v60  ;;  %v12676_v60 = vld [vmem:[%s16180_s8 + $0x28] sm:$0xff]  }
0x12b8   :  { %10805 = vmatpush3.bf16.msra.mxu0 %v12656_v22  ;;  %v11921_v37 = vpop.permute.xlu0 %11920  ;;  %v12678_v22 = vld [vmem:[%s16180_s8 + $0x30] sm:$0xff]  }
0x12b9   :  { %10806 = vmatprep.subr.bf16.mxu0 %v12657_v33  ;;  %v11923_v42 = vunpack.i.h.bf16 %v11921_v37  ;;  %v11922_v53 = vunpack.i.l.bf16 %v11921_v37  ;;  %v12679_v33 = vld [vmem:[%s16180_s8 + $0x78] sm:$0xff]  }
0x12ba   :  { %v12680_v37 = vld [vmem:[%s16180_s8 + $0x38] sm:$0xff]  }
0x12bb   :  { %v7512_v11 = vsel %vm2157_vm15, %v7510_v2, %v11923_v42  ;;  %v7511_v9 = vsel %vm2157_vm15, %v7509_v28, %v11922_v53 }
0x12bc   :  { %10807 = vmatpush3.bf16.msra.mxu0 %v12658_v23  ;;  %v11926_v18 = vpop.permute.xlu0 %11925 }
0x12bd   :  { %v11928_v40 = vunpack.i.h.bf16 %v11926_v18  ;;  %v11927_v52 = vunpack.i.l.bf16 %v11926_v18  ;;  %10808 = vmatprep.subr.bf16.mxu0 %v12659_v34 }
0x12bf   :  { %v7513_v8 = vsel %vm16263_vm8, %v7511_v9, %v11927_v52  ;;  %v7514_v31 = vsel %vm16264_vm9, %v7512_v11, %v11928_v40 }
0x12c0   :  { %10809 = vmatpush3.bf16.msra.mxu0 %v12660_v32  ;;  %v7518_v21 = vpack.c.bf16 %v7514_v31, %v7513_v8 }
0x12c2   :  { %7855 = vmatprep.mubr.bf16.mxu0 %v7518_v21 }
0x12c3   :  { %7856 = vmatmul.mubr.bf16.vlgmr.msra.gmra.mrb[44].mxu0 %v7517_v24  ;;  %v12674_v24 = vld [vmem:[%s16180_s8 + $0x20] sm:$0xff]  }
0x12c4   :  { %11129 = vmatprep.mubr.msk.bf16.mxu0 %vm2006_vm3, %v12661_v16 }
0x1376   :  { %v10788_v15 = vpop.f32.mrb[40].mxu0 }
0x1377   :  { %v10789_v30 = vpop.f32.mrb[41].mxu0 }
0x1378   :  { %v10790_v3 = vadd.f32 %v10789_v30, %v10788_v15  ;;  %v10791_v0 = vpop.f32.mrb[42].mxu0 }
0x1379   :  { %v10792_v26 = vpop.f32.mrb[43].mxu0 }
0x137a   :  { %v10793_v19 = vadd.f32 %v10792_v26, %v10791_v0  ;;  %v7817_v29 = vadd.f32 %v10790_v3, %v10299_v58 }
0x137c   :  { %v7820_v41 = vadd.f32 %v10793_v19, %v10299_v58 }
0x1396   :  { %v10810_v14 = vpop.f32.mrb[44].mxu0 }
0x1397   :  { %v10811_v56 = vpop.f32.mrb[45].mxu0 }
0x1398   :  { %v10812_v48 = vadd.f32 %v10811_v56, %v10810_v14  ;;  %v10813_v12 = vpop.f32.mrb[46].mxu0 }
0x1399   :  { %v10814_v25 = vpop.f32.mrb[47].mxu0 }
0x139a   :  { %v7858_v27 = vadd.f32 %v10812_v48, %v7817_v29  ;;  %v10815_v13 = vadd.f32 %v10814_v25, %v10813_v12 }
0x139c   :  { %v7861_v39 = vadd.f32 %v10815_v13, %v7820_v41  ;;  %v7864_v59 = vmax.f32 %v7858_v27, 0.0 }
0x139e   :  { %v7865_v55 = vmax.f32 %v7861_v39, 0.0 }
0x13a0   :  { %v7866_v38 = vpack.c.bf16 %v7865_v55, %v7864_v59 }
0x13a2   :  { %11127 = vmatprep.subr.bf16.mxu0 %v7866_v38 }
0x13a3   :  { %11128 = vmatpush3.bf16.msra.mxu0 %v7866_v38 }
0x13a4   :  { %10821 = vmatprep.subr.bf16.mxu0 %v12665_v10 }
0x13a6   :  { %11130 = vmatmul.mubr.msk.bf16.vlgmr.msra.gmra.mrb[48].mxu0 %vm2006_vm3, %v12662_v50 }
0x13a7   :  { %11133 = vmatprep.mubr.msk.bf16.mxu0 %vm2006_vm3, %v12663_v35  ;;  %10822 = vmatpush3.bf16.msra.mxu0 %v12666_v63  ;;  %v12682_v63 = vld [vmem:[%s16180_s8 + $0x80] sm:$0xff]  }
0x13a8   :  { %10823 = vmatprep.subr.bf16.mxu0 %v12667_v4 }
0x13ab   :  { %10824 = vmatpush3.bf16.msra.mxu0 %v12668_v47  ;;  %v12683_v47 = vld [vmem:[%s16180_s8 + $0xc8] sm:$0xff]  }
0x13ac   :  { %10825 = vmatprep.subr.bf16.mxu0 %v12669_v17 }
0x13ae   :  { %11134 = vmatmul.mubr.msk.bf16.gmra.mrb[52].mxu0 %vm2006_vm3, %v12664_v51  ;;  %vm16265_vm3 = vmmov %vm16261_vm1 }
0x13af   :  { %10826 = vmatpush3.bf16.msra.mxu0 %v12670_v61 }
0x13b0   :  { %10827 = vmatprep.subr.bf16.mxu0 %v12671_v57 }
0x13b3   :  { %10828 = vmatpush3.bf16.msra.mxu0 %v12672_v43  ;;  %v12684_v43 = vld [vmem:[%s16180_s8 + $0x88] sm:$0xff]  }
0x13b4   :  { %10829 = vmatprep.subr.bf16.mxu0 %v12673_v20 }
0x13b7   :  { %10830 = vmatpush3.bf16.msra.mxu0 %v12674_v24  ;;  %v12685_v24 = vld [vmem:[%s16180_s8 + $0xd0] sm:$0xff]  }
0x13b8   :  { %10831 = vmatprep.subr.bf16.mxu0 %v12675_v7 }
0x13bb   :  { %10832 = vmatpush3.bf16.msra.mxu0 %v12676_v60 }
0x13bc   :  { %10833 = vmatprep.subr.bf16.mxu0 %v12677_v44 }
0x13bf   :  { %10834 = vmatpush3.bf16.msra.mxu0 %v12678_v22  ;;  %v12686_v22 = vld [vmem:[%s16180_s8 + $0x90] sm:$0xff]  }
0x13c0   :  { %10835 = vmatprep.subr.bf16.mxu0 %v12679_v33  ;;  %v12687_v33 = vld [vmem:[%s16180_s8 + $0xd8] sm:$0xff]  }
0x13c3   :  { %10836 = vmatpush3.bf16.msra.mxu0 %v12680_v37  ;;  %v12688_v37 = vld [vmem:[%s16180_s8 + $0x98] sm:$0xff]  }
0x13c4   :  { %10843 = vmatprep.subr.bf16.mxu0 %v12681_v45  ;;  %v12690_v45 = vld [vmem:[%s16180_s8 + $0xa0] sm:$0xff]  }
0x1479   :  { %v11131_v23 = vpop.f32.mrb[48].mxu0 }
0x147a   :  { %v7986_v54 = vrot.slane %v11131_v23, 4  ;;  %v7941_v34 = vpop.f32.mrb[49].mxu0 }
0x147b   :  { %v7973_v42 = vrot.slane %v7941_v34, 4  ;;  %v11132_v53 = vpop.f32.mrb[50].mxu0 }
0x147c   :  { %v7994_v18 = vrot.slane %v11132_v53, 4  ;;  %v7944_v32 = vpop.f32.mrb[51].mxu0 }
0x147d   :  { %v11934_v28 = vpack.i.bf16 %v7973_v42, %v7986_v54  ;;  %v11939_v2 = vpack.i.bf16 %v7944_v32, %v11132_v53  ;;  %v7981_v40 = vrot.slane %v7944_v32, 4  ;;  %v12691_v54 = vld [vmem:[%s16180_s8 + $0xe8] sm:$0xff]   ;;  %v12693_v42 = vld [vmem:[%s16180_s8 + $0xf0] sm:$0xff]  }
0x147f   :  { %v11944_v52 = vpack.i.bf16 %v7981_v40, %v7994_v18  ;;  %11935 = vrot.lane.b32.xlu0 %v11934_v28, %s12850_s25  ;;  %11940 = vrot.lane.b32.xlu1 %v11939_v2, %s12858_s29  ;;  %v12694_v18 = vld [vmem:[%s16180_s8 + $0xb0] sm:$0xff]   ;;  %v12695_v28 = vld [vmem:[%s16180_s8 + $0xf8] sm:$0xff]  }
0x1481   :  { %v11135_v11 = vpop.f32.mrb[52].mxu0 }
0x1482   :  { %v8012_v9 = vrot.slane %v11135_v11, 4  ;;  %v15694_v8 = vpop.f32.mrb[53].mxu0 }
0x1483   :  { %v7999_v31 = vrot.slane %v15694_v8, 4  ;;  %11945 = vrot.lane.b32.xlu0 %v11944_v52, %s12859_s18  ;;  %v11136_v21 = vpop.f32.mrb[54].mxu0  ;;  %v12696_v52 = vld [vmem:[%s16180_s8 + $0xb8] sm:$0xff]  }
0x1484   :  { %v8020_v16 = vrot.slane %v11136_v21, 4  ;;  %v7960_v15 = vpop.f32.mrb[55].mxu0 }
0x1485   :  { %v11949_v30 = vpack.i.bf16 %v7999_v31, %v8012_v9  ;;  %v11954_v3 = vpack.i.bf16 %v7960_v15, %v11136_v21  ;;  %v8007_v0 = vrot.slane %v7960_v15, 4 }
0x1487   :  { %v11959_v26 = vpack.i.bf16 %v8007_v0, %v8020_v16  ;;  %11950 = vrot.lane.b32.xlu1 %v11949_v30, %s12850_s25  ;;  %11955 = vrot.lane.b32.xlu0 %v11954_v3, %s12858_s29  ;;  %v10340_v3 = vld [vmem:[%s16181_s9] ss:$0 sm:$0xff] }
0x148b   :  { %11960 = vrot.lane.b32.xlu1 %v11959_v26, %s12859_s18 }
0x14f1   :  { %v11936_v19 = vpop.permute.xlu0 %11935  ;;  %v11941_v58 = vpop.permute.xlu1 %11940 }
0x14f2   :  { %v11938_v14 = vunpack.i.h.bf16 %v11936_v19  ;;  %v11937_v56 = vunpack.i.l.bf16 %v11936_v19  ;;  %v11943_v29 = vunpack.i.h.bf16 %v11941_v58  ;;  %v11942_v48 = vunpack.i.l.bf16 %v11941_v58 }
0x14f4   :  { %v8024_v12 = vsel %vm2042_vm7, %v7941_v34, %v11938_v14  ;;  %v8027_v25 = vsel %vm2042_vm7, %v11131_v23, %v11937_v56  ;;  %v12689_v23 = vld [vmem:[%s16180_s8 + $0xe0] sm:$0xff]   ;;  %v12692_v34 = vld [vmem:[%s16180_s8 + $0xa8] sm:$0xff]  }
0x14f5   :  { %v11946_v41 = vpop.permute.xlu0 %11945  ;;  %v8025_v39 = vsel %vm2157_vm15, %v8024_v12, %v11943_v29  ;;  %v8028_v59 = vsel %vm2157_vm15, %v8027_v25, %v11942_v48  ;;  %v12697_v25 = vld [vmem:[%s16182_s10] sm:$0xff]  }
0x14f6   :  { %v11948_v27 = vunpack.i.h.bf16 %v11946_v41  ;;  %v11947_v13 = vunpack.i.l.bf16 %v11946_v41  ;;  %v12698_v41 = vld [vmem:[%s16183_s11 + $0x40] sm:$0xff]  }
0x14f8   :  { %v8026_v55 = vsel %vm16265_vm3, %v8025_v39, %v11948_v27  ;;  %v8029_v38 = vsel %vm16266_vm4, %v8028_v59, %v11947_v13  ;;  %v12699_v27 = vld [vmem:[%s16183_s11] sm:$0xff]   ;;  %v12700_v13 = vld [vmem:[%s16183_s11 + $0x48] sm:$0xff]   ;;  %v12702_v59 = vld [vmem:[%s16183_s11 + $0x50] sm:$0xff]  }
0x14f9   :  { %v8036_v50 = vpack.c.bf16 %v8026_v55, %v8026_v55  ;;  %v11951_v35 = vpop.permute.xlu1 %11950  ;;  %v11956_v51 = vpop.permute.xlu0 %11955  ;;  %v8037_v10 = vpack.c.bf16 %v8029_v38, %v8029_v38  ;;  %v12701_v39 = vld [vmem:[%s16183_s11 + $0x8] sm:$0xff]   ;;  %v12703_v55 = vld [vmem:[%s16183_s11 + $0x10] sm:$0xff]   ;;  %v12704_v38 = vld [vmem:[%s16183_s11 + $0x58] sm:$0xff]  }
0x14fa   :  { %v11952_v4 = vunpack.i.l.bf16 %v11951_v35  ;;  %v11957_v17 = vunpack.i.l.bf16 %v11956_v51  ;;  %v11953_v53 = vunpack.i.h.bf16 %v11951_v35  ;;  %v11958_v32 = vunpack.i.h.bf16 %v11956_v51  ;;  %v12706_v35 = vld [vmem:[%s16183_s11 + $0x60] sm:$0xff]  }
0x14fb   :  { %8335 = vmatprep.mubr.bf16.mxu0 %v8037_v10  ;;  %v12707_v51 = vld [vmem:[%s16183_s11 + $0x20] sm:$0xff]   ;;  %v12708_v10 = vld [vmem:[%s16183_s11 + $0x68] sm:$0xff]  }
0x14fc   :  { %v8033_v61 = vsel %vm2042_vm7, %v11135_v11, %v11952_v4  ;;  %8336 = vmatmul.mubr.bf16.vlgmr.msra.gmra.mrb[56].mxu0 %v8036_v50  ;;  %v8030_v2 = vsel %vm2042_vm7, %v15694_v8, %v11953_v53  ;;  %vm16269_vm7 = vcmask 1041408   ;;  %v12705_v50 = vld [vmem:[%s16183_s11 + $0x18] sm:$0xff]   ;;  %v12710_v4 = vld [vmem:[%s16183_s11 + $0x70] sm:$0xff]  }
0x14fd   :  { %10844 = vmatpush3.bf16.msra.mxu0 %v12682_v63  ;;  %v11961_v57 = vpop.permute.xlu1 %11960  ;;  %v8034_v7 = vsel %vm2157_vm15, %v8033_v61, %v11957_v17  ;;  %v8031_v11 = vsel %vm2157_vm15, %v8030_v2, %v11958_v32  ;;  %v12709_v63 = vld [vmem:[%s16183_s11 + $0x28] sm:$0xff]   ;;  %v12712_v17 = vld [vmem:[%s16183_s11 + $0x78] sm:$0xff]  }
0x14fe   :  { %v11962_v20 = vunpack.i.l.bf16 %v11961_v57  ;;  %10845 = vmatprep.subr.bf16.mxu0 %v12683_v47  ;;  %v11963_v40 = vunpack.i.h.bf16 %v11961_v57  ;;  %v12711_v47 = vld [vmem:[%s16183_s11 + $0x30] sm:$0xff]   ;;  %v12713_v61 = vld [vmem:[%s16183_s11 + $0x38] sm:$0xff]   ;;  %v12714_v57 = vld [vmem:[%s16183_s11 + $0xc0] sm:$0xff]  }
0x1500   :  { %v8035_v60 = vsel %vm16267_vm5, %v8034_v7, %v11962_v20  ;;  %v8032_v9 = vsel %vm16268_vm10, %v8031_v11, %v11963_v40 }
0x1501   :  { %10846 = vmatpush3.bf16.msra.mxu0 %v12684_v43  ;;  %v8039_v44 = vpack.c.bf16 %v8035_v60, %v8035_v60  ;;  %v8038_v31 = vpack.c.bf16 %v8032_v9, %v8032_v9 }
0x1502   :  { %10847 = vmatprep.subr.bf16.mxu0 %v12685_v24 }
0x1503   :  { %8375 = vmatprep.mubr.bf16.mxu0 %v8039_v44 }
0x1505   :  { %10848 = vmatpush3.bf16.msra.mxu0 %v12686_v22 }
0x1506   :  { %10849 = vmatprep.subr.bf16.mxu0 %v12687_v33 }
0x1509   :  { %10850 = vmatpush3.bf16.msra.mxu0 %v12688_v37 }
0x150a   :  { %10851 = vmatprep.subr.bf16.mxu0 %v12689_v23 }
0x150d   :  { %10852 = vmatpush3.bf16.msra.mxu0 %v12690_v45 }
0x150e   :  { %10853 = vmatprep.subr.bf16.mxu0 %v12691_v54 }
0x1511   :  { %10854 = vmatpush3.bf16.msra.mxu0 %v12692_v34 }
0x1512   :  { %10855 = vmatprep.subr.bf16.mxu0 %v12693_v42 }
0x1515   :  { %10856 = vmatpush3.bf16.msra.mxu0 %v12694_v18 }
0x1516   :  { %10857 = vmatprep.subr.bf16.mxu0 %v12695_v28 }
0x1519   :  { %10858 = vmatpush3.bf16.msra.mxu0 %v12696_v52 }
0x151a   :  { %11137 = vmatprep.subr.bf16.mxu0 %v12860_v49 }
0x151c   :  { %8376 = vmatmul.mubr.bf16.vlgmr.msra.gmra.mrb[60].mxu0 %v8038_v31 }
0x151d   :  { %11139 = vmatprep.mubr.msk.bf16.mxu0 %vm12861_vm13, %v12860_v49 }
0x15cf   :  { %v10837_v8 = vpop.f32.mrb[56].mxu0 }
0x15d0   :  { %v10838_v21 = vpop.f32.mrb[57].mxu0 }
0x15d1   :  { %v10839_v16 = vadd.f32 %v10838_v21, %v10837_v8  ;;  %v10840_v15 = vpop.f32.mrb[58].mxu0 }
0x15d2   :  { %v10841_v30 = vpop.f32.mrb[59].mxu0 }
0x15d3   :  { %v8338_v19 = vadd.f32 %v10839_v16, %v10340_v3  ;;  %v12715_v30 = vld [vmem:[%s16183_s11 + $0x80] sm:$0xff]   ;;  %v12716_v3 = vld [vmem:[%s16183_s11 + $0xc8] sm:$0xff]  }
0x15ef   :  { %v10859_v0 = vpop.f32.mrb[60].mxu0 }
0x15f0   :  { %v10860_v26 = vpop.f32.mrb[61].mxu0 }
0x15f1   :  { %v10861_v58 = vadd.f32 %v10860_v26, %v10859_v0  ;;  %v10862_v14 = vpop.f32.mrb[62].mxu0  ;;  %v12717_v26 = vld [vmem:[%s16183_s11 + $0x88] sm:$0xff]  }
0x15f2   :  { %v10863_v56 = vpop.f32.mrb[63].mxu0  ;;  %v12720_v14 = vld [vmem:[%s16183_s11 + $0xd8] sm:$0xff]  }
0x15f3   :  { %v8378_v29 = vadd.f32 %v10861_v58, %v8338_v19  ;;  %v12718_v19 = vld [vmem:[%s16183_s11 + $0xd0] sm:$0xff]   ;;  %v12721_v56 = vld [vmem:[%s16183_s11 + $0x98] sm:$0xff]  }
0x15f4   :  { %v12719_v58 = vld [vmem:[%s16183_s11 + $0x90] sm:$0xff]  }
0x15f5   :  { %v8383_v48 = vmax.f32 %v8378_v29, 0.0  ;;  %v12722_v29 = vld [vmem:[%s16183_s11 + $0xe0] sm:$0xff]  }
0x15f7   :  { %v8384_v12 = vpack.c.bf16 %v8383_v48, %v8383_v48  ;;  %v12723_v48 = vld [vmem:[%s16183_s11 + $0xa0] sm:$0xff]  }
0x15f9   :  { %v8396_v49 = vsel %vm16269_vm7, %v8384_v12, 0  ;;  %v12724_v12 = vld [vmem:[%s16183_s11 + $0xe8] sm:$0xff]  }
0x15fa   :  { %11138 = vmatpush3.bf16.msra.mxu0 %v8396_v49  ;;  %v12725_v49 = vld [vmem:[%s16183_s11 + $0xa8] sm:$0xff]  }
0x15fb   :  { %10867 = vmatprep.subr.bf16.mxu0 %v12698_v41 }
0x15fd   :  { %11140 = vmatmul.mubr.msk.bf16.vlgmr.msra.gmra.mrb[64].mxu0 %vm1979_vm0, %v12697_v25  ;;  %v12726_v25 = vld [vmem:[%s16183_s11 + $0xf0] sm:$0xff]  }
0x15fe   :  { %10868 = vmatpush3.bf16.msra.mxu0 %v12699_v27  ;;  %v12727_v27 = vld [vmem:[%s16183_s11 + $0xb0] sm:$0xff]  }
0x15ff   :  { %10869 = vmatprep.subr.bf16.mxu0 %v12700_v13  ;;  %v12728_v13 = vld [vmem:[%s16183_s11 + $0xf8] sm:$0xff]  }
0x1602   :  { %10870 = vmatpush3.bf16.msra.mxu0 %v12701_v39 }
0x1603   :  { %10871 = vmatprep.subr.bf16.mxu0 %v12702_v59 }
0x1606   :  { %10872 = vmatpush3.bf16.msra.mxu0 %v12703_v55 }
0x1607   :  { %10873 = vmatprep.subr.bf16.mxu0 %v12704_v38  ;;  %v12729_v38 = vld [vmem:[%s16183_s11 + $0xb8] sm:$0xff]  }
0x160a   :  { %10874 = vmatpush3.bf16.msra.mxu0 %v12705_v50  ;;  %v12730_v50 = vld [vmem:[%s16183_s11 + $0x140] sm:$0xff]  }
0x160b   :  { %10875 = vmatprep.subr.bf16.mxu0 %v12706_v35 }
0x160e   :  { %10876 = vmatpush3.bf16.msra.mxu0 %v12707_v51 }
0x160f   :  { %10877 = vmatprep.subr.bf16.mxu0 %v12708_v10 }
0x1612   :  { %10878 = vmatpush3.bf16.msra.mxu0 %v12709_v63  ;;  %v12731_v63 = vld [vmem:[%s16183_s11 + $0x100] sm:$0xff]  }
0x1613   :  { %10879 = vmatprep.subr.bf16.mxu0 %v12710_v4 }
0x1616   :  { %10880 = vmatpush3.bf16.msra.mxu0 %v12711_v47  ;;  %v12732_v47 = vld [vmem:[%s16183_s11 + $0x148] sm:$0xff]  }
0x1617   :  { %10881 = vmatprep.subr.bf16.mxu0 %v12712_v17 }
0x161a   :  { %10882 = vmatpush3.bf16.msra.mxu0 %v12713_v61  ;;  %v12733_v61 = vld [vmem:[%s16183_s11 + $0x108] sm:$0xff]  }
0x161b   :  { %10889 = vmatprep.subr.bf16.mxu0 %v12714_v57  ;;  %v12734_v57 = vld [vmem:[%s16183_s11 + $0x150] sm:$0xff]  }
0x16d0   :  { %v15821_v43 = vpop.f32.mrb[64].mxu0 }
0x16d1   :  { %v11141_v20 = vpop.f32.mrb[65].mxu0  ;;  %v8452_v24 = vrot.slane %v15821_v43, 5  ;;  %v8458_v7 = vrot.slane %v15821_v43, 7  ;;  %v8440_v60 = vrot.slane %v15821_v43, 1  ;;  %v8446_v44 = vrot.slane %v15821_v43, 3 }
0x16d2   :  { %v15827_v22 = vpop.f32.mrb[66].mxu0  ;;  %v8444_v2 = vrot.slane %v15821_v43, 2  ;;  %v8456_v9 = vrot.slane %v15821_v43, 6  ;;  %v8450_v55 = vrot.slane %v15821_v43, 4  ;;  %v12736_v20 = vld [vmem:[%s16183_s11 + $0x158] sm:$0xff]  }
0x16d3   :  { %v11969_v33 = vpack.i.bf16 %v8452_v24, %v8458_v7  ;;  %v11964_v37 = vpack.i.bf16 %v8440_v60, %v8446_v44  ;;  %v11142_v23 = vpop.f32.mrb[67].mxu0  ;;  %v8475_v45 = vrot.slane %v15827_v22, 5  ;;  %v8481_v54 = vrot.slane %v15827_v22, 7  ;;  %v12737_v24 = vld [vmem:[%s16183_s11 + $0x118] sm:$0xff]   ;;  %v12738_v7 = vld [vmem:[%s16183_s11 + $0x160] sm:$0xff]   ;;  %v12740_v44 = vld [vmem:[%s16183_s11 + $0x168] sm:$0xff]  }
0x16d4   :  { %v8463_v34 = vrot.slane %v15827_v22, 1  ;;  %v8469_v42 = vrot.slane %v15827_v22, 3  ;;  %v8467_v35 = vrot.slane %v15827_v22, 2  ;;  %v12739_v60 = vld [vmem:[%s16183_s11 + $0x120] sm:$0xff]  }
0x16d5   :  { %11970 = vrot.lane.b32.xlu1 %v11969_v33, %s12858_s29  ;;  %11965 = vrot.lane.b32.xlu0 %v11964_v37, %s12858_s29  ;;  %v11979_v53 = vpack.i.bf16 %v8475_v45, %v8481_v54  ;;  %v12741_v33 = vld [vmem:[%s16183_s11 + $0x128] sm:$0xff]   ;;  %v12742_v37 = vld [vmem:[%s16183_s11 + $0x170] sm:$0xff]  }
0x16d6   :  { %v11974_v18 = vpack.i.bf16 %v8463_v34, %v8469_v42  ;;  %v12743_v45 = vld [vmem:[%s16183_s11 + $0x130] sm:$0xff]   ;;  %v12744_v54 = vld [vmem:[%s16183_s11 + $0x178] sm:$0xff]  }
0x16d9   :  { %11980 = vrot.lane.b32.xlu1 %v11979_v53, %s12858_s29  ;;  %11975 = vrot.lane.b32.xlu0 %v11974_v18, %s12858_s29  ;;  %v12745_v53 = vld [vmem:[%s16183_s11 + $0x138] sm:$0xff]   ;;  %v12746_v18 = vld [vmem:[%s16183_s11 + $0x1c0] sm:$0xff]  }
0x1747   :  { %v11971_v32 = vpop.permute.xlu1 %11970  ;;  %v11966_v28 = vpop.permute.xlu0 %11965 }
0x1748   :  { %v11972_v40 = vunpack.i.l.bf16 %v11971_v32  ;;  %v11968_v52 = vunpack.i.h.bf16 %v11966_v28  ;;  %v11967_v11 = vunpack.i.l.bf16 %v11966_v28  ;;  %v11973_v39 = vunpack.i.h.bf16 %v11971_v32 }
0x1749   :  { %v8479_v32 = vrot.slane %v15827_v22, 6 }
0x174a   :  { %v8485_v31 = vsel %vm2157_vm15, %v15821_v43, %v11968_v52  ;;  %v8486_v8 = vsel %vm2157_vm15, %v8444_v2, %v11967_v11  ;;  %v8488_v21 = vsel %vm2157_vm15, %v8456_v9, %v11972_v40  ;;  %v8487_v51 = vsel %vm2157_vm15, %v8450_v55, %v11973_v39  ;;  %v12735_v43 = vld [vmem:[%s16183_s11 + $0x110] sm:$0xff]   ;;  %v12747_v40 = vld [vmem:[%s16183_s11 + $0x180] sm:$0xff]   ;;  %v12748_v11 = vld [vmem:[%s16183_s11 + $0x1c8] sm:$0xff]  }
0x174b   :  { %v8493_v16 = vpack.c.bf16 %v8485_v31, %v8485_v31  ;;  %v8494_v15 = vpack.c.bf16 %v8486_v8, %v8486_v8  ;;  %v8496_v0 = vpack.c.bf16 %v8488_v21, %v8488_v21  ;;  %v11976_v41 = vpop.permute.xlu0 %11975  ;;  %v8495_v4 = vpack.c.bf16 %v8487_v51, %v8487_v51  ;;  %v11981_v23 = vpop.permute.xlu1 %11980  ;;  %v12749_v31 = vld [vmem:[%s16183_s11 + $0x188] sm:$0xff]   ;;  %v12750_v8 = vld [vmem:[%s16183_s11 + $0x1d0] sm:$0xff]  }
0x174c   :  { %v11977_v59 = vunpack.i.l.bf16 %v11976_v41  ;;  %v11978_v34 = vunpack.i.h.bf16 %v11976_v41  ;;  %v11982_v42 = vunpack.i.l.bf16 %v11981_v23  ;;  %v12751_v21 = vld [vmem:[%s16183_s11 + $0x190] sm:$0xff]  }
0x174d   :  { %9046 = vmatprep.mubr.bf16.mxu0 %v8494_v15  ;;  %v12753_v15 = vld [vmem:[%s16183_s11 + $0x198] sm:$0xff]   ;;  %v12767_v41 = vld [vmem:[%s16185_s13 + $0x24] ss:$16 sps:$4 sm:$0xff]   ;;  %v12768_v39 = vld [vmem:[%s16185_s13 + $0x40] ss:$16 sps:$4 sm:$0xff]  }
0x174e   :  { %9047 = vmatmul.mubr.bf16.vlgmr.msra.gmra.mrb[68].mxu0 %v8493_v16  ;;  %v8490_v10 = vsel %vm2157_vm15, %v8467_v35, %v11977_v59  ;;  %v8489_v28 = vsel %vm2157_vm15, %v15827_v22, %v11978_v34  ;;  %v8492_v2 = vsel %vm2157_vm15, %v8479_v32, %v11982_v42  ;;  %v12752_v16 = vld [vmem:[%s16183_s11 + $0x1d8] sm:$0xff]   ;;  %v12773_v59 = vld [vmem:[%s16185_s13 + $0x64] ss:$16 sps:$4 sm:$0xff]   ;;  %v12771_v55 = vld [vmem:[%s16185_s13 + $0x60] ss:$16 sps:$4 sm:$0xff]  }
0x174f   :  { %10890 = vmatpush3.bf16.msra.mxu0 %v12715_v30  ;;  %9086 = vmatprep.mubr.bf16.mxu0 %v8496_v0  ;;  %v8498_v17 = vpack.c.bf16 %v8490_v10, %v8490_v10  ;;  %v8497_v52 = vpack.c.bf16 %v8489_v28, %v8489_v28  ;;  %v8500_v9 = vpack.c.bf16 %v8492_v2, %v8492_v2  ;;  %v12754_v30 = vld [vmem:[%s16183_s11 + $0x1e0] sm:$0xff]   ;;  %v12756_v0 = vld [vmem:[%s16183_s11 + $0x1e8] sm:$0xff]  }
0x1750   :  { %10891 = vmatprep.subr.bf16.mxu0 %v12716_v3  ;;  %v12755_v3 = vld [vmem:[%s16183_s11 + $0x1a0] sm:$0xff]   ;;  %v12774_v28 = vld [vmem:[%s16185_s13 + $0x8] ss:$16 sps:$4 sm:$0xff]  }
0x1753   :  { %10892 = vmatpush3.bf16.msra.mxu0 %v12717_v26  ;;  %v12757_v26 = vld [vmem:[%s16183_s11 + $0x1a8] sm:$0xff]  }
0x1754   :  { %10893 = vmatprep.subr.bf16.mxu0 %v12718_v19  ;;  %v12758_v19 = vld [vmem:[%s16183_s11 + $0x1f0] sm:$0xff]  }
0x1757   :  { %10894 = vmatpush3.bf16.msra.mxu0 %v12719_v58  ;;  %v12759_v58 = vld [vmem:[%s16183_s11 + $0x1b0] sm:$0xff]  }
0x1758   :  { %10895 = vmatprep.subr.bf16.mxu0 %v12720_v14  ;;  %v12760_v14 = vld [vmem:[%s16183_s11 + $0x1f8] sm:$0xff]  }
0x175b   :  { %10896 = vmatpush3.bf16.msra.mxu0 %v12721_v56  ;;  %v11983_v56 = vunpack.i.h.bf16 %v11981_v23 }
0x175c   :  { %10897 = vmatprep.subr.bf16.mxu0 %v12722_v29  ;;  %v8473_v29 = vrot.slane %v15827_v22, 4  ;;  %v12764_v22 = vld [vmem:[%s16185_s13 + $0x4] ss:$16 sps:$4 sm:$0xff]  }
0x175f   :  { %10898 = vmatpush3.bf16.msra.mxu0 %v12723_v48  ;;  %v12761_v48 = vld [vmem:[%s16183_s11 + $0x1b8] sm:$0xff]  }
0x1760   :  { %10899 = vmatprep.subr.bf16.mxu0 %v12724_v12  ;;  %v8491_v12 = vsel %vm2157_vm15, %v8473_v29, %v11983_v56  ;;  %v12797_v56 = vld [vmem:[%s16187_s15 + $0x28] sm:$0xff]   ;;  %v12798_v29 = vld [vmem:[%s16187_s15 + $0x70] sm:$0xff]  }
0x1763   :  { %10900 = vmatpush3.bf16.msra.mxu0 %v12725_v49  ;;  %v8499_v49 = vpack.c.bf16 %v8491_v12, %v8491_v12  ;;  %v12800_v12 = vld [vmem:[%s16187_s15 + $0x78] sm:$0xff]  }
0x1764   :  { %10901 = vmatprep.subr.bf16.mxu0 %v12726_v25  ;;  %v12762_v25 = vld [vmem:[%s16185_s13] ss:$16 sps:$4 sm:$0xff]  }
0x1767   :  { %10902 = vmatpush3.bf16.msra.mxu0 %v12727_v27  ;;  %v12765_v27 = vld [vmem:[%s16185_s13 + $0x20] ss:$16 sps:$4 sm:$0xff]  }
0x1768   :  { %10903 = vmatprep.subr.bf16.mxu0 %v12728_v13  ;;  %v12770_v13 = vld [vmem:[%s16185_s13 + $0x44] ss:$16 sps:$4 sm:$0xff]  }
0x176b   :  { %10904 = vmatpush3.bf16.msra.mxu0 %v12729_v38  ;;  %v12776_v38 = vld [vmem:[%s16185_s13 + $0xc] ss:$16 sps:$4 sm:$0xff]  }
0x176c   :  { %10911 = vmatprep.subr.bf16.mxu0 %v12730_v50 }
0x176e   :  { %9087 = vmatmul.mubr.bf16.vlgmr.msra.gmra.mrb[72].mxu0 %v8495_v4  ;;  %v8629_v4 = vld [vmem:[%s16184_s12] sm:$0x1]  ;;  %s9731_s12 = sshll.u32 %s12862_s27, 4  ;;  %s9732_s12 = int_to_ptr.vmem [resolvable:$true] %s9731_s12 }
0x176f   :  { %10912 = vmatpush3.bf16.msra.mxu0 %v12731_v63  ;;  %9126 = vmatprep.mubr.bf16.mxu0 %v8498_v17  ;;  %p12823_p1 = scmp.lt.s32.totalorder %s9732_s12, %s9732_s12 }
0x1770   :  { %10913 = vmatprep.subr.bf16.mxu0 %v12732_v47 }
0x1773   :  { %10914 = vmatpush3.bf16.msra.mxu0 %v12733_v61 }
0x1774   :  { %10915 = vmatprep.subr.bf16.mxu0 %v12734_v57 }
0x1777   :  { %10916 = vmatpush3.bf16.msra.mxu0 %v12735_v43 }
0x1778   :  { %10917 = vmatprep.subr.bf16.mxu0 %v12736_v20 }
0x177b   :  { %10918 = vmatpush3.bf16.msra.mxu0 %v12737_v24 }
0x177c   :  { %10919 = vmatprep.subr.bf16.mxu0 %v12738_v7 }
0x177f   :  { %10920 = vmatpush3.bf16.msra.mxu0 %v12739_v60 }
0x1780   :  { %10921 = vmatprep.subr.bf16.mxu0 %v12740_v44 }
0x1783   :  { %10922 = vmatpush3.bf16.msra.mxu0 %v12741_v33 }
0x1784   :  { %10923 = vmatprep.subr.bf16.mxu0 %v12742_v37 }
0x1787   :  { %10924 = vmatpush3.bf16.msra.mxu0 %v12743_v45 }
0x1788   :  { %10925 = vmatprep.subr.bf16.mxu0 %v12744_v54 }
0x178b   :  { %10926 = vmatpush3.bf16.msra.mxu0 %v12745_v53 }
0x178c   :  { %10933 = vmatprep.subr.bf16.mxu0 %v12746_v18 }
0x178e   :  { %9127 = vmatmul.mubr.bf16.vlgmr.msra.gmra.mrb[76].mxu0 %v8497_v52  ;;  %v12777_v52 = vld [vmem:[%s16185_s13 + $0x28] ss:$16 sps:$4 sm:$0xff]  }
0x178f   :  { %10934 = vmatpush3.bf16.msra.mxu0 %v12747_v40  ;;  %9166 = vmatprep.mubr.bf16.mxu0 %v8500_v9  ;;  %v12779_v40 = vld [vmem:[%s16185_s13 + $0x2c] ss:$16 sps:$4 sm:$0xff]   ;;  %v12780_v9 = vld [vmem:[%s16185_s13 + $0x48] ss:$16 sps:$4 sm:$0xff]  }
0x1790   :  { %10935 = vmatprep.subr.bf16.mxu0 %v12748_v11  ;;  %v12782_v11 = vld [vmem:[%s16185_s13 + $0x4c] ss:$16 sps:$4 sm:$0xff]  }
0x1793   :  { %10936 = vmatpush3.bf16.msra.mxu0 %v12749_v31  ;;  %v12785_v31 = vld [vmem:[%s16185_s13 + $0x6c] ss:$16 sps:$4 sm:$0xff]  }
0x1794   :  { %10937 = vmatprep.subr.bf16.mxu0 %v12750_v8  ;;  %v12786_v8 = vld [vmem:[%s16187_s15 + $0x40] sm:$0xff]  }
0x1797   :  { %10938 = vmatpush3.bf16.msra.mxu0 %v12751_v21  ;;  %v12787_v21 = vld [vmem:[%s16187_s15] sm:$0xff]  }
0x1798   :  { %10939 = vmatprep.subr.bf16.mxu0 %v12752_v16  ;;  %v12788_v16 = vld [vmem:[%s16187_s15 + $0x48] sm:$0xff]  }
0x179b   :  { %10940 = vmatpush3.bf16.msra.mxu0 %v12753_v15  ;;  %v12789_v15 = vld [vmem:[%s16187_s15 + $0x8] sm:$0xff]  }
0x179c   :  { %10941 = vmatprep.subr.bf16.mxu0 %v12754_v30  ;;  %v12790_v30 = vld [vmem:[%s16187_s15 + $0x50] sm:$0xff]  }
0x179f   :  { %10942 = vmatpush3.bf16.msra.mxu0 %v12755_v3  ;;  %v12791_v3 = vld [vmem:[%s16187_s15 + $0x10] sm:$0xff]  }
0x17a0   :  { %10943 = vmatprep.subr.bf16.mxu0 %v12756_v0  ;;  %v12792_v0 = vld [vmem:[%s16187_s15 + $0x58] sm:$0xff]  }
0x17a3   :  { %10944 = vmatpush3.bf16.msra.mxu0 %v12757_v26  ;;  %v12793_v26 = vld [vmem:[%s16187_s15 + $0x18] sm:$0xff]  }
0x17a4   :  { %10945 = vmatprep.subr.bf16.mxu0 %v12758_v19  ;;  %v12794_v19 = vld [vmem:[%s16187_s15 + $0x60] sm:$0xff]  }
0x17a7   :  { %10946 = vmatpush3.bf16.msra.mxu0 %v12759_v58  ;;  %v12795_v58 = vld [vmem:[%s16187_s15 + $0x20] sm:$0xff]  }
0x17a8   :  { %10947 = vmatprep.subr.bf16.mxu0 %v12760_v14  ;;  %v12796_v14 = vld [vmem:[%s16187_s15 + $0x68] sm:$0xff]  }
0x17ab   :  { %10948 = vmatpush3.bf16.msra.mxu0 %v12761_v48  ;;  %v12799_v48 = vld [vmem:[%s16187_s15 + $0x30] sm:$0xff]  }
0x17ac   :  { %9297 = vmatprep.subr.bf16.mxu0 %v12764_v22  ;;  %v9192_v22 = vld [vmem:[%s16186_s14] sm:$0xf] }
0x17ae   :  { %9167 = vmatmul.mubr.bf16.vlgmr.msra.gmra.mrb[80].mxu0 %v8499_v49  ;;  %v12801_v49 = vld [vmem:[%s16187_s15 + $0x38] sm:$0xff]  }
0x17af   :  { %9329 = vmatprep.mubr.bf16.mxu0 %v12842_v1  ;;  %9298 = vmatpush1.bf16.msra.mxu0 %v12762_v25  ;;  %v12802_v25 = vld [vmem:[%s16187_s15 + $0xc0] sm:$0xff]  }
0x17b0   :  { %9299 = vmatprep.subr.bf16.mxu0 %v12767_v41  ;;  %v9277_v41 = vrot.slane %v9192_v22, %v4451_v5  ;;  %v12804_v5 = vld [vmem:[%s16187_s15 + $0xc8] sm:$0xff]  }
0x17b3   :  { %9300 = vmatpush1.bf16.msra.mxu0 %v12765_v27  ;;  %v9281_v27 = vrot.slane %v9192_v22, %v4455_v6  ;;  %v12805_v6 = vld [vmem:[%s16187_s15 + $0x88] sm:$0xff]  }
0x17b4   :  { %9301 = vmatprep.subr.bf16.mxu0 %v12770_v13 }
0x17b7   :  { %9302 = vmatpush1.bf16.msra.mxu0 %v12768_v39 }
0x17b8   :  { %9303 = vmatprep.subr.bf16.mxu0 %v12773_v59 }
0x17bb   :  { %9304 = vmatpush1.bf16.msra.mxu0 %v12771_v55 }
0x17bc   :  { %9338 = vmatprep.subr.bf16.mxu0 %v12776_v38 }
0x1821   :  { %v10883_v50 = vpop.f32.mrb[68].mxu0 }
0x1822   :  { %v10884_v35 = vpop.f32.mrb[69].mxu0 }
0x1823   :  { %v10885_v51 = vadd.f32 %v10884_v35, %v10883_v50  ;;  %v10886_v10 = vpop.f32.mrb[70].mxu0 }
0x1824   :  { %v10887_v63 = vpop.f32.mrb[71].mxu0 }
0x1825   :  { %v9049_v61 = vadd.f32 %v10885_v51, %v8629_v4  ;;  %v12803_v63 = vld [vmem:[%s16187_s15 + $0x80] sm:$0xff]  }
0x1841   :  { %v10905_v47 = vpop.f32.mrb[72].mxu0 }
0x1842   :  { %v10906_v17 = vpop.f32.mrb[73].mxu0 }
0x1843   :  { %v10907_v57 = vadd.f32 %v10906_v17, %v10905_v47  ;;  %v10908_v43 = vpop.f32.mrb[74].mxu0  ;;  %v12806_v47 = vld [vmem:[%s16187_s15 + $0xd0] sm:$0xff]   ;;  %v9289_v17 = vrot.slane %v9192_v22, %v4463_v36  ;;  %v12810_v36 = vld [vmem:[%s16187_s15 + $0xe0] sm:$0xff]  }
0x1844   :  { %v10909_v20 = vpop.f32.mrb[75].mxu0 }
0x1845   :  { %v9089_v24 = vadd.f32 %v10907_v57, %v9049_v61  ;;  %v12807_v61 = vld [vmem:[%s16187_s15 + $0x90] sm:$0xff]   ;;  %v12808_v57 = vld [vmem:[%s16187_s15 + $0xd8] sm:$0xff]  }
0x1861   :  { %v10927_v7 = vpop.f32.mrb[76].mxu0 }
0x1862   :  { %v10928_v60 = vpop.f32.mrb[77].mxu0 }
0x1863   :  { %v10929_v44 = vadd.f32 %v10928_v60, %v10927_v7  ;;  %v10930_v33 = vpop.f32.mrb[78].mxu0  ;;  %v12809_v60 = vld [vmem:[%s16187_s15 + $0x98] sm:$0xff]  }
0x1864   :  { %v10931_v37 = vpop.f32.mrb[79].mxu0 }
0x1865   :  { %v9129_v23 = vadd.f32 %v10929_v44, %v9089_v24 }
0x1881   :  { %v10949_v45 = vpop.f32.mrb[80].mxu0 }
0x1882   :  { %v10950_v54 = vpop.f32.mrb[81].mxu0 }
0x1883   :  { %v10951_v34 = vadd.f32 %v10950_v54, %v10949_v45  ;;  %v10952_v42 = vpop.f32.mrb[82].mxu0  ;;  %v12812_v45 = vld [vmem:[%s16187_s15 + $0xe8] sm:$0xff]  }
0x1884   :  { %v10953_v53 = vpop.f32.mrb[83].mxu0  ;;  %v12813_v54 = vld [vmem:[%s16187_s15 + $0xa8] sm:$0xff]   ;;  %v12814_v42 = vld [vmem:[%s16187_s15 + $0xf0] sm:$0xff]  }
0x1885   :  { %v9169_v18 = vadd.f32 %v10951_v34, %v9129_v23  ;;  %v12811_v23 = vld [vmem:[%s16187_s15 + $0xa0] sm:$0xff]   ;;  %v9285_v34 = vrot.slane %v9192_v22, %v4459_v46  ;;  %v12815_v53 = vld [vmem:[%s16187_s15 + $0xb0] sm:$0xff]  }
0x1887   :  { %v9174_v32 = vmax.f32 %v9169_v18, 0.0 }
0x1889   :  { %v9175_v2 = vpack.c.bf16 %v9174_v32, %v9174_v32  ;;  %v12816_v32 = vld [vmem:[%s16187_s15 + $0xf8] sm:$0xff]   ;;  %s12818_s15 = scalar_lea.vmem %s9732_s12, 32 }
0x188a   :  { %p12819_p0 = scmp.ne.s32.totalorder %s9732_s12, %s12818_s15  ;;  %p12824_p2 = scmp.lt.s32.totalorder %s12818_s15, %s12818_s15 }
0x188b   :  { %10455 = vmatmul.mubr.msk.bf16.vlgmr.msra.gmra.mrb[84].mxu0 %vm2157_vm15, %v9175_v2 }
0x188c   :  { %9339 = vmatpush1.bf16.msra.mxu0 %v12774_v28  ;;  %9370 = vmatprep.mubr.bf16.mxu0 %v12842_v1  ;;  %v12783_v1 = vld [vmem:[%s16185_s13 + $0x68] ss:$16 sps:$4 sm:$0xff]   ;;  %p12825_p3 = por %p12824_p2, %p12823_p1 }
0x188d   :  { %9340 = vmatprep.subr.bf16.mxu0 %v12779_v40 }
0x188e   :  { %p12826_p4 = pnand %p12825_p3, %p12819_p0 }
0x1890   :  { %9341 = vmatpush1.bf16.msra.mxu0 %v12777_v52 }
0x1891   :  { %9342 = vmatprep.subr.bf16.mxu0 %v12782_v11 }
0x1894   :  { %9343 = vmatpush1.bf16.msra.mxu0 %v12780_v9 }
0x1895   :  { %9344 = vmatprep.subr.bf16.mxu0 %v12785_v31  ;;  %v9451_v31 = vld [vmem:[%s16188_s16] sm:$0x1] }
0x1898   :  { %9345 = vmatpush1.bf16.msra.mxu0 %v12783_v1 }
0x1899   :  { %10955 = vmatprep.subr.bf16.mxu0 %v12786_v8 }
0x189b   :  { %10456 = vmatmul.mubr.msk.bf16.vlgmr.msra.gmra.mrb[88].mxu0 %vm2157_vm15, %v9175_v2 }
0x189c   :  { %10956 = vmatpush3.bf16.msra.mxu0 %v12787_v21 }
0x189d   :  { %10957 = vmatprep.subr.bf16.mxu0 %v12788_v16 }
0x18a0   :  { %10958 = vmatpush3.bf16.msra.mxu0 %v12789_v15 }
0x18a1   :  { %10959 = vmatprep.subr.bf16.mxu0 %v12790_v30 }
0x18a4   :  { %10960 = vmatpush3.bf16.msra.mxu0 %v12791_v3 }
0x18a5   :  { %10961 = vmatprep.subr.bf16.mxu0 %v12792_v0 }
0x18a8   :  { %10962 = vmatpush3.bf16.msra.mxu0 %v12793_v26 }
0x18a9   :  { %10963 = vmatprep.subr.bf16.mxu0 %v12794_v19 }
0x18ac   :  { %10964 = vmatpush3.bf16.msra.mxu0 %v12795_v58 }
0x18ad   :  { %10965 = vmatprep.subr.bf16.mxu0 %v12796_v14 }
0x18b0   :  { %10966 = vmatpush3.bf16.msra.mxu0 %v12797_v56 }
0x18b1   :  { %10967 = vmatprep.subr.bf16.mxu0 %v12798_v29 }
0x18b4   :  { %10968 = vmatpush3.bf16.msra.mxu0 %v12799_v48 }
0x18b5   :  { %10969 = vmatprep.subr.bf16.mxu0 %v12800_v12 }
0x18b8   :  { %10970 = vmatpush3.bf16.msra.mxu0 %v12801_v49 }
0x18b9   :  { %10977 = vmatprep.subr.bf16.mxu0 %v12802_v25 }
0x195e   :  { %v9331_v13 = vpop.f32.mrb[84].mxu0 }
0x195f   :  { %v9332_v39 = vadd.f32 %v9331_v13, %v9277_v41  ;;  %v9333_v59 = vpop.f32.mrb[85].mxu0 }
0x1960   :  { %v9334_v55 = vadd.f32 %v9333_v59, %v9281_v27  ;;  %v9335_v38 = vpop.f32.mrb[86].mxu0 }
0x1961   :  { %v9379_v50 = vmax.f32 %v9332_v39, 0.0  ;;  %v9336_v35 = vpop.f32.mrb[87].mxu0 }
0x1962   :  { %v9380_v51 = vmax.f32 %v9334_v55, 0.0 }
0x1963   :  { %v9383_v4 = vpack.c.bf16 %v9379_v50, %v9379_v50 }
0x1964   :  { %v9384_v10 = vpack.c.bf16 %v9380_v51, %v9380_v51 }
0x1966   :  { %9676 = vmatprep.mubr.bf16.mxu0 %v9384_v10 }
0x1967   :  { %9677 = vmatmul.mubr.bf16.vlgmr.msra.gmra.mrb[92].mxu0 %v9383_v4 }
0x1968   :  { %10978 = vmatpush3.bf16.msra.mxu0 %v12803_v63 }
0x1969   :  { %10979 = vmatprep.subr.bf16.mxu0 %v12804_v5 }
0x196c   :  { %10980 = vmatpush3.bf16.msra.mxu0 %v12805_v6 }
0x196d   :  { %10981 = vmatprep.subr.bf16.mxu0 %v12806_v47 }
0x196e   :  { %v9372_v43 = vpop.f32.mrb[88].mxu0 }
0x196f   :  { %v9374_v20 = vpop.f32.mrb[89].mxu0  ;;  %v9373_v18 = vadd.f32 %v9372_v43, %v9285_v34 }
0x1970   :  { %v9375_v24 = vadd.f32 %v9374_v20, %v9289_v17  ;;  %v9376_v7 = vpop.f32.mrb[90].mxu0  ;;  %10982 = vmatpush3.bf16.msra.mxu0 %v12807_v61 }
0x1971   :  { %v9377_v44 = vpop.f32.mrb[91].mxu0  ;;  %10983 = vmatprep.subr.bf16.mxu0 %v12808_v57  ;;  %v9381_v46 = vmax.f32 %v9373_v18, 0.0 }
0x1972   :  { %v9382_v33 = vmax.f32 %v9375_v24, 0.0 }
0x1973   :  { %v9385_v28 = vpack.c.bf16 %v9381_v46, %v9381_v46 }
0x1974   :  { %v9386_v37 = vpack.c.bf16 %v9382_v33, %v9382_v33  ;;  %10984 = vmatpush3.bf16.msra.mxu0 %v12809_v60 }
0x1975   :  { %10985 = vmatprep.subr.bf16.mxu0 %v12810_v36 }
0x1976   :  { %9716 = vmatprep.mubr.bf16.mxu0 %v9386_v37 }
0x1978   :  { %10986 = vmatpush3.bf16.msra.mxu0 %v12811_v23 }
0x1979   :  { %10987 = vmatprep.subr.bf16.mxu0 %v12812_v45 }
0x197c   :  { %10988 = vmatpush3.bf16.msra.mxu0 %v12813_v54 }
0x197d   :  { %10989 = vmatprep.subr.bf16.mxu0 %v12814_v42 }
0x1980   :  { %10990 = vmatpush3.bf16.msra.mxu0 %v12815_v53 }
0x1981   :  { %10991 = vmatprep.subr.bf16.mxu0 %v12816_v32 }
0x1984   :  { %10992 = vmatpush3.bf16.msra.mxu0 %v12817_v62 }
0x1987   :  { %9717 = vmatmul.mubr.bf16.vlgmr.msra.gmra.mrb[96].mxu0 %v9385_v28 }
0x1a3a   :  { %v10971_v2 = vpop.f32.mrb[92].mxu0 }
0x1a3b   :  { %v10972_v40 = vpop.f32.mrb[93].mxu0 }
0x1a3c   :  { %v10973_v52 = vadd.f32 %v10972_v40, %v10971_v2  ;;  %v10974_v11 = vpop.f32.mrb[94].mxu0 }
0x1a3d   :  { %v10975_v9 = vpop.f32.mrb[95].mxu0 }
0x1a3e   :  { %v9679_v21 = vadd.f32 %v10973_v52, %v9451_v31 }
0x1a5a   :  { %v10993_v1 = vpop.f32.mrb[96].mxu0 }
0x1a5b   :  { %v10994_v8 = vpop.f32.mrb[97].mxu0 }
0x1a5c   :  { %v10995_v16 = vadd.f32 %v10994_v8, %v10993_v1  ;;  %v10996_v15 = vpop.f32.mrb[98].mxu0 }
0x1a5d   :  { %v10997_v30 = vpop.f32.mrb[99].mxu0 }
0x1a5e   :  { %v9719_v3 = vadd.f32 %v10995_v16, %v9679_v21 }
0x1a60   :  { %9724 = vst.msk [vmem:[#allocation2 + $0x1] sm:$0x1] %vm4899_vm14, %v9719_v3 }
0x1a61   :  { %12829 = shalt.err (!%p12826_p4)
}
0x1a62   :  { %s12830_s4 = scalar_lea.hbm %s16189_s17, 32 }
0x1a63   :  { %p12831_p5 = scmp.ne.s32.totalorder %s16189_s17, %s12830_s4  ;;  %p12834_p6 = scmp.lt.u32.totalorder %s12830_s4, %s16189_s17 }
0x1a65   :  { %p12836_p7 = pnand %p12834_p6, %p12831_p5 }
0x1a67   :  { %12839 = shalt.err (!%p12836_p7)
}
0x1a68   :  { %9734 = dma.vmem_to_hbm [thread:$0]  %s9732_s12, 32, %s16189_s17, [#allocation3]  }
0x1a69   :  { %12840 = dma.done.wait [#allocation3], 32  }
0x1a6a   :  { %12841 = vsyncadd [#allocation3], 4294967264 }
0x1a6b   :  { %9738 = vsyncpa [#allocation3], 1 }

</bundles_post_ra>
